<compile_context>
chip_gen: v7x
topology: tpu7x:2x2x1
jax: 0.10.0
libtpu: 0.0.40
codegen_flags: <defaults>
</compile_context>

<pallas_src>
import jax
import jax.numpy as jnp
from jax.experimental import pallas as pl
from jax.experimental.pallas import tpu as pltpu


# ------------------------------ kernel helpers ------------------------------ #

def _conv_same_relu(h, w_ref, b_ref, B):
    """'Same'-padded 1-D conv (odd K, stride 1) + bias + ReLU.

    h:      (L*B, Cin) activations, rows ordered l*B + b (position-major).
    w_ref:  (K, Cin, Cout) weight ref.   b_ref: (1, Cout) bias ref.
    Returns (L*B, Cout), same row ordering.
    """
    LB, C = h.shape
    K = w_ref.shape[0]
    pad = (K - 1) // 2
    z = jnp.zeros((pad * B, C), h.dtype)
    hp = jnp.concatenate([z, h, z], axis=0)            # ((L + K - 1) * B, Cin)
    acc = jnp.dot(hp[0:LB, :], w_ref[0], preferred_element_type=jnp.float32)
    for k in range(1, K):                               # static unroll over taps
        acc = acc + jnp.dot(hp[k * B:k * B + LB, :], w_ref[k],
                            preferred_element_type=jnp.float32)
    return jnp.maximum(acc + b_ref[...], 0.0)


def _dense0_over_seq(h, wd0_ref, bd0_ref, B):
    """Fused (flatten over (L, C)) + Linear + ReLU.

    h:       (L*B, C) activations, rows ordered l*B + b.
    wd0_ref: (L, C, O) weight ref.  bd0_ref: (1, O).
    Returns (B, O).
    """
    L = wd0_ref.shape[0]
    acc = jnp.dot(h[0:B, :], wd0_ref[0], preferred_element_type=jnp.float32)
    for l in range(1, L):                               # static unroll
        acc = acc + jnp.dot(h[l * B:(l + 1) * B, :], wd0_ref[l],
                            preferred_element_type=jnp.float32)
    return jnp.maximum(acc + bd0_ref[...], 0.0)


# ------------------------------ Pallas kernels ------------------------------ #

def _meter_kernel(xc_ref, w1_ref, b1_ref, w2_ref, b2_ref, w3_ref, b3_ref,
                  w4_ref, b4_ref, wd0_ref, bd0_ref, wd1_ref, bd1_ref, o_ref):
    """One full GeneratorB branch (4 convs + 2 dense) for one meter, whole batch."""
    B = o_ref.shape[0]
    # conv1: im2col'ed in the wrapper -> one matmul, contraction depth 9.
    h = jnp.dot(xc_ref[...], w1_ref[...], preferred_element_type=jnp.float32)
    h = jnp.maximum(h + b1_ref[...], 0.0)               # (L*B, 24)
    h = _conv_same_relu(h, w2_ref, b2_ref, B)           # (L*B, 48)
    h = _conv_same_relu(h, w3_ref, b3_ref, B)           # (L*B, 72)
    h = _conv_same_relu(h, w4_ref, b4_ref, B)           # (L*B, 96)
    d0 = _dense0_over_seq(h, wd0_ref, bd0_ref, B)       # (B, 6*L)
    d1 = jnp.dot(d0, wd1_ref[...], preferred_element_type=jnp.float32) + bd1_ref[...]
    o_ref[...] = d1.astype(o_ref.dtype)                 # (B, 35)


def _rec_kernel(xin_ref, w1_ref, b1_ref, w2_ref, b2_ref, w3_ref, b3_ref,
                wd0_ref, bd0_ref, wd1_ref, bd1_ref, o_ref):
    """Generator_rec branch (3 convs + 2 dense), whole batch."""
    B = o_ref.shape[0]
    h = xin_ref[...]                                    # (35*B, 5), rows l*B + b
    h = _conv_same_relu(h, w1_ref, b1_ref, B)           # (35*B, 30)
    h = _conv_same_relu(h, w2_ref, b2_ref, B)           # (35*B, 40)
    h = _conv_same_relu(h, w3_ref, b3_ref, B)           # (35*B, 50)
    d0 = _dense0_over_seq(h, wd0_ref, bd0_ref, B)       # (B, 175)
    d1 = jnp.dot(d0, wd1_ref[...], preferred_element_type=jnp.float32) + bd1_ref[...]
    o_ref[...] = d1.astype(o_ref.dtype)                 # (B, 1)


# ------------------------------ pallas wrappers ------------------------------ #

def _param_bytes(p, prefix):
    return 4 * sum(int(v.size) for k, v in p.items() if k.startswith(prefix))


def _meters_call(p, x_cols, B, L):
    """All 5 meter branches in one pallas_call, grid over the meter axis."""
    n_m = p["m_w1"].shape[0]                            # 5

    def per_meter(arr):
        # block: leading meter dim squeezed, rest full; indexed by grid position.
        nd = arr.ndim
        return pl.BlockSpec((None,) + arr.shape[1:],
                            (lambda m, nd=nd: (m,) + (0,) * (nd - 1)))

    in_specs = [
        pl.BlockSpec((L * B, 9), lambda m: (0, 0)),     # shared im2col'd input
        per_meter(p["m_w1"]), per_meter(p["m_b1"]),
        per_meter(p["m_w2"]), per_meter(p["m_b2"]),
        per_meter(p["m_w3"]), per_meter(p["m_b3"]),
        per_meter(p["m_w4"]), per_meter(p["m_b4"]),
        per_meter(p["m_wd0"]), per_meter(p["m_bd0"]),
        per_meter(p["m_wd1"]), per_meter(p["m_bd1"]),
    ]
    LB = L * B
    flops = 2 * n_m * (LB * 9 * 24 + LB * 7 * 24 * 48 + LB * 5 * 48 * 72
                       + LB * 3 * 72 * 96 + B * (L * 96) * (6 * L)
                       + B * (6 * L) * 35)
    bytes_accessed = (_param_bytes(p, "m_") + 4 * int(x_cols.size)
                      + 4 * n_m * B * 35)
    return pl.pallas_call(
        _meter_kernel,
        out_shape=jax.ShapeDtypeStruct((n_m, B, 35), jnp.float32),
        grid=(n_m,),
        in_specs=in_specs,
        out_specs=pl.BlockSpec((None, B, 35), lambda m: (m, 0, 0)),
        compiler_params=pltpu.CompilerParams(dimension_semantics=("parallel",)),
        cost_estimate=pl.CostEstimate(flops=int(flops), transcendentals=0,
                                      bytes_accessed=int(bytes_accessed)),
    )(x_cols, p["m_w1"], p["m_b1"], p["m_w2"], p["m_b2"], p["m_w3"], p["m_b3"],
      p["m_w4"], p["m_b4"], p["m_wd0"], p["m_bd0"], p["m_wd1"], p["m_bd1"])


def _rec_call(p, rec_in, B):
    """Rec branch in a single VMEM-resident pallas_call (no grid)."""
    RB = 35 * B
    flops = 2 * (RB * 9 * 5 * 30 + RB * 7 * 30 * 40 + RB * 5 * 40 * 50
                 + B * (35 * 50) * (5 * 35) + B * (5 * 35) * 1)
    bytes_accessed = _param_bytes(p, "r_") + 4 * int(rec_in.size) + 4 * B
    return pl.pallas_call(
        _rec_kernel,
        out_shape=jax.ShapeDtypeStruct((B, 1), jnp.float32),
        cost_estimate=pl.CostEstimate(flops=int(flops), transcendentals=0,
                                      bytes_accessed=int(bytes_accessed)),
    )(rec_in, p["r_w1"], p["r_b1"], p["r_w2"], p["r_b2"], p["r_w3"], p["r_b3"],
      p["r_wd0"], p["r_bd0"], p["r_wd1"], p["r_bd1"])


# ---------------------------- parameter creation ----------------------------- #

def init_generator_params(key, seq_len, scale=0.05):
    L = seq_len
    d0 = 6 * L
    meter_num = 35
    keys = iter(jax.random.split(key, 22))

    def rnd(shape):
        return scale * jax.random.normal(next(keys), shape, jnp.float32)

    return {
        # 5 meter branches, stacked along a leading meter axis.
        "m_w1": rnd((5, 9, 24)),          "m_b1": rnd((5, 1, 24)),
        "m_w2": rnd((5, 7, 24, 48)),      "m_b2": rnd((5, 1, 48)),
        "m_w3": rnd((5, 5, 48, 72)),      "m_b3": rnd((5, 1, 72)),
        "m_w4": rnd((5, 3, 72, 96)),      "m_b4": rnd((5, 1, 96)),
        "m_wd0": rnd((5, L, 96, d0)),     "m_bd0": rnd((5, 1, d0)),
        "m_wd1": rnd((5, d0, 35)),        "m_bd1": rnd((5, 1, 35)),
        # rec branch.
        "r_w1": rnd((9, 5, 30)),          "r_b1": rnd((1, 30)),
        "r_w2": rnd((7, 30, 40)),         "r_b2": rnd((1, 40)),
        "r_w3": rnd((5, 40, 50)),         "r_b3": rnd((1, 50)),
        "r_wd0": rnd((meter_num, 50, 5 * meter_num)),
        "r_bd0": rnd((1, 5 * meter_num)),
        "r_wd1": rnd((5 * meter_num, 1)), "r_bd1": rnd((1, 1)),
    }


# --------------------------------- forward ----------------------------------- #

def generator_forward(params, x_ncl):
    """x_ncl: (B, 1, L) (PyTorch NCL layout) -> (m1..m5: (B, 35), rec: (B, 1))."""
    B, _, L = x_ncl.shape

    # Layer-1 im2col (tiny, plain XLA): cols[l*B + b, k] = x[b, 0, l + k - 4].
    xpad = jnp.pad(x_ncl[:, 0, :], ((0, 0), (4, 4)))                   # (B, L + 8)
    cols = jnp.stack([xpad[:, k:k + L] for k in range(9)], axis=-1)    # (B, L, 9)
    x_cols = jnp.transpose(cols, (1, 0, 2)).reshape(L * B, 9)          # position-major

    meters = _meters_call(params, x_cols, B, L)                        # (5, B, 35)

    # rec input: torch cat((m1..m5), dim=1) on (B,1,35) tensors -> (B,5,35) NCL.
    # Position-major channel-last 2-D layout: rows l*B + b, lanes = meter index.
    rec_in = jnp.transpose(meters, (2, 1, 0)).reshape(35 * B, 5)
    rec = _rec_call(params, rec_in, B)                                 # (B, 1)

    return (meters[0], meters[1], meters[2], meters[3], meters[4], rec)


# ----------------------------------- main ------------------------------------ #

if __name__ == "__main__":
    B = 2
    seq_len = 16          # appliance_length == mains_length == input length

    root = jax.random.PRNGKey(0)
    k_params, k_x = jax.random.split(root)
    params = init_generator_params(k_params, seq_len)
    x = jax.random.normal(k_x, (B, 1, seq_len), jnp.float32)   # PyTorch NCL input

    fwd = jax.jit(generator_forward)
    outs = jax.block_until_ready(fwd(params, x))

    m1, m2, m3, m4, m5, rec = outs
    assert m1.shape == (B, 35) and m5.shape == (B, 35)
    assert rec.shape == (B, 1)
    assert all(bool(jnp.all(jnp.isfinite(o))) for o in outs)
    print("KERNEL_OK")
</pallas_src>

<mosaic_0001>
module attributes {stable_mosaic.version = 11 : i64} {
  func.func @_meter_kernel(%arg0: i32, %arg1: memref<32x9xf32, #tpu.memory_space<vmem>>, %arg2: memref<1x9x24xf32, #tpu.memory_space<vmem>>, %arg3: memref<1x1x24xf32, #tpu.memory_space<vmem>>, %arg4: memref<1x7x24x48xf32, #tpu.memory_space<vmem>>, %arg5: memref<1x1x48xf32, #tpu.memory_space<vmem>>, %arg6: memref<1x5x48x72xf32, #tpu.memory_space<vmem>>, %arg7: memref<1x1x72xf32, #tpu.memory_space<vmem>>, %arg8: memref<1x3x72x96xf32, #tpu.memory_space<vmem>>, %arg9: memref<1x1x96xf32, #tpu.memory_space<vmem>>, %arg10: memref<1x16x96x96xf32, #tpu.memory_space<vmem>>, %arg11: memref<1x1x96xf32, #tpu.memory_space<vmem>>, %arg12: memref<1x96x35xf32, #tpu.memory_space<vmem>>, %arg13: memref<1x1x35xf32, #tpu.memory_space<vmem>>, %arg14: memref<1x2x35xf32, #tpu.memory_space<vmem>>) attributes {dimension_semantics = [#tpu.dimension_semantics<parallel>], iteration_bounds = array<i64: 5>, scalar_prefetch = 0 : i64, scratch_operands = 0 : i64, tpu.core_type = #tpu.core_type<tc>, window_params = [{pipeline_mode = #tpu.pipeline_mode<synchronous>, transform_indices = @transform_0, window_bounds = array<i64: 32, 9>}, {transform_indices = @transform_1, window_bounds = array<i64: 1, 9, 24>}, {transform_indices = @transform_2, window_bounds = array<i64: 1, 1, 24>}, {transform_indices = @transform_3, window_bounds = array<i64: 1, 7, 24, 48>}, {transform_indices = @transform_4, window_bounds = array<i64: 1, 1, 48>}, {transform_indices = @transform_5, window_bounds = array<i64: 1, 5, 48, 72>}, {transform_indices = @transform_6, window_bounds = array<i64: 1, 1, 72>}, {transform_indices = @transform_7, window_bounds = array<i64: 1, 3, 72, 96>}, {transform_indices = @transform_8, window_bounds = array<i64: 1, 1, 96>}, {transform_indices = @transform_9, window_bounds = array<i64: 1, 16, 96, 96>}, {transform_indices = @transform_10, window_bounds = array<i64: 1, 1, 96>}, {transform_indices = @transform_11, window_bounds = array<i64: 1, 96, 35>}, {transform_indices = @transform_12, window_bounds = array<i64: 1, 1, 35>}, {transform_indices = @transform_13, window_bounds = array<i64: 1, 2, 35>}]} {
    %c0 = arith.constant 0 : index
    %c0_0 = arith.constant 0 : index
    %0 = vector.load %arg1[%c0, %c0_0] : memref<32x9xf32, #tpu.memory_space<vmem>>, vector<32x9xf32>
    %c0_1 = arith.constant 0 : index
    %c0_2 = arith.constant 0 : index
    %c0_3 = arith.constant 0 : index
    %1 = vector.load %arg2[%c0_1, %c0_2, %c0_3] : memref<1x9x24xf32, #tpu.memory_space<vmem>>, vector<1x9x24xf32>
    %2 = vector.shape_cast %1 : vector<1x9x24xf32> to vector<9x24xf32>
    %cst = arith.constant dense<0.000000e+00> : vector<32x24xf32>
    %3 = tpu.matmul %0, %2, %cst {dimension_numbers = #tpu.dot_dimension_numbers<[1], [0], [0], [1], [0, 0, 1, 1], [], []>} : vector<32x9xf32>, vector<9x24xf32>, vector<32x24xf32> -> vector<32x24xf32>
    %c0_4 = arith.constant 0 : index
    %c0_5 = arith.constant 0 : index
    %c0_6 = arith.constant 0 : index
    %4 = vector.load %arg3[%c0_4, %c0_5, %c0_6] : memref<1x1x24xf32, #tpu.memory_space<vmem>>, vector<1x1x24xf32>
    %5 = vector.shape_cast %4 : vector<1x1x24xf32> to vector<1x24xf32>
    %6 = vector.broadcast %5 : vector<1x24xf32> to vector<32x24xf32>
    %7 = arith.addf %3, %6 : vector<32x24xf32>
    %cst_7 = arith.constant 0.000000e+00 : f32
    %8 = vector.broadcast %cst_7 : f32 to vector<32x24xf32>
    %9 = arith.maximumf %7, %8 : vector<32x24xf32>
    %cst_8 = arith.constant 0.000000e+00 : f32
    %10 = vector.broadcast %cst_8 : f32 to vector<6x24xf32>
    %11 = tpu.concatenate %10, %9, %10 in 0 : vector<6x24xf32>, vector<32x24xf32>, vector<6x24xf32> -> vector<44x24xf32>
    %12 = vector.extract_strided_slice %11 {offsets = [0, 0], sizes = [32, 24], strides = [1, 1]} : vector<44x24xf32> to vector<32x24xf32>
    %c0_9 = arith.constant 0 : index
    %c0_10 = arith.constant 0 : index
    %c0_11 = arith.constant 0 : index
    %c0_12 = arith.constant 0 : index
    %13 = vector.load %arg4[%c0_9, %c0_10, %c0_11, %c0_12] : memref<1x7x24x48xf32, #tpu.memory_space<vmem>>, vector<1x1x24x48xf32>
    %14 = vector.shape_cast %13 : vector<1x1x24x48xf32> to vector<24x48xf32>
    %cst_13 = arith.constant dense<0.000000e+00> : vector<32x48xf32>
    %15 = tpu.matmul %12, %14, %cst_13 {dimension_numbers = #tpu.dot_dimension_numbers<[1], [0], [0], [1], [0, 0, 1, 1], [], []>} : vector<32x24xf32>, vector<24x48xf32>, vector<32x48xf32> -> vector<32x48xf32>
    %16 = vector.extract_strided_slice %11 {offsets = [2, 0], sizes = [32, 24], strides = [1, 1]} : vector<44x24xf32> to vector<32x24xf32>
    %c0_14 = arith.constant 0 : index
    %c1 = arith.constant 1 : index
    %c0_15 = arith.constant 0 : index
    %c0_16 = arith.constant 0 : index
    %17 = vector.load %arg4[%c0_14, %c1, %c0_15, %c0_16] : memref<1x7x24x48xf32, #tpu.memory_space<vmem>>, vector<1x1x24x48xf32>
    %18 = vector.shape_cast %17 : vector<1x1x24x48xf32> to vector<24x48xf32>
    %cst_17 = arith.constant dense<0.000000e+00> : vector<32x48xf32>
    %19 = tpu.matmul %16, %18, %cst_17 {dimension_numbers = #tpu.dot_dimension_numbers<[1], [0], [0], [1], [0, 0, 1, 1], [], []>} : vector<32x24xf32>, vector<24x48xf32>, vector<32x48xf32> -> vector<32x48xf32>
    %20 = arith.addf %15, %19 : vector<32x48xf32>
    %21 = vector.extract_strided_slice %11 {offsets = [4, 0], sizes = [32, 24], strides = [1, 1]} : vector<44x24xf32> to vector<32x24xf32>
    %c0_18 = arith.constant 0 : index
    %c2 = arith.constant 2 : index
    %c0_19 = arith.constant 0 : index
    %c0_20 = arith.constant 0 : index
    %22 = vector.load %arg4[%c0_18, %c2, %c0_19, %c0_20] : memref<1x7x24x48xf32, #tpu.memory_space<vmem>>, vector<1x1x24x48xf32>
    %23 = vector.shape_cast %22 : vector<1x1x24x48xf32> to vector<24x48xf32>
    %cst_21 = arith.constant dense<0.000000e+00> : vector<32x48xf32>
    %24 = tpu.matmul %21, %23, %cst_21 {dimension_numbers = #tpu.dot_dimension_numbers<[1], [0], [0], [1], [0, 0, 1, 1], [], []>} : vector<32x24xf32>, vector<24x48xf32>, vector<32x48xf32> -> vector<32x48xf32>
    %25 = arith.addf %20, %24 : vector<32x48xf32>
    %26 = vector.extract_strided_slice %11 {offsets = [6, 0], sizes = [32, 24], strides = [1, 1]} : vector<44x24xf32> to vector<32x24xf32>
    %c0_22 = arith.constant 0 : index
    %c3 = arith.constant 3 : index
    %c0_23 = arith.constant 0 : index
    %c0_24 = arith.constant 0 : index
    %27 = vector.load %arg4[%c0_22, %c3, %c0_23, %c0_24] : memref<1x7x24x48xf32, #tpu.memory_space<vmem>>, vector<1x1x24x48xf32>
    %28 = vector.shape_cast %27 : vector<1x1x24x48xf32> to vector<24x48xf32>
    %cst_25 = arith.constant dense<0.000000e+00> : vector<32x48xf32>
    %29 = tpu.matmul %26, %28, %cst_25 {dimension_numbers = #tpu.dot_dimension_numbers<[1], [0], [0], [1], [0, 0, 1, 1], [], []>} : vector<32x24xf32>, vector<24x48xf32>, vector<32x48xf32> -> vector<32x48xf32>
    %30 = arith.addf %25, %29 : vector<32x48xf32>
    %31 = vector.extract_strided_slice %11 {offsets = [8, 0], sizes = [32, 24], strides = [1, 1]} : vector<44x24xf32> to vector<32x24xf32>
    %c0_26 = arith.constant 0 : index
    %c4 = arith.constant 4 : index
    %c0_27 = arith.constant 0 : index
    %c0_28 = arith.constant 0 : index
    %32 = vector.load %arg4[%c0_26, %c4, %c0_27, %c0_28] : memref<1x7x24x48xf32, #tpu.memory_space<vmem>>, vector<1x1x24x48xf32>
    %33 = vector.shape_cast %32 : vector<1x1x24x48xf32> to vector<24x48xf32>
    %cst_29 = arith.constant dense<0.000000e+00> : vector<32x48xf32>
    %34 = tpu.matmul %31, %33, %cst_29 {dimension_numbers = #tpu.dot_dimension_numbers<[1], [0], [0], [1], [0, 0, 1, 1], [], []>} : vector<32x24xf32>, vector<24x48xf32>, vector<32x48xf32> -> vector<32x48xf32>
    %35 = arith.addf %30, %34 : vector<32x48xf32>
    %36 = vector.extract_strided_slice %11 {offsets = [10, 0], sizes = [32, 24], strides = [1, 1]} : vector<44x24xf32> to vector<32x24xf32>
    %c0_30 = arith.constant 0 : index
    %c5 = arith.constant 5 : index
    %c0_31 = arith.constant 0 : index
    %c0_32 = arith.constant 0 : index
    %37 = vector.load %arg4[%c0_30, %c5, %c0_31, %c0_32] : memref<1x7x24x48xf32, #tpu.memory_space<vmem>>, vector<1x1x24x48xf32>
    %38 = vector.shape_cast %37 : vector<1x1x24x48xf32> to vector<24x48xf32>
    %cst_33 = arith.constant dense<0.000000e+00> : vector<32x48xf32>
    %39 = tpu.matmul %36, %38, %cst_33 {dimension_numbers = #tpu.dot_dimension_numbers<[1], [0], [0], [1], [0, 0, 1, 1], [], []>} : vector<32x24xf32>, vector<24x48xf32>, vector<32x48xf32> -> vector<32x48xf32>
    %40 = arith.addf %35, %39 : vector<32x48xf32>
    %41 = vector.extract_strided_slice %11 {offsets = [12, 0], sizes = [32, 24], strides = [1, 1]} : vector<44x24xf32> to vector<32x24xf32>
    %c0_34 = arith.constant 0 : index
    %c6 = arith.constant 6 : index
    %c0_35 = arith.constant 0 : index
    %c0_36 = arith.constant 0 : index
    %42 = vector.load %arg4[%c0_34, %c6, %c0_35, %c0_36] : memref<1x7x24x48xf32, #tpu.memory_space<vmem>>, vector<1x1x24x48xf32>
    %43 = vector.shape_cast %42 : vector<1x1x24x48xf32> to vector<24x48xf32>
    %cst_37 = arith.constant dense<0.000000e+00> : vector<32x48xf32>
    %44 = tpu.matmul %41, %43, %cst_37 {dimension_numbers = #tpu.dot_dimension_numbers<[1], [0], [0], [1], [0, 0, 1, 1], [], []>} : vector<32x24xf32>, vector<24x48xf32>, vector<32x48xf32> -> vector<32x48xf32>
    %45 = arith.addf %40, %44 : vector<32x48xf32>
    %c0_38 = arith.constant 0 : index
    %c0_39 = arith.constant 0 : index
    %c0_40 = arith.constant 0 : index
    %46 = vector.load %arg5[%c0_38, %c0_39, %c0_40] : memref<1x1x48xf32, #tpu.memory_space<vmem>>, vector<1x1x48xf32>
    %47 = vector.shape_cast %46 : vector<1x1x48xf32> to vector<1x48xf32>
    %48 = vector.broadcast %47 : vector<1x48xf32> to vector<32x48xf32>
    %49 = arith.addf %45, %48 : vector<32x48xf32>
    %cst_41 = arith.constant 0.000000e+00 : f32
    %50 = vector.broadcast %cst_41 : f32 to vector<32x48xf32>
    %51 = arith.maximumf %49, %50 : vector<32x48xf32>
    %cst_42 = arith.constant 0.000000e+00 : f32
    %52 = vector.broadcast %cst_42 : f32 to vector<4x48xf32>
    %53 = tpu.concatenate %52, %51, %52 in 0 : vector<4x48xf32>, vector<32x48xf32>, vector<4x48xf32> -> vector<40x48xf32>
    %54 = vector.extract_strided_slice %53 {offsets = [0, 0], sizes = [32, 48], strides = [1, 1]} : vector<40x48xf32> to vector<32x48xf32>
    %c0_43 = arith.constant 0 : index
    %c0_44 = arith.constant 0 : index
    %c0_45 = arith.constant 0 : index
    %c0_46 = arith.constant 0 : index
    %55 = vector.load %arg6[%c0_43, %c0_44, %c0_45, %c0_46] : memref<1x5x48x72xf32, #tpu.memory_space<vmem>>, vector<1x1x48x72xf32>
    %56 = vector.shape_cast %55 : vector<1x1x48x72xf32> to vector<48x72xf32>
    %cst_47 = arith.constant dense<0.000000e+00> : vector<32x72xf32>
    %57 = tpu.matmul %54, %56, %cst_47 {dimension_numbers = #tpu.dot_dimension_numbers<[1], [0], [0], [1], [0, 0, 1, 1], [], []>} : vector<32x48xf32>, vector<48x72xf32>, vector<32x72xf32> -> vector<32x72xf32>
    %58 = vector.extract_strided_slice %53 {offsets = [2, 0], sizes = [32, 48], strides = [1, 1]} : vector<40x48xf32> to vector<32x48xf32>
    %c0_48 = arith.constant 0 : index
    %c1_49 = arith.constant 1 : index
    %c0_50 = arith.constant 0 : index
    %c0_51 = arith.constant 0 : index
    %59 = vector.load %arg6[%c0_48, %c1_49, %c0_50, %c0_51] : memref<1x5x48x72xf32, #tpu.memory_space<vmem>>, vector<1x1x48x72xf32>
    %60 = vector.shape_cast %59 : vector<1x1x48x72xf32> to vector<48x72xf32>
    %cst_52 = arith.constant dense<0.000000e+00> : vector<32x72xf32>
    %61 = tpu.matmul %58, %60, %cst_52 {dimension_numbers = #tpu.dot_dimension_numbers<[1], [0], [0], [1], [0, 0, 1, 1], [], []>} : vector<32x48xf32>, vector<48x72xf32>, vector<32x72xf32> -> vector<32x72xf32>
    %62 = arith.addf %57, %61 : vector<32x72xf32>
    %63 = vector.extract_strided_slice %53 {offsets = [4, 0], sizes = [32, 48], strides = [1, 1]} : vector<40x48xf32> to vector<32x48xf32>
    %c0_53 = arith.constant 0 : index
    %c2_54 = arith.constant 2 : index
    %c0_55 = arith.constant 0 : index
    %c0_56 = arith.constant 0 : index
    %64 = vector.load %arg6[%c0_53, %c2_54, %c0_55, %c0_56] : memref<1x5x48x72xf32, #tpu.memory_space<vmem>>, vector<1x1x48x72xf32>
    %65 = vector.shape_cast %64 : vector<1x1x48x72xf32> to vector<48x72xf32>
    %cst_57 = arith.constant dense<0.000000e+00> : vector<32x72xf32>
    %66 = tpu.matmul %63, %65, %cst_57 {dimension_numbers = #tpu.dot_dimension_numbers<[1], [0], [0], [1], [0, 0, 1, 1], [], []>} : vector<32x48xf32>, vector<48x72xf32>, vector<32x72xf32> -> vector<32x72xf32>
    %67 = arith.addf %62, %66 : vector<32x72xf32>
    %68 = vector.extract_strided_slice %53 {offsets = [6, 0], sizes = [32, 48], strides = [1, 1]} : vector<40x48xf32> to vector<32x48xf32>
    %c0_58 = arith.constant 0 : index
    %c3_59 = arith.constant 3 : index
    %c0_60 = arith.constant 0 : index
    %c0_61 = arith.constant 0 : index
    %69 = vector.load %arg6[%c0_58, %c3_59, %c0_60, %c0_61] : memref<1x5x48x72xf32, #tpu.memory_space<vmem>>, vector<1x1x48x72xf32>
    %70 = vector.shape_cast %69 : vector<1x1x48x72xf32> to vector<48x72xf32>
    %cst_62 = arith.constant dense<0.000000e+00> : vector<32x72xf32>
    %71 = tpu.matmul %68, %70, %cst_62 {dimension_numbers = #tpu.dot_dimension_numbers<[1], [0], [0], [1], [0, 0, 1, 1], [], []>} : vector<32x48xf32>, vector<48x72xf32>, vector<32x72xf32> -> vector<32x72xf32>
    %72 = arith.addf %67, %71 : vector<32x72xf32>
    %73 = vector.extract_strided_slice %53 {offsets = [8, 0], sizes = [32, 48], strides = [1, 1]} : vector<40x48xf32> to vector<32x48xf32>
    %c0_63 = arith.constant 0 : index
    %c4_64 = arith.constant 4 : index
    %c0_65 = arith.constant 0 : index
    %c0_66 = arith.constant 0 : index
    %74 = vector.load %arg6[%c0_63, %c4_64, %c0_65, %c0_66] : memref<1x5x48x72xf32, #tpu.memory_space<vmem>>, vector<1x1x48x72xf32>
    %75 = vector.shape_cast %74 : vector<1x1x48x72xf32> to vector<48x72xf32>
    %cst_67 = arith.constant dense<0.000000e+00> : vector<32x72xf32>
    %76 = tpu.matmul %73, %75, %cst_67 {dimension_numbers = #tpu.dot_dimension_numbers<[1], [0], [0], [1], [0, 0, 1, 1], [], []>} : vector<32x48xf32>, vector<48x72xf32>, vector<32x72xf32> -> vector<32x72xf32>
    %77 = arith.addf %72, %76 : vector<32x72xf32>
    %c0_68 = arith.constant 0 : index
    %c0_69 = arith.constant 0 : index
    %c0_70 = arith.constant 0 : index
    %78 = vector.load %arg7[%c0_68, %c0_69, %c0_70] : memref<1x1x72xf32, #tpu.memory_space<vmem>>, vector<1x1x72xf32>
    %79 = vector.shape_cast %78 : vector<1x1x72xf32> to vector<1x72xf32>
    %80 = vector.broadcast %79 : vector<1x72xf32> to vector<32x72xf32>
    %81 = arith.addf %77, %80 : vector<32x72xf32>
    %cst_71 = arith.constant 0.000000e+00 : f32
    %82 = vector.broadcast %cst_71 : f32 to vector<32x72xf32>
    %83 = arith.maximumf %81, %82 : vector<32x72xf32>
    %cst_72 = arith.constant 0.000000e+00 : f32
    %84 = vector.broadcast %cst_72 : f32 to vector<2x72xf32>
    %85 = tpu.concatenate %84, %83, %84 in 0 : vector<2x72xf32>, vector<32x72xf32>, vector<2x72xf32> -> vector<36x72xf32>
    %86 = vector.extract_strided_slice %85 {offsets = [0, 0], sizes = [32, 72], strides = [1, 1]} : vector<36x72xf32> to vector<32x72xf32>
    %c0_73 = arith.constant 0 : index
    %c0_74 = arith.constant 0 : index
    %c0_75 = arith.constant 0 : index
    %c0_76 = arith.constant 0 : index
    %87 = vector.load %arg8[%c0_73, %c0_74, %c0_75, %c0_76] : memref<1x3x72x96xf32, #tpu.memory_space<vmem>>, vector<1x1x72x96xf32>
    %88 = vector.shape_cast %87 : vector<1x1x72x96xf32> to vector<72x96xf32>
    %cst_77 = arith.constant dense<0.000000e+00> : vector<32x96xf32>
    %89 = tpu.matmul %86, %88, %cst_77 {dimension_numbers = #tpu.dot_dimension_numbers<[1], [0], [0], [1], [0, 0, 1, 1], [], []>} : vector<32x72xf32>, vector<72x96xf32>, vector<32x96xf32> -> vector<32x96xf32>
    %90 = vector.extract_strided_slice %85 {offsets = [2, 0], sizes = [32, 72], strides = [1, 1]} : vector<36x72xf32> to vector<32x72xf32>
    %c0_78 = arith.constant 0 : index
    %c1_79 = arith.constant 1 : index
    %c0_80 = arith.constant 0 : index
    %c0_81 = arith.constant 0 : index
    %91 = vector.load %arg8[%c0_78, %c1_79, %c0_80, %c0_81] : memref<1x3x72x96xf32, #tpu.memory_space<vmem>>, vector<1x1x72x96xf32>
    %92 = vector.shape_cast %91 : vector<1x1x72x96xf32> to vector<72x96xf32>
    %cst_82 = arith.constant dense<0.000000e+00> : vector<32x96xf32>
    %93 = tpu.matmul %90, %92, %cst_82 {dimension_numbers = #tpu.dot_dimension_numbers<[1], [0], [0], [1], [0, 0, 1, 1], [], []>} : vector<32x72xf32>, vector<72x96xf32>, vector<32x96xf32> -> vector<32x96xf32>
    %94 = arith.addf %89, %93 : vector<32x96xf32>
    %95 = vector.extract_strided_slice %85 {offsets = [4, 0], sizes = [32, 72], strides = [1, 1]} : vector<36x72xf32> to vector<32x72xf32>
    %c0_83 = arith.constant 0 : index
    %c2_84 = arith.constant 2 : index
    %c0_85 = arith.constant 0 : index
    %c0_86 = arith.constant 0 : index
    %96 = vector.load %arg8[%c0_83, %c2_84, %c0_85, %c0_86] : memref<1x3x72x96xf32, #tpu.memory_space<vmem>>, vector<1x1x72x96xf32>
    %97 = vector.shape_cast %96 : vector<1x1x72x96xf32> to vector<72x96xf32>
    %cst_87 = arith.constant dense<0.000000e+00> : vector<32x96xf32>
    %98 = tpu.matmul %95, %97, %cst_87 {dimension_numbers = #tpu.dot_dimension_numbers<[1], [0], [0], [1], [0, 0, 1, 1], [], []>} : vector<32x72xf32>, vector<72x96xf32>, vector<32x96xf32> -> vector<32x96xf32>
    %99 = arith.addf %94, %98 : vector<32x96xf32>
    %c0_88 = arith.constant 0 : index
    %c0_89 = arith.constant 0 : index
    %c0_90 = arith.constant 0 : index
    %100 = vector.load %arg9[%c0_88, %c0_89, %c0_90] : memref<1x1x96xf32, #tpu.memory_space<vmem>>, vector<1x1x96xf32>
    %101 = vector.shape_cast %100 : vector<1x1x96xf32> to vector<1x96xf32>
    %102 = vector.broadcast %101 : vector<1x96xf32> to vector<32x96xf32>
    %103 = arith.addf %99, %102 : vector<32x96xf32>
    %cst_91 = arith.constant 0.000000e+00 : f32
    %104 = vector.broadcast %cst_91 : f32 to vector<32x96xf32>
    %105 = arith.maximumf %103, %104 : vector<32x96xf32>
    %106 = vector.extract_strided_slice %105 {offsets = [0, 0], sizes = [2, 96], strides = [1, 1]} : vector<32x96xf32> to vector<2x96xf32>
    %c0_92 = arith.constant 0 : index
    %c0_93 = arith.constant 0 : index
    %c0_94 = arith.constant 0 : index
    %c0_95 = arith.constant 0 : index
    %107 = vector.load %arg10[%c0_92, %c0_93, %c0_94, %c0_95] : memref<1x16x96x96xf32, #tpu.memory_space<vmem>>, vector<1x1x96x96xf32>
    %108 = vector.shape_cast %107 : vector<1x1x96x96xf32> to vector<96x96xf32>
    %cst_96 = arith.constant dense<0.000000e+00> : vector<2x96xf32>
    %109 = tpu.matmul %106, %108, %cst_96 {dimension_numbers = #tpu.dot_dimension_numbers<[1], [0], [0], [1], [0, 0, 1, 1], [], []>} : vector<2x96xf32>, vector<96x96xf32>, vector<2x96xf32> -> vector<2x96xf32>
    %110 = vector.extract_strided_slice %105 {offsets = [2, 0], sizes = [2, 96], strides = [1, 1]} : vector<32x96xf32> to vector<2x96xf32>
    %c0_97 = arith.constant 0 : index
    %c1_98 = arith.constant 1 : index
    %c0_99 = arith.constant 0 : index
    %c0_100 = arith.constant 0 : index
    %111 = vector.load %arg10[%c0_97, %c1_98, %c0_99, %c0_100] : memref<1x16x96x96xf32, #tpu.memory_space<vmem>>, vector<1x1x96x96xf32>
    %112 = vector.shape_cast %111 : vector<1x1x96x96xf32> to vector<96x96xf32>
    %cst_101 = arith.constant dense<0.000000e+00> : vector<2x96xf32>
    %113 = tpu.matmul %110, %112, %cst_101 {dimension_numbers = #tpu.dot_dimension_numbers<[1], [0], [0], [1], [0, 0, 1, 1], [], []>} : vector<2x96xf32>, vector<96x96xf32>, vector<2x96xf32> -> vector<2x96xf32>
    %114 = arith.addf %109, %113 : vector<2x96xf32>
    %115 = vector.extract_strided_slice %105 {offsets = [4, 0], sizes = [2, 96], strides = [1, 1]} : vector<32x96xf32> to vector<2x96xf32>
    %c0_102 = arith.constant 0 : index
    %c2_103 = arith.constant 2 : index
    %c0_104 = arith.constant 0 : index
    %c0_105 = arith.constant 0 : index
    %116 = vector.load %arg10[%c0_102, %c2_103, %c0_104, %c0_105] : memref<1x16x96x96xf32, #tpu.memory_space<vmem>>, vector<1x1x96x96xf32>
    %117 = vector.shape_cast %116 : vector<1x1x96x96xf32> to vector<96x96xf32>
    %cst_106 = arith.constant dense<0.000000e+00> : vector<2x96xf32>
    %118 = tpu.matmul %115, %117, %cst_106 {dimension_numbers = #tpu.dot_dimension_numbers<[1], [0], [0], [1], [0, 0, 1, 1], [], []>} : vector<2x96xf32>, vector<96x96xf32>, vector<2x96xf32> -> vector<2x96xf32>
    %119 = arith.addf %114, %118 : vector<2x96xf32>
    %120 = vector.extract_strided_slice %105 {offsets = [6, 0], sizes = [2, 96], strides = [1, 1]} : vector<32x96xf32> to vector<2x96xf32>
    %c0_107 = arith.constant 0 : index
    %c3_108 = arith.constant 3 : index
    %c0_109 = arith.constant 0 : index
    %c0_110 = arith.constant 0 : index
    %121 = vector.load %arg10[%c0_107, %c3_108, %c0_109, %c0_110] : memref<1x16x96x96xf32, #tpu.memory_space<vmem>>, vector<1x1x96x96xf32>
    %122 = vector.shape_cast %121 : vector<1x1x96x96xf32> to vector<96x96xf32>
    %cst_111 = arith.constant dense<0.000000e+00> : vector<2x96xf32>
    %123 = tpu.matmul %120, %122, %cst_111 {dimension_numbers = #tpu.dot_dimension_numbers<[1], [0], [0], [1], [0, 0, 1, 1], [], []>} : vector<2x96xf32>, vector<96x96xf32>, vector<2x96xf32> -> vector<2x96xf32>
    %124 = arith.addf %119, %123 : vector<2x96xf32>
    %125 = vector.extract_strided_slice %105 {offsets = [8, 0], sizes = [2, 96], strides = [1, 1]} : vector<32x96xf32> to vector<2x96xf32>
    %c0_112 = arith.constant 0 : index
    %c4_113 = arith.constant 4 : index
    %c0_114 = arith.constant 0 : index
    %c0_115 = arith.constant 0 : index
    %126 = vector.load %arg10[%c0_112, %c4_113, %c0_114, %c0_115] : memref<1x16x96x96xf32, #tpu.memory_space<vmem>>, vector<1x1x96x96xf32>
    %127 = vector.shape_cast %126 : vector<1x1x96x96xf32> to vector<96x96xf32>
    %cst_116 = arith.constant dense<0.000000e+00> : vector<2x96xf32>
    %128 = tpu.matmul %125, %127, %cst_116 {dimension_numbers = #tpu.dot_dimension_numbers<[1], [0], [0], [1], [0, 0, 1, 1], [], []>} : vector<2x96xf32>, vector<96x96xf32>, vector<2x96xf32> -> vector<2x96xf32>
    %129 = arith.addf %124, %128 : vector<2x96xf32>
    %130 = vector.extract_strided_slice %105 {offsets = [10, 0], sizes = [2, 96], strides = [1, 1]} : vector<32x96xf32> to vector<2x96xf32>
    %c0_117 = arith.constant 0 : index
    %c5_118 = arith.constant 5 : index
    %c0_119 = arith.constant 0 : index
    %c0_120 = arith.constant 0 : index
    %131 = vector.load %arg10[%c0_117, %c5_118, %c0_119, %c0_120] : memref<1x16x96x96xf32, #tpu.memory_space<vmem>>, vector<1x1x96x96xf32>
    %132 = vector.shape_cast %131 : vector<1x1x96x96xf32> to vector<96x96xf32>
    %cst_121 = arith.constant dense<0.000000e+00> : vector<2x96xf32>
    %133 = tpu.matmul %130, %132, %cst_121 {dimension_numbers = #tpu.dot_dimension_numbers<[1], [0], [0], [1], [0, 0, 1, 1], [], []>} : vector<2x96xf32>, vector<96x96xf32>, vector<2x96xf32> -> vector<2x96xf32>
    %134 = arith.addf %129, %133 : vector<2x96xf32>
    %135 = vector.extract_strided_slice %105 {offsets = [12, 0], sizes = [2, 96], strides = [1, 1]} : vector<32x96xf32> to vector<2x96xf32>
    %c0_122 = arith.constant 0 : index
    %c6_123 = arith.constant 6 : index
    %c0_124 = arith.constant 0 : index
    %c0_125 = arith.constant 0 : index
    %136 = vector.load %arg10[%c0_122, %c6_123, %c0_124, %c0_125] : memref<1x16x96x96xf32, #tpu.memory_space<vmem>>, vector<1x1x96x96xf32>
    %137 = vector.shape_cast %136 : vector<1x1x96x96xf32> to vector<96x96xf32>
    %cst_126 = arith.constant dense<0.000000e+00> : vector<2x96xf32>
    %138 = tpu.matmul %135, %137, %cst_126 {dimension_numbers = #tpu.dot_dimension_numbers<[1], [0], [0], [1], [0, 0, 1, 1], [], []>} : vector<2x96xf32>, vector<96x96xf32>, vector<2x96xf32> -> vector<2x96xf32>
    %139 = arith.addf %134, %138 : vector<2x96xf32>
    %140 = vector.extract_strided_slice %105 {offsets = [14, 0], sizes = [2, 96], strides = [1, 1]} : vector<32x96xf32> to vector<2x96xf32>
    %c0_127 = arith.constant 0 : index
    %c7 = arith.constant 7 : index
    %c0_128 = arith.constant 0 : index
    %c0_129 = arith.constant 0 : index
    %141 = vector.load %arg10[%c0_127, %c7, %c0_128, %c0_129] : memref<1x16x96x96xf32, #tpu.memory_space<vmem>>, vector<1x1x96x96xf32>
    %142 = vector.shape_cast %141 : vector<1x1x96x96xf32> to vector<96x96xf32>
    %cst_130 = arith.constant dense<0.000000e+00> : vector<2x96xf32>
    %143 = tpu.matmul %140, %142, %cst_130 {dimension_numbers = #tpu.dot_dimension_numbers<[1], [0], [0], [1], [0, 0, 1, 1], [], []>} : vector<2x96xf32>, vector<96x96xf32>, vector<2x96xf32> -> vector<2x96xf32>
    %144 = arith.addf %139, %143 : vector<2x96xf32>
    %145 = vector.extract_strided_slice %105 {offsets = [16, 0], sizes = [2, 96], strides = [1, 1]} : vector<32x96xf32> to vector<2x96xf32>
    %c0_131 = arith.constant 0 : index
    %c8 = arith.constant 8 : index
    %c0_132 = arith.constant 0 : index
    %c0_133 = arith.constant 0 : index
    %146 = vector.load %arg10[%c0_131, %c8, %c0_132, %c0_133] : memref<1x16x96x96xf32, #tpu.memory_space<vmem>>, vector<1x1x96x96xf32>
    %147 = vector.shape_cast %146 : vector<1x1x96x96xf32> to vector<96x96xf32>
    %cst_134 = arith.constant dense<0.000000e+00> : vector<2x96xf32>
    %148 = tpu.matmul %145, %147, %cst_134 {dimension_numbers = #tpu.dot_dimension_numbers<[1], [0], [0], [1], [0, 0, 1, 1], [], []>} : vector<2x96xf32>, vector<96x96xf32>, vector<2x96xf32> -> vector<2x96xf32>
    %149 = arith.addf %144, %148 : vector<2x96xf32>
    %150 = vector.extract_strided_slice %105 {offsets = [18, 0], sizes = [2, 96], strides = [1, 1]} : vector<32x96xf32> to vector<2x96xf32>
    %c0_135 = arith.constant 0 : index
    %c9 = arith.constant 9 : index
    %c0_136 = arith.constant 0 : index
    %c0_137 = arith.constant 0 : index
    %151 = vector.load %arg10[%c0_135, %c9, %c0_136, %c0_137] : memref<1x16x96x96xf32, #tpu.memory_space<vmem>>, vector<1x1x96x96xf32>
    %152 = vector.shape_cast %151 : vector<1x1x96x96xf32> to vector<96x96xf32>
    %cst_138 = arith.constant dense<0.000000e+00> : vector<2x96xf32>
    %153 = tpu.matmul %150, %152, %cst_138 {dimension_numbers = #tpu.dot_dimension_numbers<[1], [0], [0], [1], [0, 0, 1, 1], [], []>} : vector<2x96xf32>, vector<96x96xf32>, vector<2x96xf32> -> vector<2x96xf32>
    %154 = arith.addf %149, %153 : vector<2x96xf32>
    %155 = vector.extract_strided_slice %105 {offsets = [20, 0], sizes = [2, 96], strides = [1, 1]} : vector<32x96xf32> to vector<2x96xf32>
    %c0_139 = arith.constant 0 : index
    %c10 = arith.constant 10 : index
    %c0_140 = arith.constant 0 : index
    %c0_141 = arith.constant 0 : index
    %156 = vector.load %arg10[%c0_139, %c10, %c0_140, %c0_141] : memref<1x16x96x96xf32, #tpu.memory_space<vmem>>, vector<1x1x96x96xf32>
    %157 = vector.shape_cast %156 : vector<1x1x96x96xf32> to vector<96x96xf32>
    %cst_142 = arith.constant dense<0.000000e+00> : vector<2x96xf32>
    %158 = tpu.matmul %155, %157, %cst_142 {dimension_numbers = #tpu.dot_dimension_numbers<[1], [0], [0], [1], [0, 0, 1, 1], [], []>} : vector<2x96xf32>, vector<96x96xf32>, vector<2x96xf32> -> vector<2x96xf32>
    %159 = arith.addf %154, %158 : vector<2x96xf32>
    %160 = vector.extract_strided_slice %105 {offsets = [22, 0], sizes = [2, 96], strides = [1, 1]} : vector<32x96xf32> to vector<2x96xf32>
    %c0_143 = arith.constant 0 : index
    %c11 = arith.constant 11 : index
    %c0_144 = arith.constant 0 : index
    %c0_145 = arith.constant 0 : index
    %161 = vector.load %arg10[%c0_143, %c11, %c0_144, %c0_145] : memref<1x16x96x96xf32, #tpu.memory_space<vmem>>, vector<1x1x96x96xf32>
    %162 = vector.shape_cast %161 : vector<1x1x96x96xf32> to vector<96x96xf32>
    %cst_146 = arith.constant dense<0.000000e+00> : vector<2x96xf32>
    %163 = tpu.matmul %160, %162, %cst_146 {dimension_numbers = #tpu.dot_dimension_numbers<[1], [0], [0], [1], [0, 0, 1, 1], [], []>} : vector<2x96xf32>, vector<96x96xf32>, vector<2x96xf32> -> vector<2x96xf32>
    %164 = arith.addf %159, %163 : vector<2x96xf32>
    %165 = vector.extract_strided_slice %105 {offsets = [24, 0], sizes = [2, 96], strides = [1, 1]} : vector<32x96xf32> to vector<2x96xf32>
    %c0_147 = arith.constant 0 : index
    %c12 = arith.constant 12 : index
    %c0_148 = arith.constant 0 : index
    %c0_149 = arith.constant 0 : index
    %166 = vector.load %arg10[%c0_147, %c12, %c0_148, %c0_149] : memref<1x16x96x96xf32, #tpu.memory_space<vmem>>, vector<1x1x96x96xf32>
    %167 = vector.shape_cast %166 : vector<1x1x96x96xf32> to vector<96x96xf32>
    %cst_150 = arith.constant dense<0.000000e+00> : vector<2x96xf32>
    %168 = tpu.matmul %165, %167, %cst_150 {dimension_numbers = #tpu.dot_dimension_numbers<[1], [0], [0], [1], [0, 0, 1, 1], [], []>} : vector<2x96xf32>, vector<96x96xf32>, vector<2x96xf32> -> vector<2x96xf32>
    %169 = arith.addf %164, %168 : vector<2x96xf32>
    %170 = vector.extract_strided_slice %105 {offsets = [26, 0], sizes = [2, 96], strides = [1, 1]} : vector<32x96xf32> to vector<2x96xf32>
    %c0_151 = arith.constant 0 : index
    %c13 = arith.constant 13 : index
    %c0_152 = arith.constant 0 : index
    %c0_153 = arith.constant 0 : index
    %171 = vector.load %arg10[%c0_151, %c13, %c0_152, %c0_153] : memref<1x16x96x96xf32, #tpu.memory_space<vmem>>, vector<1x1x96x96xf32>
    %172 = vector.shape_cast %171 : vector<1x1x96x96xf32> to vector<96x96xf32>
    %cst_154 = arith.constant dense<0.000000e+00> : vector<2x96xf32>
    %173 = tpu.matmul %170, %172, %cst_154 {dimension_numbers = #tpu.dot_dimension_numbers<[1], [0], [0], [1], [0, 0, 1, 1], [], []>} : vector<2x96xf32>, vector<96x96xf32>, vector<2x96xf32> -> vector<2x96xf32>
    %174 = arith.addf %169, %173 : vector<2x96xf32>
    %175 = vector.extract_strided_slice %105 {offsets = [28, 0], sizes = [2, 96], strides = [1, 1]} : vector<32x96xf32> to vector<2x96xf32>
    %c0_155 = arith.constant 0 : index
    %c14 = arith.constant 14 : index
    %c0_156 = arith.constant 0 : index
    %c0_157 = arith.constant 0 : index
    %176 = vector.load %arg10[%c0_155, %c14, %c0_156, %c0_157] : memref<1x16x96x96xf32, #tpu.memory_space<vmem>>, vector<1x1x96x96xf32>
    %177 = vector.shape_cast %176 : vector<1x1x96x96xf32> to vector<96x96xf32>
    %cst_158 = arith.constant dense<0.000000e+00> : vector<2x96xf32>
    %178 = tpu.matmul %175, %177, %cst_158 {dimension_numbers = #tpu.dot_dimension_numbers<[1], [0], [0], [1], [0, 0, 1, 1], [], []>} : vector<2x96xf32>, vector<96x96xf32>, vector<2x96xf32> -> vector<2x96xf32>
    %179 = arith.addf %174, %178 : vector<2x96xf32>
    %180 = vector.extract_strided_slice %105 {offsets = [30, 0], sizes = [2, 96], strides = [1, 1]} : vector<32x96xf32> to vector<2x96xf32>
    %c0_159 = arith.constant 0 : index
    %c15 = arith.constant 15 : index
    %c0_160 = arith.constant 0 : index
    %c0_161 = arith.constant 0 : index
    %181 = vector.load %arg10[%c0_159, %c15, %c0_160, %c0_161] : memref<1x16x96x96xf32, #tpu.memory_space<vmem>>, vector<1x1x96x96xf32>
    %182 = vector.shape_cast %181 : vector<1x1x96x96xf32> to vector<96x96xf32>
    %cst_162 = arith.constant dense<0.000000e+00> : vector<2x96xf32>
    %183 = tpu.matmul %180, %182, %cst_162 {dimension_numbers = #tpu.dot_dimension_numbers<[1], [0], [0], [1], [0, 0, 1, 1], [], []>} : vector<2x96xf32>, vector<96x96xf32>, vector<2x96xf32> -> vector<2x96xf32>
    %184 = arith.addf %179, %183 : vector<2x96xf32>
    %c0_163 = arith.constant 0 : index
    %c0_164 = arith.constant 0 : index
    %c0_165 = arith.constant 0 : index
    %185 = vector.load %arg11[%c0_163, %c0_164, %c0_165] : memref<1x1x96xf32, #tpu.memory_space<vmem>>, vector<1x1x96xf32>
    %186 = vector.shape_cast %185 : vector<1x1x96xf32> to vector<1x96xf32>
    %187 = vector.broadcast %186 : vector<1x96xf32> to vector<2x96xf32>
    %188 = arith.addf %184, %187 : vector<2x96xf32>
    %cst_166 = arith.constant 0.000000e+00 : f32
    %189 = vector.broadcast %cst_166 : f32 to vector<2x96xf32>
    %190 = arith.maximumf %188, %189 : vector<2x96xf32>
    %c0_167 = arith.constant 0 : index
    %c0_168 = arith.constant 0 : index
    %c0_169 = arith.constant 0 : index
    %191 = vector.load %arg12[%c0_167, %c0_168, %c0_169] : memref<1x96x35xf32, #tpu.memory_space<vmem>>, vector<1x96x35xf32>
    %192 = vector.shape_cast %191 : vector<1x96x35xf32> to vector<96x35xf32>
    %cst_170 = arith.constant dense<0.000000e+00> : vector<2x35xf32>
    %193 = tpu.matmul %190, %192, %cst_170 {dimension_numbers = #tpu.dot_dimension_numbers<[1], [0], [0], [1], [0, 0, 1, 1], [], []>} : vector<2x96xf32>, vector<96x35xf32>, vector<2x35xf32> -> vector<2x35xf32>
    %c0_171 = arith.constant 0 : index
    %c0_172 = arith.constant 0 : index
    %c0_173 = arith.constant 0 : index
    %194 = vector.load %arg13[%c0_171, %c0_172, %c0_173] : memref<1x1x35xf32, #tpu.memory_space<vmem>>, vector<1x1x35xf32>
    %195 = vector.shape_cast %194 : vector<1x1x35xf32> to vector<1x35xf32>
    %196 = vector.broadcast %195 : vector<1x35xf32> to vector<2x35xf32>
    %197 = arith.addf %193, %196 : vector<2x35xf32>
    %c0_174 = arith.constant 0 : index
    %c0_175 = arith.constant 0 : index
    %c0_176 = arith.constant 0 : index
    %198 = vector.load %arg14[%c0_174, %c0_175, %c0_176] : memref<1x2x35xf32, #tpu.memory_space<vmem>>, vector<1x2x35xf32>
    %199 = vector.shape_cast %198 : vector<1x2x35xf32> to vector<2x35xf32>
    %200 = vector.shape_cast %197 : vector<2x35xf32> to vector<1x2x35xf32>
    tpu.vector_store %arg14[%c0_174, %c0_175, %c0_176], %200 {strides = array<i32>} : memref<1x2x35xf32, #tpu.memory_space<vmem>>, vector<1x2x35xf32>,
    return
  }
  func.func @transform_0(%arg0: i32) -> (i32, i32) {
    %c0_i32 = arith.constant 0 : i32
    %c0_i32_0 = arith.constant 0 : i32
    %c0_i32_1 = arith.constant 0 : i32
    return %c0_i32, %c0_i32_0 : i32, i32
  }
  func.func @transform_1(%arg0: i32) -> (i32, i32, i32) {
    %c0_i32 = arith.constant 0 : i32
    %c0_i32_0 = arith.constant 0 : i32
    %c0_i32_1 = arith.constant 0 : i32
    return %arg0, %c0_i32, %c0_i32_0 : i32, i32, i32
  }
  func.func @transform_2(%arg0: i32) -> (i32, i32, i32) {
    %c0_i32 = arith.constant 0 : i32
    %c0_i32_0 = arith.constant 0 : i32
    %c0_i32_1 = arith.constant 0 : i32
    return %arg0, %c0_i32, %c0_i32_0 : i32, i32, i32
  }
  func.func @transform_3(%arg0: i32) -> (i32, i32, i32, i32) {
    %c0_i32 = arith.constant 0 : i32
    %c0_i32_0 = arith.constant 0 : i32
    %c0_i32_1 = arith.constant 0 : i32
    %c0_i32_2 = arith.constant 0 : i32
    return %arg0, %c0_i32, %c0_i32_0, %c0_i32_1 : i32, i32, i32, i32
  }
  func.func @transform_4(%arg0: i32) -> (i32, i32, i32) {
    %c0_i32 = arith.constant 0 : i32
    %c0_i32_0 = arith.constant 0 : i32
    %c0_i32_1 = arith.constant 0 : i32
    return %arg0, %c0_i32, %c0_i32_0 : i32, i32, i32
  }
  func.func @transform_5(%arg0: i32) -> (i32, i32, i32, i32) {
    %c0_i32 = arith.constant 0 : i32
    %c0_i32_0 = arith.constant 0 : i32
    %c0_i32_1 = arith.constant 0 : i32
    %c0_i32_2 = arith.constant 0 : i32
    return %arg0, %c0_i32, %c0_i32_0, %c0_i32_1 : i32, i32, i32, i32
  }
  func.func @transform_6(%arg0: i32) -> (i32, i32, i32) {
    %c0_i32 = arith.constant 0 : i32
    %c0_i32_0 = arith.constant 0 : i32
    %c0_i32_1 = arith.constant 0 : i32
    return %arg0, %c0_i32, %c0_i32_0 : i32, i32, i32
  }
  func.func @transform_7(%arg0: i32) -> (i32, i32, i32, i32) {
    %c0_i32 = arith.constant 0 : i32
    %c0_i32_0 = arith.constant 0 : i32
    %c0_i32_1 = arith.constant 0 : i32
    %c0_i32_2 = arith.constant 0 : i32
    return %arg0, %c0_i32, %c0_i32_0, %c0_i32_1 : i32, i32, i32, i32
  }
  func.func @transform_8(%arg0: i32) -> (i32, i32, i32) {
    %c0_i32 = arith.constant 0 : i32
    %c0_i32_0 = arith.constant 0 : i32
    %c0_i32_1 = arith.constant 0 : i32
    return %arg0, %c0_i32, %c0_i32_0 : i32, i32, i32
  }
  func.func @transform_9(%arg0: i32) -> (i32, i32, i32, i32) {
    %c0_i32 = arith.constant 0 : i32
    %c0_i32_0 = arith.constant 0 : i32
    %c0_i32_1 = arith.constant 0 : i32
    %c0_i32_2 = arith.constant 0 : i32
    return %arg0, %c0_i32, %c0_i32_0, %c0_i32_1 : i32, i32, i32, i32
  }
  func.func @transform_10(%arg0: i32) -> (i32, i32, i32) {
    %c0_i32 = arith.constant 0 : i32
    %c0_i32_0 = arith.constant 0 : i32
    %c0_i32_1 = arith.constant 0 : i32
    return %arg0, %c0_i32, %c0_i32_0 : i32, i32, i32
  }
  func.func @transform_11(%arg0: i32) -> (i32, i32, i32) {
    %c0_i32 = arith.constant 0 : i32
    %c0_i32_0 = arith.constant 0 : i32
    %c0_i32_1 = arith.constant 0 : i32
    return %arg0, %c0_i32, %c0_i32_0 : i32, i32, i32
  }
  func.func @transform_12(%arg0: i32) -> (i32, i32, i32) {
    %c0_i32 = arith.constant 0 : i32
    %c0_i32_0 = arith.constant 0 : i32
    %c0_i32_1 = arith.constant 0 : i32
    return %arg0, %c0_i32, %c0_i32_0 : i32, i32, i32
  }
  func.func @transform_13(%arg0: i32) -> (i32, i32, i32) {
    %c0_i32 = arith.constant 0 : i32
    %c0_i32_0 = arith.constant 0 : i32
    %c0_i32_1 = arith.constant 0 : i32
    return %arg0, %c0_i32, %c0_i32_0 : i32, i32, i32
  }
}

module attributes {stable_mosaic.version = 11 : i64} {
  func.func @_rec_kernel(%arg0: memref<70x5xf32, #tpu.memory_space<vmem>>, %arg1: memref<9x5x30xf32, #tpu.memory_space<vmem>>, %arg2: memref<1x30xf32, #tpu.memory_space<vmem>>, %arg3: memref<7x30x40xf32, #tpu.memory_space<vmem>>, %arg4: memref<1x40xf32, #tpu.memory_space<vmem>>, %arg5: memref<5x40x50xf32, #tpu.memory_space<vmem>>, %arg6: memref<1x50xf32, #tpu.memory_space<vmem>>, %arg7: memref<35x50x175xf32, #tpu.memory_space<vmem>>, %arg8: memref<1x175xf32, #tpu.memory_space<vmem>>, %arg9: memref<175x1xf32, #tpu.memory_space<vmem>>, %arg10: memref<1x1xf32, #tpu.memory_space<vmem>>, %arg11: memref<2x1xf32, #tpu.memory_space<vmem>>) attributes {dimension_semantics = [], scalar_prefetch = 0 : i64, scratch_operands = 0 : i64, tpu.core_type = #tpu.core_type<tc>} {
    %c0 = arith.constant 0 : index
    %c0_0 = arith.constant 0 : index
    %0 = vector.load %arg0[%c0, %c0_0] : memref<70x5xf32, #tpu.memory_space<vmem>>, vector<70x5xf32>
    %cst = arith.constant 0.000000e+00 : f32
    %1 = vector.broadcast %cst : f32 to vector<8x5xf32>
    %2 = tpu.concatenate %1, %0, %1 in 0 : vector<8x5xf32>, vector<70x5xf32>, vector<8x5xf32> -> vector<86x5xf32>
    %3 = vector.extract_strided_slice %2 {offsets = [0, 0], sizes = [70, 5], strides = [1, 1]} : vector<86x5xf32> to vector<70x5xf32>
    %c0_1 = arith.constant 0 : index
    %c0_2 = arith.constant 0 : index
    %c0_3 = arith.constant 0 : index
    %4 = vector.load %arg1[%c0_1, %c0_2, %c0_3] : memref<9x5x30xf32, #tpu.memory_space<vmem>>, vector<1x5x30xf32>
    %5 = vector.shape_cast %4 : vector<1x5x30xf32> to vector<5x30xf32>
    %cst_4 = arith.constant dense<0.000000e+00> : vector<70x30xf32>
    %6 = tpu.matmul %3, %5, %cst_4 {dimension_numbers = #tpu.dot_dimension_numbers<[1], [0], [0], [1], [0, 0, 1, 1], [], []>} : vector<70x5xf32>, vector<5x30xf32>, vector<70x30xf32> -> vector<70x30xf32>
    %7 = vector.extract_strided_slice %2 {offsets = [2, 0], sizes = [70, 5], strides = [1, 1]} : vector<86x5xf32> to vector<70x5xf32>
    %c1 = arith.constant 1 : index
    %c0_5 = arith.constant 0 : index
    %c0_6 = arith.constant 0 : index
    %8 = vector.load %arg1[%c1, %c0_5, %c0_6] : memref<9x5x30xf32, #tpu.memory_space<vmem>>, vector<1x5x30xf32>
    %9 = vector.shape_cast %8 : vector<1x5x30xf32> to vector<5x30xf32>
    %cst_7 = arith.constant dense<0.000000e+00> : vector<70x30xf32>
    %10 = tpu.matmul %7, %9, %cst_7 {dimension_numbers = #tpu.dot_dimension_numbers<[1], [0], [0], [1], [0, 0, 1, 1], [], []>} : vector<70x5xf32>, vector<5x30xf32>, vector<70x30xf32> -> vector<70x30xf32>
    %11 = arith.addf %6, %10 : vector<70x30xf32>
    %12 = vector.extract_strided_slice %2 {offsets = [4, 0], sizes = [70, 5], strides = [1, 1]} : vector<86x5xf32> to vector<70x5xf32>
    %c2 = arith.constant 2 : index
    %c0_8 = arith.constant 0 : index
    %c0_9 = arith.constant 0 : index
    %13 = vector.load %arg1[%c2, %c0_8, %c0_9] : memref<9x5x30xf32, #tpu.memory_space<vmem>>, vector<1x5x30xf32>
    %14 = vector.shape_cast %13 : vector<1x5x30xf32> to vector<5x30xf32>
    %cst_10 = arith.constant dense<0.000000e+00> : vector<70x30xf32>
    %15 = tpu.matmul %12, %14, %cst_10 {dimension_numbers = #tpu.dot_dimension_numbers<[1], [0], [0], [1], [0, 0, 1, 1], [], []>} : vector<70x5xf32>, vector<5x30xf32>, vector<70x30xf32> -> vector<70x30xf32>
    %16 = arith.addf %11, %15 : vector<70x30xf32>
    %17 = vector.extract_strided_slice %2 {offsets = [6, 0], sizes = [70, 5], strides = [1, 1]} : vector<86x5xf32> to vector<70x5xf32>
    %c3 = arith.constant 3 : index
    %c0_11 = arith.constant 0 : index
    %c0_12 = arith.constant 0 : index
    %18 = vector.load %arg1[%c3, %c0_11, %c0_12] : memref<9x5x30xf32, #tpu.memory_space<vmem>>, vector<1x5x30xf32>
    %19 = vector.shape_cast %18 : vector<1x5x30xf32> to vector<5x30xf32>
    %cst_13 = arith.constant dense<0.000000e+00> : vector<70x30xf32>
    %20 = tpu.matmul %17, %19, %cst_13 {dimension_numbers = #tpu.dot_dimension_numbers<[1], [0], [0], [1], [0, 0, 1, 1], [], []>} : vector<70x5xf32>, vector<5x30xf32>, vector<70x30xf32> -> vector<70x30xf32>
    %21 = arith.addf %16, %20 : vector<70x30xf32>
    %22 = vector.extract_strided_slice %2 {offsets = [8, 0], sizes = [70, 5], strides = [1, 1]} : vector<86x5xf32> to vector<70x5xf32>
    %c4 = arith.constant 4 : index
    %c0_14 = arith.constant 0 : index
    %c0_15 = arith.constant 0 : index
    %23 = vector.load %arg1[%c4, %c0_14, %c0_15] : memref<9x5x30xf32, #tpu.memory_space<vmem>>, vector<1x5x30xf32>
    %24 = vector.shape_cast %23 : vector<1x5x30xf32> to vector<5x30xf32>
    %cst_16 = arith.constant dense<0.000000e+00> : vector<70x30xf32>
    %25 = tpu.matmul %22, %24, %cst_16 {dimension_numbers = #tpu.dot_dimension_numbers<[1], [0], [0], [1], [0, 0, 1, 1], [], []>} : vector<70x5xf32>, vector<5x30xf32>, vector<70x30xf32> -> vector<70x30xf32>
    %26 = arith.addf %21, %25 : vector<70x30xf32>
    %27 = vector.extract_strided_slice %2 {offsets = [10, 0], sizes = [70, 5], strides = [1, 1]} : vector<86x5xf32> to vector<70x5xf32>
    %c5 = arith.constant 5 : index
    %c0_17 = arith.constant 0 : index
    %c0_18 = arith.constant 0 : index
    %28 = vector.load %arg1[%c5, %c0_17, %c0_18] : memref<9x5x30xf32, #tpu.memory_space<vmem>>, vector<1x5x30xf32>
    %29 = vector.shape_cast %28 : vector<1x5x30xf32> to vector<5x30xf32>
    %cst_19 = arith.constant dense<0.000000e+00> : vector<70x30xf32>
    %30 = tpu.matmul %27, %29, %cst_19 {dimension_numbers = #tpu.dot_dimension_numbers<[1], [0], [0], [1], [0, 0, 1, 1], [], []>} : vector<70x5xf32>, vector<5x30xf32>, vector<70x30xf32> -> vector<70x30xf32>
    %31 = arith.addf %26, %30 : vector<70x30xf32>
    %32 = vector.extract_strided_slice %2 {offsets = [12, 0], sizes = [70, 5], strides = [1, 1]} : vector<86x5xf32> to vector<70x5xf32>
    %c6 = arith.constant 6 : index
    %c0_20 = arith.constant 0 : index
    %c0_21 = arith.constant 0 : index
    %33 = vector.load %arg1[%c6, %c0_20, %c0_21] : memref<9x5x30xf32, #tpu.memory_space<vmem>>, vector<1x5x30xf32>
    %34 = vector.shape_cast %33 : vector<1x5x30xf32> to vector<5x30xf32>
    %cst_22 = arith.constant dense<0.000000e+00> : vector<70x30xf32>
    %35 = tpu.matmul %32, %34, %cst_22 {dimension_numbers = #tpu.dot_dimension_numbers<[1], [0], [0], [1], [0, 0, 1, 1], [], []>} : vector<70x5xf32>, vector<5x30xf32>, vector<70x30xf32> -> vector<70x30xf32>
    %36 = arith.addf %31, %35 : vector<70x30xf32>
    %37 = vector.extract_strided_slice %2 {offsets = [14, 0], sizes = [70, 5], strides = [1, 1]} : vector<86x5xf32> to vector<70x5xf32>
    %c7 = arith.constant 7 : index
    %c0_23 = arith.constant 0 : index
    %c0_24 = arith.constant 0 : index
    %38 = vector.load %arg1[%c7, %c0_23, %c0_24] : memref<9x5x30xf32, #tpu.memory_space<vmem>>, vector<1x5x30xf32>
    %39 = vector.shape_cast %38 : vector<1x5x30xf32> to vector<5x30xf32>
    %cst_25 = arith.constant dense<0.000000e+00> : vector<70x30xf32>
    %40 = tpu.matmul %37, %39, %cst_25 {dimension_numbers = #tpu.dot_dimension_numbers<[1], [0], [0], [1], [0, 0, 1, 1], [], []>} : vector<70x5xf32>, vector<5x30xf32>, vector<70x30xf32> -> vector<70x30xf32>
    %41 = arith.addf %36, %40 : vector<70x30xf32>
    %42 = vector.extract_strided_slice %2 {offsets = [16, 0], sizes = [70, 5], strides = [1, 1]} : vector<86x5xf32> to vector<70x5xf32>
    %c8 = arith.constant 8 : index
    %c0_26 = arith.constant 0 : index
    %c0_27 = arith.constant 0 : index
    %43 = vector.load %arg1[%c8, %c0_26, %c0_27] : memref<9x5x30xf32, #tpu.memory_space<vmem>>, vector<1x5x30xf32>
    %44 = vector.shape_cast %43 : vector<1x5x30xf32> to vector<5x30xf32>
    %cst_28 = arith.constant dense<0.000000e+00> : vector<70x30xf32>
    %45 = tpu.matmul %42, %44, %cst_28 {dimension_numbers = #tpu.dot_dimension_numbers<[1], [0], [0], [1], [0, 0, 1, 1], [], []>} : vector<70x5xf32>, vector<5x30xf32>, vector<70x30xf32> -> vector<70x30xf32>
    %46 = arith.addf %41, %45 : vector<70x30xf32>
    %c0_29 = arith.constant 0 : index
    %c0_30 = arith.constant 0 : index
    %47 = vector.load %arg2[%c0_29, %c0_30] : memref<1x30xf32, #tpu.memory_space<vmem>>, vector<1x30xf32>
    %48 = vector.broadcast %47 : vector<1x30xf32> to vector<70x30xf32>
    %49 = arith.addf %46, %48 : vector<70x30xf32>
    %cst_31 = arith.constant 0.000000e+00 : f32
    %50 = vector.broadcast %cst_31 : f32 to vector<70x30xf32>
    %51 = arith.maximumf %49, %50 : vector<70x30xf32>
    %cst_32 = arith.constant 0.000000e+00 : f32
    %52 = vector.broadcast %cst_32 : f32 to vector<6x30xf32>
    %53 = tpu.concatenate %52, %51, %52 in 0 : vector<6x30xf32>, vector<70x30xf32>, vector<6x30xf32> -> vector<82x30xf32>
    %54 = vector.extract_strided_slice %53 {offsets = [0, 0], sizes = [70, 30], strides = [1, 1]} : vector<82x30xf32> to vector<70x30xf32>
    %c0_33 = arith.constant 0 : index
    %c0_34 = arith.constant 0 : index
    %c0_35 = arith.constant 0 : index
    %55 = vector.load %arg3[%c0_33, %c0_34, %c0_35] : memref<7x30x40xf32, #tpu.memory_space<vmem>>, vector<1x30x40xf32>
    %56 = vector.shape_cast %55 : vector<1x30x40xf32> to vector<30x40xf32>
    %cst_36 = arith.constant dense<0.000000e+00> : vector<70x40xf32>
    %57 = tpu.matmul %54, %56, %cst_36 {dimension_numbers = #tpu.dot_dimension_numbers<[1], [0], [0], [1], [0, 0, 1, 1], [], []>} : vector<70x30xf32>, vector<30x40xf32>, vector<70x40xf32> -> vector<70x40xf32>
    %58 = vector.extract_strided_slice %53 {offsets = [2, 0], sizes = [70, 30], strides = [1, 1]} : vector<82x30xf32> to vector<70x30xf32>
    %c1_37 = arith.constant 1 : index
    %c0_38 = arith.constant 0 : index
    %c0_39 = arith.constant 0 : index
    %59 = vector.load %arg3[%c1_37, %c0_38, %c0_39] : memref<7x30x40xf32, #tpu.memory_space<vmem>>, vector<1x30x40xf32>
    %60 = vector.shape_cast %59 : vector<1x30x40xf32> to vector<30x40xf32>
    %cst_40 = arith.constant dense<0.000000e+00> : vector<70x40xf32>
    %61 = tpu.matmul %58, %60, %cst_40 {dimension_numbers = #tpu.dot_dimension_numbers<[1], [0], [0], [1], [0, 0, 1, 1], [], []>} : vector<70x30xf32>, vector<30x40xf32>, vector<70x40xf32> -> vector<70x40xf32>
    %62 = arith.addf %57, %61 : vector<70x40xf32>
    %63 = vector.extract_strided_slice %53 {offsets = [4, 0], sizes = [70, 30], strides = [1, 1]} : vector<82x30xf32> to vector<70x30xf32>
    %c2_41 = arith.constant 2 : index
    %c0_42 = arith.constant 0 : index
    %c0_43 = arith.constant 0 : index
    %64 = vector.load %arg3[%c2_41, %c0_42, %c0_43] : memref<7x30x40xf32, #tpu.memory_space<vmem>>, vector<1x30x40xf32>
    %65 = vector.shape_cast %64 : vector<1x30x40xf32> to vector<30x40xf32>
    %cst_44 = arith.constant dense<0.000000e+00> : vector<70x40xf32>
    %66 = tpu.matmul %63, %65, %cst_44 {dimension_numbers = #tpu.dot_dimension_numbers<[1], [0], [0], [1], [0, 0, 1, 1], [], []>} : vector<70x30xf32>, vector<30x40xf32>, vector<70x40xf32> -> vector<70x40xf32>
    %67 = arith.addf %62, %66 : vector<70x40xf32>
    %68 = vector.extract_strided_slice %53 {offsets = [6, 0], sizes = [70, 30], strides = [1, 1]} : vector<82x30xf32> to vector<70x30xf32>
    %c3_45 = arith.constant 3 : index
    %c0_46 = arith.constant 0 : index
    %c0_47 = arith.constant 0 : index
    %69 = vector.load %arg3[%c3_45, %c0_46, %c0_47] : memref<7x30x40xf32, #tpu.memory_space<vmem>>, vector<1x30x40xf32>
    %70 = vector.shape_cast %69 : vector<1x30x40xf32> to vector<30x40xf32>
    %cst_48 = arith.constant dense<0.000000e+00> : vector<70x40xf32>
    %71 = tpu.matmul %68, %70, %cst_48 {dimension_numbers = #tpu.dot_dimension_numbers<[1], [0], [0], [1], [0, 0, 1, 1], [], []>} : vector<70x30xf32>, vector<30x40xf32>, vector<70x40xf32> -> vector<70x40xf32>
    %72 = arith.addf %67, %71 : vector<70x40xf32>
    %73 = vector.extract_strided_slice %53 {offsets = [8, 0], sizes = [70, 30], strides = [1, 1]} : vector<82x30xf32> to vector<70x30xf32>
    %c4_49 = arith.constant 4 : index
    %c0_50 = arith.constant 0 : index
    %c0_51 = arith.constant 0 : index
    %74 = vector.load %arg3[%c4_49, %c0_50, %c0_51] : memref<7x30x40xf32, #tpu.memory_space<vmem>>, vector<1x30x40xf32>
    %75 = vector.shape_cast %74 : vector<1x30x40xf32> to vector<30x40xf32>
    %cst_52 = arith.constant dense<0.000000e+00> : vector<70x40xf32>
    %76 = tpu.matmul %73, %75, %cst_52 {dimension_numbers = #tpu.dot_dimension_numbers<[1], [0], [0], [1], [0, 0, 1, 1], [], []>} : vector<70x30xf32>, vector<30x40xf32>, vector<70x40xf32> -> vector<70x40xf32>
    %77 = arith.addf %72, %76 : vector<70x40xf32>
    %78 = vector.extract_strided_slice %53 {offsets = [10, 0], sizes = [70, 30], strides = [1, 1]} : vector<82x30xf32> to vector<70x30xf32>
    %c5_53 = arith.constant 5 : index
    %c0_54 = arith.constant 0 : index
    %c0_55 = arith.constant 0 : index
    %79 = vector.load %arg3[%c5_53, %c0_54, %c0_55] : memref<7x30x40xf32, #tpu.memory_space<vmem>>, vector<1x30x40xf32>
    %80 = vector.shape_cast %79 : vector<1x30x40xf32> to vector<30x40xf32>
    %cst_56 = arith.constant dense<0.000000e+00> : vector<70x40xf32>
    %81 = tpu.matmul %78, %80, %cst_56 {dimension_numbers = #tpu.dot_dimension_numbers<[1], [0], [0], [1], [0, 0, 1, 1], [], []>} : vector<70x30xf32>, vector<30x40xf32>, vector<70x40xf32> -> vector<70x40xf32>
    %82 = arith.addf %77, %81 : vector<70x40xf32>
    %83 = vector.extract_strided_slice %53 {offsets = [12, 0], sizes = [70, 30], strides = [1, 1]} : vector<82x30xf32> to vector<70x30xf32>
    %c6_57 = arith.constant 6 : index
    %c0_58 = arith.constant 0 : index
    %c0_59 = arith.constant 0 : index
    %84 = vector.load %arg3[%c6_57, %c0_58, %c0_59] : memref<7x30x40xf32, #tpu.memory_space<vmem>>, vector<1x30x40xf32>
    %85 = vector.shape_cast %84 : vector<1x30x40xf32> to vector<30x40xf32>
    %cst_60 = arith.constant dense<0.000000e+00> : vector<70x40xf32>
    %86 = tpu.matmul %83, %85, %cst_60 {dimension_numbers = #tpu.dot_dimension_numbers<[1], [0], [0], [1], [0, 0, 1, 1], [], []>} : vector<70x30xf32>, vector<30x40xf32>, vector<70x40xf32> -> vector<70x40xf32>
    %87 = arith.addf %82, %86 : vector<70x40xf32>
    %c0_61 = arith.constant 0 : index
    %c0_62 = arith.constant 0 : index
    %88 = vector.load %arg4[%c0_61, %c0_62] : memref<1x40xf32, #tpu.memory_space<vmem>>, vector<1x40xf32>
    %89 = vector.broadcast %88 : vector<1x40xf32> to vector<70x40xf32>
    %90 = arith.addf %87, %89 : vector<70x40xf32>
    %cst_63 = arith.constant 0.000000e+00 : f32
    %91 = vector.broadcast %cst_63 : f32 to vector<70x40xf32>
    %92 = arith.maximumf %90, %91 : vector<70x40xf32>
    %cst_64 = arith.constant 0.000000e+00 : f32
    %93 = vector.broadcast %cst_64 : f32 to vector<4x40xf32>
    %94 = tpu.concatenate %93, %92, %93 in 0 : vector<4x40xf32>, vector<70x40xf32>, vector<4x40xf32> -> vector<78x40xf32>
    %95 = vector.extract_strided_slice %94 {offsets = [0, 0], sizes = [70, 40], strides = [1, 1]} : vector<78x40xf32> to vector<70x40xf32>
    %c0_65 = arith.constant 0 : index
    %c0_66 = arith.constant 0 : index
    %c0_67 = arith.constant 0 : index
    %96 = vector.load %arg5[%c0_65, %c0_66, %c0_67] : memref<5x40x50xf32, #tpu.memory_space<vmem>>, vector<1x40x50xf32>
    %97 = vector.shape_cast %96 : vector<1x40x50xf32> to vector<40x50xf32>
    %cst_68 = arith.constant dense<0.000000e+00> : vector<70x50xf32>
    %98 = tpu.matmul %95, %97, %cst_68 {dimension_numbers = #tpu.dot_dimension_numbers<[1], [0], [0], [1], [0, 0, 1, 1], [], []>} : vector<70x40xf32>, vector<40x50xf32>, vector<70x50xf32> -> vector<70x50xf32>
    %99 = vector.extract_strided_slice %94 {offsets = [2, 0], sizes = [70, 40], strides = [1, 1]} : vector<78x40xf32> to vector<70x40xf32>
    %c1_69 = arith.constant 1 : index
    %c0_70 = arith.constant 0 : index
    %c0_71 = arith.constant 0 : index
    %100 = vector.load %arg5[%c1_69, %c0_70, %c0_71] : memref<5x40x50xf32, #tpu.memory_space<vmem>>, vector<1x40x50xf32>
    %101 = vector.shape_cast %100 : vector<1x40x50xf32> to vector<40x50xf32>
    %cst_72 = arith.constant dense<0.000000e+00> : vector<70x50xf32>
    %102 = tpu.matmul %99, %101, %cst_72 {dimension_numbers = #tpu.dot_dimension_numbers<[1], [0], [0], [1], [0, 0, 1, 1], [], []>} : vector<70x40xf32>, vector<40x50xf32>, vector<70x50xf32> -> vector<70x50xf32>
    %103 = arith.addf %98, %102 : vector<70x50xf32>
    %104 = vector.extract_strided_slice %94 {offsets = [4, 0], sizes = [70, 40], strides = [1, 1]} : vector<78x40xf32> to vector<70x40xf32>
    %c2_73 = arith.constant 2 : index
    %c0_74 = arith.constant 0 : index
    %c0_75 = arith.constant 0 : index
    %105 = vector.load %arg5[%c2_73, %c0_74, %c0_75] : memref<5x40x50xf32, #tpu.memory_space<vmem>>, vector<1x40x50xf32>
    %106 = vector.shape_cast %105 : vector<1x40x50xf32> to vector<40x50xf32>
    %cst_76 = arith.constant dense<0.000000e+00> : vector<70x50xf32>
    %107 = tpu.matmul %104, %106, %cst_76 {dimension_numbers = #tpu.dot_dimension_numbers<[1], [0], [0], [1], [0, 0, 1, 1], [], []>} : vector<70x40xf32>, vector<40x50xf32>, vector<70x50xf32> -> vector<70x50xf32>
    %108 = arith.addf %103, %107 : vector<70x50xf32>
    %109 = vector.extract_strided_slice %94 {offsets = [6, 0], sizes = [70, 40], strides = [1, 1]} : vector<78x40xf32> to vector<70x40xf32>
    %c3_77 = arith.constant 3 : index
    %c0_78 = arith.constant 0 : index
    %c0_79 = arith.constant 0 : index
    %110 = vector.load %arg5[%c3_77, %c0_78, %c0_79] : memref<5x40x50xf32, #tpu.memory_space<vmem>>, vector<1x40x50xf32>
    %111 = vector.shape_cast %110 : vector<1x40x50xf32> to vector<40x50xf32>
    %cst_80 = arith.constant dense<0.000000e+00> : vector<70x50xf32>
    %112 = tpu.matmul %109, %111, %cst_80 {dimension_numbers = #tpu.dot_dimension_numbers<[1], [0], [0], [1], [0, 0, 1, 1], [], []>} : vector<70x40xf32>, vector<40x50xf32>, vector<70x50xf32> -> vector<70x50xf32>
    %113 = arith.addf %108, %112 : vector<70x50xf32>
    %114 = vector.extract_strided_slice %94 {offsets = [8, 0], sizes = [70, 40], strides = [1, 1]} : vector<78x40xf32> to vector<70x40xf32>
    %c4_81 = arith.constant 4 : index
    %c0_82 = arith.constant 0 : index
    %c0_83 = arith.constant 0 : index
    %115 = vector.load %arg5[%c4_81, %c0_82, %c0_83] : memref<5x40x50xf32, #tpu.memory_space<vmem>>, vector<1x40x50xf32>
    %116 = vector.shape_cast %115 : vector<1x40x50xf32> to vector<40x50xf32>
    %cst_84 = arith.constant dense<0.000000e+00> : vector<70x50xf32>
    %117 = tpu.matmul %114, %116, %cst_84 {dimension_numbers = #tpu.dot_dimension_numbers<[1], [0], [0], [1], [0, 0, 1, 1], [], []>} : vector<70x40xf32>, vector<40x50xf32>, vector<70x50xf32> -> vector<70x50xf32>
    %118 = arith.addf %113, %117 : vector<70x50xf32>
    %c0_85 = arith.constant 0 : index
    %c0_86 = arith.constant 0 : index
    %119 = vector.load %arg6[%c0_85, %c0_86] : memref<1x50xf32, #tpu.memory_space<vmem>>, vector<1x50xf32>
    %120 = vector.broadcast %119 : vector<1x50xf32> to vector<70x50xf32>
    %121 = arith.addf %118, %120 : vector<70x50xf32>
    %cst_87 = arith.constant 0.000000e+00 : f32
    %122 = vector.broadcast %cst_87 : f32 to vector<70x50xf32>
    %123 = arith.maximumf %121, %122 : vector<70x50xf32>
    %124 = vector.extract_strided_slice %123 {offsets = [0, 0], sizes = [2, 50], strides = [1, 1]} : vector<70x50xf32> to vector<2x50xf32>
    %c0_88 = arith.constant 0 : index
    %c0_89 = arith.constant 0 : index
    %c0_90 = arith.constant 0 : index
    %125 = vector.load %arg7[%c0_88, %c0_89, %c0_90] : memref<35x50x175xf32, #tpu.memory_space<vmem>>, vector<1x50x175xf32>
    %126 = vector.shape_cast %125 : vector<1x50x175xf32> to vector<50x175xf32>
    %cst_91 = arith.constant dense<0.000000e+00> : vector<2x175xf32>
    %127 = tpu.matmul %124, %126, %cst_91 {dimension_numbers = #tpu.dot_dimension_numbers<[1], [0], [0], [1], [0, 0, 1, 1], [], []>} : vector<2x50xf32>, vector<50x175xf32>, vector<2x175xf32> -> vector<2x175xf32>
    %128 = vector.extract_strided_slice %123 {offsets = [2, 0], sizes = [2, 50], strides = [1, 1]} : vector<70x50xf32> to vector<2x50xf32>
    %c1_92 = arith.constant 1 : index
    %c0_93 = arith.constant 0 : index
    %c0_94 = arith.constant 0 : index
    %129 = vector.load %arg7[%c1_92, %c0_93, %c0_94] : memref<35x50x175xf32, #tpu.memory_space<vmem>>, vector<1x50x175xf32>
    %130 = vector.shape_cast %129 : vector<1x50x175xf32> to vector<50x175xf32>
    %cst_95 = arith.constant dense<0.000000e+00> : vector<2x175xf32>
    %131 = tpu.matmul %128, %130, %cst_95 {dimension_numbers = #tpu.dot_dimension_numbers<[1], [0], [0], [1], [0, 0, 1, 1], [], []>} : vector<2x50xf32>, vector<50x175xf32>, vector<2x175xf32> -> vector<2x175xf32>
    %132 = arith.addf %127, %131 : vector<2x175xf32>
    %133 = vector.extract_strided_slice %123 {offsets = [4, 0], sizes = [2, 50], strides = [1, 1]} : vector<70x50xf32> to vector<2x50xf32>
    %c2_96 = arith.constant 2 : index
    %c0_97 = arith.constant 0 : index
    %c0_98 = arith.constant 0 : index
    %134 = vector.load %arg7[%c2_96, %c0_97, %c0_98] : memref<35x50x175xf32, #tpu.memory_space<vmem>>, vector<1x50x175xf32>
    %135 = vector.shape_cast %134 : vector<1x50x175xf32> to vector<50x175xf32>
    %cst_99 = arith.constant dense<0.000000e+00> : vector<2x175xf32>
    %136 = tpu.matmul %133, %135, %cst_99 {dimension_numbers = #tpu.dot_dimension_numbers<[1], [0], [0], [1], [0, 0, 1, 1], [], []>} : vector<2x50xf32>, vector<50x175xf32>, vector<2x175xf32> -> vector<2x175xf32>
    %137 = arith.addf %132, %136 : vector<2x175xf32>
    %138 = vector.extract_strided_slice %123 {offsets = [6, 0], sizes = [2, 50], strides = [1, 1]} : vector<70x50xf32> to vector<2x50xf32>
    %c3_100 = arith.constant 3 : index
    %c0_101 = arith.constant 0 : index
    %c0_102 = arith.constant 0 : index
    %139 = vector.load %arg7[%c3_100, %c0_101, %c0_102] : memref<35x50x175xf32, #tpu.memory_space<vmem>>, vector<1x50x175xf32>
    %140 = vector.shape_cast %139 : vector<1x50x175xf32> to vector<50x175xf32>
    %cst_103 = arith.constant dense<0.000000e+00> : vector<2x175xf32>
    %141 = tpu.matmul %138, %140, %cst_103 {dimension_numbers = #tpu.dot_dimension_numbers<[1], [0], [0], [1], [0, 0, 1, 1], [], []>} : vector<2x50xf32>, vector<50x175xf32>, vector<2x175xf32> -> vector<2x175xf32>
    %142 = arith.addf %137, %141 : vector<2x175xf32>
    %143 = vector.extract_strided_slice %123 {offsets = [8, 0], sizes = [2, 50], strides = [1, 1]} : vector<70x50xf32> to vector<2x50xf32>
    %c4_104 = arith.constant 4 : index
    %c0_105 = arith.constant 0 : index
    %c0_106 = arith.constant 0 : index
    %144 = vector.load %arg7[%c4_104, %c0_105, %c0_106] : memref<35x50x175xf32, #tpu.memory_space<vmem>>, vector<1x50x175xf32>
    %145 = vector.shape_cast %144 : vector<1x50x175xf32> to vector<50x175xf32>
    %cst_107 = arith.constant dense<0.000000e+00> : vector<2x175xf32>
    %146 = tpu.matmul %143, %145, %cst_107 {dimension_numbers = #tpu.dot_dimension_numbers<[1], [0], [0], [1], [0, 0, 1, 1], [], []>} : vector<2x50xf32>, vector<50x175xf32>, vector<2x175xf32> -> vector<2x175xf32>
    %147 = arith.addf %142, %146 : vector<2x175xf32>
    %148 = vector.extract_strided_slice %123 {offsets = [10, 0], sizes = [2, 50], strides = [1, 1]} : vector<70x50xf32> to vector<2x50xf32>
    %c5_108 = arith.constant 5 : index
    %c0_109 = arith.constant 0 : index
    %c0_110 = arith.constant 0 : index
    %149 = vector.load %arg7[%c5_108, %c0_109, %c0_110] : memref<35x50x175xf32, #tpu.memory_space<vmem>>, vector<1x50x175xf32>
    %150 = vector.shape_cast %149 : vector<1x50x175xf32> to vector<50x175xf32>
    %cst_111 = arith.constant dense<0.000000e+00> : vector<2x175xf32>
    %151 = tpu.matmul %148, %150, %cst_111 {dimension_numbers = #tpu.dot_dimension_numbers<[1], [0], [0], [1], [0, 0, 1, 1], [], []>} : vector<2x50xf32>, vector<50x175xf32>, vector<2x175xf32> -> vector<2x175xf32>
    %152 = arith.addf %147, %151 : vector<2x175xf32>
    %153 = vector.extract_strided_slice %123 {offsets = [12, 0], sizes = [2, 50], strides = [1, 1]} : vector<70x50xf32> to vector<2x50xf32>
    %c6_112 = arith.constant 6 : index
    %c0_113 = arith.constant 0 : index
    %c0_114 = arith.constant 0 : index
    %154 = vector.load %arg7[%c6_112, %c0_113, %c0_114] : memref<35x50x175xf32, #tpu.memory_space<vmem>>, vector<1x50x175xf32>
    %155 = vector.shape_cast %154 : vector<1x50x175xf32> to vector<50x175xf32>
    %cst_115 = arith.constant dense<0.000000e+00> : vector<2x175xf32>
    %156 = tpu.matmul %153, %155, %cst_115 {dimension_numbers = #tpu.dot_dimension_numbers<[1], [0], [0], [1], [0, 0, 1, 1], [], []>} : vector<2x50xf32>, vector<50x175xf32>, vector<2x175xf32> -> vector<2x175xf32>
    %157 = arith.addf %152, %156 : vector<2x175xf32>
    %158 = vector.extract_strided_slice %123 {offsets = [14, 0], sizes = [2, 50], strides = [1, 1]} : vector<70x50xf32> to vector<2x50xf32>
    %c7_116 = arith.constant 7 : index
    %c0_117 = arith.constant 0 : index
    %c0_118 = arith.constant 0 : index
    %159 = vector.load %arg7[%c7_116, %c0_117, %c0_118] : memref<35x50x175xf32, #tpu.memory_space<vmem>>, vector<1x50x175xf32>
    %160 = vector.shape_cast %159 : vector<1x50x175xf32> to vector<50x175xf32>
    %cst_119 = arith.constant dense<0.000000e+00> : vector<2x175xf32>
    %161 = tpu.matmul %158, %160, %cst_119 {dimension_numbers = #tpu.dot_dimension_numbers<[1], [0], [0], [1], [0, 0, 1, 1], [], []>} : vector<2x50xf32>, vector<50x175xf32>, vector<2x175xf32> -> vector<2x175xf32>
    %162 = arith.addf %157, %161 : vector<2x175xf32>
    %163 = vector.extract_strided_slice %123 {offsets = [16, 0], sizes = [2, 50], strides = [1, 1]} : vector<70x50xf32> to vector<2x50xf32>
    %c8_120 = arith.constant 8 : index
    %c0_121 = arith.constant 0 : index
    %c0_122 = arith.constant 0 : index
    %164 = vector.load %arg7[%c8_120, %c0_121, %c0_122] : memref<35x50x175xf32, #tpu.memory_space<vmem>>, vector<1x50x175xf32>
    %165 = vector.shape_cast %164 : vector<1x50x175xf32> to vector<50x175xf32>
    %cst_123 = arith.constant dense<0.000000e+00> : vector<2x175xf32>
    %166 = tpu.matmul %163, %165, %cst_123 {dimension_numbers = #tpu.dot_dimension_numbers<[1], [0], [0], [1], [0, 0, 1, 1], [], []>} : vector<2x50xf32>, vector<50x175xf32>, vector<2x175xf32> -> vector<2x175xf32>
    %167 = arith.addf %162, %166 : vector<2x175xf32>
    %168 = vector.extract_strided_slice %123 {offsets = [18, 0], sizes = [2, 50], strides = [1, 1]} : vector<70x50xf32> to vector<2x50xf32>
    %c9 = arith.constant 9 : index
    %c0_124 = arith.constant 0 : index
    %c0_125 = arith.constant 0 : index
    %169 = vector.load %arg7[%c9, %c0_124, %c0_125] : memref<35x50x175xf32, #tpu.memory_space<vmem>>, vector<1x50x175xf32>
    %170 = vector.shape_cast %169 : vector<1x50x175xf32> to vector<50x175xf32>
    %cst_126 = arith.constant dense<0.000000e+00> : vector<2x175xf32>
    %171 = tpu.matmul %168, %170, %cst_126 {dimension_numbers = #tpu.dot_dimension_numbers<[1], [0], [0], [1], [0, 0, 1, 1], [], []>} : vector<2x50xf32>, vector<50x175xf32>, vector<2x175xf32> -> vector<2x175xf32>
    %172 = arith.addf %167, %171 : vector<2x175xf32>
    %173 = vector.extract_strided_slice %123 {offsets = [20, 0], sizes = [2, 50], strides = [1, 1]} : vector<70x50xf32> to vector<2x50xf32>
    %c10 = arith.constant 10 : index
    %c0_127 = arith.constant 0 : index
    %c0_128 = arith.constant 0 : index
    %174 = vector.load %arg7[%c10, %c0_127, %c0_128] : memref<35x50x175xf32, #tpu.memory_space<vmem>>, vector<1x50x175xf32>
    %175 = vector.shape_cast %174 : vector<1x50x175xf32> to vector<50x175xf32>
    %cst_129 = arith.constant dense<0.000000e+00> : vector<2x175xf32>
    %176 = tpu.matmul %173, %175, %cst_129 {dimension_numbers = #tpu.dot_dimension_numbers<[1], [0], [0], [1], [0, 0, 1, 1], [], []>} : vector<2x50xf32>, vector<50x175xf32>, vector<2x175xf32> -> vector<2x175xf32>
    %177 = arith.addf %172, %176 : vector<2x175xf32>
    %178 = vector.extract_strided_slice %123 {offsets = [22, 0], sizes = [2, 50], strides = [1, 1]} : vector<70x50xf32> to vector<2x50xf32>
    %c11 = arith.constant 11 : index
    %c0_130 = arith.constant 0 : index
    %c0_131 = arith.constant 0 : index
    %179 = vector.load %arg7[%c11, %c0_130, %c0_131] : memref<35x50x175xf32, #tpu.memory_space<vmem>>, vector<1x50x175xf32>
    %180 = vector.shape_cast %179 : vector<1x50x175xf32> to vector<50x175xf32>
    %cst_132 = arith.constant dense<0.000000e+00> : vector<2x175xf32>
    %181 = tpu.matmul %178, %180, %cst_132 {dimension_numbers = #tpu.dot_dimension_numbers<[1], [0], [0], [1], [0, 0, 1, 1], [], []>} : vector<2x50xf32>, vector<50x175xf32>, vector<2x175xf32> -> vector<2x175xf32>
    %182 = arith.addf %177, %181 : vector<2x175xf32>
    %183 = vector.extract_strided_slice %123 {offsets = [24, 0], sizes = [2, 50], strides = [1, 1]} : vector<70x50xf32> to vector<2x50xf32>
    %c12 = arith.constant 12 : index
    %c0_133 = arith.constant 0 : index
    %c0_134 = arith.constant 0 : index
    %184 = vector.load %arg7[%c12, %c0_133, %c0_134] : memref<35x50x175xf32, #tpu.memory_space<vmem>>, vector<1x50x175xf32>
    %185 = vector.shape_cast %184 : vector<1x50x175xf32> to vector<50x175xf32>
    %cst_135 = arith.constant dense<0.000000e+00> : vector<2x175xf32>
    %186 = tpu.matmul %183, %185, %cst_135 {dimension_numbers = #tpu.dot_dimension_numbers<[1], [0], [0], [1], [0, 0, 1, 1], [], []>} : vector<2x50xf32>, vector<50x175xf32>, vector<2x175xf32> -> vector<2x175xf32>
    %187 = arith.addf %182, %186 : vector<2x175xf32>
    %188 = vector.extract_strided_slice %123 {offsets = [26, 0], sizes = [2, 50], strides = [1, 1]} : vector<70x50xf32> to vector<2x50xf32>
    %c13 = arith.constant 13 : index
    %c0_136 = arith.constant 0 : index
    %c0_137 = arith.constant 0 : index
    %189 = vector.load %arg7[%c13, %c0_136, %c0_137] : memref<35x50x175xf32, #tpu.memory_space<vmem>>, vector<1x50x175xf32>
    %190 = vector.shape_cast %189 : vector<1x50x175xf32> to vector<50x175xf32>
    %cst_138 = arith.constant dense<0.000000e+00> : vector<2x175xf32>
    %191 = tpu.matmul %188, %190, %cst_138 {dimension_numbers = #tpu.dot_dimension_numbers<[1], [0], [0], [1], [0, 0, 1, 1], [], []>} : vector<2x50xf32>, vector<50x175xf32>, vector<2x175xf32> -> vector<2x175xf32>
    %192 = arith.addf %187, %191 : vector<2x175xf32>
    %193 = vector.extract_strided_slice %123 {offsets = [28, 0], sizes = [2, 50], strides = [1, 1]} : vector<70x50xf32> to vector<2x50xf32>
    %c14 = arith.constant 14 : index
    %c0_139 = arith.constant 0 : index
    %c0_140 = arith.constant 0 : index
    %194 = vector.load %arg7[%c14, %c0_139, %c0_140] : memref<35x50x175xf32, #tpu.memory_space<vmem>>, vector<1x50x175xf32>
    %195 = vector.shape_cast %194 : vector<1x50x175xf32> to vector<50x175xf32>
    %cst_141 = arith.constant dense<0.000000e+00> : vector<2x175xf32>
    %196 = tpu.matmul %193, %195, %cst_141 {dimension_numbers = #tpu.dot_dimension_numbers<[1], [0], [0], [1], [0, 0, 1, 1], [], []>} : vector<2x50xf32>, vector<50x175xf32>, vector<2x175xf32> -> vector<2x175xf32>
    %197 = arith.addf %192, %196 : vector<2x175xf32>
    %198 = vector.extract_strided_slice %123 {offsets = [30, 0], sizes = [2, 50], strides = [1, 1]} : vector<70x50xf32> to vector<2x50xf32>
    %c15 = arith.constant 15 : index
    %c0_142 = arith.constant 0 : index
    %c0_143 = arith.constant 0 : index
    %199 = vector.load %arg7[%c15, %c0_142, %c0_143] : memref<35x50x175xf32, #tpu.memory_space<vmem>>, vector<1x50x175xf32>
    %200 = vector.shape_cast %199 : vector<1x50x175xf32> to vector<50x175xf32>
    %cst_144 = arith.constant dense<0.000000e+00> : vector<2x175xf32>
    %201 = tpu.matmul %198, %200, %cst_144 {dimension_numbers = #tpu.dot_dimension_numbers<[1], [0], [0], [1], [0, 0, 1, 1], [], []>} : vector<2x50xf32>, vector<50x175xf32>, vector<2x175xf32> -> vector<2x175xf32>
    %202 = arith.addf %197, %201 : vector<2x175xf32>
    %203 = vector.extract_strided_slice %123 {offsets = [32, 0], sizes = [2, 50], strides = [1, 1]} : vector<70x50xf32> to vector<2x50xf32>
    %c16 = arith.constant 16 : index
    %c0_145 = arith.constant 0 : index
    %c0_146 = arith.constant 0 : index
    %204 = vector.load %arg7[%c16, %c0_145, %c0_146] : memref<35x50x175xf32, #tpu.memory_space<vmem>>, vector<1x50x175xf32>
    %205 = vector.shape_cast %204 : vector<1x50x175xf32> to vector<50x175xf32>
    %cst_147 = arith.constant dense<0.000000e+00> : vector<2x175xf32>
    %206 = tpu.matmul %203, %205, %cst_147 {dimension_numbers = #tpu.dot_dimension_numbers<[1], [0], [0], [1], [0, 0, 1, 1], [], []>} : vector<2x50xf32>, vector<50x175xf32>, vector<2x175xf32> -> vector<2x175xf32>
    %207 = arith.addf %202, %206 : vector<2x175xf32>
    %208 = vector.extract_strided_slice %123 {offsets = [34, 0], sizes = [2, 50], strides = [1, 1]} : vector<70x50xf32> to vector<2x50xf32>
    %c17 = arith.constant 17 : index
    %c0_148 = arith.constant 0 : index
    %c0_149 = arith.constant 0 : index
    %209 = vector.load %arg7[%c17, %c0_148, %c0_149] : memref<35x50x175xf32, #tpu.memory_space<vmem>>, vector<1x50x175xf32>
    %210 = vector.shape_cast %209 : vector<1x50x175xf32> to vector<50x175xf32>
    %cst_150 = arith.constant dense<0.000000e+00> : vector<2x175xf32>
    %211 = tpu.matmul %208, %210, %cst_150 {dimension_numbers = #tpu.dot_dimension_numbers<[1], [0], [0], [1], [0, 0, 1, 1], [], []>} : vector<2x50xf32>, vector<50x175xf32>, vector<2x175xf32> -> vector<2x175xf32>
    %212 = arith.addf %207, %211 : vector<2x175xf32>
    %213 = vector.extract_strided_slice %123 {offsets = [36, 0], sizes = [2, 50], strides = [1, 1]} : vector<70x50xf32> to vector<2x50xf32>
    %c18 = arith.constant 18 : index
    %c0_151 = arith.constant 0 : index
    %c0_152 = arith.constant 0 : index
    %214 = vector.load %arg7[%c18, %c0_151, %c0_152] : memref<35x50x175xf32, #tpu.memory_space<vmem>>, vector<1x50x175xf32>
    %215 = vector.shape_cast %214 : vector<1x50x175xf32> to vector<50x175xf32>
    %cst_153 = arith.constant dense<0.000000e+00> : vector<2x175xf32>
    %216 = tpu.matmul %213, %215, %cst_153 {dimension_numbers = #tpu.dot_dimension_numbers<[1], [0], [0], [1], [0, 0, 1, 1], [], []>} : vector<2x50xf32>, vector<50x175xf32>, vector<2x175xf32> -> vector<2x175xf32>
    %217 = arith.addf %212, %216 : vector<2x175xf32>
    %218 = vector.extract_strided_slice %123 {offsets = [38, 0], sizes = [2, 50], strides = [1, 1]} : vector<70x50xf32> to vector<2x50xf32>
    %c19 = arith.constant 19 : index
    %c0_154 = arith.constant 0 : index
    %c0_155 = arith.constant 0 : index
    %219 = vector.load %arg7[%c19, %c0_154, %c0_155] : memref<35x50x175xf32, #tpu.memory_space<vmem>>, vector<1x50x175xf32>
    %220 = vector.shape_cast %219 : vector<1x50x175xf32> to vector<50x175xf32>
    %cst_156 = arith.constant dense<0.000000e+00> : vector<2x175xf32>
    %221 = tpu.matmul %218, %220, %cst_156 {dimension_numbers = #tpu.dot_dimension_numbers<[1], [0], [0], [1], [0, 0, 1, 1], [], []>} : vector<2x50xf32>, vector<50x175xf32>, vector<2x175xf32> -> vector<2x175xf32>
    %222 = arith.addf %217, %221 : vector<2x175xf32>
    %223 = vector.extract_strided_slice %123 {offsets = [40, 0], sizes = [2, 50], strides = [1, 1]} : vector<70x50xf32> to vector<2x50xf32>
    %c20 = arith.constant 20 : index
    %c0_157 = arith.constant 0 : index
    %c0_158 = arith.constant 0 : index
    %224 = vector.load %arg7[%c20, %c0_157, %c0_158] : memref<35x50x175xf32, #tpu.memory_space<vmem>>, vector<1x50x175xf32>
    %225 = vector.shape_cast %224 : vector<1x50x175xf32> to vector<50x175xf32>
    %cst_159 = arith.constant dense<0.000000e+00> : vector<2x175xf32>
    %226 = tpu.matmul %223, %225, %cst_159 {dimension_numbers = #tpu.dot_dimension_numbers<[1], [0], [0], [1], [0, 0, 1, 1], [], []>} : vector<2x50xf32>, vector<50x175xf32>, vector<2x175xf32> -> vector<2x175xf32>
    %227 = arith.addf %222, %226 : vector<2x175xf32>
    %228 = vector.extract_strided_slice %123 {offsets = [42, 0], sizes = [2, 50], strides = [1, 1]} : vector<70x50xf32> to vector<2x50xf32>
    %c21 = arith.constant 21 : index
    %c0_160 = arith.constant 0 : index
    %c0_161 = arith.constant 0 : index
    %229 = vector.load %arg7[%c21, %c0_160, %c0_161] : memref<35x50x175xf32, #tpu.memory_space<vmem>>, vector<1x50x175xf32>
    %230 = vector.shape_cast %229 : vector<1x50x175xf32> to vector<50x175xf32>
    %cst_162 = arith.constant dense<0.000000e+00> : vector<2x175xf32>
    %231 = tpu.matmul %228, %230, %cst_162 {dimension_numbers = #tpu.dot_dimension_numbers<[1], [0], [0], [1], [0, 0, 1, 1], [], []>} : vector<2x50xf32>, vector<50x175xf32>, vector<2x175xf32> -> vector<2x175xf32>
    %232 = arith.addf %227, %231 : vector<2x175xf32>
    %233 = vector.extract_strided_slice %123 {offsets = [44, 0], sizes = [2, 50], strides = [1, 1]} : vector<70x50xf32> to vector<2x50xf32>
    %c22 = arith.constant 22 : index
    %c0_163 = arith.constant 0 : index
    %c0_164 = arith.constant 0 : index
    %234 = vector.load %arg7[%c22, %c0_163, %c0_164] : memref<35x50x175xf32, #tpu.memory_space<vmem>>, vector<1x50x175xf32>
    %235 = vector.shape_cast %234 : vector<1x50x175xf32> to vector<50x175xf32>
    %cst_165 = arith.constant dense<0.000000e+00> : vector<2x175xf32>
    %236 = tpu.matmul %233, %235, %cst_165 {dimension_numbers = #tpu.dot_dimension_numbers<[1], [0], [0], [1], [0, 0, 1, 1], [], []>} : vector<2x50xf32>, vector<50x175xf32>, vector<2x175xf32> -> vector<2x175xf32>
    %237 = arith.addf %232, %236 : vector<2x175xf32>
    %238 = vector.extract_strided_slice %123 {offsets = [46, 0], sizes = [2, 50], strides = [1, 1]} : vector<70x50xf32> to vector<2x50xf32>
    %c23 = arith.constant 23 : index
    %c0_166 = arith.constant 0 : index
    %c0_167 = arith.constant 0 : index
    %239 = vector.load %arg7[%c23, %c0_166, %c0_167] : memref<35x50x175xf32, #tpu.memory_space<vmem>>, vector<1x50x175xf32>
    %240 = vector.shape_cast %239 : vector<1x50x175xf32> to vector<50x175xf32>
    %cst_168 = arith.constant dense<0.000000e+00> : vector<2x175xf32>
    %241 = tpu.matmul %238, %240, %cst_168 {dimension_numbers = #tpu.dot_dimension_numbers<[1], [0], [0], [1], [0, 0, 1, 1], [], []>} : vector<2x50xf32>, vector<50x175xf32>, vector<2x175xf32> -> vector<2x175xf32>
    %242 = arith.addf %237, %241 : vector<2x175xf32>
    %243 = vector.extract_strided_slice %123 {offsets = [48, 0], sizes = [2, 50], strides = [1, 1]} : vector<70x50xf32> to vector<2x50xf32>
    %c24 = arith.constant 24 : index
    %c0_169 = arith.constant 0 : index
    %c0_170 = arith.constant 0 : index
    %244 = vector.load %arg7[%c24, %c0_169, %c0_170] : memref<35x50x175xf32, #tpu.memory_space<vmem>>, vector<1x50x175xf32>
    %245 = vector.shape_cast %244 : vector<1x50x175xf32> to vector<50x175xf32>
    %cst_171 = arith.constant dense<0.000000e+00> : vector<2x175xf32>
    %246 = tpu.matmul %243, %245, %cst_171 {dimension_numbers = #tpu.dot_dimension_numbers<[1], [0], [0], [1], [0, 0, 1, 1], [], []>} : vector<2x50xf32>, vector<50x175xf32>, vector<2x175xf32> -> vector<2x175xf32>
    %247 = arith.addf %242, %246 : vector<2x175xf32>
    %248 = vector.extract_strided_slice %123 {offsets = [50, 0], sizes = [2, 50], strides = [1, 1]} : vector<70x50xf32> to vector<2x50xf32>
    %c25 = arith.constant 25 : index
    %c0_172 = arith.constant 0 : index
    %c0_173 = arith.constant 0 : index
    %249 = vector.load %arg7[%c25, %c0_172, %c0_173] : memref<35x50x175xf32, #tpu.memory_space<vmem>>, vector<1x50x175xf32>
    %250 = vector.shape_cast %249 : vector<1x50x175xf32> to vector<50x175xf32>
    %cst_174 = arith.constant dense<0.000000e+00> : vector<2x175xf32>
    %251 = tpu.matmul %248, %250, %cst_174 {dimension_numbers = #tpu.dot_dimension_numbers<[1], [0], [0], [1], [0, 0, 1, 1], [], []>} : vector<2x50xf32>, vector<50x175xf32>, vector<2x175xf32> -> vector<2x175xf32>
    %252 = arith.addf %247, %251 : vector<2x175xf32>
    %253 = vector.extract_strided_slice %123 {offsets = [52, 0], sizes = [2, 50], strides = [1, 1]} : vector<70x50xf32> to vector<2x50xf32>
    %c26 = arith.constant 26 : index
    %c0_175 = arith.constant 0 : index
    %c0_176 = arith.constant 0 : index
    %254 = vector.load %arg7[%c26, %c0_175, %c0_176] : memref<35x50x175xf32, #tpu.memory_space<vmem>>, vector<1x50x175xf32>
    %255 = vector.shape_cast %254 : vector<1x50x175xf32> to vector<50x175xf32>
    %cst_177 = arith.constant dense<0.000000e+00> : vector<2x175xf32>
    %256 = tpu.matmul %253, %255, %cst_177 {dimension_numbers = #tpu.dot_dimension_numbers<[1], [0], [0], [1], [0, 0, 1, 1], [], []>} : vector<2x50xf32>, vector<50x175xf32>, vector<2x175xf32> -> vector<2x175xf32>
    %257 = arith.addf %252, %256 : vector<2x175xf32>
    %258 = vector.extract_strided_slice %123 {offsets = [54, 0], sizes = [2, 50], strides = [1, 1]} : vector<70x50xf32> to vector<2x50xf32>
    %c27 = arith.constant 27 : index
    %c0_178 = arith.constant 0 : index
    %c0_179 = arith.constant 0 : index
    %259 = vector.load %arg7[%c27, %c0_178, %c0_179] : memref<35x50x175xf32, #tpu.memory_space<vmem>>, vector<1x50x175xf32>
    %260 = vector.shape_cast %259 : vector<1x50x175xf32> to vector<50x175xf32>
    %cst_180 = arith.constant dense<0.000000e+00> : vector<2x175xf32>
    %261 = tpu.matmul %258, %260, %cst_180 {dimension_numbers = #tpu.dot_dimension_numbers<[1], [0], [0], [1], [0, 0, 1, 1], [], []>} : vector<2x50xf32>, vector<50x175xf32>, vector<2x175xf32> -> vector<2x175xf32>
    %262 = arith.addf %257, %261 : vector<2x175xf32>
    %263 = vector.extract_strided_slice %123 {offsets = [56, 0], sizes = [2, 50], strides = [1, 1]} : vector<70x50xf32> to vector<2x50xf32>
    %c28 = arith.constant 28 : index
    %c0_181 = arith.constant 0 : index
    %c0_182 = arith.constant 0 : index
    %264 = vector.load %arg7[%c28, %c0_181, %c0_182] : memref<35x50x175xf32, #tpu.memory_space<vmem>>, vector<1x50x175xf32>
    %265 = vector.shape_cast %264 : vector<1x50x175xf32> to vector<50x175xf32>
    %cst_183 = arith.constant dense<0.000000e+00> : vector<2x175xf32>
    %266 = tpu.matmul %263, %265, %cst_183 {dimension_numbers = #tpu.dot_dimension_numbers<[1], [0], [0], [1], [0, 0, 1, 1], [], []>} : vector<2x50xf32>, vector<50x175xf32>, vector<2x175xf32> -> vector<2x175xf32>
    %267 = arith.addf %262, %266 : vector<2x175xf32>
    %268 = vector.extract_strided_slice %123 {offsets = [58, 0], sizes = [2, 50], strides = [1, 1]} : vector<70x50xf32> to vector<2x50xf32>
    %c29 = arith.constant 29 : index
    %c0_184 = arith.constant 0 : index
    %c0_185 = arith.constant 0 : index
    %269 = vector.load %arg7[%c29, %c0_184, %c0_185] : memref<35x50x175xf32, #tpu.memory_space<vmem>>, vector<1x50x175xf32>
    %270 = vector.shape_cast %269 : vector<1x50x175xf32> to vector<50x175xf32>
    %cst_186 = arith.constant dense<0.000000e+00> : vector<2x175xf32>
    %271 = tpu.matmul %268, %270, %cst_186 {dimension_numbers = #tpu.dot_dimension_numbers<[1], [0], [0], [1], [0, 0, 1, 1], [], []>} : vector<2x50xf32>, vector<50x175xf32>, vector<2x175xf32> -> vector<2x175xf32>
    %272 = arith.addf %267, %271 : vector<2x175xf32>
    %273 = vector.extract_strided_slice %123 {offsets = [60, 0], sizes = [2, 50], strides = [1, 1]} : vector<70x50xf32> to vector<2x50xf32>
    %c30 = arith.constant 30 : index
    %c0_187 = arith.constant 0 : index
    %c0_188 = arith.constant 0 : index
    %274 = vector.load %arg7[%c30, %c0_187, %c0_188] : memref<35x50x175xf32, #tpu.memory_space<vmem>>, vector<1x50x175xf32>
    %275 = vector.shape_cast %274 : vector<1x50x175xf32> to vector<50x175xf32>
    %cst_189 = arith.constant dense<0.000000e+00> : vector<2x175xf32>
    %276 = tpu.matmul %273, %275, %cst_189 {dimension_numbers = #tpu.dot_dimension_numbers<[1], [0], [0], [1], [0, 0, 1, 1], [], []>} : vector<2x50xf32>, vector<50x175xf32>, vector<2x175xf32> -> vector<2x175xf32>
    %277 = arith.addf %272, %276 : vector<2x175xf32>
    %278 = vector.extract_strided_slice %123 {offsets = [62, 0], sizes = [2, 50], strides = [1, 1]} : vector<70x50xf32> to vector<2x50xf32>
    %c31 = arith.constant 31 : index
    %c0_190 = arith.constant 0 : index
    %c0_191 = arith.constant 0 : index
    %279 = vector.load %arg7[%c31, %c0_190, %c0_191] : memref<35x50x175xf32, #tpu.memory_space<vmem>>, vector<1x50x175xf32>
    %280 = vector.shape_cast %279 : vector<1x50x175xf32> to vector<50x175xf32>
    %cst_192 = arith.constant dense<0.000000e+00> : vector<2x175xf32>
    %281 = tpu.matmul %278, %280, %cst_192 {dimension_numbers = #tpu.dot_dimension_numbers<[1], [0], [0], [1], [0, 0, 1, 1], [], []>} : vector<2x50xf32>, vector<50x175xf32>, vector<2x175xf32> -> vector<2x175xf32>
    %282 = arith.addf %277, %281 : vector<2x175xf32>
    %283 = vector.extract_strided_slice %123 {offsets = [64, 0], sizes = [2, 50], strides = [1, 1]} : vector<70x50xf32> to vector<2x50xf32>
    %c32 = arith.constant 32 : index
    %c0_193 = arith.constant 0 : index
    %c0_194 = arith.constant 0 : index
    %284 = vector.load %arg7[%c32, %c0_193, %c0_194] : memref<35x50x175xf32, #tpu.memory_space<vmem>>, vector<1x50x175xf32>
    %285 = vector.shape_cast %284 : vector<1x50x175xf32> to vector<50x175xf32>
    %cst_195 = arith.constant dense<0.000000e+00> : vector<2x175xf32>
    %286 = tpu.matmul %283, %285, %cst_195 {dimension_numbers = #tpu.dot_dimension_numbers<[1], [0], [0], [1], [0, 0, 1, 1], [], []>} : vector<2x50xf32>, vector<50x175xf32>, vector<2x175xf32> -> vector<2x175xf32>
    %287 = arith.addf %282, %286 : vector<2x175xf32>
    %288 = vector.extract_strided_slice %123 {offsets = [66, 0], sizes = [2, 50], strides = [1, 1]} : vector<70x50xf32> to vector<2x50xf32>
    %c33 = arith.constant 33 : index
    %c0_196 = arith.constant 0 : index
    %c0_197 = arith.constant 0 : index
    %289 = vector.load %arg7[%c33, %c0_196, %c0_197] : memref<35x50x175xf32, #tpu.memory_space<vmem>>, vector<1x50x175xf32>
    %290 = vector.shape_cast %289 : vector<1x50x175xf32> to vector<50x175xf32>
    %cst_198 = arith.constant dense<0.000000e+00> : vector<2x175xf32>
    %291 = tpu.matmul %288, %290, %cst_198 {dimension_numbers = #tpu.dot_dimension_numbers<[1], [0], [0], [1], [0, 0, 1, 1], [], []>} : vector<2x50xf32>, vector<50x175xf32>, vector<2x175xf32> -> vector<2x175xf32>
    %292 = arith.addf %287, %291 : vector<2x175xf32>
    %293 = vector.extract_strided_slice %123 {offsets = [68, 0], sizes = [2, 50], strides = [1, 1]} : vector<70x50xf32> to vector<2x50xf32>
    %c34 = arith.constant 34 : index
    %c0_199 = arith.constant 0 : index
    %c0_200 = arith.constant 0 : index
    %294 = vector.load %arg7[%c34, %c0_199, %c0_200] : memref<35x50x175xf32, #tpu.memory_space<vmem>>, vector<1x50x175xf32>
    %295 = vector.shape_cast %294 : vector<1x50x175xf32> to vector<50x175xf32>
    %cst_201 = arith.constant dense<0.000000e+00> : vector<2x175xf32>
    %296 = tpu.matmul %293, %295, %cst_201 {dimension_numbers = #tpu.dot_dimension_numbers<[1], [0], [0], [1], [0, 0, 1, 1], [], []>} : vector<2x50xf32>, vector<50x175xf32>, vector<2x175xf32> -> vector<2x175xf32>
    %297 = arith.addf %292, %296 : vector<2x175xf32>
    %c0_202 = arith.constant 0 : index
    %c0_203 = arith.constant 0 : index
    %298 = vector.load %arg8[%c0_202, %c0_203] : memref<1x175xf32, #tpu.memory_space<vmem>>, vector<1x175xf32>
    %299 = vector.broadcast %298 : vector<1x175xf32> to vector<2x175xf32>
    %300 = arith.addf %297, %299 : vector<2x175xf32>
    %cst_204 = arith.constant 0.000000e+00 : f32
    %301 = vector.broadcast %cst_204 : f32 to vector<2x175xf32>
    %302 = arith.maximumf %300, %301 : vector<2x175xf32>
    %c0_205 = arith.constant 0 : index
    %c0_206 = arith.constant 0 : index
    %303 = vector.load %arg9[%c0_205, %c0_206] : memref<175x1xf32, #tpu.memory_space<vmem>>, vector<175x1xf32>
    %cst_207 = arith.constant dense<0.000000e+00> : vector<2x1xf32>
    %304 = tpu.matmul %302, %303, %cst_207 {dimension_numbers = #tpu.dot_dimension_numbers<[1], [0], [0], [1], [0, 0, 1, 1], [], []>} : vector<2x175xf32>, vector<175x1xf32>, vector<2x1xf32> -> vector<2x1xf32>
    %c0_208 = arith.constant 0 : index
    %c0_209 = arith.constant 0 : index
    %305 = vector.load %arg10[%c0_208, %c0_209] : memref<1x1xf32, #tpu.memory_space<vmem>>, vector<1x1xf32>
    %306 = vector.broadcast %305 : vector<1x1xf32> to vector<2x1xf32>
    %307 = arith.addf %304, %306 : vector<2x1xf32>
    %c0_210 = arith.constant 0 : index
    %c0_211 = arith.constant 0 : index
    %308 = vector.load %arg11[%c0_210, %c0_211] : memref<2x1xf32, #tpu.memory_space<vmem>>, vector<2x1xf32>
    tpu.vector_store %arg11[%c0_210, %c0_211], %307 {strides = array<i32>} : memref<2x1xf32, #tpu.memory_space<vmem>>, vector<2x1xf32>,
    return
  }
}

</mosaic_0001>

<bundles_post_ra>
// kernel: generator_forward.2
= control target key start
LH: loop header
LB: loop body
LE: loop exit
PB: predicated region body
PF: predicated region fallthrough
CT: control target
= control target key end

     0   :  { %s7952_s0 = inlined_call_operand.vmem [shape: f32[32,9], index: 0, kind: input, shape index: {}]   ;;  %s7953_s1 = inlined_call_operand.vmem [shape: f32[5,9,24], index: 1, kind: input, shape index: {}]   ;;  %s7954_s2 = inlined_call_operand.hbm [shape: f32[5,1,24], index: 2, kind: input, shape index: {}]   ;;  %s7955_s3 = inlined_call_operand.hbm [shape: f32[5,7,24,48], index: 3, kind: input, shape index: {}]   ;;  %s7956_s4 = inlined_call_operand.hbm [shape: f32[5,1,48], index: 4, kind: input, shape index: {}]   ;;  %s7957_s5 = inlined_call_operand.hbm [shape: f32[5,5,48,72], index: 5, kind: input, shape index: {}]   ;;  %s7958_s6 = inlined_call_operand.hbm [shape: f32[5,1,72], index: 6, kind: input, shape index: {}]   ;;  %s7959_s7 = inlined_call_operand.hbm [shape: f32[5,3,72,96], index: 7, kind: input, shape index: {}]   ;;  %s7960_s8 = inlined_call_operand.hbm [shape: f32[5,1,96], index: 8, kind: input, shape index: {}]   ;;  %s7961_s9 = inlined_call_operand.hbm [shape: f32[5,16,96,96], index: 9, kind: input, shape index: {}]   ;;  %s7962_s10 = inlined_call_operand.hbm [shape: f32[5,1,96], index: 10, kind: input, shape index: {}]   ;;  %s7963_s11 = inlined_call_operand.vmem [shape: f32[5,96,35], index: 11, kind: input, shape index: {}]   ;;  %s7964_s12 = inlined_call_operand.hbm [shape: f32[5,1,35], index: 12, kind: input, shape index: {}]   ;;  %s7965_s13 = inlined_call_operand.vmem [shape: f32[5,2,35], index: 13, kind: output, shape index: {}]  }
   0x1   :  { %7979 = sst [smem:[#allocation27_spill]] %s7952_s0 }
   0x2   :  { %7980 = sst [smem:[#allocation28_spill]] %s7953_s1 }
   0x3   :  { %7981 = sst [smem:[#allocation29_spill]] %s7955_s3 }
   0x4   :  { %7982 = sst [smem:[#allocation30_spill]] %s7957_s5 }
   0x5   :  { %7983 = sst [smem:[#allocation31_spill]] %s7959_s7 }
   0x6   :  { %7984 = sst [smem:[#allocation32_spill]] %s7961_s9 }
   0x7   :  { %7985 = sst [smem:[#allocation33_spill]] %s7963_s11 }
   0x8   :  { %7986 = sst [smem:[#allocation34_spill]] %s7965_s13 }
   0x9   :  { %18 = vsyncpa [#allocation3], 0 }
   0xa   :  { %20 = vsyncpa [#allocation3 + $0x1], 0 }
   0xb   :  { %21 = vsyncpa [#allocation5], 0 }
   0xc   :  { %23 = vsyncpa [#allocation5 + $0x1], 0 }
   0xd   :  { %24 = vsyncpa [#allocation8], 0 }
   0xe   :  { %26 = vsyncpa [#allocation8 + $0x1], 0 }
   0xf   :  { %27 = vsyncpa [#allocation11], 0 }
  0x10   :  { %29 = vsyncpa [#allocation11 + $0x1], 0 }
  0x11   :  { %30 = vsyncpa [#allocation14], 0 }
  0x12   :  { %32 = vsyncpa [#allocation14 + $0x1], 0 }
  0x13   :  { %33 = vsyncpa [#allocation17], 0 }
  0x14   :  { %35 = vsyncpa [#allocation17 + $0x1], 0  ;;  %s6835_s25 = smov 0   ;;  %s6837_s26 = smov 0  }
  0x15   :  { %s6839_s27 = smov 0   ;;  %s6841_s28 = smov 0  }
  0x16 LB: > { %7987 = sst [smem:[#allocation24_spill]] %s6743_s27  ;;  %s6854_s29 = sadd.s32 4294967295, %s6747_s28   ;;  %s6747_s28 = sphi %s6841_s28, %s8015_s28   ;;  %s6743_s27 = sphi %s6839_s27, %s8017_s27   ;;  %s6739_s26 = sphi %s6837_s26, %s8019_s26   ;;  %s6735_s25 = sphi %s6835_s25, %s8018_s25  }
  0x17   : > { %s6857_s30 = sadd.s32 1, %s6747_s28   ;;  %s95_s15 = sadd.s32 1, %s6743_s27 }
  0x18   : > { %7988 = sst [smem:[#allocation25_spill]] %s6857_s30  ;;  %s92_s14 = ssub.s32 %s6747_s28, %s6857_s30 }
  0x19   : > { %p93_p0 = scmp.eq.s32.totalorder %s92_s14, 0  ;;  %p102_p1 = scmp.ne.s32.totalorder %s6743_s27, %s6739_s26 }
  0x1a   : > { %p103_p2 = scmp.eq.s32.totalorder %s6747_s28, 0  ;;  %p108_p3 = scmp.ne.s32.totalorder %s6739_s26, %s6735_s25 }
  0x1b   : > { %s6867_s16 = scalar_select %p93_p0, %s6743_s27, %s95_s15  }
  0x1c   : > { %p104_p4 = por %p103_p2, %p102_p1  ;;  %p109_p5 = scmp.eq.s32.totalorder %s6854_s29, 0 }
  0x1d   : > { %7989 = sst [smem:[#allocation26_spill]] %s6867_s16  ;;  %p6354_p6 = scmp.lt.s32.totalorder %s6747_s28, 5 }
  0x1e   : > { %p6871_p7 = por %p109_p5, %p108_p3  ;;  %s6876_s18 = sand.u32 1, %s6743_s27  }
  0x1f   : > { %p6878_p8 = pnand %p6354_p6, %p104_p4  ;;  %s6883_s20 = sand.u32 1, %s6747_s28  }
  0x20   : > { %s7990_s17 = scalar_select %p6871_p7, 1, 0 }
  0x21   : > { %s7991_s19 = scalar_select %p6878_p8, 1, 0 }
  0x22   : > { %s6290_s21 = smul.u32 168, %s6876_s18  ;;  %s7992_s3 = sld [smem:[#allocation29_spill]] }
  0x23   : > { %s6291_s22 = smul.u32 2688, %s6747_s28  ;;  %p6899_p10 = pneg %p6878_p8 }
  0x24   : > { %s450_s14 = scalar_lea.vmem [#allocation4], %s6290_s21 }
  0x25   : > { %s457_s15 = sshll.u32 %s450_s14, 4  ;;  %s6892_s15 = int_to_ptr.vmem [resolvable:$true] %s457_s15 }
  0x28   : > { %s6890_s25 = scalar_lea.hbm %s7992_s3, %s6291_s22  ;;  %s6398_s24 = scalar_lea.hbm %s7992_s3, 13440 }
  0x29   : > { %s6393_s27 = scalar_lea.hbm %s6890_s25, 2688  ;;  %p6399_p13 = scmp.lt.u32.totalorder %s6890_s25, %s7992_s3 }
  0x2a   : > { %p6394_p9 = scmp.ne.s32.totalorder %s6890_s25, %s6393_s27  ;;  %p6400_p0 = scmp.lt.u32.totalorder %s6398_s24, %s6393_s27 }
  0x2b   : > { %p6402_p2 = scmp.lt.u32.totalorder %s6393_s27, %s6890_s25 }
  0x2c   : > { %p6396_p11 = pnand %p6899_p10, %p6394_p9  ;;  %p6401_p1 = por %p6400_p0, %p6399_p13 }
  0x2e   : > { %p6397_p12 = pneg %p6396_p11  ;;  %p6403_p3 = por %p6402_p2, %p6401_p1 }
  0x30   : > { %p6404_p4 = pnand %p6403_p3, %p6397_p12 }
  0x32   : > { %6407 = shalt.err (!%p6404_p4)
}
  0x33   : > { %s6408_s16 = scalar_lea.vmem %s6892_s15, 2688  ;;  %s6749_s22 = smov [#allocation4]  }
  0x34   : > { %p6409_p5 = scmp.ne.s32.totalorder %s6892_s15, %s6408_s16  ;;  %s6413_s23 = sshll.u32 %s6749_s22, 4  ;;  %s6414_s23 = int_to_ptr.vmem [resolvable:$false] %s6413_s23 }
  0x35   : > { %s6415_s21 = scalar_lea.vmem %s6414_s23, 5376  ;;  %p6416_p11 = scmp.lt.s32.totalorder %s6892_s15, %s6414_s23 }
  0x36   : > { %p6411_p6 = pnand %p6409_p5, %p6899_p10  ;;  %p6417_p7 = scmp.lt.s32.totalorder %s6415_s21, %s6408_s16 }
  0x38   : > { %p6412_p9 = pneg %p6411_p6  ;;  %p6418_p13 = por %p6417_p7, %p6416_p11 }
  0x3a   : > { %p6419_p0 = pnand %p6418_p13, %p6412_p9 }
  0x3c   : > { %6422 = shalt.err (!%p6419_p0)
}
  0x3d   : > { %s7971_s27 = smov 128   ;;  %s7973_s24 = smov 8  }
  0x3e   : > { %s7994_s16 = scalar_lea.sflag [#allocation5], %s6883_s20  ;;  %p4378_p7 = scmp.ge.s32.totalorder %s6747_s28, 1 }
  0x3f   : > { %6329 = dma.hbm_to_vmem [thread:$0]  (!%p6878_p8), %s6890_s25, 2688, %s6892_s15, %s7994_s16, %s7971_s27, %s7971_s27, %s7973_s24  }
  0x40   : > { %p621_p12 = scmp.lt.s32.totalorder %s6747_s28, 6  ;;  %s6292_s14 = smul.u32 240, %s6876_s18 }
  0x41   : > { %s6293_s23 = smul.u32 3840, %s6747_s28  ;;  %s7996_s5 = sld [smem:[#allocation30_spill]] }
  0x42   : > { %p6930_p1 = pnand %p4378_p7, %p621_p12  ;;  %s488_s11 = scalar_lea.vmem [#allocation7], %s6292_s14 }
  0x43   : > { %s495_s0 = sshll.u32 %s488_s11, 4  ;;  %s6294_s25 = smul.u32 216, %s6876_s18  ;;  %s6940_s0 = int_to_ptr.vmem [resolvable:$true] %s495_s0 }
  0x44   : > { %s7995_s22 = scalar_select %p6930_p1, 1, 0 }
  0x45   : > { %s7975_s15 = scalar_lea.sflag [#allocation8], %s6883_s20 }
  0x47   : > { %s6938_s13 = scalar_lea.hbm %s7996_s5, %s6293_s23  ;;  %s6428_s3 = scalar_lea.hbm %s7996_s5, 19200 }
  0x48   : > { %s6423_s16 = scalar_lea.hbm %s6938_s13, 3840  ;;  %p6429_p5 = scmp.lt.u32.totalorder %s6938_s13, %s7996_s5 }
  0x49   : > { %p6424_p2 = scmp.ne.s32.totalorder %s6938_s13, %s6423_s16  ;;  %p6430_p6 = scmp.lt.u32.totalorder %s6428_s3, %s6423_s16 }
  0x4a   : > { %p6432_p11 = scmp.lt.u32.totalorder %s6423_s16, %s6938_s13 }
  0x4b   : > { %p6426_p3 = pnand %p6424_p2, %p6899_p10  ;;  %p6431_p9 = por %p6430_p6, %p6429_p5 }
  0x4d   : > { %p6427_p4 = pneg %p6426_p3  ;;  %p6433_p13 = por %p6432_p11, %p6431_p9 }
  0x4f   : > { %p6434_p0 = pnand %p6433_p13, %p6427_p4 }
  0x51   : > { %6437 = shalt.err (!%p6434_p0)
}
  0x52   : > { %s6438_s11 = scalar_lea.vmem %s6940_s0, 3840  ;;  %s6752_s27 = smov [#allocation7]  }
  0x53   : > { %p6439_p7 = scmp.ne.s32.totalorder %s6940_s0, %s6438_s11  ;;  %s6443_s24 = sshll.u32 %s6752_s27, 4  ;;  %s6444_s24 = int_to_ptr.vmem [resolvable:$false] %s6443_s24 }
  0x54   : > { %s6445_s14 = scalar_lea.vmem %s6444_s24, 7680  ;;  %p6446_p3 = scmp.lt.s32.totalorder %s6940_s0, %s6444_s24 }
  0x55   : > { %p6441_p12 = pnand %p6439_p7, %p6899_p10  ;;  %p6447_p1 = scmp.lt.s32.totalorder %s6445_s14, %s6438_s11 }
  0x57   : > { %p6442_p2 = pneg %p6441_p12  ;;  %p6448_p5 = por %p6447_p1, %p6446_p3 }
  0x59   : > { %p6449_p6 = pnand %p6448_p5, %p6442_p2 }
  0x5b   : > { %6452 = shalt.err (!%p6449_p6)
}
  0x5c   : > { %s7997_s16 = smov 8   ;;  %s7998_s3 = smov 128  }
  0x5d   : > { %6335 = dma.hbm_to_vmem [thread:$0]  (!%p6878_p8), %s6938_s13, 3840, %s6940_s0, %s7975_s15, %s7998_s3, %s7998_s3, %s7997_s16  }
  0x5e   : > { %s6295_s23 = smul.u32 3456, %s6747_s28  ;;  %s526_s21 = scalar_lea.vmem [#allocation10], %s6294_s25 }
  0x5f   : > { %s533_s11 = sshll.u32 %s526_s21, 4  ;;  %s7999_s7 = sld [smem:[#allocation31_spill]]  ;;  %s6978_s11 = int_to_ptr.vmem [resolvable:$true] %s533_s11 }
  0x60   : > { %s7976_s5 = scalar_lea.sflag [#allocation11], %s6883_s20 }
  0x65   : > { %s6976_s14 = scalar_lea.hbm %s7999_s7, %s6295_s23  ;;  %s6458_s25 = scalar_lea.hbm %s7999_s7, 17280 }
  0x66   : > { %s6453_s1 = scalar_lea.hbm %s6976_s14, 3456  ;;  %p6459_p11 = scmp.lt.u32.totalorder %s6976_s14, %s7999_s7 }
  0x67   : > { %p6454_p1 = scmp.ne.s32.totalorder %s6976_s14, %s6453_s1  ;;  %p6460_p13 = scmp.lt.u32.totalorder %s6458_s25, %s6453_s1 }
  0x68   : > { %p6462_p7 = scmp.lt.u32.totalorder %s6453_s1, %s6976_s14 }
  0x69   : > { %p6456_p4 = pnand %p6454_p1, %p6899_p10  ;;  %p6461_p0 = por %p6460_p13, %p6459_p11 }
  0x6b   : > { %p6457_p9 = pneg %p6456_p4  ;;  %p6463_p12 = por %p6462_p7, %p6461_p0 }
  0x6d   : > { %p6464_p2 = pnand %p6463_p12, %p6457_p9 }
  0x6f   : > { %6467 = shalt.err (!%p6464_p2)
}
  0x70   : > { %s6468_s23 = scalar_lea.vmem %s6978_s11, 3456  ;;  %s6753_s24 = smov [#allocation10]  }
  0x71   : > { %p6469_p3 = scmp.ne.s32.totalorder %s6978_s11, %s6468_s23  ;;  %s6473_s0 = sshll.u32 %s6753_s24, 4  ;;  %s6474_s0 = int_to_ptr.vmem [resolvable:$false] %s6473_s0 }
  0x72   : > { %s6475_s13 = scalar_lea.vmem %s6474_s0, 6912  ;;  %p6476_p1 = scmp.lt.s32.totalorder %s6978_s11, %s6474_s0 }
  0x73   : > { %p6471_p5 = pnand %p6469_p3, %p6899_p10  ;;  %p6477_p4 = scmp.lt.s32.totalorder %s6475_s13, %s6468_s23 }
  0x75   : > { %p6472_p6 = pneg %p6471_p5  ;;  %p6478_p11 = por %p6477_p4, %p6476_p1 }
  0x77   : > { %p6479_p13 = pnand %p6478_p11, %p6472_p6 }
  0x79   : > { %6482 = shalt.err (!%p6479_p13)
}
  0x7a   : > { %6341 = dma.hbm_to_vmem [thread:$0]  (!%p6878_p8), %s6976_s14, 3456, %s6978_s11, %s7976_s5, %s7998_s3, %s7998_s3, %s7997_s16  }
  0x7b   : > { %s6296_s1 = smul.u32 1536, %s6876_s18  ;;  %s7010_s21 = sshll.u32 %s6747_s28, 4 }
  0x7c   : > { %s6297_s25 = smul.u32 24576, %s6747_s28  ;;  %s8000_s9 = sld [smem:[#allocation32_spill]] }
  0x7d   : > { %s564_s0 = scalar_lea.vmem [#allocation13], %s6296_s1  ;;  %s7023_s14 = scalar_lea.hbm %s7954_s2, %s7010_s21 }
  0x7e   : > { %s571_s13 = sshll.u32 %s564_s0, 4  ;;  %s561_s28 = scalar_lea.sflag [#allocation14], %s6883_s20  ;;  %s7017_s13 = int_to_ptr.vmem [resolvable:$true] %s571_s13 }
  0x82   : > { %s7015_s24 = scalar_lea.hbm %s8000_s9, %s6297_s25  ;;  %s6488_s23 = scalar_lea.hbm %s8000_s9, 122880 }
  0x83   : > { %s6483_s5 = scalar_lea.hbm %s7015_s24, 24576  ;;  %p6489_p12 = scmp.lt.u32.totalorder %s7015_s24, %s8000_s9 }
  0x84   : > { %p6484_p9 = scmp.ne.s32.totalorder %s7015_s24, %s6483_s5  ;;  %p6490_p2 = scmp.lt.u32.totalorder %s6488_s23, %s6483_s5 }
  0x85   : > { %p6492_p5 = scmp.lt.u32.totalorder %s6483_s5, %s7015_s24 }
  0x86   : > { %p6486_p0 = pnand %p6484_p9, %p6899_p10  ;;  %p6491_p3 = por %p6490_p2, %p6489_p12 }
  0x88   : > { %p6487_p7 = pneg %p6486_p0  ;;  %p6493_p6 = por %p6492_p5, %p6491_p3 }
  0x8a   : > { %p6494_p1 = pnand %p6493_p6, %p6487_p7 }
  0x8c   : > { %6497 = shalt.err (!%p6494_p1)
}
  0x8d   : > { %s6498_s15 = scalar_lea.vmem %s7017_s13, 24576  ;;  %s6754_s0 = smov [#allocation13]  }
  0x8e   : > { %p6499_p4 = scmp.ne.s32.totalorder %s7017_s13, %s6498_s15  ;;  %s6503_s11 = sshll.u32 %s6754_s0, 4  ;;  %s6504_s11 = int_to_ptr.vmem [resolvable:$false] %s6503_s11 }
  0x8f   : > { %s6505_s7 = scalar_lea.vmem %s6504_s11, 49152  ;;  %p6506_p9 = scmp.lt.s32.totalorder %s7017_s13, %s6504_s11 }
  0x90   : > { %p6501_p11 = pnand %p6499_p4, %p6899_p10  ;;  %p6507_p0 = scmp.lt.s32.totalorder %s6505_s7, %s6498_s15 }
  0x92   : > { %p6502_p13 = pneg %p6501_p11  ;;  %p6508_p12 = por %p6507_p0, %p6506_p9 }
  0x94   : > { %p6509_p2 = pnand %p6508_p12, %p6502_p13 }
  0x96   : > { %6512 = shalt.err (!%p6509_p2)
}
  0x97   : > { %6347 = dma.hbm_to_vmem [thread:$0]  (!%p6878_p8), %s7015_s24, 24576, %s7017_s13, %s561_s28, %s7998_s3, %s7998_s3, %s7997_s16  }
  0x98   : > { %s432_s5 = scalar_lea.vmem [#allocation2], %s6876_s18  ;;  %s7059_s1 = scalar_lea.hbm %s7956_s4, %s7010_s21 }
  0x99   : > { %s439_s25 = sshll.u32 %s432_s5, 4  ;;  %s430_s15 = scalar_lea.sflag [#allocation3], %s6876_s18  ;;  %s7053_s25 = int_to_ptr.vmem [resolvable:$true] %s439_s25 }
  0x9a   : > { %s6513_s0 = scalar_lea.hbm %s7023_s14, 16  ;;  %s6518_s9 = scalar_lea.hbm %s7954_s2, 80 }
  0x9b   : > { %p6514_p7 = scmp.ne.s32.totalorder %s7023_s14, %s6513_s0  ;;  %p6519_p6 = scmp.lt.u32.totalorder %s7023_s14, %s7954_s2 }
  0x9c   : > { %p6520_p1 = scmp.lt.u32.totalorder %s6518_s9, %s6513_s0  ;;  %p6522_p11 = scmp.lt.u32.totalorder %s6513_s0, %s7023_s14 }
  0x9d   : > { %p6516_p3 = pnand %p6514_p7, %p6899_p10 }
  0x9e   : > { %p6521_p4 = por %p6520_p1, %p6519_p6 }
  0x9f   : > { %p6517_p5 = pneg %p6516_p3 }
  0xa0   : > { %p6523_p13 = por %p6522_p11, %p6521_p4 }
  0xa2   : > { %p6524_p9 = pnand %p6523_p13, %p6517_p5 }
  0xa4   : > { %6527 = shalt.err (!%p6524_p9)
}
  0xa5   : > { %s6528_s24 = scalar_lea.vmem %s7053_s25, 16  ;;  %s6755_s13 = smov [#allocation2]  }
  0xa6   : > { %p6529_p0 = scmp.ne.s32.totalorder %s7053_s25, %s6528_s24  ;;  %s6533_s5 = sshll.u32 %s6755_s13, 4  ;;  %s6534_s5 = int_to_ptr.vmem [resolvable:$false] %s6533_s5 }
  0xa7   : > { %s6535_s27 = scalar_lea.vmem %s6534_s5, 32  ;;  %p6536_p7 = scmp.lt.s32.totalorder %s7053_s25, %s6534_s5 }
  0xa8   : > { %p6531_p12 = pnand %p6529_p0, %p6899_p10  ;;  %p6537_p3 = scmp.lt.s32.totalorder %s6535_s27, %s6528_s24 }
  0xaa   : > { %p6532_p2 = pneg %p6531_p12  ;;  %p6538_p6 = por %p6537_p3, %p6536_p7 }
  0xac   : > { %p6539_p1 = pnand %p6538_p6, %p6532_p2 }
  0xae   : > { %6542 = shalt.err (!%p6539_p1)
}
  0xaf   : > { %6326 = dma.hbm_to_vmem [thread:$0]  (!%p6878_p8), %s7023_s14, 16, %s7053_s25, %s430_s15  }
  0xb0   : > { %s470_s9 = scalar_lea.vmem [#allocation6], %s6876_s18  ;;  %s7088_s7 = scalar_lea.hbm %s7958_s6, %s7010_s21 }
  0xb1   : > { %s477_s23 = sshll.u32 %s470_s9, 4  ;;  %s6543_s16 = scalar_lea.hbm %s7059_s1, 16  ;;  %s478_s23 = int_to_ptr.vmem [resolvable:$true] %s477_s23 }
  0xb2   : > { %p6544_p5 = scmp.ne.s32.totalorder %s7059_s1, %s6543_s16  ;;  %s6548_s13 = scalar_lea.hbm %s7956_s4, 80 }
  0xb3   : > { %p6549_p13 = scmp.lt.u32.totalorder %s7059_s1, %s7956_s4  ;;  %p6550_p9 = scmp.lt.u32.totalorder %s6548_s13, %s6543_s16 }
  0xb4   : > { %p6546_p4 = pnand %p6544_p5, %p6899_p10  ;;  %p6552_p12 = scmp.lt.u32.totalorder %s6543_s16, %s7059_s1 }
  0xb5   : > { %p6551_p0 = por %p6550_p9, %p6549_p13 }
  0xb6   : > { %p6547_p11 = pneg %p6546_p4 }
  0xb7   : > { %p6553_p2 = por %p6552_p12, %p6551_p0 }
  0xb9   : > { %p6554_p7 = pnand %p6553_p2, %p6547_p11 }
  0xbb   : > { %6557 = shalt.err (!%p6554_p7)
}
  0xbc   : > { %s6558_s14 = scalar_lea.vmem %s478_s23, 16  ;;  %s6756_s25 = smov [#allocation6]  }
  0xbd   : > { %p6559_p3 = scmp.ne.s32.totalorder %s478_s23, %s6558_s14  ;;  %s6563_s15 = sshll.u32 %s6756_s25, 4  ;;  %s6564_s15 = int_to_ptr.vmem [resolvable:$false] %s6563_s15 }
  0xbe   : > { %s6565_s9 = scalar_lea.vmem %s6564_s15, 32  ;;  %p6566_p5 = scmp.lt.s32.totalorder %s478_s23, %s6564_s15 }
  0xbf   : > { %p6561_p6 = pnand %p6559_p3, %p6899_p10  ;;  %p6567_p4 = scmp.lt.s32.totalorder %s6565_s9, %s6558_s14 }
  0xc1   : > { %p6562_p1 = pneg %p6561_p6  ;;  %p6568_p8 = por %p6567_p4, %p6566_p5 }
  0xc3   : > { %p6569_p9 = pnand %p6568_p8, %p6562_p1 }
  0xc5   : > { %6572 = shalt.err (!%p6569_p9)
}
  0xc6   : > { %p8001_p13 = scmp.ne.s32.totalorder %s7991_s19, 0  ;;  %s8002_s0 = scalar_lea.sflag [#allocation5], %s6883_s20 }
  0xc7   : > { %s508_s11 = scalar_lea.vmem [#allocation9], %s6876_s18  ;;  %s7114_s13 = scalar_lea.hbm %s7960_s8, %s7010_s21 }
  0xc8   : > { %6332 = dma.hbm_to_vmem [thread:$0]  (!%p8001_p13), %s7059_s1, 16, %s478_s23, %s8002_s0  }
  0xc9   : > { %s515_s16 = sshll.u32 %s508_s11, 4  ;;  %s6573_s5 = scalar_lea.hbm %s7088_s7, 16  ;;  %s516_s16 = int_to_ptr.vmem [resolvable:$true] %s515_s16 }
  0xca   : > { %p6574_p8 = scmp.ne.s32.totalorder %s7088_s7, %s6573_s5  ;;  %s6578_s25 = scalar_lea.hbm %s7958_s6, 80 }
  0xcb   : > { %p6579_p12 = scmp.lt.u32.totalorder %s7088_s7, %s7958_s6  ;;  %p6580_p2 = scmp.lt.u32.totalorder %s6578_s25, %s6573_s5 }
  0xcc   : > { %p6576_p11 = pnand %p6574_p8, %p6899_p10  ;;  %p6582_p3 = scmp.lt.u32.totalorder %s6573_s5, %s7088_s7 }
  0xcd   : > { %p6581_p7 = por %p6580_p2, %p6579_p12 }
  0xce   : > { %p6577_p0 = pneg %p6576_p11 }
  0xcf   : > { %p6583_p6 = por %p6582_p3, %p6581_p7 }
  0xd1   : > { %p6584_p1 = pnand %p6583_p6, %p6577_p0 }
  0xd3   : > { %6587 = shalt.err (!%p6584_p1)
}
  0xd4   : > { %s6588_s1 = scalar_lea.vmem %s516_s16, 16  ;;  %s6757_s23 = smov [#allocation9]  }
  0xd5   : > { %p6589_p5 = scmp.ne.s32.totalorder %s516_s16, %s6588_s1  ;;  %s6593_s0 = sshll.u32 %s6757_s23, 4  ;;  %s6594_s0 = int_to_ptr.vmem [resolvable:$false] %s6593_s0 }
  0xd6   : > { %s6595_s11 = scalar_lea.vmem %s6594_s0, 32  ;;  %p6596_p8 = scmp.lt.s32.totalorder %s516_s16, %s6594_s0 }
  0xd7   : > { %p6591_p4 = pnand %p6589_p5, %p6899_p10  ;;  %p6597_p11 = scmp.lt.s32.totalorder %s6595_s11, %s6588_s1 }
  0xd9   : > { %p6592_p9 = pneg %p6591_p4  ;;  %p6598_p13 = por %p6597_p11, %p6596_p8 }
  0xdb   : > { %p6599_p2 = pnand %p6598_p13, %p6592_p9 }
  0xdd   : > { %6602 = shalt.err (!%p6599_p2)
}
  0xde   : > { %p8003_p12 = scmp.ne.s32.totalorder %s7991_s19, 0  ;;  %s8004_s3 = scalar_lea.sflag [#allocation8], %s6883_s20 }
  0xdf   : > { %s546_s24 = scalar_lea.vmem [#allocation12], %s6876_s18  ;;  %s7140_s25 = scalar_lea.hbm %s7962_s10, %s7010_s21 }
  0xe0   : > { %6338 = dma.hbm_to_vmem [thread:$0]  (!%p8003_p12), %s7088_s7, 16, %s516_s16, %s8004_s3  }
  0xe1   : > { %s553_s5 = sshll.u32 %s546_s24, 4  ;;  %s6603_s15 = scalar_lea.hbm %s7114_s13, 16  ;;  %s554_s5 = int_to_ptr.vmem [resolvable:$true] %s553_s5 }
  0xe2   : > { %p6604_p13 = scmp.ne.s32.totalorder %s7114_s13, %s6603_s15  ;;  %s6608_s23 = scalar_lea.hbm %s7960_s8, 80 }
  0xe3   : > { %p6609_p3 = scmp.lt.u32.totalorder %s7114_s13, %s7960_s8  ;;  %p6610_p6 = scmp.lt.u32.totalorder %s6608_s23, %s6603_s15 }
  0xe4   : > { %p6606_p0 = pnand %p6604_p13, %p6899_p10  ;;  %p6612_p5 = scmp.lt.u32.totalorder %s6603_s15, %s7114_s13 }
  0xe5   : > { %p6611_p1 = por %p6610_p6, %p6609_p3 }
  0xe6   : > { %p6607_p7 = pneg %p6606_p0 }
  0xe7   : > { %p6613_p4 = por %p6612_p5, %p6611_p1 }
  0xe9   : > { %p6614_p9 = pnand %p6613_p4, %p6607_p7 }
  0xeb   : > { %6617 = shalt.err (!%p6614_p9)
}
  0xec   : > { %s6618_s7 = scalar_lea.vmem %s554_s5, 16  ;;  %s6758_s16 = smov [#allocation12]  }
  0xed   : > { %p6619_p8 = scmp.ne.s32.totalorder %s554_s5, %s6618_s7  ;;  %s6623_s3 = sshll.u32 %s6758_s16, 4  ;;  %s6624_s3 = int_to_ptr.vmem [resolvable:$false] %s6623_s3 }
  0xee   : > { %s6625_s24 = scalar_lea.vmem %s6624_s3, 32  ;;  %p6626_p13 = scmp.lt.s32.totalorder %s554_s5, %s6624_s3 }
  0xef   : > { %p6621_p11 = pnand %p6619_p8, %p6899_p10  ;;  %p6627_p0 = scmp.lt.s32.totalorder %s6625_s24, %s6618_s7 }
  0xf1   : > { %p6622_p2 = pneg %p6621_p11  ;;  %p6628_p12 = por %p6627_p0, %p6626_p13 }
  0xf3   : > { %p6629_p3 = pnand %p6628_p12, %p6622_p2 }
  0xf5   : > { %6632 = shalt.err (!%p6629_p3)
}
  0xf6   : > { %p8005_p6 = scmp.ne.s32.totalorder %s7991_s19, 0  ;;  %s8006_s27 = scalar_lea.sflag [#allocation11], %s6883_s20 }
  0xf7   : > { %s584_s14 = scalar_lea.vmem [#allocation15], %s6876_s18  ;;  %s6633_s9 = scalar_lea.hbm %s7140_s25, 16 }
  0xf8   : > { %6344 = dma.hbm_to_vmem [thread:$0]  (!%p8005_p6), %s7114_s13, 16, %s554_s5, %s8006_s27  }
  0xf9   : > { %s591_s15 = sshll.u32 %s584_s14, 4  ;;  %p6634_p7 = scmp.ne.s32.totalorder %s7140_s25, %s6633_s9  ;;  %s592_s15 = int_to_ptr.vmem [resolvable:$true] %s591_s15 }
  0xfa   : > { %s6638_s0 = scalar_lea.hbm %s7962_s10, 80  ;;  %p6639_p5 = scmp.lt.u32.totalorder %s7140_s25, %s7962_s10 }
  0xfb   : > { %p6636_p12 = pnand %p6634_p7, %p6899_p10  ;;  %p6640_p4 = scmp.lt.u32.totalorder %s6638_s0, %s6633_s9 }
  0xfc   : > { %p6642_p8 = scmp.lt.u32.totalorder %s6633_s9, %s7140_s25 }
  0xfd   : > { %p6637_p1 = pneg %p6636_p12  ;;  %p6641_p9 = por %p6640_p4, %p6639_p5 }
  0xff   : > { %p6643_p11 = por %p6642_p8, %p6641_p9 }
 0x101   : > { %p6644_p2 = pnand %p6643_p11, %p6637_p1 }
 0x103   : > { %6647 = shalt.err (!%p6644_p2)
}
 0x104   : > { %s6648_s13 = scalar_lea.vmem %s592_s15, 16  ;;  %s6759_s5 = smov [#allocation15]  }
 0x105   : > { %p6649_p13 = scmp.ne.s32.totalorder %s592_s15, %s6648_s13  ;;  %s6653_s16 = sshll.u32 %s6759_s5, 4  ;;  %s6654_s16 = int_to_ptr.vmem [resolvable:$false] %s6653_s16 }
 0x106   : > { %s6655_s3 = scalar_lea.vmem %s6654_s16, 32  ;;  %p6656_p7 = scmp.lt.s32.totalorder %s592_s15, %s6654_s16 }
 0x107   : > { %p6651_p0 = pnand %p6649_p13, %p6899_p10  ;;  %p6657_p12 = scmp.lt.s32.totalorder %s6655_s3, %s6648_s13 }
 0x109   : > { %p6652_p3 = pneg %p6651_p0  ;;  %p6658_p6 = por %p6657_p12, %p6656_p7 }
 0x10b   : > { %p6659_p4 = pnand %p6658_p6, %p6652_p3 }
 0x10d   : > { %6662 = shalt.err (!%p6659_p4)
}
 0x10e   : > { %p8007_p5 = scmp.ne.s32.totalorder %s7991_s19, 0  ;;  %s7185_s14 = scalar_lea.hbm %s7964_s12, %s7010_s21 }
 0x10f   : > { %s609_s9 = scalar_lea.vmem [#allocation16], %s6876_s18  ;;  %s607_s23 = scalar_lea.sflag [#allocation17], %s6876_s18 }
 0x110   : > { %6350 = dma.hbm_to_vmem [thread:$0]  (!%p8007_p5), %s7140_s25, 16, %s592_s15, %s561_s28  }
 0x111   : > { %s616_s1 = sshll.u32 %s609_s9, 4  ;;  %s6663_s20 = scalar_lea.hbm %s7185_s14, 16  ;;  %s617_s1 = int_to_ptr.vmem [resolvable:$true] %s616_s1 }
 0x112   : > { %p6664_p6 = scmp.ne.s32.totalorder %s7185_s14, %s6663_s20  ;;  %s6668_s25 = scalar_lea.hbm %s7964_s12, 80 }
 0x113   : > { %p6669_p8 = scmp.lt.u32.totalorder %s7185_s14, %s7964_s12  ;;  %p6670_p11 = scmp.lt.u32.totalorder %s6668_s25, %s6663_s20 }
 0x114   : > { %p6666_p1 = pnand %p6664_p6, %p6899_p10  ;;  %p6672_p13 = scmp.lt.u32.totalorder %s6663_s20, %s7185_s14 }
 0x115   : > { %p6671_p2 = por %p6670_p11, %p6669_p8 }
 0x116   : > { %p6667_p9 = pneg %p6666_p1 }
 0x117   : > { %p6673_p0 = por %p6672_p13, %p6671_p2 }
 0x119   : > { %p6674_p3 = pnand %p6673_p0, %p6667_p9 }
 0x11b   : > { %6677 = shalt.err (!%p6674_p3)
}
 0x11c   : > { %s6678_s18 = scalar_lea.vmem %s617_s1, 16  ;;  %s6760_s11 = smov [#allocation16]  }
 0x11d   : > { %p6679_p7 = scmp.ne.s32.totalorder %s617_s1, %s6678_s18  ;;  %s6683_s7 = sshll.u32 %s6760_s11, 4  ;;  %s6684_s7 = int_to_ptr.vmem [resolvable:$false] %s6683_s7 }
 0x11e   : > { %s6685_s13 = scalar_lea.vmem %s6684_s7, 32  ;;  %p6686_p6 = scmp.lt.s32.totalorder %s617_s1, %s6684_s7 }
 0x11f   : > { %p6681_p12 = pnand %p6679_p7, %p6899_p10  ;;  %p6687_p1 = scmp.lt.s32.totalorder %s6685_s13, %s6678_s18 }
 0x121   : > { %p6682_p4 = pneg %p6681_p12  ;;  %p6688_p5 = por %p6687_p1, %p6686_p6 }
 0x123   : > { %p6689_p8 = pnand %p6688_p5, %p6682_p4 }
 0x125   : > { %6692 = shalt.err (!%p6689_p8)
}
 0x126   : > { %p8008_p11 = scmp.ne.s32.totalorder %s7991_s19, 0  ;;  %p8009_p9 = scmp.ne.s32.totalorder %s7995_s22, 0 }
 0x127   : > { %s7209_s30 = sand.u32 (!%p8009_p9), 1, %s6739_s26   ;;  %p8010_p10 = scmp.ne.s32.totalorder (!%p8009_p9), %s7990_s17, 0 }
 0x128   : > { %6353 = dma.hbm_to_vmem [thread:$0]  (!%p8008_p11), %s7185_s14, 16, %s617_s1, %s607_s23  }
 0x129   : > { %625 = sbr.rel (%p8009_p9) target bundleno = 1984 (0x7c0), region = 72  ;;  %s628_s5 = scalar_lea.sflag (!%p8009_p9), [#allocation3], %s7209_s30 }
 0x12a   : > { %s630_s16 = scalar_lea.vmem (!%p8009_p9), [#allocation2], %s7209_s30 }
 0x130   : > { %6710 = dma.done.wait (%p8010_p10), %s628_s5, 16  }
 0x131   : > { %6712 = vsyncadd (%p8010_p10), %s628_s5, 4294967280  ;;  %s635_s19 = sand.u32 1, %s6854_s29   ;;  %s6298_s3 = smul.u32 168, %s7209_s30 }
 0x132   : > { %s636_s22 = scalar_lea.sflag [#allocation5], %s635_s19 }
 0x133   : > { %s7219_s24 = scalar_lea.vmem [#allocation4], %s6298_s3 }
 0x134   : > { %6714 = dma.done.wait (%p8010_p10), %s636_s22, 2704  }
 0x135   : > { %6716 = vsyncadd (%p8010_p10), %s636_s22, 4294964592  ;;  %s6299_s27 = smul.u32 240, %s7209_s30  ;;  %s647_s14 = scalar_lea.vmem [#allocation6], %s7209_s30 }
 0x136   : > { %s653_s9 = scalar_lea.sflag [#allocation8], %s635_s19 }
 0x137   : > { %s7227_s1 = scalar_lea.vmem [#allocation7], %s6299_s27 }
 0x138   : > { %6718 = dma.done.wait (%p8010_p10), %s653_s9, 3856  }
 0x139   : > { %6720 = vsyncadd (%p8010_p10), %s653_s9, 4294963440  ;;  %s6300_s23 = smul.u32 216, %s7209_s30  ;;  %s664_s20 = scalar_lea.vmem [#allocation9], %s7209_s30 }
 0x13a   : > { %s670_s0 = scalar_lea.sflag [#allocation11], %s635_s19 }
 0x13b   : > { %s7235_s28 = scalar_lea.vmem [#allocation10], %s6300_s23 }
 0x13c   : > { %6722 = dma.done.wait (%p8010_p10), %s670_s0, 3472  }
 0x13d   : > { %6724 = vsyncadd (%p8010_p10), %s670_s0, 4294963824  ;;  %s6301_s25 = smul.u32 1536, %s7209_s30  ;;  %s681_s15 = scalar_lea.vmem [#allocation12], %s7209_s30 }
 0x13e   : > { %s687_s21 = scalar_lea.sflag [#allocation14], %s635_s19 }
 0x13f   : > { %s7243_s18 = scalar_lea.vmem [#allocation13], %s6301_s25 }
 0x140   : > { %6726 = dma.done.wait (%p8010_p10), %s687_s21, 24592  }
 0x141   : > { %6728 = vsyncadd (%p8010_p10), %s687_s21, 4294942704  ;;  %s698_s11 = scalar_lea.vmem [#allocation15], %s7209_s30  ;;  %s704_s7 = scalar_lea.sflag [#allocation17], %s7209_s30 }
 0x142   : > { %s706_s13 = scalar_lea.vmem [#allocation16], %s7209_s30 }
 0x143   : > { %6730 = dma.done.wait (%p8010_p10), %s704_s7, 16  }
 0x144   : > { %6732 = vsyncadd (%p8010_p10), %s704_s7, 4294967280  ;;  %p797_p5 = scmp.lt.s32.totalorder %s6854_s29, 4  ;;  %vm837_vm0 = vcmask 1040384   ;;  %s8011_s22 = sld [smem:[#allocation28_spill]]  ;;  %vm824_vm1 = vcmask 72704   ;;  %vm6761_vm2 = vmmov 1  }
 0x145   : > { %vm5795_vm3 = vmpackc.low %vm837_vm0, %vm6761_vm2  ;;  %s8012_s23 = sld [smem:[#allocation27_spill]]  ;;  %v946_v7 = vld [vmem:[%s7219_s24] sm:$0xff]  ;;  %v947_v8 = vld [vmem:[%s7219_s24 + $0x8] sm:$0xff]  ;;  %vm934_vm4 = vcmask 1045504   ;;  %vm964_vm5 = vcmask 195584   ;;  %vm1155_vm6 = vcmask 1043456  }
 0x146   : > { %s8021_s29 = smov (!%p797_p5, %s6854_s29), 4  ;;  %v5804_v9 = vpack.c.bf16 %v947_v8, %v946_v7  ;;  %v948_v10 = vld [vmem:[%s7219_s24 + $0x10] sm:$0xff]  ;;  %v4389_v11 = vld [vmem:[%s7219_s24 + $0x18] sm:$0xff]  ;;  %v4390_v12 = vld [vmem:[%s7219_s24 + $0x20] sm:$0xff]  ;;  %vm1266_vm7 = vcmask 1041408   ;;  %vm1717_vm8 = vcmask 392192  }
 0x147   : > { %s4713_s5 = sshll.u32 %s8021_s29, 4  ;;  %v5800_v13 = vpack.c.bf16 %v4390_v12, %v4389_v11  ;;  %v4400_v14 = vld [vmem:[%s7219_s24 + $0x30] sm:$0xff]  ;;  %v4401_v15 = vld [vmem:[%s7219_s24 + $0x38] sm:$0xff]  ;;  %v4391_v17 = vld [vmem:[%s7219_s24 + $0x28] sm:$0xff]  ;;  %vm2288_vm9 = vcmask 588800   ;;  %vm6764_vm10 = vmmov 0  }
 0x148   : > { %5805 = vmatprep.subr.bf16.mxu1 %v5804_v9  ;;  %v5808_v16 = vpack.c.bf16 %v4401_v15, %v4400_v14  ;;  %v4383_v18 = vld [vmem:[%s630_s16] ss:$0 sm:$0xff]  ;;  %v4407_v35 = vld [vmem:[%s7219_s24 + $0x48] sm:$0xff]  ;;  %v4402_v41 = vld [vmem:[%s7219_s24 + $0x40] sm:$0xff]  ;;  %vm2633_vm11 = vcmask 785408   ;;  %s6302_s16 = smul.u32 96, %s8021_s29 }
 0x149   : > { %5807 = vmatpush3.bf16.msra.mxu1 %v5804_v9  ;;  %v4408_v36 = vld [vmem:[%s7219_s24 + $0x50] sm:$0xff]  ;;  %v4421_v12 = vld [vmem:[%s7219_s24 + $0x78] sm:$0xff]  ;;  %v4423_v15 = vld [vmem:[%s7219_s24 + $0x88] sm:$0xff]  ;;  %s8014_s3 = sld [smem:[#allocation34_spill]]  ;;  %vm4097_vm12 = vcmask 279552  }
 0x14a   : > { %s801_s27 = scalar_lea.vmem %s8011_s22, %s4713_s5  ;;  %5105 = vmatprep.subr.mxu1 %v948_v10  ;;  %v5812_v47 = vpack.c.bf16 %v4408_v36, %v4407_v35  ;;  %v4416_v11 = vld [vmem:[%s7219_s24 + $0x70] sm:$0xff]  ;;  %v1694_v35 = vld [vmem:[%s7227_s1 + $0x8] sm:$0xff] }
 0x14b   : > { %v815_v0 = vld [vmem:[%s801_s27] sm:$0xff]  ;;  %v816_v1 = vld [vmem:[%s801_s27 + $0x8] sm:$0x1]  ;;  %v813_v5 = vld [vmem:[%s8012_s23 + $0x10] sm:$0xff] }
 0x14c   : > { %v811_v2 = vld [vmem:[%s8012_s23] sm:$0xff]  ;;  %v5794_v3 = vpack.c.bf16 %v816_v1, %v815_v0  ;;  %v812_v4 = vld [vmem:[%s8012_s23 + $0x8] sm:$0xff]  ;;  %v814_v6 = vld [vmem:[%s8012_s23 + $0x18] sm:$0xff] }
 0x14d   : > { %5083 = vmatprep.mubr.msk.f32.mxu0 %vm824_vm1, %v811_v2  ;;  %5106 = vmatpush3.msra.mxu1 %v948_v10 }
 0x14e   : > { %5796 = vmatprep.subr.msk.bf16.mxu0 %vm5795_vm3, %v5794_v3  ;;  %5809 = vmatprep.subr.bf16.mxu1 %v5808_v16 }
 0x14f   : > { %5799 = vmatpush3.bf16.msk.msra.mxu0 %vm5795_vm3, %v5794_v3 }
 0x150   : > { %5801 = vmatprep.subr.bf16.mxu0 %v5800_v13 }
 0x152   : > { %5084 = vmatmul.mubr.msk.f32.vlgmr.msra.gmra.mrb[0].mxu0 %vm824_vm1, %v812_v4  ;;  %v4409_v4 = vld [vmem:[%s7219_s24 + $0x58] sm:$0xff] }
 0x153   : > { %5086 = vmatprep.mubr.msk.f32.mxu0 %vm824_vm1, %v813_v5  ;;  %5803 = vmatpush3.bf16.msra.mxu0 %v5800_v13  ;;  %v4414_v5 = vld [vmem:[%s7219_s24 + $0x60] sm:$0xff] }
 0x154   : > { %5093 = vmatprep.subr.mxu0 %v4391_v17  ;;  %v4422_v13 = vld [vmem:[%s7219_s24 + $0x80] sm:$0xff] }
 0x155   : > { %v5820_v14 = vpack.c.bf16 %v4422_v13, %v4421_v12 }
 0x156   : > { %5087 = vmatmul.mubr.msk.f32.gmra.mrb[2].mxu0 %vm824_vm1, %v814_v6  ;;  %v4415_v6 = vld [vmem:[%s7219_s24 + $0x68] sm:$0xff] }
 0x157   : > { %5094 = vmatpush3.msra.mxu0 %v4391_v17  ;;  %v5816_v10 = vpack.c.bf16 %v4415_v6, %v4414_v5  ;;  %v4429_v17 = vld [vmem:[%s7219_s24 + $0x98] sm:$0xff] }
 0x225   : > { %v5085_v19 = vpop.f32.mrb[0].mxu0 }
 0x226   : > { %v913_v20 = vadd.f32 %v5085_v19, %v4383_v18  ;;  %v907_v21 = vpop.f32.mrb[1].mxu0  ;;  %v4430_v19 = vld [vmem:[%s7219_s24 + $0xa0] sm:$0xff] }
 0x227   : > { %v908_v22 = vadd.f32 %v4383_v18, %v907_v21 }
 0x228   : > { %v927_v23 = vmax.f32 %v913_v20, 0.0  ;;  %v6762_v20 = vmov 0.0  }
 0x229   : > { %v926_v24 = vmax.f32 %v908_v22, 0.0  ;;  %v5088_v25 = vpop.f32.mrb[2].mxu0  ;;  %v1473_v21 = vrot.slane %v6762_v20, 2 }
 0x22a   : > { %v936_v26 = vrot.slane %v927_v23, 2  ;;  %v923_v27 = vadd.f32 %v5088_v25, %v4383_v18  ;;  %v917_v28 = vpop.f32.mrb[3].mxu0  ;;  %v1570_v23 = vrot.slane %v6762_v20, 4  ;;  %v4436_v25 = vld [vmem:[%s7227_s1 + $0x30] sm:$0xff] }
 0x22b   : > { %v935_v29 = vrot.slane %v926_v24, 2  ;;  %v918_v30 = vadd.f32 %v4383_v18, %v917_v28  ;;  %v4438_v28 = vld [vmem:[%s7227_s1 + $0x40] sm:$0xff] }
 0x22c   : > { %v929_v31 = vmax.f32 %v923_v27, 0.0 }
 0x22d   : > { %v928_v32 = vmax.f32 %v918_v30, 0.0  ;;  %v944_v33 = vsel %vm934_vm4, 0.0, %v935_v29  ;;  %v7288_v34 = vsel %vm934_vm4, %v935_v29, %v936_v26  ;;  %v4439_v29 = vld [vmem:[%s7227_s1 + $0x48] sm:$0xff] }
 0x22e   : > { %v940_v37 = vrot.slane %v929_v31, 2  ;;  %v955_v38 = vrot.slane %v944_v33, 2  ;;  %5107 = vmatprep.mubr.msk.f32.mxu1 %vm964_vm5, %v944_v33  ;;  %v1156_v39 = vrot.slane %v944_v33, 4  ;;  %v1267_v40 = vrot.slane %v944_v33, 6  ;;  %v4440_v31 = vld [vmem:[%s7227_s1 + $0x50] sm:$0xff] }
 0x22f   : > { %v938_v42 = vrot.slane %v928_v32, 2  ;;  %5108 = vmatmul.mubr.msk.f32.vlgmr.msra.gmra.mrb[0].mxu1 %vm964_vm5, %v7288_v34  ;;  %v956_v43 = vrot.slane %v7288_v34, 2  ;;  %v1157_v44 = vrot.slane %v7288_v34, 4  ;;  %v1268_v45 = vrot.slane %v7288_v34, 6  ;;  %v4441_v32 = vld [vmem:[%s7227_s1 + $0x58] sm:$0xff] }
 0x230   : > { %v7300_v46 = vsel %vm934_vm4, %v940_v37, 0.0  ;;  %5811 = vmatpush3.bf16.msra.mxu1 %v5808_v16  ;;  %v4428_v16 = vld [vmem:[%s7219_s24 + $0x90] sm:$0xff]  ;;  %v5832_v30 = vpack.c.bf16 %v4439_v29, %v4438_v28  ;;  %v5836_v33 = vpack.c.bf16 %v4441_v32, %v4440_v31  ;;  %v1698_v31 = vld [vmem:[%s7227_s1 + $0x28] sm:$0xff] }
 0x231   : > { %v962_v48 = vrot.slane %v7300_v46, 2  ;;  %v1163_v49 = vrot.slane %v7300_v46, 4  ;;  %v1274_v50 = vrot.slane %v7300_v46, 6  ;;  %v957_v51 = vsel %vm934_vm4, %v955_v38, %v956_v43  ;;  %5117 = vmatprep.subr.mxu1 %v4402_v41  ;;  %v4482_v38 = vld [vmem:[%s7235_s28 + $0x50] sm:$0xff] }
 0x232   : > { %5095 = vmatprep.mubr.msk.f32.mxu0 %vm964_vm5, %v957_v51  ;;  %v939_v52 = vsel %vm934_vm4, %v936_v26, %v938_v42  ;;  %v941_v53 = vsel %vm934_vm4, %v938_v42, %v940_v37  ;;  %v1158_v54 = vsel %vm1155_vm6, %v1156_v39, %v1157_v44  ;;  %v1269_v55 = vsel %vm1266_vm7, %v1267_v40, %v1268_v45  ;;  %v4437_v26 = vld [vmem:[%s7227_s1 + $0x38] sm:$0xff] }
 0x233   : > { %v958_v56 = vrot.slane %v939_v52, 2  ;;  %5110 = vmatprep.mubr.msk.f32.mxu1 %vm964_vm5, %v939_v52  ;;  %v1159_v57 = vrot.slane %v939_v52, 4  ;;  %v1270_v58 = vrot.slane %v939_v52, 6  ;;  %v960_v59 = vrot.slane %v941_v53, 2  ;;  %v4481_v37 = vld [vmem:[%s7235_s28 + $0x48] sm:$0xff] }
 0x234   : > { %5111 = vmatmul.mubr.msk.f32.gmra.mrb[2].mxu1 %vm964_vm5, %v941_v53  ;;  %v1161_v60 = vrot.slane %v941_v53, 4  ;;  %v1272_v61 = vrot.slane %v941_v53, 6  ;;  %v5824_v18 = vpack.c.bf16 %v4429_v17, %v4428_v16  ;;  %v1474_v22 = vsel %vm934_vm4, %v962_v48, %v1473_v21 }
 0x235   : > { %5118 = vmatpush3.msra.mxu1 %v4402_v41  ;;  %5119 = vmatprep.mubr.msk.f32.mxu1 %vm964_vm5, %v1158_v54  ;;  %v959_v62 = vsel %vm934_vm4, %v956_v43, %v958_v56  ;;  %v961_v63 = vsel %vm934_vm4, %v958_v56, %v960_v59  ;;  %v1160_v0 = vsel %vm1155_vm6, %v1157_v44, %v1159_v57 }
 0x236   : > { %5096 = vmatmul.mubr.msk.f32.vlgmr.msra.gmra.mrb[4].mxu0 %vm964_vm5, %v959_v62  ;;  %5813 = vmatprep.subr.bf16.mxu1 %v5812_v47  ;;  %v1162_v1 = vsel %vm1155_vm6, %v1159_v57, %v1161_v60  ;;  %v963_v2 = vsel %vm934_vm4, %v960_v59, %v962_v48  ;;  %v1164_v3 = vsel %vm1155_vm6, %v1161_v60, %v1163_v49 }
 0x237   : > { %5098 = vmatprep.mubr.msk.f32.mxu0 %vm964_vm5, %v961_v63  ;;  %v1271_v7 = vsel %vm1266_vm7, %v1268_v45, %v1270_v58  ;;  %v1273_v8 = vsel %vm1266_vm7, %v1270_v58, %v1272_v61  ;;  %v1275_v9 = vsel %vm1266_vm7, %v1272_v61, %v1274_v50  ;;  %v1571_v24 = vsel %vm1155_vm6, %v1163_v49, %v1570_v23  ;;  %v4435_v45 = vld [vmem:[%s647_s14] ss:$0 sm:$0xff] }
 0x238   : > { %5120 = vmatmul.mubr.msk.f32.vlgmr.msra.gmra.mrb[0].mxu1 %vm964_vm5, %v1160_v0  ;;  %v5828_v27 = vpack.c.bf16 %v4437_v26, %v4436_v25  ;;  %v5888_v39 = vpack.c.bf16 %v4482_v38, %v4481_v37 }
 0x239   : > { %5815 = vmatpush3.bf16.msra.mxu1 %v5812_v47  ;;  %5122 = vmatprep.mubr.msk.f32.mxu1 %vm964_vm5, %v1162_v1 }
 0x23a   : > { %5099 = vmatmul.mubr.msk.f32.gmra.mrb[6].mxu0 %vm964_vm5, %v963_v2  ;;  %5129 = vmatprep.subr.mxu1 %v4409_v4 }
 0x23b   : > { %5829 = vmatprep.subr.bf16.mxu0 %v5828_v27 }
 0x23c   : > { %5123 = vmatmul.mubr.msk.f32.gmra.mrb[2].mxu1 %vm964_vm5, %v1164_v3  ;;  %5831 = vmatpush3.bf16.msra.mxu0 %v5828_v27 }
 0x23d   : > { %5130 = vmatpush3.msra.mxu1 %v4409_v4  ;;  %5131 = vmatprep.mubr.msk.f32.mxu1 %vm964_vm5, %v1269_v55 }
 0x23e   : > { %5817 = vmatprep.subr.bf16.mxu1 %v5816_v10  ;;  %5833 = vmatprep.subr.bf16.mxu0 %v5832_v30 }
 0x240   : > { %5132 = vmatmul.mubr.msk.f32.vlgmr.msra.gmra.mrb[0].mxu1 %vm964_vm5, %v1271_v7  ;;  %5835 = vmatpush3.bf16.msra.mxu0 %v5832_v30  ;;  %v1697_v30 = vld [vmem:[%s7227_s1 + $0x20] sm:$0xff] }
 0x241   : > { %5819 = vmatpush3.bf16.msra.mxu1 %v5816_v10  ;;  %5134 = vmatprep.mubr.msk.f32.mxu1 %vm964_vm5, %v1273_v8 }
 0x242   : > { %5141 = vmatprep.subr.mxu1 %v4416_v11  ;;  %5837 = vmatprep.subr.bf16.mxu0 %v5836_v33 }
 0x244   : > { %5135 = vmatmul.mubr.msk.f32.gmra.mrb[2].mxu1 %vm964_vm5, %v1275_v9  ;;  %5839 = vmatpush3.bf16.msra.mxu0 %v5836_v33 }
 0x245   : > { %5142 = vmatpush3.msra.mxu1 %v4416_v11  ;;  %5143 = vmatprep.mubr.msk.f32.mxu1 %vm964_vm5, %v7288_v34  ;;  %v1693_v34 = vld [vmem:[%s7227_s1] sm:$0xff] }
 0x246   : > { %5821 = vmatprep.subr.bf16.mxu1 %v5820_v14  ;;  %v7377_v36 = vpack.c.bf16 %v1694_v35, %v1693_v34 }
 0x248   : > { %5144 = vmatmul.mubr.msk.f32.vlgmr.msra.gmra.mrb[0].mxu1 %vm964_vm5, %v939_v52  ;;  %5841 = vmatprep.subr.bf16.mxu0 %v7377_v36 }
 0x249   : > { %5823 = vmatpush3.bf16.msra.mxu1 %v5820_v14  ;;  %5146 = vmatprep.mubr.msk.f32.mxu1 %vm964_vm5, %v941_v53 }
 0x24a   : > { %5153 = vmatprep.subr.mxu1 %v4423_v15 }
 0x24c   : > { %5147 = vmatmul.mubr.msk.f32.gmra.mrb[2].mxu1 %vm964_vm5, %v7300_v46 }
 0x24d   : > { %5154 = vmatpush3.msra.mxu1 %v4423_v15  ;;  %5155 = vmatprep.mubr.msk.f32.mxu1 %vm964_vm5, %v959_v62 }
 0x24e   : > { %5825 = vmatprep.subr.bf16.mxu1 %v5824_v18 }
 0x250   : > { %5156 = vmatmul.mubr.msk.f32.vlgmr.msra.gmra.mrb[0].mxu1 %vm964_vm5, %v961_v63 }
 0x251   : > { %5827 = vmatpush3.bf16.msra.mxu1 %v5824_v18  ;;  %5158 = vmatprep.mubr.msk.f32.mxu1 %vm964_vm5, %v963_v2  ;;  %v1696_v2 = vld [vmem:[%s7227_s1 + $0x18] sm:$0xff] }
 0x252   : > { %5165 = vmatprep.subr.mxu1 %v4430_v19 }
 0x254   : > { %5159 = vmatmul.mubr.msk.f32.gmra.mrb[2].mxu1 %vm964_vm5, %v1474_v22 }
 0x255   : > { %5166 = vmatpush3.msra.mxu1 %v4430_v19  ;;  %5167 = vmatprep.mubr.msk.f32.mxu1 %vm964_vm5, %v1160_v0 }
 0x256   : > { %5889 = vmatprep.subr.bf16.mxu1 %v5888_v39 }
 0x258   : > { %5168 = vmatmul.mubr.msk.f32.vlgmr.msra.gmra.mrb[0].mxu1 %vm964_vm5, %v1162_v1  ;;  %v1695_v1 = vld [vmem:[%s7227_s1 + $0x10] sm:$0xff] }
 0x259   : > { %5170 = vmatprep.mubr.msk.f32.mxu1 %vm964_vm5, %v1164_v3  ;;  %5891 = vmatpush3.bf16.msra.mxu1 %v5888_v39  ;;  %v5844_v13 = vpack.c.bf16 %v1696_v2, %v1695_v1  ;;  %v5848_v39 = vpack.c.bf16 %v1698_v31, %v1697_v30  ;;  %v4474_v1 = vld [vmem:[%s7227_s1 + $0xe0] sm:$0xff]  ;;  %v4475_v2 = vld [vmem:[%s7227_s1 + $0xe8] sm:$0xff] }
 0x25a   : > { %v4480_v30 = vld [vmem:[%s664_s20] ss:$0 sm:$0xff] }
 0x25c   : > { %5171 = vmatmul.mubr.msk.f32.gmra.mrb[2].mxu1 %vm964_vm5, %v1571_v24 }
 0x309   : > { %v5097_v40 = vpop.f32.mrb[4].mxu0 }
 0x30a   : > { %v1039_v41 = vpop.f32.mrb[5].mxu0 }
 0x30d   : > { %v5100_v42 = vpop.f32.mrb[6].mxu0 }
 0x30e   : > { %v1049_v43 = vpop.f32.mrb[7].mxu0 }
 0x32b   : > { %v5169_v44 = vpop.f32.mrb[0].mxu1 }
 0x32c   : > { %v6242_v46 = vadd.f32 %v5169_v44, %v5097_v40  ;;  %v1640_v47 = vpop.f32.mrb[1].mxu1  ;;  %v4450_v40 = vld [vmem:[%s7227_s1 + $0x60] sm:$0xff]  ;;  %v4453_v44 = vld [vmem:[%s7227_s1 + $0x78] sm:$0xff] }
 0x32d   : > { %v6243_v48 = vadd.f32 %v1640_v47, %v1039_v41  ;;  %v4451_v41 = vld [vmem:[%s7227_s1 + $0x68] sm:$0xff] }
 0x32e   : > { %v1671_v49 = vadd.f32 %v6242_v46, %v4435_v45  ;;  %v4454_v46 = vld [vmem:[%s7227_s1 + $0x80] sm:$0xff]  ;;  %v4455_v47 = vld [vmem:[%s7227_s1 + $0x88] sm:$0xff] }
 0x32f   : > { %v1670_v50 = vadd.f32 %v6243_v48, %v4435_v45  ;;  %v5172_v51 = vpop.f32.mrb[2].mxu1  ;;  %v5860_v48 = vpack.c.bf16 %v4455_v47, %v4454_v46 }
 0x330   : > { %v1675_v52 = vmax.f32 %v1671_v49, 0.0  ;;  %v6244_v53 = vadd.f32 %v5172_v51, %v5100_v42  ;;  %v1650_v54 = vpop.f32.mrb[3].mxu1  ;;  %v4460_v49 = vld [vmem:[%s7227_s1 + $0x90] sm:$0xff] }
 0x331   : > { %v1674_v55 = vmax.f32 %v1670_v50, 0.0  ;;  %v6245_v56 = vadd.f32 %v1650_v54, %v1049_v43  ;;  %v4452_v43 = vld [vmem:[%s7227_s1 + $0x70] sm:$0xff]  ;;  %v4461_v50 = vld [vmem:[%s7227_s1 + $0x98] sm:$0xff] }
 0x332   : > { %v1683_v57 = vrot.slane %v1675_v52, 4  ;;  %v1673_v58 = vadd.f32 %v6244_v53, %v4435_v45  ;;  %v5864_v51 = vpack.c.bf16 %v4461_v50, %v4460_v49  ;;  %v4462_v52 = vld [vmem:[%s7227_s1 + $0xa0] sm:$0xff]  ;;  %v4463_v53 = vld [vmem:[%s7227_s1 + $0xa8] sm:$0xff] }
 0x333   : > { %v1682_v59 = vrot.slane %v1674_v55, 4  ;;  %v1672_v60 = vadd.f32 %v6245_v56, %v4435_v45  ;;  %v5856_v45 = vpack.c.bf16 %v4453_v44, %v4452_v43  ;;  %v5868_v54 = vpack.c.bf16 %v4463_v53, %v4462_v52  ;;  %v4464_v55 = vld [vmem:[%s7227_s1 + $0xb0] sm:$0xff]  ;;  %v4465_v56 = vld [vmem:[%s7227_s1 + $0xb8] sm:$0xff] }
 0x334   : > { %v1677_v61 = vmax.f32 %v1673_v58, 0.0  ;;  %v4470_v58 = vld [vmem:[%s7227_s1 + $0xc0] sm:$0xff] }
 0x335   : > { %v7385_v62 = vsel %vm1155_vm6, %v1682_v59, %v1683_v57  ;;  %v1691_v63 = vsel %vm1155_vm6, 0.0, %v1682_v59  ;;  %v1676_v0 = vmax.f32 %v1672_v60, 0.0  ;;  %v4471_v59 = vld [vmem:[%s7227_s1 + $0xc8] sm:$0xff] }
 0x336   : > { %v1687_v3 = vrot.slane %v1677_v61, 4  ;;  %v1708_v4 = vrot.slane %v1691_v63, 2  ;;  %v1709_v5 = vrot.slane %v7385_v62, 2  ;;  %v1911_v6 = vrot.slane %v1691_v63, 4  ;;  %v4472_v61 = vld [vmem:[%s7227_s1 + $0xd0] sm:$0xff] }
 0x337   : > { %v1685_v7 = vrot.slane %v1676_v0, 4  ;;  %v1912_v8 = vrot.slane %v7385_v62, 4  ;;  %v2024_v9 = vrot.slane %v1691_v63, 6  ;;  %v2025_v10 = vrot.slane %v7385_v62, 6 }
 0x338   : > { %v7394_v11 = vsel %vm1155_vm6, %v1687_v3, 0.0  ;;  %v1710_v12 = vsel %vm934_vm4, %v1708_v4, %v1709_v5  ;;  %v5876_v60 = vpack.c.bf16 %v4471_v59, %v4470_v58  ;;  %v4483_v4 = vld [vmem:[%s7235_s28 + $0x58] sm:$0xff] }
 0x339   : > { %v7398_v14 = vsel %vm1155_vm6, %v1683_v57, %v1685_v7  ;;  %v7401_v15 = vsel %vm1155_vm6, %v1685_v7, %v1687_v3  ;;  %5185 = vmatprep.mubr.msk.f32.mxu0 %vm1717_vm8, %v1710_v12  ;;  %v1715_v16 = vrot.slane %v7394_v11, 2  ;;  %v1913_v17 = vsel %vm1155_vm6, %v1911_v6, %v1912_v8  ;;  %v4486_v7 = vld [vmem:[%s7235_s28 + $0x70] sm:$0xff] }
 0x33a   : > { %v1711_v18 = vrot.slane %v7398_v14, 2  ;;  %v1713_v19 = vrot.slane %v7401_v15, 2  ;;  %v1914_v21 = vrot.slane %v7398_v14, 4  ;;  %v1916_v22 = vrot.slane %v7401_v15, 4 }
 0x33b   : > { %v1918_v23 = vrot.slane %v7394_v11, 4  ;;  %v2026_v24 = vsel %vm1266_vm7, %v2024_v9, %v2025_v10  ;;  %v2027_v25 = vrot.slane %v7398_v14, 6  ;;  %v2029_v26 = vrot.slane %v7401_v15, 6  ;;  %v4487_v9 = vld [vmem:[%s7235_s28 + $0x78] sm:$0xff] }
 0x33c   : > { %v1712_v27 = vsel %vm934_vm4, %v1709_v5, %v1711_v18  ;;  %v1714_v28 = vsel %vm934_vm4, %v1711_v18, %v1713_v19  ;;  %v1716_v29 = vsel %vm934_vm4, %v1713_v19, %v1715_v16  ;;  %v1915_v32 = vsel %vm1155_vm6, %v1912_v8, %v1914_v21  ;;  %v4484_v5 = vld [vmem:[%s7235_s28 + $0x60] sm:$0xff] }
 0x33d   : > { %5186 = vmatmul.mubr.msk.f32.vlgmr.msra.gmra.mrb[8].mxu0 %vm1717_vm8, %v1712_v27  ;;  %v1917_v33 = vsel %vm1155_vm6, %v1914_v21, %v1916_v22  ;;  %v1919_v34 = vsel %vm1155_vm6, %v1916_v22, %v1918_v23  ;;  %v2028_v35 = vsel %vm1266_vm7, %v2025_v10, %v2027_v25  ;;  %v2030_v37 = vsel %vm1266_vm7, %v2027_v25, %v2029_v26  ;;  %v4488_v10 = vld [vmem:[%s7235_s28 + $0x80] sm:$0xff]  ;;  %v4515_v22 = vld [vmem:[%s7243_s18 + $0x78] sm:$0xff] }
 0x33e   : > { %5843 = vmatpush3.bf16.msra.mxu0 %v7377_v36  ;;  %5188 = vmatprep.mubr.msk.f32.mxu0 %vm1717_vm8, %v1714_v28  ;;  %v2031_v38 = vrot.slane %v7394_v11, 6  ;;  %v5852_v36 = vpack.c.bf16 %v4451_v41, %v4450_v40  ;;  %v5872_v57 = vpack.c.bf16 %v4465_v56, %v4464_v55  ;;  %v5884_v3 = vpack.c.bf16 %v4475_v2, %v4474_v1  ;;  %v4512_v16 = vld [vmem:[%s7243_s18 + $0x60] sm:$0xff]  ;;  %v4514_v21 = vld [vmem:[%s7243_s18 + $0x70] sm:$0xff]  ;;  %v4517_v25 = vld [vmem:[%s7243_s18 + $0x88] sm:$0xff] }
 0x33f   : > { %5845 = vmatprep.subr.bf16.mxu0 %v5844_v13  ;;  %v5892_v6 = vpack.c.bf16 %v4484_v5, %v4483_v4  ;;  %v5900_v12 = vpack.c.bf16 %v4488_v10, %v4487_v9  ;;  %v6763_v18 = vmov 0.0|0.0   ;;  %v5940_v23 = vpack.c.bf16 %v4515_v22, %v4514_v21  ;;  %v4518_v27 = vld [vmem:[%s7243_s18 + $0x90] sm:$0xff]  ;;  %v4519_v28 = vld [vmem:[%s7243_s18 + $0x98] sm:$0xff] }
 0x340   : > { %v2032_v42 = vsel %vm1266_vm7, %v2029_v26, %v2031_v38  ;;  %v2260_v55 = vld [vmem:[%s7235_s28 + $0x10] sm:$0xff]  ;;  %v2261_v56 = vld [vmem:[%s7235_s28 + $0x18] sm:$0xff]  ;;  %v4501_v21 = vld [vmem:[%s7235_s28 + $0xa8] sm:$0xff] }
 0x341   : > { %5189 = vmatmul.mubr.msk.f32.gmra.mrb[10].mxu0 %vm1717_vm8, %v1716_v29  ;;  %5893 = vmatprep.subr.bf16.mxu1 %v5892_v6  ;;  %v5946_v29 = vpack.c.bf16 %v4519_v28, %v4518_v27  ;;  %v5908_v2 = vpack.c.bf16 %v2261_v56, %v2260_v55  ;;  %v4504_v27 = vld [vmem:[%s7235_s28 + $0xc0] sm:$0xff]  ;;  %v4505_v28 = vld [vmem:[%s7235_s28 + $0xc8] sm:$0xff] }
 0x342   : > { %5847 = vmatpush3.bf16.msra.mxu0 %v5844_v13  ;;  %5203 = vmatprep.mubr.msk.f32.mxu0 %vm1717_vm8, %v1691_v63  ;;  %v4473_v63 = vld [vmem:[%s7227_s1 + $0xd8] sm:$0xff]  ;;  %v2258_v13 = vld [vmem:[%s7235_s28] sm:$0xff]  ;;  %s8013_s1 = sld [smem:[#allocation33_spill]] }
 0x343   : > { %5849 = vmatprep.subr.bf16.mxu0 %v5848_v39  ;;  %v5880_v0 = vpack.c.bf16 %v4473_v63, %v4472_v61  ;;  %5895 = vmatpush3.bf16.msra.mxu1 %v5892_v6  ;;  %v7571_v55 = vld [vmem:[%s681_s15] ss:$0 sm:$0xff] }
 0x346   : > { %5851 = vmatpush3.bf16.msra.mxu0 %v5848_v39 }
 0x347   : > { %5853 = vmatprep.subr.bf16.mxu0 %v5852_v36 }
 0x348   : > { %s7911_s20 = scalar_lea.vmem %s8013_s1, %s6302_s16 }
 0x349   : > { %5204 = vmatmul.mubr.msk.f32.vlgmr.msra.gmra.mrb[8].mxu0 %vm1717_vm8, %v7385_v62 }
 0x34a   : > { %5206 = vmatprep.mubr.msk.f32.mxu0 %vm1717_vm8, %v7398_v14  ;;  %5855 = vmatpush3.bf16.msra.mxu0 %v5852_v36 }
 0x34b   : > { %5857 = vmatprep.subr.bf16.mxu0 %v5856_v45 }
 0x34d   : > { %5207 = vmatmul.mubr.msk.f32.gmra.mrb[10].mxu0 %vm1717_vm8, %v7401_v15 }
 0x34e   : > { %5859 = vmatpush3.bf16.msra.mxu0 %v5856_v45  ;;  %5221 = vmatprep.mubr.msk.f32.mxu0 %vm1717_vm8, %v1913_v17  ;;  %v4513_v17 = vld [vmem:[%s7243_s18 + $0x68] sm:$0xff] }
 0x34f   : > { %5861 = vmatprep.subr.bf16.mxu0 %v5860_v48  ;;  %v5937_v19 = vpack.c.bf16 %v4513_v17, %v4512_v16  ;;  %v4498_v16 = vld [vmem:[%s7235_s28 + $0x90] sm:$0xff]  ;;  %v4499_v17 = vld [vmem:[%s7235_s28 + $0x98] sm:$0xff] }
 0x350   : > { %v5920_v22 = vpack.c.bf16 %v4499_v17, %v4498_v16  ;;  %v4556_v16 = vld [vmem:[%s7243_s18 + $0x1a0] sm:$0xff]  ;;  %v4557_v17 = vld [vmem:[%s7243_s18 + $0x1a8] sm:$0xff] }
 0x352   : > { %5863 = vmatpush3.bf16.msra.mxu0 %v5860_v48 }
 0x353   : > { %5865 = vmatprep.subr.bf16.mxu0 %v5864_v51 }
 0x355   : > { %5222 = vmatmul.mubr.msk.f32.vlgmr.msra.gmra.mrb[8].mxu0 %vm1717_vm8, %v1915_v32 }
 0x356   : > { %5224 = vmatprep.mubr.msk.f32.mxu0 %vm1717_vm8, %v1917_v33  ;;  %5867 = vmatpush3.bf16.msra.mxu0 %v5864_v51 }
 0x357   : > { %5869 = vmatprep.subr.bf16.mxu0 %v5868_v54 }
 0x359   : > { %5225 = vmatmul.mubr.msk.f32.gmra.mrb[10].mxu0 %vm1717_vm8, %v1919_v34 }
 0x35a   : > { %5871 = vmatpush3.bf16.msra.mxu0 %v5868_v54  ;;  %5239 = vmatprep.mubr.msk.f32.mxu0 %vm1717_vm8, %v2026_v24  ;;  %v4516_v24 = vld [vmem:[%s7243_s18 + $0x80] sm:$0xff] }
 0x35b   : > { %5873 = vmatprep.subr.bf16.mxu0 %v5872_v57  ;;  %v5943_v26 = vpack.c.bf16 %v4517_v25, %v4516_v24  ;;  %v4502_v24 = vld [vmem:[%s7235_s28 + $0xb0] sm:$0xff]  ;;  %v4503_v25 = vld [vmem:[%s7235_s28 + $0xb8] sm:$0xff] }
 0x35e   : > { %5875 = vmatpush3.bf16.msra.mxu0 %v5872_v57 }
 0x35f   : > { %5877 = vmatprep.subr.bf16.mxu0 %v5876_v60 }
 0x361   : > { %5240 = vmatmul.mubr.msk.f32.vlgmr.msra.gmra.mrb[8].mxu0 %vm1717_vm8, %v2028_v35 }
 0x362   : > { %5242 = vmatprep.mubr.msk.f32.mxu0 %vm1717_vm8, %v2030_v37  ;;  %5879 = vmatpush3.bf16.msra.mxu0 %v5876_v60 }
 0x363   : > { %5881 = vmatprep.subr.bf16.mxu0 %v5880_v0 }
 0x365   : > { %5243 = vmatmul.mubr.msk.f32.gmra.mrb[10].mxu0 %vm1717_vm8, %v2032_v42 }
 0x366   : > { %5883 = vmatpush3.bf16.msra.mxu0 %v5880_v0  ;;  %5257 = vmatprep.mubr.msk.f32.mxu0 %vm1717_vm8, %v7385_v62  ;;  %v4485_v62 = vld [vmem:[%s7235_s28 + $0x68] sm:$0xff] }
 0x367   : > { %5885 = vmatprep.subr.bf16.mxu0 %v5884_v3  ;;  %v5896_v8 = vpack.c.bf16 %v4486_v7, %v4485_v62  ;;  %v2262_v62 = vld [vmem:[%s7235_s28 + $0x20] sm:$0xff]  ;;  %v2263_v7 = vld [vmem:[%s7235_s28 + $0x28] sm:$0xff] }
 0x369   : > { %5897 = vmatprep.subr.bf16.mxu1 %v5896_v8 }
 0x36a   : > { %5887 = vmatpush3.bf16.msra.mxu0 %v5884_v3  ;;  %5899 = vmatpush3.bf16.msra.mxu1 %v5896_v8 }
 0x36b   : > { %5901 = vmatprep.subr.bf16.mxu1 %v5900_v12  ;;  %5936 = vmatprep.subr.bf16.mxu0 %v6763_v18 }
 0x36d   : > { %5258 = vmatmul.mubr.msk.f32.vlgmr.msra.gmra.mrb[8].mxu0 %vm1717_vm8, %v7398_v14  ;;  %v2259_v14 = vld [vmem:[%s7235_s28 + $0x8] sm:$0xff] }
 0x36e   : > { %5260 = vmatprep.mubr.msk.f32.mxu0 %vm1717_vm8, %v7401_v15  ;;  %5903 = vmatpush3.bf16.msra.mxu1 %v5900_v12  ;;  %v7480_v15 = vpack.c.bf16 %v2259_v14, %v2258_v13  ;;  %v5912_v12 = vpack.c.bf16 %v2263_v7, %v2262_v62  ;;  %v2265_v13 = vld [vmem:[%s7235_s28 + $0x38] sm:$0xff] }
 0x36f   : > { %5938 = vmatpush3.bf16.msra.mxu0 %v5937_v19  ;;  %v4500_v19 = vld [vmem:[%s7235_s28 + $0xa0] sm:$0xff] }
 0x370   : > { %5939 = vmatprep.subr.bf16.mxu0 %v6763_v18 }
 0x371   : > { %5261 = vmatmul.mubr.msk.f32.gmra.mrb[10].mxu0 %vm1717_vm8, %v7394_v11  ;;  %v4489_v11 = vld [vmem:[%s7235_s28 + $0x88] sm:$0xff] }
 0x372   : > { %5279 = vmatprep.subr.mxu1 %v4489_v11  ;;  %5359 = vmatprep.mubr.msk.f32.mxu0 %vm6764_vm10, %v6762_v20 }
 0x373   : > { %5280 = vmatpush3.msra.mxu1 %v4489_v11  ;;  %5941 = vmatpush3.bf16.msra.mxu0 %v5940_v23  ;;  %v2264_v11 = vld [vmem:[%s7235_s28 + $0x30] sm:$0xff]  ;;  %v5924_v23 = vpack.c.bf16 %v4501_v21, %v4500_v19  ;;  %v6015_v21 = vpack.c.bf16 %v4557_v17, %v4556_v16 }
 0x374   : > { %5905 = vmatprep.subr.bf16.mxu1 %v7480_v15  ;;  %5942 = vmatprep.subr.bf16.mxu0 %v6763_v18  ;;  %v5916_v14 = vpack.c.bf16 %v2265_v13, %v2264_v11  ;;  %v4565_v17 = vld [vmem:[%s7243_s18 + $0x1e0] sm:$0xff] }
 0x377   : > { %5944 = vmatpush3.bf16.msra.mxu0 %v5943_v26  ;;  %v5928_v26 = vpack.c.bf16 %v4503_v25, %v4502_v24  ;;  %v4558_v24 = vld [vmem:[%s7243_s18 + $0x1b0] sm:$0xff]  ;;  %v4559_v25 = vld [vmem:[%s7243_s18 + $0x1b8] sm:$0xff] }
 0x378   : > { %5945 = vmatprep.subr.bf16.mxu0 %v6763_v18 }
 0x37b   : > { %5947 = vmatpush3.bf16.msra.mxu0 %v5946_v29  ;;  %v5932_v29 = vpack.c.bf16 %v4505_v28, %v4504_v27  ;;  %v6018_v27 = vpack.c.bf16 %v4559_v25, %v4558_v24  ;;  %v2614_v28 = vld [vmem:[%s7243_s18 + $0x40] sm:$0xff]  ;;  %v4567_v25 = vld [vmem:[%s7243_s18 + $0x1f0] sm:$0xff] }
 0x37c   : > { %5948 = vmatprep.subr.bf16.mxu0 %v6763_v18 }
 0x440   : > { %v5259_v31 = vpop.f32.mrb[8].mxu0 }
 0x441   : > { %v2236_v32 = vadd.f32 %v5259_v31, %v4480_v30  ;;  %v2205_v33 = vpop.f32.mrb[9].mxu0  ;;  %v4526_v31 = vld [vmem:[%s7243_s18 + $0xc0] sm:$0xff] }
 0x442   : > { %v2235_v34 = vadd.f32 %v4480_v30, %v2205_v33 }
 0x443   : > { %v2240_v35 = vmax.f32 %v2236_v32, 0.0  ;;  %v4527_v32 = vld [vmem:[%s7243_s18 + $0xc8] sm:$0xff] }
 0x444   : > { %v2239_v37 = vmax.f32 %v2235_v34, 0.0  ;;  %v5262_v38 = vpop.f32.mrb[10].mxu0  ;;  %v5973_v33 = vpack.c.bf16 %v4527_v32, %v4526_v31  ;;  %v4528_v34 = vld [vmem:[%s7243_s18 + $0xd0] sm:$0xff]  ;;  %v4561_v31 = vld [vmem:[%s7243_s18 + $0x1c8] sm:$0xff] }
 0x445   : > { %v2248_v39 = vrot.slane %v2240_v35, 6  ;;  %v2238_v40 = vadd.f32 %v5262_v38, %v4480_v30  ;;  %v2215_v41 = vpop.f32.mrb[11].mxu0  ;;  %v4529_v35 = vld [vmem:[%s7243_s18 + $0xd8] sm:$0xff]  ;;  %v4530_v38 = vld [vmem:[%s7243_s18 + $0xe0] sm:$0xff] }
 0x446   : > { %v2247_v42 = vrot.slane %v2239_v37, 6  ;;  %v2237_v36 = vadd.f32 %v4480_v30, %v2215_v41  ;;  %v4506_v30 = vld [vmem:[%s7235_s28 + $0xd0] sm:$0xff]  ;;  %v5976_v37 = vpack.c.bf16 %v4529_v35, %v4528_v34 }
 0x447   : > { %v2242_v43 = vmax.f32 %v2238_v40, 0.0  ;;  %v4532_v41 = vld [vmem:[%s7243_s18 + $0xf0] sm:$0xff]  ;;  %v2617_v35 = vld [vmem:[%s7243_s18 + $0x58] sm:$0xff] }
 0x448   : > { %v2249_v44 = vsel %vm1266_vm7, %v2247_v42, %v2248_v39  ;;  %v2256_v45 = vsel %vm1266_vm7, 0.0, %v2247_v42  ;;  %v2241_v46 = vmax.f32 %v2237_v36, 0.0  ;;  %v4533_v42 = vld [vmem:[%s7243_s18 + $0xf8] sm:$0xff]  ;;  %v2616_v34 = vld [vmem:[%s7243_s18 + $0x50] sm:$0xff] }
 0x449   : > { %v2279_v47 = vrot.slane %v2256_v45, 2  ;;  %v2485_v48 = vrot.slane %v2256_v45, 4  ;;  %v2252_v49 = vrot.slane %v2242_v43, 6  ;;  %v2280_v50 = vrot.slane %v2249_v44, 2  ;;  %v4520_v43 = vld [vmem:[%s7243_s18 + $0xa0] sm:$0xff] }
 0x44a   : > { %v2250_v51 = vrot.slane %v2241_v46, 6  ;;  %v2486_v52 = vrot.slane %v2249_v44, 4  ;;  %v5982_v36 = vpack.c.bf16 %v4533_v42, %v4532_v41  ;;  %v4534_v46 = vld [vmem:[%s7243_s18 + $0x100] sm:$0xff] }
 0x44b   : > { %v2257_v53 = vsel %vm1266_vm7, %v2252_v49, 0.0  ;;  %v2281_v54 = vsel %vm934_vm4, %v2279_v47, %v2280_v50  ;;  %v4535_v47 = vld [vmem:[%s7243_s18 + $0x108] sm:$0xff]  ;;  %v4539_v41 = vld [vmem:[%s7243_s18 + $0x120] sm:$0xff] }
 0x44c   : > { %v2286_v57 = vrot.slane %v2257_v53, 2  ;;  %v2492_v58 = vrot.slane %v2257_v53, 4  ;;  %v2251_v59 = vsel %vm1266_vm7, %v2248_v39, %v2250_v51  ;;  %v2253_v60 = vsel %vm1266_vm7, %v2250_v51, %v2252_v49  ;;  %5281 = vmatprep.mubr.msk.f32.mxu1 %vm2288_vm9, %v2281_v54  ;;  %v4531_v39 = vld [vmem:[%s7243_s18 + $0xe8] sm:$0xff]  ;;  %v4522_v49 = vld [vmem:[%s7243_s18 + $0xb0] sm:$0xff]  ;;  %v4537_v53 = vld [vmem:[%s7243_s18 + $0x118] sm:$0xff] }
 0x44d   : > { %v2282_v61 = vrot.slane %v2251_v59, 2  ;;  %v2488_v63 = vrot.slane %v2251_v59, 4  ;;  %v2284_v0 = vrot.slane %v2253_v60, 2  ;;  %v2487_v1 = vsel %vm1155_vm6, %v2485_v48, %v2486_v52  ;;  %v4536_v51 = vld [vmem:[%s7243_s18 + $0x110] sm:$0xff] }
 0x44e   : > { %v2490_v3 = vrot.slane %v2253_v60, 4  ;;  %v5979_v40 = vpack.c.bf16 %v4531_v39, %v4530_v38  ;;  %v5985_v48 = vpack.c.bf16 %v4535_v47, %v4534_v46  ;;  %v5988_v54 = vpack.c.bf16 %v4537_v53, %v4536_v51  ;;  %v4563_v38 = vld [vmem:[%s7243_s18 + $0x1d8] sm:$0xff]  ;;  %v4541_v47 = vld [vmem:[%s7243_s18 + $0x130] sm:$0xff] }
 0x44f   : > { %v2283_v4 = vsel %vm934_vm4, %v2280_v50, %v2282_v61  ;;  %v2285_v5 = vsel %vm934_vm4, %v2282_v61, %v2284_v0  ;;  %v2287_v6 = vsel %vm934_vm4, %v2284_v0, %v2286_v57  ;;  %v2489_v8 = vsel %vm1155_vm6, %v2486_v52, %v2488_v63  ;;  %v4523_v50 = vld [vmem:[%s7243_s18 + $0xb8] sm:$0xff]  ;;  %v4552_v61 = vld [vmem:[%s7243_s18 + $0x180] sm:$0xff] }
 0x450   : > { %5282 = vmatmul.mubr.msk.f32.vlgmr.msra.gmra.mrb[4].mxu1 %vm2288_vm9, %v2283_v4  ;;  %v2491_v9 = vsel %vm1155_vm6, %v2488_v63, %v2490_v3  ;;  %v2493_v10 = vsel %vm1155_vm6, %v2490_v3, %v2492_v58  ;;  %v5952_v52 = vpack.c.bf16 %v4523_v50, %v4522_v49  ;;  %v2606_v58 = vld [vmem:[%s7243_s18] sm:$0xff]  ;;  %v4553_v63 = vld [vmem:[%s7243_s18 + $0x188] sm:$0xff]  ;;  %v5970_v39 = vpack.c.bf16 %v2617_v35, %v2616_v34  ;;  %v4542_v49 = vld [vmem:[%s7243_s18 + $0x138] sm:$0xff] }
 0x451   : > { %5907 = vmatpush3.bf16.msra.mxu1 %v7480_v15  ;;  %5284 = vmatprep.mubr.msk.f32.mxu1 %vm2288_vm9, %v2285_v5  ;;  %v2266_v15 = vld [vmem:[%s7235_s28 + $0x40] sm:$0xff]  ;;  %v6009_v5 = vpack.c.bf16 %v4553_v63, %v4552_v61  ;;  %v4581_v51 = vld [vmem:[%s7243_s18 + $0x258] sm:$0xff]  ;;  %s4382_s28 = sshll.u32 %s8021_s29, 1 }
 0x452   : > { %5909 = vmatprep.subr.bf16.mxu1 %v5908_v2  ;;  %v4580_v50 = vld [vmem:[%s7243_s18 + $0x250] sm:$0xff]  ;;  %v4546_v61 = vld [vmem:[%s7243_s18 + $0x158] sm:$0xff]  ;;  %v4608_v34 = vld [vmem:[%s7243_s18 + $0x320] sm:$0xff]  ;;  %s810_s22 = scalar_lea.vmem %s8014_s3, %s4382_s28 }
 0x453   : > { %v6048_v53 = vpack.c.bf16 %v4581_v51, %v4580_v50  ;;  %v4584_v63 = vld [vmem:[%s7243_s18 + $0x270] sm:$0xff]  ;;  %v4609_v35 = vld [vmem:[%s7243_s18 + $0x328] sm:$0xff] }
 0x454   : > { %5285 = vmatmul.mubr.msk.f32.gmra.mrb[6].mxu1 %vm2288_vm9, %v2287_v6  ;;  %v2608_v6 = vld [vmem:[%s7243_s18 + $0x10] sm:$0xff] }
 0x455   : > { %5911 = vmatpush3.bf16.msra.mxu1 %v5908_v2  ;;  %5305 = vmatprep.mubr.msk.f32.mxu1 %vm2288_vm9, %v2256_v45  ;;  %v4575_v51 = vld [vmem:[%s7243_s18 + $0x230] sm:$0xff] }
 0x456   : > { %5913 = vmatprep.subr.bf16.mxu1 %v5912_v12 }
 0x459   : > { %5915 = vmatpush3.bf16.msra.mxu1 %v5912_v12  ;;  %v4555_v12 = vld [vmem:[%s7243_s18 + $0x198] sm:$0xff] }
 0x45a   : > { %5917 = vmatprep.subr.bf16.mxu1 %v5916_v14 }
 0x45d   : > { %5919 = vmatpush3.bf16.msra.mxu1 %v5916_v14  ;;  %v2610_v14 = vld [vmem:[%s7243_s18 + $0x20] sm:$0xff] }
 0x45e   : > { %5303 = vmatprep.subr.mxu1 %v2266_v15 }
 0x461   : > { %5304 = vmatpush3.msra.mxu1 %v2266_v15  ;;  %v2611_v15 = vld [vmem:[%s7243_s18 + $0x28] sm:$0xff] }
 0x462   : > { %5306 = vmatmul.mubr.msk.f32.vlgmr.msra.gmra.mrb[4].mxu1 %vm2288_vm9, %v2249_v44  ;;  %5921 = vmatprep.subr.bf16.mxu1 %v5920_v22  ;;  %v4521_v44 = vld [vmem:[%s7243_s18 + $0xa8] sm:$0xff]  ;;  %v5961_v19 = vpack.c.bf16 %v2611_v15, %v2610_v14  ;;  %v4589_v14 = vld [vmem:[%s7243_s18 + $0x298] sm:$0xff] }
 0x463   : > { %5308 = vmatprep.mubr.msk.f32.mxu1 %vm2288_vm9, %v2251_v59  ;;  %5923 = vmatpush3.bf16.msra.mxu1 %v5920_v22  ;;  %v5949_v45 = vpack.c.bf16 %v4521_v44, %v4520_v43  ;;  %v2612_v22 = vld [vmem:[%s7243_s18 + $0x30] sm:$0xff]  ;;  %v4578_v43 = vld [vmem:[%s7243_s18 + $0x240] sm:$0xff]  ;;  %v4579_v44 = vld [vmem:[%s7243_s18 + $0x248] sm:$0xff] }
 0x464   : > { %5925 = vmatprep.subr.bf16.mxu1 %v5924_v23  ;;  %v6045_v46 = vpack.c.bf16 %v4579_v44, %v4578_v43  ;;  %v4573_v44 = vld [vmem:[%s7243_s18 + $0x220] sm:$0xff] }
 0x465   : > { %5950 = vmatpush3.bf16.msra.mxu0 %v5949_v45 }
 0x466   : > { %5309 = vmatmul.mubr.msk.f32.gmra.mrb[6].mxu1 %vm2288_vm9, %v2253_v60  ;;  %5951 = vmatprep.subr.bf16.mxu0 %v6763_v18  ;;  %v2607_v60 = vld [vmem:[%s7243_s18 + $0x8] sm:$0xff] }
 0x467   : > { %5927 = vmatpush3.bf16.msra.mxu1 %v5924_v23  ;;  %5329 = vmatprep.mubr.msk.f32.mxu1 %vm2288_vm9, %v2487_v1  ;;  %v5955_v4 = vpack.c.bf16 %v2607_v60, %v2606_v58  ;;  %v2613_v23 = vld [vmem:[%s7243_s18 + $0x38] sm:$0xff]  ;;  %v4545_v60 = vld [vmem:[%s7243_s18 + $0x150] sm:$0xff] }
 0x468   : > { %5929 = vmatprep.subr.bf16.mxu1 %v5928_v26 }
 0x469   : > { %5953 = vmatpush3.bf16.msra.mxu0 %v5952_v52  ;;  %v5994_v52 = vpack.c.bf16 %v4542_v49, %v4541_v47  ;;  %v4613_v47 = vld [vmem:[%s7243_s18 + $0x348] sm:$0xff] }
 0x46a   : > { %5954 = vmatprep.subr.bf16.mxu0 %v6763_v18 }
 0x46b   : > { %5931 = vmatpush3.bf16.msra.mxu1 %v5928_v26  ;;  %v5964_v26 = vpack.c.bf16 %v2613_v23, %v2612_v22  ;;  %v4605_v22 = vld [vmem:[%s7243_s18 + $0x308] sm:$0xff] }
 0x46c   : > { %5933 = vmatprep.subr.bf16.mxu1 %v5932_v29 }
 0x46f   : > { %5935 = vmatpush3.bf16.msra.mxu1 %v5932_v29  ;;  %v2615_v29 = vld [vmem:[%s7243_s18 + $0x48] sm:$0xff] }
 0x470   : > { %5327 = vmatprep.subr.mxu1 %v4506_v30  ;;  %v5967_v32 = vpack.c.bf16 %v2615_v29, %v2614_v28  ;;  %v4568_v28 = vld [vmem:[%s7243_s18 + $0x1f8] sm:$0xff]  ;;  %v4606_v29 = vld [vmem:[%s7243_s18 + $0x310] sm:$0xff] }
 0x473   : > { %5328 = vmatpush3.msra.mxu1 %v4506_v30  ;;  %v4560_v30 = vld [vmem:[%s7243_s18 + $0x1c0] sm:$0xff] }
 0x474   : > { %5330 = vmatmul.mubr.msk.f32.vlgmr.msra.gmra.mrb[4].mxu1 %vm2288_vm9, %v2489_v8  ;;  %5972 = vmatprep.subr.bf16.mxu1 %v6763_v18 }
 0x475   : > { %5332 = vmatprep.mubr.msk.f32.mxu1 %vm2288_vm9, %v2491_v9  ;;  %5974 = vmatpush3.bf16.msra.mxu1 %v5973_v33  ;;  %v2609_v9 = vld [vmem:[%s7243_s18 + $0x18] sm:$0xff]  ;;  %v6021_v33 = vpack.c.bf16 %v4561_v31, %v4560_v30  ;;  %v6030_v31 = vpack.c.bf16 %v4568_v28, %v4567_v25  ;;  %v4638_v25 = vld [vmem:[%s7243_s18 + $0x400] sm:$0xff] }
 0x476   : > { %5975 = vmatprep.subr.bf16.mxu1 %v6763_v18  ;;  %v5958_v11 = vpack.c.bf16 %v2609_v9, %v2608_v6  ;;  %v4548_v6 = vld [vmem:[%s7243_s18 + $0x168] sm:$0xff]  ;;  %v4607_v30 = vld [vmem:[%s7243_s18 + $0x318] sm:$0xff] }
 0x478   : > { %5333 = vmatmul.mubr.msk.f32.gmra.mrb[6].mxu1 %vm2288_vm9, %v2493_v10  ;;  %v4554_v10 = vld [vmem:[%s7243_s18 + $0x190] sm:$0xff] }
 0x479   : > { %5977 = vmatpush3.bf16.msra.mxu1 %v5976_v37  ;;  %5413 = vmatprep.mubr.msk.f32.mxu1 %vm6764_vm10, %v6762_v20  ;;  %v6012_v13 = vpack.c.bf16 %v4555_v12, %v4554_v10  ;;  %v4562_v37 = vld [vmem:[%s7243_s18 + $0x1d0] sm:$0xff] }
 0x47a   : > { %5978 = vmatprep.subr.bf16.mxu1 %v6763_v18  ;;  %v4549_v12 = vld [vmem:[%s7243_s18 + $0x170] sm:$0xff] }
 0x47d   : > { %5980 = vmatpush3.bf16.msra.mxu1 %v5979_v40  ;;  %v6024_v40 = vpack.c.bf16 %v4563_v38, %v4562_v37  ;;  %v6087_v38 = vpack.c.bf16 %v4609_v35, %v4608_v34  ;;  %v4617_v34 = vld [vmem:[%s7243_s18 + $0x360] sm:$0xff]  ;;  %v4618_v35 = vld [vmem:[%s7243_s18 + $0x368] sm:$0xff] }
 0x47e   : > { %5981 = vmatprep.subr.bf16.mxu1 %v6763_v18 }
 0x481   : > { %5983 = vmatpush3.bf16.msra.mxu1 %v5982_v36  ;;  %v4540_v36 = vld [vmem:[%s7243_s18 + $0x128] sm:$0xff] }
 0x482   : > { %5984 = vmatprep.subr.bf16.mxu1 %v6763_v18  ;;  %v5991_v45 = vpack.c.bf16 %v4540_v36, %v4539_v41  ;;  %v4610_v41 = vld [vmem:[%s7243_s18 + $0x330] sm:$0xff] }
 0x485   : > { %5986 = vmatpush3.bf16.msra.mxu1 %v5985_v48 }
 0x486   : > { %5987 = vmatprep.subr.bf16.mxu1 %v6763_v18 }
 0x489   : > { %5989 = vmatpush3.bf16.msra.mxu1 %v5988_v54  ;;  %v4543_v54 = vld [vmem:[%s7243_s18 + $0x140] sm:$0xff] }
 0x48a   : > { %6008 = vmatprep.subr.bf16.mxu1 %v6763_v18 }
 0x547   : > { %v7573_v56 = vpop.f32.mrb[4].mxu1 }
 0x548   : > { %v2568_v57 = vpop.f32.mrb[5].mxu1  ;;  %v2599_v42 = vadd.f32 %v7573_v56, %v7571_v55  ;;  %v4582_v56 = vld [vmem:[%s7243_s18 + $0x260] sm:$0xff] }
 0x549   : > { %v2598_v59 = vadd.f32 %v7571_v55, %v2568_v57  ;;  %v4583_v57 = vld [vmem:[%s7243_s18 + $0x268] sm:$0xff] }
 0x54a   : > { %v7633_v48 = vmax.f32 %v2599_v42, 0.0  ;;  %v4611_v42 = vld [vmem:[%s7243_s18 + $0x338] sm:$0xff] }
 0x54b   : > { %v7580_v0 = vmax.f32 %v2598_v59, 0.0  ;;  %v5334_v1 = vpop.f32.mrb[6].mxu1  ;;  %v6051_v59 = vpack.c.bf16 %v4583_v57, %v4582_v56  ;;  %v6090_v43 = vpack.c.bf16 %v4611_v42, %v4610_v41  ;;  %v4591_v57 = vld [vmem:[%s7243_s18 + $0x2a0] sm:$0xff]  ;;  %v4619_v41 = vld [vmem:[%s7243_s18 + $0x370] sm:$0xff] }
 0x54c   : > { %v7583_v2 = vadd.f32 %v5334_v1, %v7571_v55  ;;  %v2578_v3 = vpop.f32.mrb[7].mxu1  ;;  %v4585_v1 = vld [vmem:[%s7243_s18 + $0x278] sm:$0xff]  ;;  %v3226_v42 = vrot.slane %v7633_v48, 6 }
 0x54d   : > { %v2632_v62 = vrot.slane %v7580_v0, 2  ;;  %v2791_v7 = vrot.slane %v7580_v0, 4  ;;  %v7589_v8 = vadd.f32 %v7571_v55, %v2578_v3  ;;  %v4544_v55 = vld [vmem:[%s7243_s18 + $0x148] sm:$0xff]  ;;  %v6000_v3 = vpack.c.bf16 %v4546_v61, %v4545_v60 }
 0x54e   : > { %v5997_v58 = vpack.c.bf16 %v4544_v55, %v4543_v54  ;;  %v4615_v54 = vld [vmem:[%s7243_s18 + $0x358] sm:$0xff]  ;;  %v4631_v60 = vld [vmem:[%s7243_s18 + $0x3c8] sm:$0xff] }
 0x54f   : > { %5360 = vmatmul.mubr.msk.f32.vlgmr.msra.gmra.mrb[12].mxu0 %vm2633_vm11, %v2632_v62  ;;  %5414 = vmatmul.mubr.msk.f32.vlgmr.msra.gmra.mrb[8].mxu1 %vm2633_vm11, %v2791_v7  ;;  %v4586_v62 = vld [vmem:[%s7243_s18 + $0x280] sm:$0xff]  ;;  %v4587_v7 = vld [vmem:[%s7243_s18 + $0x288] sm:$0xff] }
 0x550   : > { %5956 = vmatpush3.bf16.msra.mxu0 %v5955_v4  ;;  %6010 = vmatpush3.bf16.msra.mxu1 %v6009_v5  ;;  %v6054_v4 = vpack.c.bf16 %v4585_v1, %v4584_v63  ;;  %v4547_v5 = vld [vmem:[%s7243_s18 + $0x160] sm:$0xff]  ;;  %v6057_v10 = vpack.c.bf16 %v4587_v7, %v4586_v62  ;;  %v4593_v1 = vld [vmem:[%s7243_s18 + $0x2b0] sm:$0xff]  ;;  %v4633_v62 = vld [vmem:[%s7243_s18 + $0x3d8] sm:$0xff] }
 0x551   : > { %5957 = vmatprep.subr.bf16.mxu0 %v6763_v18  ;;  %6011 = vmatprep.subr.bf16.mxu1 %v6763_v18  ;;  %v6003_v9 = vpack.c.bf16 %v4548_v6, %v4547_v5  ;;  %v4594_v5 = vld [vmem:[%s7243_s18 + $0x2b8] sm:$0xff]  ;;  %v4632_v6 = vld [vmem:[%s7243_s18 + $0x3d0] sm:$0xff] }
 0x552   : > { %5386 = vmatprep.mubr.msk.f32.mxu0 %vm6764_vm10, %v6762_v20  ;;  %5467 = vmatprep.mubr.msk.f32.mxu1 %vm6764_vm10, %v6762_v20  ;;  %v6066_v7 = vpack.c.bf16 %v4594_v5, %v4593_v1  ;;  %v4665_v1 = vld [vmem:[%s7243_s18 + $0x4c8] sm:$0xff] }
 0x554   : > { %5959 = vmatpush3.bf16.msra.mxu0 %v5958_v11  ;;  %6013 = vmatpush3.bf16.msra.mxu1 %v6012_v13  ;;  %v4550_v11 = vld [vmem:[%s7243_s18 + $0x178] sm:$0xff]  ;;  %v4588_v13 = vld [vmem:[%s7243_s18 + $0x290] sm:$0xff] }
 0x555   : > { %5960 = vmatprep.subr.bf16.mxu0 %v6763_v18  ;;  %6014 = vmatprep.subr.bf16.mxu1 %v6763_v18  ;;  %v6006_v15 = vpack.c.bf16 %v4550_v11, %v4549_v12  ;;  %v6060_v16 = vpack.c.bf16 %v4589_v14, %v4588_v13  ;;  %v4634_v12 = vld [vmem:[%s7243_s18 + $0x3e0] sm:$0xff]  ;;  %v4635_v11 = vld [vmem:[%s7243_s18 + $0x3e8] sm:$0xff] }
 0x556   : > { %v6123_v14 = vpack.c.bf16 %v4635_v11, %v4634_v12  ;;  %v4643_v12 = vld [vmem:[%s7243_s18 + $0x420] sm:$0xff]  ;;  %v4644_v11 = vld [vmem:[%s7243_s18 + $0x428] sm:$0xff] }
 0x558   : > { %5962 = vmatpush3.bf16.msra.mxu0 %v5961_v19  ;;  %6016 = vmatpush3.bf16.msra.mxu1 %v6015_v21  ;;  %v4566_v19 = vld [vmem:[%s7243_s18 + $0x1e8] sm:$0xff]  ;;  %v4604_v21 = vld [vmem:[%s7243_s18 + $0x300] sm:$0xff] }
 0x559   : > { %5963 = vmatprep.subr.bf16.mxu0 %v6763_v18  ;;  %6017 = vmatprep.subr.bf16.mxu1 %v6763_v18  ;;  %v6027_v23 = vpack.c.bf16 %v4566_v19, %v4565_v17  ;;  %v6081_v24 = vpack.c.bf16 %v4605_v22, %v4604_v21  ;;  %v4636_v17 = vld [vmem:[%s7243_s18 + $0x3f0] sm:$0xff]  ;;  %v4637_v19 = vld [vmem:[%s7243_s18 + $0x3f8] sm:$0xff] }
 0x55a   : > { %v6126_v22 = vpack.c.bf16 %v4637_v19, %v4636_v17  ;;  %v4645_v17 = vld [vmem:[%s7243_s18 + $0x430] sm:$0xff]  ;;  %v7815_v19 = vmax.f32 %v7583_v2, 0.0 }
 0x55c   : > { %5965 = vmatpush3.bf16.msra.mxu0 %v5964_v26  ;;  %6019 = vmatpush3.bf16.msra.mxu1 %v6018_v27  ;;  %v3139_v26 = vrot.slane %v7633_v48, 4  ;;  %v2878_v27 = vrot.slane %v7580_v0, 6 }
 0x55d   : > { %5966 = vmatprep.subr.bf16.mxu0 %v6763_v18  ;;  %6020 = vmatprep.subr.bf16.mxu1 %v6763_v18 }
 0x560   : > { %5968 = vmatpush3.bf16.msra.mxu0 %v5967_v32  ;;  %6022 = vmatpush3.bf16.msra.mxu1 %v6021_v33  ;;  %v6084_v32 = vpack.c.bf16 %v4607_v30, %v4606_v29  ;;  %v4570_v33 = vld [vmem:[%s7243_s18 + $0x208] sm:$0xff]  ;;  %v4601_v29 = vld [vmem:[%s7243_s18 + $0x2f0] sm:$0xff]  ;;  %v4602_v30 = vld [vmem:[%s7243_s18 + $0x2f8] sm:$0xff] }
 0x561   : > { %5969 = vmatprep.subr.bf16.mxu0 %v6763_v18  ;;  %6023 = vmatprep.subr.bf16.mxu1 %v6763_v18 }
 0x564   : > { %5971 = vmatpush3.bf16.msra.mxu0 %v5970_v39  ;;  %6025 = vmatpush3.bf16.msra.mxu1 %v6024_v40  ;;  %v4571_v39 = vld [vmem:[%s7243_s18 + $0x210] sm:$0xff]  ;;  %v4572_v40 = vld [vmem:[%s7243_s18 + $0x218] sm:$0xff] }
 0x565   : > { %5990 = vmatprep.subr.bf16.mxu0 %v6763_v18  ;;  %6044 = vmatprep.subr.bf16.mxu1 %v6763_v18  ;;  %v6036_v36 = vpack.c.bf16 %v4572_v40, %v4571_v39  ;;  %v6099_v39 = vpack.c.bf16 %v4618_v35, %v4617_v34  ;;  %v4689_v34 = vld [vmem:[%s7243_s18 + $0x578] sm:$0xff] }
 0x567   : > { %5387 = vmatmul.mubr.msk.f32.vlgmr.msra.gmra.mrb[14].mxu0 %vm2633_vm11, %v7580_v0  ;;  %5468 = vmatmul.mubr.msk.f32.vlgmr.msra.gmra.mrb[10].mxu1 %vm2633_vm11, %v7633_v48  ;;  %v4569_v0 = vld [vmem:[%s7243_s18 + $0x200] sm:$0xff] }
 0x568   : > { %5992 = vmatpush3.bf16.msra.mxu0 %v5991_v45  ;;  %6046 = vmatpush3.bf16.msra.mxu1 %v6045_v46  ;;  %v6033_v37 = vpack.c.bf16 %v4570_v33, %v4569_v0  ;;  %v4574_v45 = vld [vmem:[%s7243_s18 + $0x228] sm:$0xff]  ;;  %v4612_v46 = vld [vmem:[%s7243_s18 + $0x340] sm:$0xff]  ;;  %v6078_v0 = vpack.c.bf16 %v4602_v30, %v4601_v29 }
 0x569   : > { %5993 = vmatprep.subr.bf16.mxu0 %v6763_v18  ;;  %6047 = vmatprep.subr.bf16.mxu1 %v6763_v18  ;;  %v6039_v49 = vpack.c.bf16 %v4574_v45, %v4573_v44  ;;  %v6093_v50 = vpack.c.bf16 %v4613_v47, %v4612_v46  ;;  %v4658_v44 = vld [vmem:[%s7243_s18 + $0x490] sm:$0xff]  ;;  %v4659_v45 = vld [vmem:[%s7243_s18 + $0x498] sm:$0xff]  ;;  %v4621_v47 = vld [vmem:[%s7243_s18 + $0x380] sm:$0xff] }
 0x56a   : > { %5440 = vmatprep.mubr.msk.f32.mxu0 %vm6764_vm10, %v6762_v20  ;;  %5521 = vmatprep.mubr.msk.f32.mxu1 %vm6764_vm10, %v6762_v20  ;;  %v6156_v46 = vpack.c.bf16 %v4659_v45, %v4658_v44  ;;  %v4687_v29 = vld [vmem:[%s7243_s18 + $0x568] sm:$0xff]  ;;  %v4654_v44 = vld [vmem:[%s7243_s18 + $0x478] sm:$0xff]  ;;  %v4692_v45 = vld [vmem:[%s7243_s18 + $0x590] sm:$0xff] }
 0x56c   : > { %5995 = vmatpush3.bf16.msra.mxu0 %v5994_v52  ;;  %6049 = vmatpush3.bf16.msra.mxu1 %v6048_v53  ;;  %v4576_v52 = vld [vmem:[%s7243_s18 + $0x238] sm:$0xff]  ;;  %v4614_v53 = vld [vmem:[%s7243_s18 + $0x350] sm:$0xff] }
 0x56d   : > { %5996 = vmatprep.subr.bf16.mxu0 %v6763_v18  ;;  %6050 = vmatprep.subr.bf16.mxu1 %v6763_v18  ;;  %v6042_v55 = vpack.c.bf16 %v4576_v52, %v4575_v51  ;;  %v6096_v56 = vpack.c.bf16 %v4615_v54, %v4614_v53  ;;  %v4661_v51 = vld [vmem:[%s7243_s18 + $0x4a8] sm:$0xff]  ;;  %v4623_v54 = vld [vmem:[%s7243_s18 + $0x390] sm:$0xff] }
 0x570   : > { %5998 = vmatpush3.bf16.msra.mxu0 %v5997_v58  ;;  %6052 = vmatpush3.bf16.msra.mxu1 %v6051_v59  ;;  %v4592_v58 = vld [vmem:[%s7243_s18 + $0x2a8] sm:$0xff]  ;;  %v4630_v59 = vld [vmem:[%s7243_s18 + $0x3c0] sm:$0xff] }
 0x571   : > { %5999 = vmatprep.subr.bf16.mxu0 %v6763_v18  ;;  %6053 = vmatprep.subr.bf16.mxu1 %v6763_v18  ;;  %v6063_v61 = vpack.c.bf16 %v4592_v58, %v4591_v57  ;;  %v6117_v63 = vpack.c.bf16 %v4631_v60, %v4630_v59  ;;  %v4663_v57 = vld [vmem:[%s7243_s18 + $0x4b8] sm:$0xff]  ;;  %v4625_v60 = vld [vmem:[%s7243_s18 + $0x3a0] sm:$0xff] }
 0x574   : > { %6001 = vmatpush3.bf16.msra.mxu0 %v6000_v3  ;;  %6055 = vmatpush3.bf16.msra.mxu1 %v6054_v4  ;;  %v3052_v3 = vrot.slane %v7633_v48, 2  ;;  %v7725_v4 = vmax.f32 %v7589_v8, 0.0  ;;  %v6120_v8 = vpack.c.bf16 %v4633_v62, %v4632_v6  ;;  %v4627_v6 = vld [vmem:[%s7243_s18 + $0x3b0] sm:$0xff]  ;;  %v4628_v62 = vld [vmem:[%s7243_s18 + $0x3b8] sm:$0xff] }
 0x575   : > { %6002 = vmatprep.subr.bf16.mxu0 %v6763_v18  ;;  %6056 = vmatprep.subr.bf16.mxu1 %v6763_v18 }
 0x578   : > { %6004 = vmatpush3.bf16.msra.mxu0 %v6003_v9  ;;  %6058 = vmatpush3.bf16.msra.mxu1 %v6057_v10  ;;  %v4595_v9 = vld [vmem:[%s7243_s18 + $0x2c0] sm:$0xff]  ;;  %v4596_v10 = vld [vmem:[%s7243_s18 + $0x2c8] sm:$0xff] }
 0x579   : > { %6005 = vmatprep.subr.bf16.mxu0 %v6763_v18  ;;  %6059 = vmatprep.subr.bf16.mxu1 %v6763_v18  ;;  %v6069_v13 = vpack.c.bf16 %v4596_v10, %v4595_v9  ;;  %v6114_v9 = vpack.c.bf16 %v4628_v62, %v4627_v6  ;;  %v4680_v6 = vld [vmem:[%s7243_s18 + $0x538] sm:$0xff] }
 0x57c   : > { %6007 = vmatpush3.bf16.msra.mxu0 %v6006_v15  ;;  %6061 = vmatpush3.bf16.msra.mxu1 %v6060_v16  ;;  %v4597_v15 = vld [vmem:[%s7243_s18 + $0x2d0] sm:$0xff]  ;;  %v4598_v16 = vld [vmem:[%s7243_s18 + $0x2d8] sm:$0xff] }
 0x57d   : > { %6026 = vmatprep.subr.bf16.mxu0 %v6763_v18  ;;  %6080 = vmatprep.subr.bf16.mxu1 %v6763_v18  ;;  %v6072_v21 = vpack.c.bf16 %v4598_v16, %v4597_v15  ;;  %v6135_v15 = vpack.c.bf16 %v4644_v11, %v4643_v12  ;;  %v4697_v12 = vld [vmem:[%s7243_s18 + $0x5b0] sm:$0xff]  ;;  %v4698_v11 = vld [vmem:[%s7243_s18 + $0x5b8] sm:$0xff] }
 0x57f   : > { %5441 = vmatmul.mubr.msk.f32.vlgmr.msra.gmra.mrb[16].mxu0 %vm2633_vm11, %v2878_v27  ;;  %5522 = vmatmul.mubr.msk.f32.vlgmr.msra.gmra.mrb[12].mxu1 %vm2633_vm11, %v3139_v26  ;;  %v4639_v26 = vld [vmem:[%s7243_s18 + $0x408] sm:$0xff] }
 0x580   : > { %6028 = vmatpush3.bf16.msra.mxu0 %v6027_v23  ;;  %6082 = vmatpush3.bf16.msra.mxu1 %v6081_v24  ;;  %v4599_v23 = vld [vmem:[%s7243_s18 + $0x2e0] sm:$0xff]  ;;  %v4600_v24 = vld [vmem:[%s7243_s18 + $0x2e8] sm:$0xff]  ;;  %v6129_v28 = vpack.c.bf16 %v4639_v26, %v4638_v25 }
 0x581   : > { %6029 = vmatprep.subr.bf16.mxu0 %v6763_v18  ;;  %6083 = vmatprep.subr.bf16.mxu1 %v6763_v18  ;;  %v6075_v27 = vpack.c.bf16 %v4600_v24, %v4599_v23  ;;  %v4684_v23 = vld [vmem:[%s7243_s18 + $0x550] sm:$0xff]  ;;  %v4685_v24 = vld [vmem:[%s7243_s18 + $0x558] sm:$0xff]  ;;  %v4647_v26 = vld [vmem:[%s7243_s18 + $0x440] sm:$0xff] }
 0x582   : > { %5494 = vmatprep.mubr.msk.f32.mxu0 %vm6764_vm10, %v6762_v20  ;;  %5575 = vmatprep.mubr.msk.f32.mxu1 %vm6764_vm10, %v6762_v20  ;;  %v6192_v25 = vpack.c.bf16 %v4685_v24, %v4684_v23  ;;  %v4703_v23 = vld [vmem:[%s7243_s18 + $0x5e0] sm:$0xff]  ;;  %v4704_v24 = vld [vmem:[%s7243_s18 + $0x5e8] sm:$0xff] }
 0x584   : > { %6031 = vmatpush3.bf16.msra.mxu0 %v6030_v31  ;;  %6085 = vmatpush3.bf16.msra.mxu1 %v6084_v32  ;;  %v4640_v31 = vld [vmem:[%s7243_s18 + $0x410] sm:$0xff]  ;;  %v4641_v32 = vld [vmem:[%s7243_s18 + $0x418] sm:$0xff] }
 0x585   : > { %6032 = vmatprep.subr.bf16.mxu0 %v6763_v18  ;;  %6086 = vmatprep.subr.bf16.mxu1 %v6763_v18  ;;  %v6132_v33 = vpack.c.bf16 %v4641_v32, %v4640_v31  ;;  %v4649_v32 = vld [vmem:[%s7243_s18 + $0x450] sm:$0xff] }
 0x588   : > { %6034 = vmatpush3.bf16.msra.mxu0 %v6033_v37  ;;  %6088 = vmatpush3.bf16.msra.mxu1 %v6087_v38  ;;  %v4656_v37 = vld [vmem:[%s7243_s18 + $0x480] sm:$0xff]  ;;  %v4657_v38 = vld [vmem:[%s7243_s18 + $0x488] sm:$0xff] }
 0x589   : > { %6035 = vmatprep.subr.bf16.mxu0 %v6763_v18  ;;  %6089 = vmatprep.subr.bf16.mxu1 %v6763_v18  ;;  %v6153_v40 = vpack.c.bf16 %v4657_v38, %v4656_v37  ;;  %v4651_v38 = vld [vmem:[%s7243_s18 + $0x460] sm:$0xff] }
 0x58c   : > { %6037 = vmatpush3.bf16.msra.mxu0 %v6036_v36  ;;  %6091 = vmatpush3.bf16.msra.mxu1 %v6090_v43  ;;  %v3487_v36 = vrot.slane %v7725_v4, 4  ;;  %v4620_v43 = vld [vmem:[%s7243_s18 + $0x378] sm:$0xff] }
 0x58d   : > { %6038 = vmatprep.subr.bf16.mxu0 %v6763_v18  ;;  %6092 = vmatprep.subr.bf16.mxu1 %v6763_v18  ;;  %v6102_v48 = vpack.c.bf16 %v4620_v43, %v4619_v41  ;;  %v4691_v41 = vld [vmem:[%s7243_s18 + $0x588] sm:$0xff]  ;;  %v4653_v43 = vld [vmem:[%s7243_s18 + $0x470] sm:$0xff] }
 0x590   : > { %6040 = vmatpush3.bf16.msra.mxu0 %v6039_v49  ;;  %6094 = vmatpush3.bf16.msra.mxu1 %v6093_v50  ;;  %v4622_v49 = vld [vmem:[%s7243_s18 + $0x388] sm:$0xff]  ;;  %v4660_v50 = vld [vmem:[%s7243_s18 + $0x4a0] sm:$0xff] }
 0x591   : > { %6041 = vmatprep.subr.bf16.mxu0 %v6763_v18  ;;  %6095 = vmatprep.subr.bf16.mxu1 %v6763_v18  ;;  %v6105_v52 = vpack.c.bf16 %v4622_v49, %v4621_v47  ;;  %v6159_v53 = vpack.c.bf16 %v4661_v51, %v4660_v50  ;;  %v4669_v49 = vld [vmem:[%s7243_s18 + $0x4e0] sm:$0xff]  ;;  %v4670_v50 = vld [vmem:[%s7243_s18 + $0x4e8] sm:$0xff] }
 0x592   : > { %v6171_v51 = vpack.c.bf16 %v4670_v50, %v4669_v49  ;;  %v4011_v50 = vld [vmem:[%s7911_s20 + $0x30] sm:$0xff] }
 0x594   : > { %6043 = vmatpush3.bf16.msra.mxu0 %v6042_v55  ;;  %6097 = vmatpush3.bf16.msra.mxu1 %v6096_v56  ;;  %v4624_v55 = vld [vmem:[%s7243_s18 + $0x398] sm:$0xff]  ;;  %v4662_v56 = vld [vmem:[%s7243_s18 + $0x4b0] sm:$0xff] }
 0x595   : > { %6062 = vmatprep.subr.bf16.mxu0 %v6763_v18  ;;  %6116 = vmatprep.subr.bf16.mxu1 %v6763_v18  ;;  %v6108_v58 = vpack.c.bf16 %v4624_v55, %v4623_v54  ;;  %v6162_v59 = vpack.c.bf16 %v4663_v57, %v4662_v56  ;;  %v4671_v54 = vld [vmem:[%s7243_s18 + $0x4f0] sm:$0xff]  ;;  %v4672_v55 = vld [vmem:[%s7243_s18 + $0x4f8] sm:$0xff]  ;;  %v4674_v57 = vld [vmem:[%s7243_s18 + $0x508] sm:$0xff] }
 0x596   : > { %v6174_v56 = vpack.c.bf16 %v4672_v55, %v4671_v54  ;;  %v4013_v54 = vld [vmem:[%s7911_s20 + $0x40] sm:$0xff]  ;;  %v4014_v55 = vld [vmem:[%s7911_s20 + $0x48] sm:$0xff] }
 0x597   : > { %5495 = vmatmul.mubr.msk.f32.vlgmr.msra.gmra.mrb[18].mxu0 %vm2633_vm11, %v3052_v3  ;;  %5576 = vmatmul.mubr.msk.f32.vlgmr.msra.gmra.mrb[14].mxu1 %vm2633_vm11, %v7725_v4 }
 0x598   : > { %6064 = vmatpush3.bf16.msra.mxu0 %v6063_v61  ;;  %6118 = vmatpush3.bf16.msra.mxu1 %v6117_v63  ;;  %v4626_v61 = vld [vmem:[%s7243_s18 + $0x3a8] sm:$0xff]  ;;  %v4664_v63 = vld [vmem:[%s7243_s18 + $0x4c0] sm:$0xff] }
 0x599   : > { %6065 = vmatprep.subr.bf16.mxu0 %v6763_v18  ;;  %6119 = vmatprep.subr.bf16.mxu1 %v6763_v18  ;;  %v6111_v3 = vpack.c.bf16 %v4626_v61, %v4625_v60  ;;  %v6165_v5 = vpack.c.bf16 %v4665_v1, %v4664_v63  ;;  %v4676_v60 = vld [vmem:[%s7243_s18 + $0x518] sm:$0xff]  ;;  %v4677_v63 = vld [vmem:[%s7243_s18 + $0x520] sm:$0xff]  ;;  %v4678_v1 = vld [vmem:[%s7243_s18 + $0x528] sm:$0xff] }
 0x59a   : > { %5548 = vmatprep.mubr.msk.f32.mxu0 %vm6764_vm10, %v6762_v20  ;;  %5629 = vmatprep.mubr.msk.f32.mxu1 %vm6764_vm10, %v6762_v20 }
 0x59c   : > { %6067 = vmatpush3.bf16.msra.mxu0 %v6066_v7  ;;  %6121 = vmatpush3.bf16.msra.mxu1 %v6120_v8  ;;  %v4666_v7 = vld [vmem:[%s7243_s18 + $0x4d0] sm:$0xff]  ;;  %v4667_v8 = vld [vmem:[%s7243_s18 + $0x4d8] sm:$0xff] }
 0x59d   : > { %6068 = vmatprep.subr.bf16.mxu0 %v6763_v18  ;;  %6122 = vmatprep.subr.bf16.mxu1 %v6763_v18  ;;  %v6168_v10 = vpack.c.bf16 %v4667_v8, %v4666_v7  ;;  %v4695_v7 = vld [vmem:[%s7243_s18 + $0x5a0] sm:$0xff]  ;;  %v4696_v8 = vld [vmem:[%s7243_s18 + $0x5a8] sm:$0xff] }
 0x5a0   : > { %6070 = vmatpush3.bf16.msra.mxu0 %v6069_v13  ;;  %6124 = vmatpush3.bf16.msra.mxu1 %v6123_v14  ;;  %v4682_v13 = vld [vmem:[%s7243_s18 + $0x540] sm:$0xff]  ;;  %v4683_v14 = vld [vmem:[%s7243_s18 + $0x548] sm:$0xff] }
 0x5a1   : > { %6071 = vmatprep.subr.bf16.mxu0 %v6763_v18  ;;  %6125 = vmatprep.subr.bf16.mxu1 %v6763_v18  ;;  %v6189_v16 = vpack.c.bf16 %v4683_v14, %v4682_v13  ;;  %v6210_v13 = vpack.c.bf16 %v4698_v11, %v4697_v12  ;;  %v4699_v14 = vld [vmem:[%s7243_s18 + $0x5c0] sm:$0xff] }
 0x5a4   : > { %6073 = vmatpush3.bf16.msra.mxu0 %v6072_v21  ;;  %6127 = vmatpush3.bf16.msra.mxu1 %v6126_v22  ;;  %v3400_v21 = vrot.slane %v7725_v4, 2  ;;  %v4646_v22 = vld [vmem:[%s7243_s18 + $0x438] sm:$0xff] }
 0x5a5   : > { %6074 = vmatprep.subr.bf16.mxu0 %v6763_v18  ;;  %6128 = vmatprep.subr.bf16.mxu1 %v6763_v18  ;;  %v6138_v2 = vpack.c.bf16 %v4646_v22, %v4645_v17  ;;  %v4701_v17 = vld [vmem:[%s7243_s18 + $0x5d0] sm:$0xff] }
 0x5a8   : > { %6076 = vmatpush3.bf16.msra.mxu0 %v6075_v27  ;;  %6130 = vmatpush3.bf16.msra.mxu1 %v6129_v28  ;;  %v4648_v27 = vld [vmem:[%s7243_s18 + $0x448] sm:$0xff]  ;;  %v4686_v28 = vld [vmem:[%s7243_s18 + $0x560] sm:$0xff] }
 0x5a9   : > { %6077 = vmatprep.subr.bf16.mxu0 %v6763_v18  ;;  %6131 = vmatprep.subr.bf16.mxu1 %v6763_v18  ;;  %v6141_v30 = vpack.c.bf16 %v4648_v27, %v4647_v26  ;;  %v6195_v31 = vpack.c.bf16 %v4687_v29, %v4686_v28  ;;  %v3922_v27 = vrot.slane %v7815_v19, 6 }
 0x5ac   : > { %6079 = vmatpush3.bf16.msra.mxu0 %v6078_v0  ;;  %6133 = vmatpush3.bf16.msra.mxu1 %v6132_v33  ;;  %v4650_v0 = vld [vmem:[%s7243_s18 + $0x458] sm:$0xff]  ;;  %v4688_v33 = vld [vmem:[%s7243_s18 + $0x570] sm:$0xff] }
 0x5ad   : > { %6098 = vmatprep.subr.bf16.mxu0 %v6763_v18  ;;  %6152 = vmatprep.subr.bf16.mxu1 %v6763_v18  ;;  %v6144_v35 = vpack.c.bf16 %v4650_v0, %v4649_v32  ;;  %v6198_v37 = vpack.c.bf16 %v4689_v34, %v4688_v33 }
 0x5af   : > { %5549 = vmatmul.mubr.msk.f32.vlgmr.msra.gmra.mrb[20].mxu0 %vm2633_vm11, %v3226_v42  ;;  %5630 = vmatmul.mubr.msk.f32.vlgmr.msra.gmra.mrb[16].mxu1 %vm2633_vm11, %v3487_v36 }
 0x5b0   : > { %6100 = vmatpush3.bf16.msra.mxu0 %v6099_v39  ;;  %6154 = vmatpush3.bf16.msra.mxu1 %v6153_v40  ;;  %v4652_v39 = vld [vmem:[%s7243_s18 + $0x468] sm:$0xff]  ;;  %v4690_v40 = vld [vmem:[%s7243_s18 + $0x580] sm:$0xff] }
 0x5b1   : > { %6101 = vmatprep.subr.bf16.mxu0 %v6763_v18  ;;  %6155 = vmatprep.subr.bf16.mxu1 %v6763_v18  ;;  %v6147_v42 = vpack.c.bf16 %v4652_v39, %v4651_v38  ;;  %v6201_v36 = vpack.c.bf16 %v4691_v41, %v4690_v40  ;;  %v4006_v38 = vld [vmem:[%s7911_s20 + $0x8] sm:$0xff]  ;;  %v4007_v39 = vld [vmem:[%s7911_s20 + $0x10] sm:$0xff]  ;;  %v4008_v41 = vld [vmem:[%s7911_s20 + $0x18] sm:$0xff] }
 0x5b2   : > { %5602 = vmatprep.mubr.msk.f32.mxu0 %vm6764_vm10, %v6762_v20  ;;  %5683 = vmatprep.mubr.msk.f32.mxu1 %vm6764_vm10, %v6762_v20 }
 0x5b4   : > { %6103 = vmatpush3.bf16.msra.mxu0 %v6102_v48  ;;  %6157 = vmatpush3.bf16.msra.mxu1 %v6156_v46  ;;  %v4693_v48 = vld [vmem:[%s7243_s18 + $0x598] sm:$0xff]  ;;  %v6150_v46 = vpack.c.bf16 %v4654_v44, %v4653_v43  ;;  %v4010_v43 = vld [vmem:[%s7911_s20 + $0x28] sm:$0xff] }
 0x5b5   : > { %6104 = vmatprep.subr.bf16.mxu0 %v6763_v18  ;;  %6158 = vmatprep.subr.bf16.mxu1 %v6763_v18  ;;  %v6204_v47 = vpack.c.bf16 %v4693_v48, %v4692_v45 }
 0x5b8   : > { %6106 = vmatpush3.bf16.msra.mxu0 %v6105_v52  ;;  %6160 = vmatpush3.bf16.msra.mxu1 %v6159_v53  ;;  %v3835_v52 = vrot.slane %v7815_v19, 4  ;;  %v3574_v53 = vrot.slane %v7725_v4, 6  ;;  %v4673_v4 = vld [vmem:[%s7243_s18 + $0x500] sm:$0xff] }
 0x5b9   : > { %6107 = vmatprep.subr.bf16.mxu0 %v6763_v18  ;;  %6161 = vmatprep.subr.bf16.mxu1 %v6763_v18 }
 0x5bc   : > { %6109 = vmatpush3.bf16.msra.mxu0 %v6108_v58  ;;  %6163 = vmatpush3.bf16.msra.mxu1 %v6162_v59  ;;  %v6177_v58 = vpack.c.bf16 %v4674_v57, %v4673_v4  ;;  %v4675_v59 = vld [vmem:[%s7243_s18 + $0x510] sm:$0xff]  ;;  %v4015_v4 = vld [vmem:[%s7911_s20 + $0x50] sm:$0xff] }
 0x5bd   : > { %6110 = vmatprep.subr.bf16.mxu0 %v6763_v18  ;;  %6164 = vmatprep.subr.bf16.mxu1 %v6763_v18  ;;  %v6180_v61 = vpack.c.bf16 %v4676_v60, %v4675_v59  ;;  %v4016_v57 = vld [vmem:[%s7911_s20 + $0x58] sm:$0xff] }
 0x5c0   : > { %6112 = vmatpush3.bf16.msra.mxu0 %v6111_v3  ;;  %6166 = vmatpush3.bf16.msra.mxu1 %v6165_v5  ;;  %v6183_v3 = vpack.c.bf16 %v4678_v1, %v4677_v63  ;;  %v4679_v5 = vld [vmem:[%s7243_s18 + $0x530] sm:$0xff] }
 0x5c1   : > { %6113 = vmatprep.subr.bf16.mxu0 %v6763_v18  ;;  %6167 = vmatprep.subr.bf16.mxu1 %v6763_v18  ;;  %v6186_v62 = vpack.c.bf16 %v4680_v6, %v4679_v5 }
 0x5c4   : > { %6115 = vmatpush3.bf16.msra.mxu0 %v6114_v9  ;;  %6169 = vmatpush3.bf16.msra.mxu1 %v6168_v10  ;;  %v6207_v9 = vpack.c.bf16 %v4696_v8, %v4695_v7  ;;  %v3748_v10 = vrot.slane %v7815_v19, 2 }
 0x5c5   : > { %6134 = vmatprep.subr.bf16.mxu0 %v6763_v18  ;;  %6188 = vmatprep.subr.bf16.mxu1 %v6763_v18 }
 0x5c7   : > { %5603 = vmatmul.mubr.msk.f32.vlgmr.msra.gmra.mrb[22].mxu0 %vm2633_vm11, %v3400_v21  ;;  %5684 = vmatmul.mubr.msk.f32.vlgmr.msra.gmra.mrb[18].mxu1 %vm2633_vm11, %v7815_v19  ;;  %v4702_v21 = vld [vmem:[%s7243_s18 + $0x5d8] sm:$0xff] }
 0x5c8   : > { %6136 = vmatpush3.bf16.msra.mxu0 %v6135_v15  ;;  %6190 = vmatpush3.bf16.msra.mxu1 %v6189_v16  ;;  %v4700_v15 = vld [vmem:[%s7243_s18 + $0x5c8] sm:$0xff]  ;;  %v6216_v22 = vpack.c.bf16 %v4702_v21, %v4701_v17  ;;  %v4005_v19 = vld [vmem:[%s7911_s20] sm:$0xff] }
 0x5c9   : > { %6137 = vmatprep.subr.bf16.mxu0 %v6763_v18  ;;  %6191 = vmatprep.subr.bf16.mxu1 %v6763_v18  ;;  %v6213_v16 = vpack.c.bf16 %v4700_v15, %v4699_v14  ;;  %v6225_v40 = vpack.c.bf16 %v4006_v38, %v4005_v19 }
 0x5ca   : > { %5656 = vmatprep.mubr.msk.f32.mxu0 %vm6764_vm10, %v6762_v20  ;;  %5737 = vmatprep.mubr.msk.f32.mxu1 %vm6764_vm10, %v6762_v20 }
 0x5cc   : > { %6139 = vmatpush3.bf16.msra.mxu0 %v6138_v2  ;;  %6193 = vmatpush3.bf16.msra.mxu1 %v6192_v25  ;;  %v4705_v2 = vld [vmem:[%s7243_s18 + $0x5f0] sm:$0xff]  ;;  %v4706_v25 = vld [vmem:[%s7243_s18 + $0x5f8] sm:$0xff] }
 0x5cd   : > { %6140 = vmatprep.subr.bf16.mxu0 %v6763_v18  ;;  %6194 = vmatprep.subr.bf16.mxu1 %v6763_v18  ;;  %v6222_v26 = vpack.c.bf16 %v4706_v25, %v4705_v2 }
 0x5d0   : > { %6142 = vmatpush3.bf16.msra.mxu0 %v6141_v30  ;;  %6196 = vmatpush3.bf16.msra.mxu1 %v6195_v31 }
 0x5d1   : > { %6143 = vmatprep.subr.bf16.mxu0 %v6763_v18  ;;  %6197 = vmatprep.subr.bf16.mxu1 %v6763_v18 }
 0x5d4   : > { %6145 = vmatpush3.bf16.msra.mxu0 %v6144_v35  ;;  %6199 = vmatpush3.bf16.msra.mxu1 %v6198_v37 }
 0x5d5   : > { %6146 = vmatprep.subr.bf16.mxu0 %v6763_v18  ;;  %6200 = vmatprep.subr.bf16.mxu1 %v6763_v18 }
 0x5d8   : > { %6148 = vmatpush3.bf16.msra.mxu0 %v6147_v42  ;;  %6202 = vmatpush3.bf16.msra.mxu1 %v6201_v36  ;;  %v6228_v42 = vpack.c.bf16 %v4008_v41, %v4007_v39  ;;  %v4009_v36 = vld [vmem:[%s7911_s20 + $0x20] sm:$0xff] }
 0x5d9   : > { %6149 = vmatprep.subr.bf16.mxu0 %v6763_v18  ;;  %6203 = vmatprep.subr.bf16.mxu1 %v6763_v18  ;;  %v6231_v48 = vpack.c.bf16 %v4010_v43, %v4009_v36 }
 0x5dc   : > { %6151 = vmatpush3.bf16.msra.mxu0 %v6150_v46  ;;  %6205 = vmatpush3.bf16.msra.mxu1 %v6204_v47 }
 0x5dd   : > { %6170 = vmatprep.subr.bf16.mxu0 %v6763_v18  ;;  %6224 = vmatprep.subr.bf16.mxu1 %v6763_v18 }
 0x5df   : > { %5657 = vmatmul.mubr.msk.f32.vlgmr.msra.gmra.mrb[24].mxu0 %vm2633_vm11, %v3574_v53  ;;  %5738 = vmatmul.mubr.msk.f32.vlgmr.msra.gmra.mrb[20].mxu1 %vm2633_vm11, %v3835_v52 }
 0x5e0   : > { %6172 = vmatpush3.bf16.msra.mxu0 %v6171_v51  ;;  %5710 = vmatprep.mubr.msk.f32.mxu0 %vm6764_vm10, %v6762_v20  ;;  %v4012_v51 = vld [vmem:[%s7911_s20 + $0x38] sm:$0xff] }
 0x5e1   : > { %6173 = vmatprep.subr.bf16.mxu0 %v6763_v18  ;;  %5791 = vmatprep.mubr.msk.f32.mxu1 %vm6764_vm10, %v6762_v20  ;;  %v6234_v53 = vpack.c.bf16 %v4012_v51, %v4011_v50 }
 0x5e2   : > { %6226 = vmatpush3.bf16.msra.mxu1 %v6225_v40 }
 0x5e3   : > { %6227 = vmatprep.subr.bf16.mxu1 %v6763_v18 }
 0x5e4   : > { %6175 = vmatpush3.bf16.msra.mxu0 %v6174_v56  ;;  %v6237_v56 = vpack.c.bf16 %v4014_v55, %v4013_v54 }
 0x5e5   : > { %6176 = vmatprep.subr.bf16.mxu0 %v6763_v18 }
 0x5e6   : > { %6229 = vmatpush3.bf16.msra.mxu1 %v6228_v42 }
 0x5e7   : > { %6230 = vmatprep.subr.bf16.mxu1 %v6763_v18 }
 0x5e8   : > { %6178 = vmatpush3.bf16.msra.mxu0 %v6177_v58  ;;  %v6240_v58 = vpack.c.bf16 %v4016_v57, %v4015_v4 }
 0x5e9   : > { %6179 = vmatprep.subr.bf16.mxu0 %v6763_v18 }
 0x5ea   : > { %6232 = vmatpush3.bf16.msra.mxu1 %v6231_v48 }
 0x5eb   : > { %6233 = vmatprep.subr.bf16.mxu1 %v6763_v18 }
 0x5ec   : > { %6181 = vmatpush3.bf16.msra.mxu0 %v6180_v61 }
 0x5ed   : > { %6182 = vmatprep.subr.bf16.mxu0 %v6763_v18 }
 0x5ee   : > { %6235 = vmatpush3.bf16.msra.mxu1 %v6234_v53 }
 0x5ef   : > { %6236 = vmatprep.subr.bf16.mxu1 %v6763_v18 }
 0x5f0   : > { %6184 = vmatpush3.bf16.msra.mxu0 %v6183_v3 }
 0x5f1   : > { %6185 = vmatprep.subr.bf16.mxu0 %v6763_v18 }
 0x5f2   : > { %6238 = vmatpush3.bf16.msra.mxu1 %v6237_v56 }
 0x5f3   : > { %6239 = vmatprep.subr.bf16.mxu1 %v6763_v18 }
 0x5f4   : > { %6187 = vmatpush3.bf16.msra.mxu0 %v6186_v62 }
 0x5f5   : > { %6206 = vmatprep.subr.bf16.mxu0 %v6763_v18 }
 0x5f6   : > { %6241 = vmatpush3.bf16.msra.mxu1 %v6240_v58 }
 0x5f7   : > { %5711 = vmatmul.mubr.msk.f32.vlgmr.msra.gmra.mrb[26].mxu0 %vm2633_vm11, %v3748_v10 }
 0x5f8   : > { %6208 = vmatpush3.bf16.msra.mxu0 %v6207_v9  ;;  %5764 = vmatprep.mubr.msk.f32.mxu0 %vm6764_vm10, %v6762_v20  ;;  %v6219_v20 = vpack.c.bf16 %v4704_v24, %v4703_v23 }
 0x5f9   : > { %6209 = vmatprep.subr.bf16.mxu0 %v6763_v18 }
 0x5fc   : > { %6211 = vmatpush3.bf16.msra.mxu0 %v6210_v13 }
 0x5fd   : > { %6212 = vmatprep.subr.bf16.mxu0 %v6763_v18 }
 0x600   : > { %6214 = vmatpush3.bf16.msra.mxu0 %v6213_v16 }
 0x601   : > { %6215 = vmatprep.subr.bf16.mxu0 %v6763_v18 }
 0x604   : > { %6217 = vmatpush3.bf16.msra.mxu0 %v6216_v22 }
 0x605   : > { %6218 = vmatprep.subr.bf16.mxu0 %v6763_v18 }
 0x608   : > { %6220 = vmatpush3.bf16.msra.mxu0 %v6219_v20 }
 0x609   : > { %6221 = vmatprep.subr.bf16.mxu0 %v6763_v18 }
 0x60c   : > { %6223 = vmatpush3.bf16.msra.mxu0 %v6222_v26 }
 0x60f   : > { %5765 = vmatmul.mubr.msk.f32.vlgmr.msra.gmra.mrb[28].mxu0 %vm2633_vm11, %v3922_v27  ;;  %v4708_v27 = vld [vmem:[%s698_s11] ss:$0 sm:$0xff] }
 0x622   : > { %v2702_v28 = vpop.f32.mrb[12].mxu0  ;;  %v2860_v29 = vpop.f32.mrb[8].mxu1 }
 0x623   : > { %v5361_v30 = vpop.f32.mrb[13].mxu0  ;;  %v5415_v31 = vpop.f32.mrb[9].mxu1 }
 0x63a   : > { %v2774_v32 = vpop.f32.mrb[14].mxu0  ;;  %v3034_v0 = vpop.f32.mrb[10].mxu1 }
 0x63b   : > { %v2775_v33 = vadd.f32 %v2774_v32, %v2702_v28  ;;  %v5388_v34 = vpop.f32.mrb[15].mxu0  ;;  %v5469_v35 = vpop.f32.mrb[11].mxu1  ;;  %v4709_v32 = vld [vmem:[%s706_s13] ss:$0 sm:$0xff] }
 0x63d   : > { %v2864_v37 = vadd.f32 %v2860_v29, %v2775_v33 }
 0x652   : > { %v2947_v44 = vpop.f32.mrb[16].mxu0  ;;  %v3208_v45 = vpop.f32.mrb[12].mxu1 }
 0x653   : > { %v2951_v46 = vadd.f32 %v2947_v44, %v2864_v37  ;;  %v5442_v47 = vpop.f32.mrb[17].mxu0  ;;  %v5523_v49 = vpop.f32.mrb[13].mxu1 }
 0x655   : > { %v3038_v52 = vadd.f32 %v3034_v0, %v2951_v46 }
 0x66a   : > { %v3121_v59 = vpop.f32.mrb[18].mxu0  ;;  %v3382_v60 = vpop.f32.mrb[14].mxu1 }
 0x66b   : > { %v3125_v61 = vadd.f32 %v3121_v59, %v3038_v52  ;;  %v5496_v63 = vpop.f32.mrb[19].mxu0  ;;  %v5577_v1 = vpop.f32.mrb[15].mxu1 }
 0x66d   : > { %v3212_v3 = vadd.f32 %v3208_v45, %v3125_v61 }
 0x682   : > { %v3295_v5 = vpop.f32.mrb[20].mxu0  ;;  %v3556_v6 = vpop.f32.mrb[16].mxu1 }
 0x683   : > { %v3299_v62 = vadd.f32 %v3295_v5, %v3212_v3  ;;  %v5550_v7 = vpop.f32.mrb[21].mxu0  ;;  %v5631_v8 = vpop.f32.mrb[17].mxu1 }
 0x685   : > { %v3386_v9 = vadd.f32 %v3382_v60, %v3299_v62 }
 0x69a   : > { %v3469_v10 = vpop.f32.mrb[22].mxu0  ;;  %v3730_v12 = vpop.f32.mrb[18].mxu1 }
 0x69b   : > { %v3473_v18 = vadd.f32 %v3469_v10, %v3386_v9  ;;  %v5604_v11 = vpop.f32.mrb[23].mxu0  ;;  %v5685_v13 = vpop.f32.mrb[19].mxu1 }
 0x69d   : > { %v3560_v14 = vadd.f32 %v3556_v6, %v3473_v18 }
 0x6b2   : > { %v3643_v15 = vpop.f32.mrb[24].mxu0  ;;  %v3904_v16 = vpop.f32.mrb[20].mxu1 }
 0x6b3   : > { %v3647_v17 = vadd.f32 %v3643_v15, %v3560_v14  ;;  %v5658_v21 = vpop.f32.mrb[25].mxu0  ;;  %v5739_v22 = vpop.f32.mrb[21].mxu1 }
 0x6b5   : > { %v3734_v23 = vadd.f32 %v3730_v12, %v3647_v17 }
 0x6ca   : > { %v3817_v24 = vpop.f32.mrb[26].mxu0 }
 0x6cb   : > { %v3821_v20 = vadd.f32 %v3817_v24, %v3734_v23  ;;  %v5712_v2 = vpop.f32.mrb[27].mxu0 }
 0x6cd   : > { %v3908_v25 = vadd.f32 %v3904_v16, %v3821_v20 }
 0x6e2   : > { %v3991_v26 = vpop.f32.mrb[28].mxu0 }
 0x6e3   : > { %v3995_v28 = vadd.f32 %v3991_v26, %v3908_v25  ;;  %v5766_v29 = vpop.f32.mrb[29].mxu0 }
 0x6e5   : > { %v4003_v30 = vadd.f32 %v4708_v27, %v3995_v28 }
 0x6e7   : > { %v4004_v31 = vmax.f32 %v4003_v30, 0.0 }
 0x6e9   : > { %5792 = vmatmul.mubr.msk.f32.vlgmr.msra.gmra.mrb[22].mxu1 %vm2633_vm11, %v4004_v31 }
 0x7bc   : > { %v4093_v0 = vpop.f32.mrb[22].mxu1 }
 0x7bd   : > { %v4094_v33 = vadd.f32 %v4709_v32, %v4093_v0  ;;  %v5793_v34 = vpop.f32.mrb[23].mxu1 }
 0x7bf   : > { %4098 = vst.msk [vmem:[%s810_s22] sm:$0x3] %vm4097_vm12, %v4094_v33 }
 0x7c0 PF: > { %s8015_s28 = sld [smem:[#allocation25_spill]]  ;;  %s8016_s11 = sld [smem:[#allocation24_spill]] }
 0x7c1   : > { %s8017_s27 = sld [smem:[#allocation26_spill]]  ;;  %s8018_s25 = smov %s6739_s26 }
 0x7c6   : > { %p38_p2 = scmp.ge.s32.totalorder %s8015_s28, 7   ;;  %s8019_s26 = smov %s8016_s11 }
 0x7c8   :  { %40 = sbr.rel (!%p38_p2) target bundleno = 22 (0x16), region = 254 }
 0x7cf   :  { %4118 = vsyncpa [#allocation3], 1 }
 0x7d0   :  { %4120 = vsyncpa [#allocation3 + $0x1], 1 }
 0x7d1   :  { %4121 = vsyncpa [#allocation5], 1 }
 0x7d2   :  { %4123 = vsyncpa [#allocation5 + $0x1], 1 }
 0x7d3   :  { %4124 = vsyncpa [#allocation8], 1 }
 0x7d4   :  { %4126 = vsyncpa [#allocation8 + $0x1], 1 }
 0x7d5   :  { %4127 = vsyncpa [#allocation11], 1 }
 0x7d6   :  { %4129 = vsyncpa [#allocation11 + $0x1], 1 }
 0x7d7   :  { %4130 = vsyncpa [#allocation14], 1 }
 0x7d8   :  { %4132 = vsyncpa [#allocation14 + $0x1], 1 }
 0x7d9   :  { %4133 = vsyncpa [#allocation17], 1 }
 0x7da   :  { %4135 = vsyncpa [#allocation17 + $0x1], 1 }

// kernel: generator_forward.3
= control target key start
LH: loop header
LB: loop body
LE: loop exit
PB: predicated region body
PF: predicated region fallthrough
CT: control target
= control target key end

     0   :  { %vm99_vm0 = vcmask 1044480   ;;  %v9096_v0 = vmov 0.0   ;;  %vm9097_vm1 = vmmov 0   ;;  %vm49_vm2 = vcmask 1045504   ;;  %s12364_s1 = inlined_call_operand.vmem [shape: f32[9,5,30], index: 1, kind: input, shape index: {}]   ;;  %s12365_s0 = inlined_call_operand.vmem [shape: f32[70,5], index: 0, kind: input, shape index: {}]   ;;  %s12366_s3 = inlined_call_operand.vmem [shape: f32[7,30,40], index: 3, kind: input, shape index: {}]   ;;  %s12367_s2 = inlined_call_operand.vmem [shape: f32[1,30], index: 2, kind: input, shape index: {}]   ;;  %s12368_s5 = inlined_call_operand.vmem [shape: f32[5,40,50], index: 5, kind: input, shape index: {}]   ;;  %s12369_s4 = inlined_call_operand.vmem [shape: f32[1,40], index: 4, kind: input, shape index: {}]   ;;  %s12370_s7 = inlined_call_operand.vmem [shape: f32[35,50,175], index: 7, kind: input, shape index: {}]   ;;  %s12371_s6 = inlined_call_operand.vmem [shape: f32[1,50], index: 6, kind: input, shape index: {}]   ;;  %s12372_s9 = inlined_call_operand.vmem [shape: f32[175,1], index: 9, kind: input, shape index: {}]   ;;  %s12373_s10 = inlined_call_operand.<no memory space> [shape: f32[1,1], index: 10, kind: input, shape index: {}]   ;;  %s12374_s8 = inlined_call_operand.vmem [shape: f32[1,175], index: 8, kind: input, shape index: {}]   ;;  %s12375_s11 = inlined_call_operand.vmem [shape: f32[2,1], index: 11, kind: output, shape index: {}]  }
   0x1   :  { %7800 = vmatprep.subr.mxu0 %v9096_v0  ;;  %v6707_v1 = vld [vmem:[%s12364_s1 + $0x8] sm:$0x1f]  ;;  %7802 = vmatprep.mubr.msk.f32.mxu0 %vm9097_vm1, %v9096_v0  ;;  %v9169_v2 = vld [vmem:[%s12365_s0] sm:$0xff]  ;;  %v63_v3 = vrot.slane %v9096_v0, 2  ;;  %vm80_vm3 = vcmask 39936   ;;  %v9188_v8 = vld [vmem:[%s12365_s0 + $0x10] sm:$0xff] }
   0x2   :  { %v9175_v4 = vld [vmem:[%s12365_s0 + $0x8] sm:$0xff]  ;;  %7801 = vmatpush3.msk.msra.mxu0 %vm99_vm0, %v6707_v1  ;;  %v64_v5 = vrot.slane %v9169_v2, 2  ;;  %8003 = vmatprep.subr.mxu1 %v9096_v0  ;;  %v51_v7 = vld [vmem:[%s12364_s1] sm:$0x1f]  ;;  %v68_v11 = vrot.slane %v9188_v8, 2  ;;  %v9204_v12 = vld [vmem:[%s12365_s0 + $0x18] sm:$0xff] }
   0x3   :  { %v66_v6 = vrot.slane %v9175_v4, 2  ;;  %7829 = vmatprep.subr.mxu0 %v9096_v0  ;;  %8005 = vmatprep.mubr.msk.f32.mxu1 %vm9097_vm1, %v9096_v0  ;;  %v70_v14 = vrot.slane %v9204_v12, 2  ;;  %v9218_v15 = vld [vmem:[%s12365_s0 + $0x20] sm:$0xff]  ;;  %v9231_v18 = vld [vmem:[%s12365_s0 + $0x28] sm:$0xff]  ;;  %v9244_v21 = vld [vmem:[%s12365_s0 + $0x30] sm:$0xff]  ;;  %v9322_v29 = vrot.slane %v9096_v0, 4 }
   0x4   :  { %v65_v9 = vsel %vm49_vm2, %v63_v3, %v64_v5  ;;  %v72_v17 = vrot.slane %v9218_v15, 2  ;;  %v74_v20 = vrot.slane %v9231_v18, 2  ;;  %v76_v23 = vrot.slane %v9244_v21, 2  ;;  %v9257_v24 = vld [vmem:[%s12365_s0 + $0x38] sm:$0xff]  ;;  %v6727_v28 = vld [vmem:[%s12364_s1 + $0x10] sm:$0x1f] }
   0x5   :  { %7803 = vmatmul.mubr.msk.f32.vlgmr.msra.gmra.mrb[0].mxu0 %vm80_vm3, %v65_v9  ;;  %v9198_v10 = vsel %vm49_vm2, %v64_v5, %v66_v6  ;;  %v9212_v13 = vsel %vm49_vm2, %v66_v6, %v68_v11  ;;  %v9225_v16 = vsel %vm49_vm2, %v68_v11, %v70_v14  ;;  %v9267_v26 = vrot.slane %v9257_v24, 2  ;;  %v6738_v33 = vld [vmem:[%s12364_s1 + $0x18] sm:$0x1f]  ;;  %v48_v49 = vld [vmem:[%s12365_s0 + $0x40] sm:$0x3f] }
   0x6   :  { %7830 = vmatpush3.msk.msra.mxu0 %vm99_vm0, %v51_v7  ;;  %7805 = vmatprep.mubr.msk.f32.mxu0 %vm9097_vm1, %v9096_v0  ;;  %v9238_v19 = vsel %vm49_vm2, %v70_v14, %v72_v17  ;;  %v9251_v22 = vsel %vm49_vm2, %v72_v17, %v74_v20  ;;  %v9264_v25 = vsel %vm49_vm2, %v74_v20, %v76_v23  ;;  %v349_v30 = vrot.slane %v9169_v2, 4  ;;  %v6782_v44 = vld [vmem:[%s12364_s1 + $0x38] sm:$0x1f]  ;;  %v6749_v5 = vld [vmem:[%s12364_s1 + $0x20] sm:$0x1f] }
   0x7   :  { %7858 = vmatprep.subr.mxu0 %v9096_v0  ;;  %v9275_v27 = vsel %vm49_vm2, %v76_v23, %v9267_v26  ;;  %vm347_vm4 = vcmask 1043456   ;;  %v351_v32 = vrot.slane %v9175_v4, 4  ;;  %v353_v35 = vrot.slane %v9188_v8, 4  ;;  %8004 = vmatpush3.msk.msra.mxu1 %vm99_vm0, %v6782_v44  ;;  %v6760_v20 = vld [vmem:[%s12364_s1 + $0x28] sm:$0x1f] }
   0x8   :  { %v350_v31 = vsel %vm347_vm4, %v9322_v29, %v349_v30  ;;  %v355_v37 = vrot.slane %v9204_v12, 4  ;;  %v357_v39 = vrot.slane %v9218_v15, 4  ;;  %v359_v41 = vrot.slane %v9231_v18, 4 }
   0x9   :  { %7806 = vmatmul.mubr.msk.f32.gmra.mrb[2].mxu0 %vm80_vm3, %v9198_v10  ;;  %v9340_v34 = vsel %vm347_vm4, %v349_v30, %v351_v32  ;;  %v9349_v36 = vsel %vm347_vm4, %v351_v32, %v353_v35  ;;  %v513_v42 = vrot.slane %v9175_v4, 6  ;;  %v511_v43 = vrot.slane %v9169_v2, 6 }
   0xa   :  { %7808 = vmatprep.mubr.msk.f32.mxu0 %vm9097_vm1, %v9096_v0  ;;  %v9357_v38 = vsel %vm347_vm4, %v353_v35, %v355_v37  ;;  %v9365_v40 = vsel %vm347_vm4, %v355_v37, %v357_v39  ;;  %vm509_vm5 = vcmask 1041408   ;;  %v9378_v45 = vsel %vm347_vm4, %v357_v39, %v359_v41 }
   0xb   :  { %v361_v46 = vrot.slane %v9244_v21, 4  ;;  %v514_v47 = vsel %vm509_vm5, %v511_v43, %v513_v42  ;;  %v515_v48 = vrot.slane %v9188_v8, 6  ;;  %v363_v51 = vrot.slane %v9257_v24, 4 }
   0xc   :  { %8006 = vmatmul.mubr.msk.f32.vlgmr.msra.gmra.mrb[0].mxu1 %vm80_vm3, %v514_v47  ;;  %v517_v53 = vrot.slane %v9204_v12, 6  ;;  %v9401_v54 = vsel %vm49_vm2, %v48_v49, 0.0  ;;  %v519_v58 = vrot.slane %v9218_v15, 6  ;;  %v510_v60 = vrot.slane %v9096_v0, 6 }
   0xd   :  { %7809 = vmatmul.mubr.msk.f32.gmra.mrb[4].mxu0 %vm80_vm3, %v9212_v13  ;;  %8008 = vmatprep.mubr.msk.f32.mxu1 %vm9097_vm1, %v9096_v0  ;;  %v9395_v50 = vsel %vm347_vm4, %v359_v41, %v361_v46  ;;  %v516_v52 = vsel %vm509_vm5, %v513_v42, %v515_v48  ;;  %v9411_v55 = vsel %vm347_vm4, %v361_v46, %v363_v51  ;;  %v365_v56 = vrot.slane %v9401_v54, 4 }
   0xe   :  { %7811 = vmatprep.mubr.msk.f32.mxu0 %vm9097_vm1, %v9096_v0  ;;  %v518_v57 = vsel %vm509_vm5, %v515_v48, %v517_v53  ;;  %v520_v61 = vsel %vm509_vm5, %v517_v53, %v519_v58  ;;  %v521_v62 = vrot.slane %v9231_v18, 6  ;;  %v512_v63 = vsel %vm509_vm5, %v510_v60, %v511_v43 }
   0xf   :  { %v9426_v59 = vsel %vm347_vm4, %v363_v51, %v365_v56  ;;  %v523_v3 = vrot.slane %v9244_v21, 6  ;;  %v525_v7 = vrot.slane %v9257_v24, 6  ;;  %v527_v11 = vrot.slane %v9401_v54, 6 }
  0x10   :  { %8009 = vmatmul.mubr.msk.f32.gmra.mrb[2].mxu1 %vm80_vm3, %v516_v52  ;;  %v522_v1 = vsel %vm509_vm5, %v519_v58, %v521_v62  ;;  %v927_v41 = vsel %vm347_vm4, %v365_v56, %v9322_v29  ;;  %vm9099_vm6 = vmmov 1   ;;  %vm1385_vm8 = vcmask 244736  }
  0x11   :  { %7812 = vmatmul.mubr.msk.f32.gmra.mrb[6].mxu0 %vm80_vm3, %v9225_v16  ;;  %8011 = vmatprep.mubr.msk.f32.mxu1 %vm9097_vm1, %v9096_v0  ;;  %v524_v6 = vsel %vm509_vm5, %v521_v62, %v523_v3  ;;  %v526_v9 = vsel %vm509_vm5, %v523_v3, %v525_v7  ;;  %v528_v14 = vsel %vm509_vm5, %v525_v7, %v527_v11  ;;  %vm9690_vm7 = vmpackc.low %vm49_vm2, %vm9099_vm6  ;;  %vm2453_vm9 = vcmask 326656  }
  0x12   :  { %7814 = vmatprep.mubr.msk.f32.mxu0 %vm9097_vm1, %v9096_v0  ;;  %v1054_v17 = vsel %vm509_vm5, %v527_v11, %v510_v60  ;;  %vm3218_vm10 = vcmask 408576   ;;  %vm6627_vm11 = vcmask 1046528   ;;  %vm6623_vm13 = vcmask 384000  }
  0x13   :  { %vm9022_vm12 = vmpackc.low %vm6627_vm11, %vm9099_vm6  ;;  %vm6701_vm14 = vcmask 1024  }
  0x14   :  { %8012 = vmatmul.mubr.msk.f32.gmra.mrb[4].mxu1 %vm80_vm3, %v518_v57 }
  0x15   :  { %7815 = vmatmul.mubr.msk.f32.gmra.mrb[8].mxu0 %vm80_vm3, %v9238_v19  ;;  %8014 = vmatprep.mubr.msk.f32.mxu1 %vm9097_vm1, %v9096_v0 }
  0x16   :  { %7817 = vmatprep.mubr.msk.f32.mxu0 %vm9097_vm1, %v9096_v0 }
  0x18   :  { %8015 = vmatmul.mubr.msk.f32.gmra.mrb[6].mxu1 %vm80_vm3, %v520_v61 }
  0x19   :  { %7818 = vmatmul.mubr.msk.f32.gmra.mrb[10].mxu0 %vm80_vm3, %v9251_v22  ;;  %8017 = vmatprep.mubr.msk.f32.mxu1 %vm9097_vm1, %v9096_v0 }
  0x1a   :  { %7820 = vmatprep.mubr.msk.f32.mxu0 %vm9097_vm1, %v9096_v0 }
  0x1c   :  { %8018 = vmatmul.mubr.msk.f32.gmra.mrb[8].mxu1 %vm80_vm3, %v522_v1 }
  0x1d   :  { %7821 = vmatmul.mubr.msk.f32.gmra.mrb[12].mxu0 %vm80_vm3, %v9264_v25  ;;  %8020 = vmatprep.mubr.msk.f32.mxu1 %vm9097_vm1, %v9096_v0 }
  0x1e   :  { %7823 = vmatprep.mubr.msk.f32.mxu0 %vm9097_vm1, %v9096_v0 }
  0x20   :  { %8021 = vmatmul.mubr.msk.f32.gmra.mrb[10].mxu1 %vm80_vm3, %v524_v6 }
  0x21   :  { %7824 = vmatmul.mubr.msk.f32.gmra.mrb[14].mxu0 %vm80_vm3, %v9275_v27  ;;  %8023 = vmatprep.mubr.msk.f32.mxu1 %vm9097_vm1, %v9096_v0 }
  0x22   :  { %7826 = vmatprep.mubr.msk.f32.mxu0 %vm9097_vm1, %v9096_v0 }
  0x24   :  { %8024 = vmatmul.mubr.msk.f32.gmra.mrb[12].mxu1 %vm80_vm3, %v526_v9 }
  0x25   :  { %7827 = vmatmul.mubr.msk.f32.gmra.mrb[16].mxu0 %vm80_vm3, %v9267_v26  ;;  %8026 = vmatprep.mubr.msk.f32.mxu1 %vm9097_vm1, %v9096_v0 }
  0x26   :  { %7831 = vmatprep.mubr.msk.f32.mxu0 %vm9097_vm1, %v9096_v0 }
  0x28   :  { %8027 = vmatmul.mubr.msk.f32.gmra.mrb[14].mxu1 %vm80_vm3, %v528_v14 }
  0x29   :  { %7832 = vmatmul.mubr.f32.vlgmr.msra.gmra.mrb[18].mxu0 %v9096_v0  ;;  %8029 = vmatprep.mubr.msk.f32.mxu1 %vm9097_vm1, %v9096_v0 }
  0x2a   :  { %7859 = vmatpush3.msk.msra.mxu0 %vm99_vm0, %v6727_v28  ;;  %7834 = vmatprep.mubr.msk.f32.mxu0 %vm9097_vm1, %v9096_v0 }
  0x2b   :  { %7887 = vmatprep.subr.mxu0 %v9096_v0 }
  0x2c   :  { %8030 = vmatmul.mubr.msk.f32.gmra.mrb[16].mxu1 %vm80_vm3, %v1054_v17 }
  0x2d   :  { %7835 = vmatmul.mubr.msk.f32.gmra.mrb[20].mxu0 %vm80_vm3, %v9169_v2  ;;  %8279 = vmatprep.mubr.msk.f32.mxu1 %vm9097_vm1, %v9096_v0 }
  0x2e   :  { %7837 = vmatprep.mubr.msk.f32.mxu0 %vm9097_vm1, %v9096_v0 }
  0x31   :  { %7838 = vmatmul.mubr.msk.f32.gmra.mrb[22].mxu0 %vm80_vm3, %v9175_v4 }
  0x32   :  { %7840 = vmatprep.mubr.msk.f32.mxu0 %vm9097_vm1, %v9096_v0 }
  0x35   :  { %7841 = vmatmul.mubr.msk.f32.gmra.mrb[24].mxu0 %vm80_vm3, %v9188_v8 }
  0x36   :  { %7843 = vmatprep.mubr.msk.f32.mxu0 %vm9097_vm1, %v9096_v0 }
  0x39   :  { %7844 = vmatmul.mubr.msk.f32.gmra.mrb[26].mxu0 %vm80_vm3, %v9204_v12 }
  0x3a   :  { %7846 = vmatprep.mubr.msk.f32.mxu0 %vm9097_vm1, %v9096_v0 }
  0x3d   :  { %7847 = vmatmul.mubr.msk.f32.gmra.mrb[28].mxu0 %vm80_vm3, %v9218_v15 }
  0x3e   :  { %7849 = vmatprep.mubr.msk.f32.mxu0 %vm9097_vm1, %v9096_v0 }
  0x41   :  { %7850 = vmatmul.mubr.msk.f32.gmra.mrb[30].mxu0 %vm80_vm3, %v9231_v18 }
  0x42   :  { %7852 = vmatprep.mubr.msk.f32.mxu0 %vm9097_vm1, %v9096_v0 }
  0x45   :  { %7853 = vmatmul.mubr.msk.f32.gmra.mrb[32].mxu0 %vm80_vm3, %v9244_v21 }
  0x46   :  { %7855 = vmatprep.mubr.msk.f32.mxu0 %vm9097_vm1, %v9096_v0 }
  0x49   :  { %7856 = vmatmul.mubr.msk.f32.gmra.mrb[34].mxu0 %vm80_vm3, %v9257_v24 }
  0x4a   :  { %7860 = vmatprep.mubr.msk.f32.mxu0 %vm9097_vm1, %v9096_v0 }
  0x4d   :  { %7861 = vmatmul.mubr.msk.f32.vlgmr.msra.gmra.mrb[36].mxu0 %vm80_vm3, %v350_v31 }
  0x4e   :  { %7888 = vmatpush3.msk.msra.mxu0 %vm99_vm0, %v6738_v33  ;;  %7863 = vmatprep.mubr.msk.f32.mxu0 %vm9097_vm1, %v9096_v0 }
  0x4f   :  { %7916 = vmatprep.subr.mxu0 %v9096_v0 }
  0x51   :  { %7864 = vmatmul.mubr.msk.f32.gmra.mrb[38].mxu0 %vm80_vm3, %v9340_v34 }
  0x52   :  { %7866 = vmatprep.mubr.msk.f32.mxu0 %vm9097_vm1, %v9096_v0 }
  0x55   :  { %7867 = vmatmul.mubr.msk.f32.gmra.mrb[40].mxu0 %vm80_vm3, %v9349_v36 }
  0x56   :  { %7869 = vmatprep.mubr.msk.f32.mxu0 %vm9097_vm1, %v9096_v0 }
  0x59   :  { %7870 = vmatmul.mubr.msk.f32.gmra.mrb[42].mxu0 %vm80_vm3, %v9357_v38 }
  0x5a   :  { %7872 = vmatprep.mubr.msk.f32.mxu0 %vm9097_vm1, %v9096_v0 }
  0x5d   :  { %7873 = vmatmul.mubr.msk.f32.gmra.mrb[44].mxu0 %vm80_vm3, %v9365_v40 }
  0x5e   :  { %7875 = vmatprep.mubr.msk.f32.mxu0 %vm9097_vm1, %v9096_v0 }
  0x61   :  { %7876 = vmatmul.mubr.msk.f32.gmra.mrb[46].mxu0 %vm80_vm3, %v9378_v45 }
  0x62   :  { %7878 = vmatprep.mubr.msk.f32.mxu0 %vm9097_vm1, %v9096_v0 }
  0x65   :  { %7879 = vmatmul.mubr.msk.f32.gmra.mrb[48].mxu0 %vm80_vm3, %v9395_v50 }
  0x66   :  { %7881 = vmatprep.mubr.msk.f32.mxu0 %vm9097_vm1, %v9096_v0 }
  0x69   :  { %7882 = vmatmul.mubr.msk.f32.gmra.mrb[50].mxu0 %vm80_vm3, %v9411_v55 }
  0x6a   :  { %7884 = vmatprep.mubr.msk.f32.mxu0 %vm9097_vm1, %v9096_v0 }
  0x6d   :  { %7885 = vmatmul.mubr.msk.f32.gmra.mrb[52].mxu0 %vm80_vm3, %v9426_v59 }
  0x6e   :  { %7889 = vmatprep.mubr.msk.f32.mxu0 %vm9097_vm1, %v9096_v0 }
  0x71   :  { %7890 = vmatmul.mubr.msk.f32.vlgmr.msra.gmra.mrb[54].mxu0 %vm80_vm3, %v512_v63 }
  0x72   :  { %7917 = vmatpush3.msk.msra.mxu0 %vm99_vm0, %v6749_v5  ;;  %7892 = vmatprep.mubr.msk.f32.mxu0 %vm9097_vm1, %v9096_v0 }
  0x73   :  { %7945 = vmatprep.subr.mxu0 %v9096_v0 }
  0x75   :  { %7893 = vmatmul.mubr.msk.f32.gmra.mrb[56].mxu0 %vm80_vm3, %v514_v47 }
  0x76   :  { %7895 = vmatprep.mubr.msk.f32.mxu0 %vm9097_vm1, %v9096_v0 }
  0x79   :  { %7896 = vmatmul.mubr.msk.f32.gmra.mrb[58].mxu0 %vm80_vm3, %v516_v52 }
  0x7a   :  { %7898 = vmatprep.mubr.msk.f32.mxu0 %vm9097_vm1, %v9096_v0 }
  0x7d   :  { %7899 = vmatmul.mubr.msk.f32.gmra.mrb[60].mxu0 %vm80_vm3, %v518_v57 }
  0x7e   :  { %7901 = vmatprep.mubr.msk.f32.mxu0 %vm9097_vm1, %v9096_v0 }
  0x81   :  { %7902 = vmatmul.mubr.msk.f32.gmra.mrb[62].mxu0 %vm80_vm3, %v520_v61 }
  0x82   :  { %7904 = vmatprep.mubr.msk.f32.mxu0 %vm9097_vm1, %v9096_v0 }
  0x85   :  { %7905 = vmatmul.mubr.msk.f32.gmra.mrb[64].mxu0 %vm80_vm3, %v522_v1 }
  0x86   :  { %7907 = vmatprep.mubr.msk.f32.mxu0 %vm9097_vm1, %v9096_v0 }
  0x89   :  { %7908 = vmatmul.mubr.msk.f32.gmra.mrb[66].mxu0 %vm80_vm3, %v524_v6 }
  0x8a   :  { %7910 = vmatprep.mubr.msk.f32.mxu0 %vm9097_vm1, %v9096_v0 }
  0x8d   :  { %7911 = vmatmul.mubr.msk.f32.gmra.mrb[68].mxu0 %vm80_vm3, %v526_v9 }
  0x8e   :  { %7913 = vmatprep.mubr.msk.f32.mxu0 %vm9097_vm1, %v9096_v0 }
  0x91   :  { %7914 = vmatmul.mubr.msk.f32.gmra.mrb[70].mxu0 %vm80_vm3, %v528_v14 }
  0x92   :  { %7918 = vmatprep.mubr.msk.f32.mxu0 %vm9097_vm1, %v9096_v0 }
  0x95   :  { %7919 = vmatmul.mubr.msk.f32.vlgmr.msra.gmra.mrb[72].mxu0 %vm80_vm3, %v9169_v2  ;;  %v6771_v2 = vld [vmem:[%s12364_s1 + $0x30] sm:$0x1f] }
  0x96   :  { %7946 = vmatpush3.msk.msra.mxu0 %vm99_vm0, %v6760_v20  ;;  %7921 = vmatprep.mubr.msk.f32.mxu0 %vm9097_vm1, %v9096_v0 }
  0x97   :  { %7974 = vmatprep.subr.mxu0 %v9096_v0 }
  0x99   :  { %7922 = vmatmul.mubr.msk.f32.gmra.mrb[74].mxu0 %vm80_vm3, %v9175_v4 }
  0x9a   :  { %7924 = vmatprep.mubr.msk.f32.mxu0 %vm9097_vm1, %v9096_v0 }
  0x9d   :  { %7925 = vmatmul.mubr.msk.f32.gmra.mrb[76].mxu0 %vm80_vm3, %v9188_v8 }
  0x9e   :  { %7927 = vmatprep.mubr.msk.f32.mxu0 %vm9097_vm1, %v9096_v0 }
  0xa1   :  { %7928 = vmatmul.mubr.msk.f32.gmra.mrb[78].mxu0 %vm80_vm3, %v9204_v12 }
  0xa2   :  { %7930 = vmatprep.mubr.msk.f32.mxu0 %vm9097_vm1, %v9096_v0 }
  0xa5   :  { %7931 = vmatmul.mubr.msk.f32.gmra.mrb[80].mxu0 %vm80_vm3, %v9218_v15 }
  0xa6   :  { %7933 = vmatprep.mubr.msk.f32.mxu0 %vm9097_vm1, %v9096_v0 }
  0xa9   :  { %7934 = vmatmul.mubr.msk.f32.gmra.mrb[82].mxu0 %vm80_vm3, %v9231_v18 }
  0xaa   :  { %7936 = vmatprep.mubr.msk.f32.mxu0 %vm9097_vm1, %v9096_v0 }
  0xad   :  { %7937 = vmatmul.mubr.msk.f32.gmra.mrb[84].mxu0 %vm80_vm3, %v9244_v21 }
  0xae   :  { %7939 = vmatprep.mubr.msk.f32.mxu0 %vm9097_vm1, %v9096_v0 }
  0xb1   :  { %7940 = vmatmul.mubr.msk.f32.gmra.mrb[86].mxu0 %vm80_vm3, %v9257_v24 }
  0xb2   :  { %7942 = vmatprep.mubr.msk.f32.mxu0 %vm9097_vm1, %v9096_v0 }
  0xb5   :  { %7943 = vmatmul.mubr.msk.f32.gmra.mrb[88].mxu0 %vm80_vm3, %v9401_v54 }
  0xb6   :  { %7947 = vmatprep.mubr.msk.f32.mxu0 %vm9097_vm1, %v9096_v0 }
  0xb9   :  { %7948 = vmatmul.mubr.msk.f32.vlgmr.msra.gmra.mrb[90].mxu0 %vm80_vm3, %v9198_v10  ;;  %v797_v10 = vrot.slane %v9401_v54, 2 }
  0xba   :  { %7975 = vmatpush3.msk.msra.mxu0 %vm99_vm0, %v6771_v2  ;;  %7950 = vmatprep.mubr.msk.f32.mxu0 %vm9097_vm1, %v9096_v0 }
  0xbb   :  { %8032 = vmatprep.subr.mxu0 %v9096_v0 }
  0xbd   :  { %7951 = vmatmul.mubr.msk.f32.gmra.mrb[92].mxu0 %vm80_vm3, %v9212_v13  ;;  %v798_v13 = vsel %vm49_vm2, %v9267_v26, %v797_v10 }
  0xbe   :  { %7953 = vmatprep.mubr.msk.f32.mxu0 %vm9097_vm1, %v9096_v0 }
  0xc1   :  { %7954 = vmatmul.mubr.msk.f32.gmra.mrb[94].mxu0 %vm80_vm3, %v9225_v16 }
  0xc2   :  { %7956 = vmatprep.mubr.msk.f32.mxu0 %vm9097_vm1, %v9096_v0 }
  0xc5   :  { %7957 = vmatmul.mubr.msk.f32.gmra.mrb[96].mxu0 %vm80_vm3, %v9238_v19 }
  0xc6   :  { %7959 = vmatprep.mubr.msk.f32.mxu0 %vm9097_vm1, %v9096_v0 }
  0xc9   :  { %7960 = vmatmul.mubr.msk.f32.gmra.mrb[98].mxu0 %vm80_vm3, %v9251_v22  ;;  %v6793_v22 = vld [vmem:[%s12364_s1 + $0x40] sm:$0x1f] }
  0xca   :  { %7962 = vmatprep.mubr.msk.f32.mxu0 %vm9097_vm1, %v9096_v0 }
  0xcd   :  { %7963 = vmatmul.mubr.msk.f32.gmra.mrb[100].mxu0 %vm80_vm3, %v9264_v25 }
  0xce   :  { %7965 = vmatprep.mubr.msk.f32.mxu0 %vm9097_vm1, %v9096_v0 }
  0xd1   :  { %7966 = vmatmul.mubr.msk.f32.gmra.mrb[102].mxu0 %vm80_vm3, %v9275_v27 }
  0xd2   :  { %7968 = vmatprep.mubr.msk.f32.mxu0 %vm9097_vm1, %v9096_v0 }
  0xd5   :  { %7969 = vmatmul.mubr.msk.f32.gmra.mrb[104].mxu0 %vm80_vm3, %v798_v13 }
  0xd6   :  { %7971 = vmatprep.mubr.msk.f32.mxu0 %vm9097_vm1, %v9096_v0 }
  0xd8   :  { %v169_v16 = vpop.f32.mrb[0].mxu0 }
  0xd9   :  { %v7804_v19 = vpop.f32.mrb[1].mxu0  ;;  %7972 = vmatmul.mubr.msk.f32.gmra.mrb[106].mxu0 %vm80_vm3, %v797_v10 }
  0xda   :  { %7976 = vmatprep.mubr.msk.f32.mxu0 %vm9097_vm1, %v9096_v0 }
  0xdc   :  { %v174_v23 = vpop.f32.mrb[2].mxu0 }
  0xdd   :  { %v7807_v25 = vpop.f32.mrb[3].mxu0  ;;  %7977 = vmatmul.mubr.msk.f32.vlgmr.msra.gmra.mrb[108].mxu0 %vm80_vm3, %v9340_v34 }
  0xde   :  { %8033 = vmatpush3.msk.msra.mxu0 %vm99_vm0, %v6793_v22  ;;  %7979 = vmatprep.mubr.msk.f32.mxu0 %vm9097_vm1, %v9096_v0 }
  0xe0   :  { %v179_v26 = vpop.f32.mrb[4].mxu0 }
  0xe1   :  { %v7810_v27 = vpop.f32.mrb[5].mxu0  ;;  %7980 = vmatmul.mubr.msk.f32.gmra.mrb[110].mxu0 %vm80_vm3, %v9349_v36 }
  0xe2   :  { %7982 = vmatprep.mubr.msk.f32.mxu0 %vm9097_vm1, %v9096_v0 }
  0xe4   :  { %v184_v28 = vpop.f32.mrb[6].mxu0 }
  0xe5   :  { %v7813_v30 = vpop.f32.mrb[7].mxu0  ;;  %7983 = vmatmul.mubr.msk.f32.gmra.mrb[112].mxu0 %vm80_vm3, %v9357_v38 }
  0xe6   :  { %7985 = vmatprep.mubr.msk.f32.mxu0 %vm9097_vm1, %v9096_v0 }
  0xe8   :  { %v189_v31 = vpop.f32.mrb[8].mxu0 }
  0xe9   :  { %v7816_v32 = vpop.f32.mrb[9].mxu0  ;;  %7986 = vmatmul.mubr.msk.f32.gmra.mrb[114].mxu0 %vm80_vm3, %v9365_v40 }
  0xea   :  { %7988 = vmatprep.mubr.msk.f32.mxu0 %vm9097_vm1, %v9096_v0 }
  0xec   :  { %v194_v33 = vpop.f32.mrb[10].mxu0 }
  0xed   :  { %v7819_v34 = vpop.f32.mrb[11].mxu0  ;;  %7989 = vmatmul.mubr.msk.f32.gmra.mrb[116].mxu0 %vm80_vm3, %v9378_v45 }
  0xee   :  { %7991 = vmatprep.mubr.msk.f32.mxu0 %vm9097_vm1, %v9096_v0 }
  0xf0   :  { %v199_v35 = vpop.f32.mrb[12].mxu0 }
  0xf1   :  { %v7822_v36 = vpop.f32.mrb[13].mxu0  ;;  %7992 = vmatmul.mubr.msk.f32.gmra.mrb[118].mxu0 %vm80_vm3, %v9395_v50 }
  0xf2   :  { %7994 = vmatprep.mubr.msk.f32.mxu0 %vm9097_vm1, %v9096_v0 }
  0xf4   :  { %v204_v37 = vpop.f32.mrb[14].mxu0 }
  0xf5   :  { %v7825_v38 = vpop.f32.mrb[15].mxu0  ;;  %7995 = vmatmul.mubr.msk.f32.gmra.mrb[120].mxu0 %vm80_vm3, %v9411_v55 }
  0xf6   :  { %7997 = vmatprep.mubr.msk.f32.mxu0 %vm9097_vm1, %v9096_v0 }
  0xf8   :  { %v209_v39 = vpop.f32.mrb[16].mxu0 }
  0xf9   :  { %v7828_v40 = vpop.f32.mrb[17].mxu0  ;;  %7998 = vmatmul.mubr.msk.f32.gmra.mrb[122].mxu0 %vm80_vm3, %v9426_v59 }
  0xfa   :  { %8000 = vmatprep.mubr.msk.f32.mxu0 %vm9097_vm1, %v9096_v0 }
  0xfc   :  { %v300_v42 = vpop.f32.mrb[18].mxu0 }
  0xfd   :  { %v301_v43 = vadd.f32 %v300_v42, %v169_v16  ;;  %v7833_v44 = vpop.f32.mrb[19].mxu0  ;;  %8001 = vmatmul.mubr.msk.f32.gmra.mrb[124].mxu0 %vm80_vm3, %v927_v41  ;;  %v9655_v16 = vpop.f32.mrb[0].mxu1  ;;  %v9098_v42 = vmov 0.0|0.0  }
  0xfe   :  { %8034 = vmatprep.mubr.msk.f32.mxu0 %vm9097_vm1, %v9096_v0  ;;  %v8007_v19 = vpop.f32.mrb[1].mxu1  ;;  %8491 = vmatprep.subr.bf16.mxu0 %v9098_v42 }
  0xff   :  { %8533 = vmatprep.subr.bf16.mxu1 %v9098_v42 }
 0x100   :  { %v305_v45 = vpop.f32.mrb[20].mxu0 }
 0x101   :  { %v306_v46 = vadd.f32 %v305_v45, %v174_v23  ;;  %v7836_v47 = vpop.f32.mrb[21].mxu0  ;;  %8035 = vmatmul.mubr.msk.f32.vlgmr.msra.gmra.mrb[126].mxu0 %vm80_vm3, %v9175_v4 }
 0x102   :  { %8037 = vmatprep.mubr.msk.f32.mxu0 %vm9097_vm1, %v9096_v0  ;;  %v6805_v47 = vld [vmem:[%s12366_s3 + $0x28] sm:$0xff] }
 0x104   :  { %v310_v48 = vpop.f32.mrb[22].mxu0 }
 0x105   :  { %v311_v49 = vadd.f32 %v310_v48, %v179_v26  ;;  %v7839_v50 = vpop.f32.mrb[23].mxu0  ;;  %8038 = vmatmul.mubr.msk.f32.gmra.mrb[128].mxu0 %vm80_vm3, %v9188_v8  ;;  %v9657_v26 = vpop.f32.mrb[2].mxu1 }
 0x106   :  { %8040 = vmatprep.mubr.msk.f32.mxu0 %vm9097_vm1, %v9096_v0  ;;  %v8010_v27 = vpop.f32.mrb[3].mxu1 }
 0x107   :  { %v9659_v32 = vpop.f32.mrb[4].mxu1  ;;  %v6887_v27 = vld [vmem:[%s12366_s3 + $0xd8] sm:$0x3f] }
 0x108   :  { %v315_v51 = vpop.f32.mrb[24].mxu0 }
 0x109   :  { %v316_v52 = vadd.f32 %v315_v51, %v184_v28  ;;  %v7842_v53 = vpop.f32.mrb[25].mxu0  ;;  %8041 = vmatmul.mubr.msk.f32.gmra.mrb[130].mxu0 %vm80_vm3, %v9204_v12 }
 0x10a   :  { %8043 = vmatprep.mubr.msk.f32.mxu0 %vm9097_vm1, %v9096_v0 }
 0x10c   :  { %v320_v4 = vpop.f32.mrb[26].mxu0 }
 0x10d   :  { %v321_v55 = vadd.f32 %v320_v4, %v189_v31  ;;  %v7845_v56 = vpop.f32.mrb[27].mxu0  ;;  %8044 = vmatmul.mubr.msk.f32.gmra.mrb[132].mxu0 %vm80_vm3, %v9218_v15 }
 0x10e   :  { %8046 = vmatprep.mubr.msk.f32.mxu0 %vm9097_vm1, %v9096_v0 }
 0x110   :  { %v325_v8 = vpop.f32.mrb[28].mxu0 }
 0x111   :  { %v326_v57 = vadd.f32 %v325_v8, %v194_v33  ;;  %v7848_v58 = vpop.f32.mrb[29].mxu0  ;;  %8047 = vmatmul.mubr.msk.f32.gmra.mrb[134].mxu0 %vm80_vm3, %v9231_v18  ;;  %v8013_v33 = vpop.f32.mrb[5].mxu1 }
 0x112   :  { %8049 = vmatprep.mubr.msk.f32.mxu0 %vm9097_vm1, %v9096_v0 }
 0x114   :  { %v330_v12 = vpop.f32.mrb[30].mxu0 }
 0x115   :  { %v331_v59 = vadd.f32 %v330_v12, %v199_v35  ;;  %v7851_v60 = vpop.f32.mrb[31].mxu0  ;;  %8050 = vmatmul.mubr.msk.f32.gmra.mrb[136].mxu0 %vm80_vm3, %v9244_v21 }
 0x116   :  { %8052 = vmatprep.mubr.msk.f32.mxu0 %vm9097_vm1, %v9096_v0 }
 0x118   :  { %v335_v15 = vpop.f32.mrb[32].mxu0 }
 0x119   :  { %v336_v61 = vadd.f32 %v335_v15, %v204_v37  ;;  %v7854_v62 = vpop.f32.mrb[33].mxu0  ;;  %8053 = vmatmul.mubr.msk.f32.gmra.mrb[138].mxu0 %vm80_vm3, %v9257_v24  ;;  %v9661_v37 = vpop.f32.mrb[6].mxu1 }
 0x11a   :  { %8055 = vmatprep.mubr.msk.f32.mxu0 %vm9097_vm1, %v9096_v0  ;;  %v8016_v38 = vpop.f32.mrb[7].mxu1 }
 0x11c   :  { %v340_v18 = vpop.f32.mrb[34].mxu0 }
 0x11d   :  { %v7857_v63 = vpop.f32.mrb[35].mxu0  ;;  %8056 = vmatmul.mubr.msk.f32.gmra.mrb[140].mxu0 %vm80_vm3, %v9401_v54  ;;  %v341_v1 = vadd.f32 %v340_v18, %v209_v39 }
 0x11e   :  { %8058 = vmatprep.mubr.msk.f32.mxu0 %vm9097_vm1, %v9096_v0 }
 0x120   :  { %v454_v21 = vpop.f32.mrb[36].mxu0 }
 0x121   :  { %v7862_v3 = vpop.f32.mrb[37].mxu0  ;;  %8059 = vmatmul.mubr.f32.gmra.mrb[142].mxu0 %v9096_v0  ;;  %v498_v5 = vadd.f32 %v454_v21, %v301_v43  ;;  %v9664_v43 = vpop.f32.mrb[8].mxu1 }
 0x122   :  { %8069 = vmatprep.mubr.msk.f32.mxu0 %vm9097_vm1, %v9096_v0  ;;  %v8019_v44 = vpop.f32.mrb[9].mxu1 }
 0x123   :  { %v9673_v51 = vpop.f32.mrb[10].mxu1 }
 0x124   :  { %v459_v24 = vpop.f32.mrb[38].mxu0 }
 0x125   :  { %v7865_v6 = vpop.f32.mrb[39].mxu0  ;;  %v499_v7 = vadd.f32 %v459_v24, %v306_v46  ;;  %v6804_v46 = vld [vmem:[%s12366_s3 + $0x20] sm:$0xff] }
 0x126   :  { %v8492_v50 = vpack.c.bf16 %v6805_v47, %v6804_v46 }
 0x128   :  { %v464_v9 = vpop.f32.mrb[40].mxu0  ;;  %8493 = vmatpush3.bf16.msra.mxu0 %v8492_v50 }
 0x129   :  { %v7868_v11 = vpop.f32.mrb[41].mxu0  ;;  %v500_v14 = vadd.f32 %v464_v9, %v311_v49  ;;  %8494 = vmatprep.subr.bf16.mxu0 %v9098_v42 }
 0x12c   :  { %v469_v17 = vpop.f32.mrb[42].mxu0 }
 0x12d   :  { %v7871_v54 = vpop.f32.mrb[43].mxu0  ;;  %v501_v20 = vadd.f32 %v469_v17, %v316_v52  ;;  %v8022_v52 = vpop.f32.mrb[11].mxu1  ;;  %v6807_v17 = vld [vmem:[%s12366_s3 + $0x38] sm:$0x3f] }
 0x12e   :  { %v9676_v56 = vpop.f32.mrb[12].mxu1 }
 0x12f   :  { %v8025_v8 = vpop.f32.mrb[13].mxu1 }
 0x130   :  { %v474_v2 = vpop.f32.mrb[44].mxu0 }
 0x131   :  { %v7874_v10 = vpop.f32.mrb[45].mxu0  ;;  %v502_v13 = vadd.f32 %v474_v2, %v321_v55  ;;  %v6884_v2 = vld [vmem:[%s12366_s3 + $0xc0] sm:$0xff] }
 0x132   :  { %v6885_v10 = vld [vmem:[%s12366_s3 + $0xc8] sm:$0xff] }
 0x133   :  { %v8534_v19 = vpack.c.bf16 %v6885_v10, %v6884_v2 }
 0x134   :  { %v479_v22 = vpop.f32.mrb[46].mxu0 }
 0x135   :  { %v7877_v23 = vpop.f32.mrb[47].mxu0  ;;  %v503_v25 = vadd.f32 %v479_v22, %v326_v57  ;;  %8535 = vmatpush3.bf16.msra.mxu1 %v8534_v19 }
 0x136   :  { %8536 = vmatprep.subr.bf16.mxu1 %v9098_v42 }
 0x138   :  { %v484_v28 = vpop.f32.mrb[48].mxu0 }
 0x139   :  { %v7880_v30 = vpop.f32.mrb[49].mxu0  ;;  %v504_v31 = vadd.f32 %v484_v28, %v331_v59  ;;  %v9678_v59 = vpop.f32.mrb[14].mxu1 }
 0x13a   :  { %v8028_v60 = vpop.f32.mrb[15].mxu1 }
 0x13b   :  { %v9680_v18 = vpop.f32.mrb[16].mxu1 }
 0x13c   :  { %v489_v34 = vpop.f32.mrb[50].mxu0  ;;  %v8031_v63 = vpop.f32.mrb[17].mxu1 }
 0x13d   :  { %v7883_v35 = vpop.f32.mrb[51].mxu0  ;;  %v505_v36 = vadd.f32 %v489_v34, %v336_v61 }
 0x140   :  { %v494_v39 = vpop.f32.mrb[52].mxu0 }
 0x141   :  { %v506_v40 = vadd.f32 %v494_v39, %v341_v1  ;;  %v7886_v41 = vpop.f32.mrb[53].mxu0 }
 0x144   :  { %v616_v45 = vpop.f32.mrb[54].mxu0 }
 0x145   :  { %v660_v48 = vadd.f32 %v616_v45, %v498_v5  ;;  %v7891_v49 = vpop.f32.mrb[55].mxu0 }
 0x148   :  { %v621_v53 = vpop.f32.mrb[56].mxu0 }
 0x149   :  { %v661_v4 = vadd.f32 %v621_v53, %v499_v7  ;;  %v7894_v55 = vpop.f32.mrb[57].mxu0 }
 0x14c   :  { %v626_v57 = vpop.f32.mrb[58].mxu0 }
 0x14d   :  { %v662_v58 = vadd.f32 %v626_v57, %v500_v14  ;;  %v7897_v12 = vpop.f32.mrb[59].mxu0  ;;  %v6806_v14 = vld [vmem:[%s12366_s3 + $0x30] sm:$0xff] }
 0x14e   :  { %v8495_v54 = vpack.c.bf16 %v6807_v17, %v6806_v14 }
 0x150   :  { %v631_v15 = vpop.f32.mrb[60].mxu0  ;;  %8497 = vmatpush3.bf16.msk.msra.mxu0 %vm9690_vm7, %v8495_v54 }
 0x151   :  { %v663_v61 = vadd.f32 %v631_v15, %v501_v20  ;;  %v7900_v62 = vpop.f32.mrb[61].mxu0  ;;  %8498 = vmatprep.subr.bf16.mxu0 %v9098_v42 }
 0x154   :  { %v636_v1 = vpop.f32.mrb[62].mxu0 }
 0x155   :  { %v664_v21 = vadd.f32 %v636_v1, %v502_v13  ;;  %v7903_v3 = vpop.f32.mrb[63].mxu0 }
 0x158   :  { %v641_v5 = vpop.f32.mrb[64].mxu0 }
 0x159   :  { %v665_v24 = vadd.f32 %v641_v5, %v503_v25  ;;  %v7906_v6 = vpop.f32.mrb[65].mxu0  ;;  %v6886_v25 = vld [vmem:[%s12366_s3 + $0xd0] sm:$0xff] }
 0x15a   :  { %v8537_v30 = vpack.c.bf16 %v6887_v27, %v6886_v25 }
 0x15c   :  { %v646_v7 = vpop.f32.mrb[66].mxu0  ;;  %8539 = vmatpush3.bf16.msk.msra.mxu1 %vm9690_vm7, %v8537_v30 }
 0x15d   :  { %v666_v9 = vadd.f32 %v646_v7, %v504_v31  ;;  %v7909_v11 = vpop.f32.mrb[67].mxu0  ;;  %8546 = vmatprep.subr.bf16.mxu1 %v9098_v42 }
 0x160   :  { %v651_v13 = vpop.f32.mrb[68].mxu0 }
 0x161   :  { %v667_v22 = vadd.f32 %v651_v13, %v505_v36  ;;  %v7912_v23 = vpop.f32.mrb[69].mxu0 }
 0x164   :  { %v656_v28 = vpop.f32.mrb[70].mxu0 }
 0x165   :  { %v668_v31 = vadd.f32 %v656_v28, %v506_v40  ;;  %v7915_v33 = vpop.f32.mrb[71].mxu0 }
 0x168   :  { %v742_v34 = vpop.f32.mrb[72].mxu0 }
 0x169   :  { %v786_v35 = vadd.f32 %v742_v34, %v660_v48  ;;  %v7920_v36 = vpop.f32.mrb[73].mxu0 }
 0x16c   :  { %v747_v38 = vpop.f32.mrb[74].mxu0 }
 0x16d   :  { %v787_v39 = vadd.f32 %v747_v38, %v661_v4  ;;  %v7923_v41 = vpop.f32.mrb[75].mxu0 }
 0x170   :  { %v752_v44 = vpop.f32.mrb[76].mxu0 }
 0x171   :  { %v788_v45 = vadd.f32 %v752_v44, %v662_v58  ;;  %v7926_v46 = vpop.f32.mrb[77].mxu0 }
 0x174   :  { %v757_v47 = vpop.f32.mrb[78].mxu0 }
 0x175   :  { %v789_v49 = vadd.f32 %v757_v47, %v663_v61  ;;  %v7929_v50 = vpop.f32.mrb[79].mxu0 }
 0x178   :  { %v762_v52 = vpop.f32.mrb[80].mxu0 }
 0x179   :  { %v790_v40 = vadd.f32 %v762_v52, %v664_v21  ;;  %v7932_v53 = vpop.f32.mrb[81].mxu0 }
 0x17c   :  { %v767_v55 = vpop.f32.mrb[82].mxu0 }
 0x17d   :  { %v791_v8 = vadd.f32 %v767_v55, %v665_v24  ;;  %v7935_v57 = vpop.f32.mrb[83].mxu0 }
 0x180   :  { %v772_v12 = vpop.f32.mrb[84].mxu0 }
 0x181   :  { %v792_v60 = vadd.f32 %v772_v12, %v666_v9  ;;  %v7938_v15 = vpop.f32.mrb[85].mxu0 }
 0x184   :  { %v777_v48 = vpop.f32.mrb[86].mxu0 }
 0x185   :  { %v793_v62 = vadd.f32 %v777_v48, %v667_v22  ;;  %v7941_v63 = vpop.f32.mrb[87].mxu0 }
 0x188   :  { %v782_v4 = vpop.f32.mrb[88].mxu0 }
 0x189   :  { %v794_v1 = vadd.f32 %v782_v4, %v668_v31  ;;  %v7944_v3 = vpop.f32.mrb[89].mxu0 }
 0x18c   :  { %v872_v58 = vpop.f32.mrb[90].mxu0 }
 0x18d   :  { %v916_v5 = vadd.f32 %v872_v58, %v786_v35  ;;  %v7949_v6 = vpop.f32.mrb[91].mxu0 }
 0x190   :  { %v877_v61 = vpop.f32.mrb[92].mxu0 }
 0x191   :  { %v917_v7 = vadd.f32 %v877_v61, %v787_v39  ;;  %v7952_v11 = vpop.f32.mrb[93].mxu0 }
 0x194   :  { %v882_v21 = vpop.f32.mrb[94].mxu0 }
 0x195   :  { %v918_v14 = vadd.f32 %v882_v21, %v788_v45  ;;  %v7955_v17 = vpop.f32.mrb[95].mxu0 }
 0x198   :  { %v887_v24 = vpop.f32.mrb[96].mxu0 }
 0x199   :  { %v919_v54 = vadd.f32 %v887_v24, %v789_v49  ;;  %v7958_v2 = vpop.f32.mrb[97].mxu0 }
 0x19c   :  { %v892_v9 = vpop.f32.mrb[98].mxu0 }
 0x19d   :  { %v920_v10 = vadd.f32 %v892_v9, %v790_v40  ;;  %v7961_v13 = vpop.f32.mrb[99].mxu0 }
 0x1a0   :  { %v897_v19 = vpop.f32.mrb[100].mxu0 }
 0x1a1   :  { %v921_v22 = vadd.f32 %v897_v19, %v791_v8  ;;  %v7964_v23 = vpop.f32.mrb[101].mxu0 }
 0x1a4   :  { %v902_v25 = vpop.f32.mrb[102].mxu0 }
 0x1a5   :  { %v922_v27 = vadd.f32 %v902_v25, %v792_v60  ;;  %v7967_v28 = vpop.f32.mrb[103].mxu0  ;;  %v1358_v25 = vld [vmem:[%s12366_s3] sm:$0xff] }
 0x1a8   :  { %v907_v30 = vpop.f32.mrb[104].mxu0 }
 0x1a9   :  { %v923_v31 = vadd.f32 %v907_v30, %v793_v62  ;;  %v7970_v33 = vpop.f32.mrb[105].mxu0 }
 0x1ac   :  { %v912_v34 = vpop.f32.mrb[106].mxu0 }
 0x1ad   :  { %v924_v35 = vadd.f32 %v912_v34, %v794_v1  ;;  %v7973_v36 = vpop.f32.mrb[107].mxu0 }
 0x1b0   :  { %v999_v38 = vpop.f32.mrb[108].mxu0 }
 0x1b1   :  { %v1043_v39 = vadd.f32 %v999_v38, %v916_v5  ;;  %v7978_v41 = vpop.f32.mrb[109].mxu0 }
 0x1b3   :  { %v1170_v44 = vadd.f32 %v9655_v16, %v1043_v39 }
 0x1b4   :  { %v1004_v45 = vpop.f32.mrb[110].mxu0 }
 0x1b5   :  { %v1044_v46 = vadd.f32 %v1004_v45, %v917_v7  ;;  %v7981_v47 = vpop.f32.mrb[111].mxu0 }
 0x1b7   :  { %v1171_v49 = vadd.f32 %v9657_v26, %v1044_v46 }
 0x1b8   :  { %v1009_v50 = vpop.f32.mrb[112].mxu0 }
 0x1b9   :  { %v1045_v52 = vadd.f32 %v1009_v50, %v918_v14  ;;  %v7984_v40 = vpop.f32.mrb[113].mxu0  ;;  %v9733_v14 = vld [vmem:[%s12367_s2] ss:$0 sm:$0xff] }
 0x1ba   :  { %v1360_v40 = vld [vmem:[%s12366_s3 + $0x10] sm:$0xff] }
 0x1bb   :  { %v1172_v53 = vadd.f32 %v9659_v32, %v1045_v52 }
 0x1bc   :  { %v1014_v55 = vpop.f32.mrb[114].mxu0 }
 0x1bd   :  { %v1046_v8 = vadd.f32 %v1014_v55, %v919_v54  ;;  %v7987_v57 = vpop.f32.mrb[115].mxu0 }
 0x1bf   :  { %v1173_v12 = vadd.f32 %v9661_v37, %v1046_v8 }
 0x1c0   :  { %v1019_v60 = vpop.f32.mrb[116].mxu0 }
 0x1c1   :  { %v1047_v15 = vadd.f32 %v1019_v60, %v920_v10  ;;  %v7990_v48 = vpop.f32.mrb[117].mxu0 }
 0x1c3   :  { %v1174_v16 = vadd.f32 %v9664_v43, %v1047_v15 }
 0x1c4   :  { %v1024_v62 = vpop.f32.mrb[118].mxu0 }
 0x1c5   :  { %v1048_v63 = vadd.f32 %v1024_v62, %v921_v22  ;;  %v7993_v4 = vpop.f32.mrb[119].mxu0 }
 0x1c7   :  { %v9719_v26 = vadd.f32 %v9673_v51, %v1048_v63 }
 0x1c8   :  { %v1029_v1 = vpop.f32.mrb[120].mxu0 }
 0x1c9   :  { %v1049_v3 = vadd.f32 %v1029_v1, %v922_v27  ;;  %v7996_v58 = vpop.f32.mrb[121].mxu0  ;;  %v1359_v27 = vld [vmem:[%s12366_s3 + $0x8] sm:$0xff] }
 0x1ca   :  { %v8499_v39 = vpack.c.bf16 %v1359_v27, %v1358_v25 }
 0x1cb   :  { %v9722_v32 = vadd.f32 %v9676_v56, %v1049_v3 }
 0x1cc   :  { %v1034_v5 = vpop.f32.mrb[122].mxu0 }
 0x1cd   :  { %v1050_v6 = vadd.f32 %v1034_v5, %v923_v31  ;;  %v7999_v37 = vpop.f32.mrb[123].mxu0 }
 0x1cf   :  { %v9725_v61 = vadd.f32 %v9678_v59, %v1050_v6 }
 0x1d0   :  { %v1039_v7 = vpop.f32.mrb[124].mxu0 }
 0x1d1   :  { %v1051_v43 = vadd.f32 %v1039_v7, %v924_v35  ;;  %v8002_v11 = vpop.f32.mrb[125].mxu0 }
 0x1d3   :  { %v9728_v21 = vadd.f32 %v9680_v18, %v1051_v43 }
 0x1d4   :  { %v1250_v51 = vpop.f32.mrb[126].mxu0 }
 0x1d5   :  { %v1294_v56 = vadd.f32 %v1250_v51, %v1170_v44  ;;  %v8036_v17 = vpop.f32.mrb[127].mxu0 }
 0x1d7   :  { %v1310_v24 = vadd.f32 %v9733_v14, %v1294_v56 }
 0x1d8   :  { %v1255_v54 = vpop.f32.mrb[128].mxu0 }
 0x1d9   :  { %v1319_v2 = vmax.f32 %v1310_v24, 0.0  ;;  %v1295_v59 = vadd.f32 %v1255_v54, %v1171_v49  ;;  %v8039_v9 = vpop.f32.mrb[129].mxu0 }
 0x1db   :  { %v1337_v10 = vrot.slane %v1319_v2, 2  ;;  %v1311_v13 = vadd.f32 %v9733_v14, %v1295_v59 }
 0x1dc   :  { %v1260_v19 = vpop.f32.mrb[130].mxu0 }
 0x1dd   :  { %v1320_v18 = vmax.f32 %v1311_v13, 0.0  ;;  %v1296_v22 = vadd.f32 %v1260_v19, %v1172_v53  ;;  %v8042_v23 = vpop.f32.mrb[131].mxu0  ;;  %v9744_v28 = vsel %vm49_vm2, 0.0, %v1337_v10  ;;  %v1361_v53 = vld [vmem:[%s12366_s3 + $0x18] sm:$0x3f] }
 0x1de   :  { %v1368_v41 = vrot.slane %v9744_v28, 2  ;;  %v1654_v44 = vrot.slane %v9744_v28, 4  ;;  %v8502_v4 = vpack.c.bf16 %v1361_v53, %v1360_v40 }
 0x1df   :  { %v1338_v30 = vrot.slane %v1320_v18, 2  ;;  %v1312_v31 = vadd.f32 %v9733_v14, %v1296_v22 }
 0x1e0   :  { %v1265_v33 = vpop.f32.mrb[132].mxu0 }
 0x1e1   :  { %v9748_v34 = vsel %vm49_vm2, %v1337_v10, %v1338_v30  ;;  %v1321_v35 = vmax.f32 %v1312_v31, 0.0  ;;  %v1297_v36 = vadd.f32 %v1265_v33, %v1173_v12  ;;  %v8045_v38 = vpop.f32.mrb[133].mxu0 }
 0x1e2   :  { %v1369_v45 = vrot.slane %v9748_v34, 2  ;;  %v1655_v46 = vrot.slane %v9748_v34, 4 }
 0x1e3   :  { %v1340_v47 = vrot.slane %v1321_v35, 2  ;;  %v1313_v49 = vadd.f32 %v9733_v14, %v1297_v36 }
 0x1e4   :  { %v1270_v50 = vpop.f32.mrb[134].mxu0  ;;  %v1370_v52 = vsel %vm49_vm2, %v1368_v41, %v1369_v45  ;;  %v9763_v55 = vsel %vm347_vm4, %v1654_v44, %v1655_v46 }
 0x1e5   :  { %v9766_v8 = vsel %vm49_vm2, %v1338_v30, %v1340_v47  ;;  %v1322_v57 = vmax.f32 %v1313_v49, 0.0  ;;  %v1298_v12 = vadd.f32 %v1270_v50, %v1174_v16  ;;  %v8048_v60 = vpop.f32.mrb[135].mxu0  ;;  %8070 = vmatmul.mubr.msk.f32.vlgmr.msra.gmra.mrb[144].mxu0 %vm1385_vm8, %v1370_v52 }
 0x1e6   :  { %8500 = vmatpush3.bf16.msra.mxu0 %v8499_v39  ;;  %8072 = vmatprep.mubr.msk.f32.mxu0 %vm9097_vm1, %v9096_v0  ;;  %v1371_v15 = vrot.slane %v9766_v8, 2  ;;  %v1657_v48 = vrot.slane %v9766_v8, 4 }
 0x1e7   :  { %v1342_v62 = vrot.slane %v1322_v57, 2  ;;  %v1314_v63 = vadd.f32 %v9733_v14, %v1298_v12  ;;  %8501 = vmatprep.subr.bf16.mxu0 %v9098_v42 }
 0x1e8   :  { %v1275_v1 = vpop.f32.mrb[136].mxu0  ;;  %v9776_v16 = vsel %vm49_vm2, %v1369_v45, %v1371_v15  ;;  %v9779_v3 = vsel %vm347_vm4, %v1655_v46, %v1657_v48 }
 0x1e9   :  { %v9782_v58 = vsel %vm49_vm2, %v1340_v47, %v1342_v62  ;;  %v1323_v5 = vmax.f32 %v1314_v63, 0.0  ;;  %v1299_v6 = vadd.f32 %v1275_v1, %v9719_v26  ;;  %v8051_v37 = vpop.f32.mrb[137].mxu0  ;;  %8073 = vmatmul.mubr.msk.f32.gmra.mrb[146].mxu0 %vm1385_vm8, %v9776_v16  ;;  %8280 = vmatmul.mubr.msk.f32.vlgmr.msra.gmra.mrb[18].mxu1 %vm1385_vm8, %v9779_v3 }
 0x1ea   :  { %8075 = vmatprep.mubr.msk.f32.mxu0 %vm9097_vm1, %v9096_v0  ;;  %8282 = vmatprep.mubr.msk.f32.mxu1 %vm9097_vm1, %v9096_v0  ;;  %v1373_v7 = vrot.slane %v9782_v58, 2  ;;  %v1659_v43 = vrot.slane %v9782_v58, 4 }
 0x1eb   :  { %v1344_v11 = vrot.slane %v1323_v5, 2  ;;  %v1315_v26 = vadd.f32 %v9733_v14, %v1299_v6  ;;  %8504 = vmatpush3.bf16.msk.msra.mxu0 %vm9690_vm7, %v8502_v4 }
 0x1ec   :  { %v1280_v51 = vpop.f32.mrb[138].mxu0  ;;  %v9799_v56 = vsel %vm49_vm2, %v1371_v15, %v1373_v7  ;;  %v9802_v17 = vsel %vm347_vm4, %v1657_v48, %v1659_v43  ;;  %8505 = vmatprep.subr.bf16.mxu0 %v9098_v42 }
 0x1ed   :  { %v9806_v24 = vsel %vm49_vm2, %v1342_v62, %v1344_v11  ;;  %v1324_v54 = vmax.f32 %v1315_v26, 0.0  ;;  %v1300_v2 = vadd.f32 %v1280_v51, %v9722_v32  ;;  %v8054_v59 = vpop.f32.mrb[139].mxu0  ;;  %8076 = vmatmul.mubr.msk.f32.gmra.mrb[148].mxu0 %vm1385_vm8, %v9799_v56  ;;  %8283 = vmatmul.mubr.msk.f32.gmra.mrb[20].mxu1 %vm1385_vm8, %v9802_v17  ;;  %v6830_v51 = vld [vmem:[%s12366_s3 + $0x50] sm:$0xff] }
 0x1ee   :  { %8078 = vmatprep.mubr.msk.f32.mxu0 %vm9097_vm1, %v9096_v0  ;;  %8285 = vmatprep.mubr.msk.f32.mxu1 %vm9097_vm1, %v9096_v0  ;;  %v1375_v9 = vrot.slane %v9806_v24, 2  ;;  %v1661_v10 = vrot.slane %v9806_v24, 4 }
 0x1ef   :  { %v1346_v13 = vrot.slane %v1324_v54, 2  ;;  %v1316_v32 = vadd.f32 %v9733_v14, %v1300_v2  ;;  %v6831_v54 = vld [vmem:[%s12366_s3 + $0x58] sm:$0x3f] }
 0x1f0   :  { %v1285_v19 = vpop.f32.mrb[140].mxu0  ;;  %v9821_v18 = vsel %vm49_vm2, %v1373_v7, %v1375_v9  ;;  %v9824_v22 = vsel %vm347_vm4, %v1659_v43, %v1661_v10  ;;  %v6828_v7 = vld [vmem:[%s12366_s3 + $0x40] sm:$0xff]  ;;  %v6829_v43 = vld [vmem:[%s12366_s3 + $0x48] sm:$0xff]  ;;  %v8509_v59 = vpack.c.bf16 %v6831_v54, %v6830_v51 }
 0x1f1   :  { %v9827_v23 = vsel %vm49_vm2, %v1344_v11, %v1346_v13  ;;  %v1325_v25 = vmax.f32 %v1316_v32, 0.0  ;;  %v1301_v27 = vadd.f32 %v1285_v19, %v9725_v61  ;;  %v8057_v30 = vpop.f32.mrb[141].mxu0  ;;  %8079 = vmatmul.mubr.msk.f32.gmra.mrb[150].mxu0 %vm1385_vm8, %v9821_v18  ;;  %8286 = vmatmul.mubr.msk.f32.gmra.mrb[22].mxu1 %vm1385_vm8, %v9824_v22  ;;  %v8506_v26 = vpack.c.bf16 %v6829_v43, %v6828_v7  ;;  %v6845_v32 = vld [vmem:[%s12366_s3 + $0x78] sm:$0x3f] }
 0x1f2   :  { %8081 = vmatprep.mubr.msk.f32.mxu0 %vm9097_vm1, %v9096_v0  ;;  %8288 = vmatprep.mubr.msk.f32.mxu1 %vm9097_vm1, %v9096_v0  ;;  %v1377_v31 = vrot.slane %v9827_v23, 2  ;;  %v1663_v33 = vrot.slane %v9827_v23, 4  ;;  %v6859_v30 = vld [vmem:[%s12366_s3 + $0x98] sm:$0x3f] }
 0x1f3   :  { %v1348_v35 = vrot.slane %v1325_v25, 2  ;;  %v1317_v61 = vadd.f32 %v9733_v14, %v1301_v27  ;;  %v6858_v27 = vld [vmem:[%s12366_s3 + $0x90] sm:$0xff] }
 0x1f4   :  { %v1290_v36 = vpop.f32.mrb[142].mxu0  ;;  %v9842_v38 = vsel %vm49_vm2, %v1375_v9, %v1377_v31  ;;  %v9845_v39 = vsel %vm347_vm4, %v1661_v10, %v1663_v33  ;;  %v6843_v9 = vld [vmem:[%s12366_s3 + $0x68] sm:$0xff] }
 0x1f5   :  { %v9848_v41 = vsel %vm49_vm2, %v1346_v13, %v1348_v35  ;;  %v1326_v44 = vmax.f32 %v1317_v61, 0.0  ;;  %v1302_v45 = vadd.f32 %v1290_v36, %v9728_v21  ;;  %v8060_v46 = vpop.f32.mrb[143].mxu0  ;;  %8082 = vmatmul.mubr.msk.f32.gmra.mrb[152].mxu0 %vm1385_vm8, %v9842_v38  ;;  %8289 = vmatmul.mubr.msk.f32.gmra.mrb[24].mxu1 %vm1385_vm8, %v9845_v39  ;;  %v6844_v13 = vld [vmem:[%s12366_s3 + $0x70] sm:$0xff]  ;;  %v1823_v61 = vrot.slane %v9782_v58, 6 }
 0x1f6   :  { %8084 = vmatprep.mubr.msk.f32.mxu0 %vm9097_vm1, %v9096_v0  ;;  %8291 = vmatprep.mubr.msk.f32.mxu1 %vm9097_vm1, %v9096_v0  ;;  %v1379_v47 = vrot.slane %v9848_v41, 2  ;;  %v1665_v49 = vrot.slane %v9848_v41, 4  ;;  %v8516_v19 = vpack.c.bf16 %v6845_v32, %v6844_v13 }
 0x1f7   :  { %v1350_v50 = vrot.slane %v1326_v44, 2  ;;  %v1318_v21 = vadd.f32 %v9733_v14, %v1302_v45  ;;  %v1827_v45 = vrot.slane %v9827_v23, 6 }
 0x1f8   :  { %v9863_v52 = vsel %vm49_vm2, %v1377_v31, %v1379_v47  ;;  %v9866_v40 = vsel %vm347_vm4, %v1663_v33, %v1665_v49  ;;  %v1821_v33 = vrot.slane %v9766_v8, 6 }
 0x1f9   :  { %v9869_v53 = vsel %vm49_vm2, %v1348_v35, %v1350_v50  ;;  %v1327_v57 = vmax.f32 %v1318_v21, 0.0  ;;  %8085 = vmatmul.mubr.msk.f32.gmra.mrb[154].mxu0 %vm1385_vm8, %v9863_v52  ;;  %8292 = vmatmul.mubr.msk.f32.gmra.mrb[26].mxu1 %vm1385_vm8, %v9866_v40 }
 0x1fa   :  { %8087 = vmatprep.mubr.msk.f32.mxu0 %vm9097_vm1, %v9096_v0  ;;  %8294 = vmatprep.mubr.msk.f32.mxu1 %vm9097_vm1, %v9096_v0  ;;  %v1381_v14 = vrot.slane %v9869_v53, 2  ;;  %v1667_v12 = vrot.slane %v9869_v53, 4  ;;  %v1824_v36 = vsel %vm509_vm5, %v1821_v33, %v1823_v61 }
 0x1fb   :  { %v1352_v60 = vrot.slane %v1327_v57, 2 }
 0x1fc   :  { %v9882_v15 = vsel %vm49_vm2, %v1379_v47, %v1381_v14  ;;  %v9885_v48 = vsel %vm347_vm4, %v1665_v49, %v1667_v12  ;;  %v1829_v47 = vrot.slane %v9848_v41, 6 }
 0x1fd   :  { %v9888_v62 = vsel %vm49_vm2, %v1350_v50, %v1352_v60  ;;  %v9891_v63 = vsel %vm347_vm4, %v1352_v60, 0.0  ;;  %8088 = vmatmul.mubr.msk.f32.gmra.mrb[156].mxu0 %vm1385_vm8, %v9882_v15  ;;  %8295 = vmatmul.mubr.msk.f32.gmra.mrb[28].mxu1 %vm1385_vm8, %v9885_v48  ;;  %v1831_v50 = vrot.slane %v9869_v53, 6  ;;  %v6871_v60 = vld [vmem:[%s12366_s3 + $0xa8] sm:$0xff] }
 0x1fe   :  { %8090 = vmatprep.mubr.msk.f32.mxu0 %vm9097_vm1, %v9096_v0  ;;  %8297 = vmatprep.mubr.msk.f32.mxu1 %vm9097_vm1, %v9096_v0  ;;  %v9902_v4 = vrot.slane %v9888_v62, 2  ;;  %v1669_v1 = vrot.slane %v9888_v62, 4  ;;  %v1671_v37 = vrot.slane %v9891_v63, 4  ;;  %v1830_v49 = vsel %vm509_vm5, %v1827_v45, %v1829_v47 }
 0x1ff   :  { %v1832_v21 = vsel %vm509_vm5, %v1829_v47, %v1831_v50  ;;  %v2111_v20 = vrot.slane %v9891_v63, 2 }
 0x200   :  { %v9907_v5 = vsel %vm49_vm2, %v1381_v14, %v9902_v4  ;;  %v9910_v6 = vsel %vm347_vm4, %v1667_v12, %v1669_v1  ;;  %v9928_v11 = vsel %vm347_vm4, %v1669_v1, %v1671_v37  ;;  %v2244_v2 = vsel %vm347_vm4, %v1671_v37, %v9322_v29  ;;  %v6842_v29 = vld [vmem:[%s12366_s3 + $0x60] sm:$0xff]  ;;  %v6873_v37 = vld [vmem:[%s12366_s3 + $0xb8] sm:$0x3f] }
 0x201   :  { %8091 = vmatmul.mubr.msk.f32.gmra.mrb[158].mxu0 %vm1385_vm8, %v9907_v5  ;;  %8298 = vmatmul.mubr.msk.f32.gmra.mrb[30].mxu1 %vm1385_vm8, %v9910_v6  ;;  %v8513_v10 = vpack.c.bf16 %v6843_v9, %v6842_v29  ;;  %v1835_v14 = vrot.slane %v9891_v63, 6  ;;  %v6870_v12 = vld [vmem:[%s12366_s3 + $0xa0] sm:$0xff] }
 0x202   :  { %8093 = vmatprep.mubr.msk.f32.mxu0 %vm9097_vm1, %v9096_v0  ;;  %8300 = vmatprep.mubr.msk.f32.mxu1 %vm9097_vm1, %v9096_v0  ;;  %v8527_v1 = vpack.c.bf16 %v6871_v60, %v6870_v12 }
 0x205   :  { %8094 = vmatmul.mubr.msk.f32.gmra.mrb[160].mxu0 %vm1385_vm8, %v9902_v4  ;;  %8301 = vmatmul.mubr.msk.f32.gmra.mrb[32].mxu1 %vm1385_vm8, %v9928_v11 }
 0x206   :  { %8104 = vmatprep.mubr.msk.f32.mxu0 %vm9097_vm1, %v9096_v0  ;;  %8303 = vmatprep.mubr.msk.f32.mxu1 %vm9097_vm1, %v9096_v0 }
 0x209   :  { %8105 = vmatmul.mubr.msk.f32.vlgmr.msra.gmra.mrb[162].mxu0 %vm1385_vm8, %v9744_v28  ;;  %8304 = vmatmul.mubr.msk.f32.gmra.mrb[34].mxu1 %vm1385_vm8, %v2244_v2 }
 0x20a   :  { %8507 = vmatpush3.bf16.msra.mxu0 %v8506_v26  ;;  %8107 = vmatprep.mubr.msk.f32.mxu0 %vm9097_vm1, %v9096_v0 }
 0x20b   :  { %8508 = vmatprep.subr.bf16.mxu0 %v9098_v42  ;;  %8353 = vmatprep.mubr.msk.f32.mxu1 %vm9097_vm1, %v9096_v0 }
 0x20d   :  { %8108 = vmatmul.mubr.msk.f32.gmra.mrb[164].mxu0 %vm1385_vm8, %v9748_v34 }
 0x20e   :  { %8110 = vmatprep.mubr.msk.f32.mxu0 %vm9097_vm1, %v9096_v0  ;;  %8511 = vmatpush3.bf16.msk.msra.mxu0 %vm9690_vm7, %v8509_v59 }
 0x20f   :  { %8512 = vmatprep.subr.bf16.mxu0 %v9098_v42 }
 0x211   :  { %8111 = vmatmul.mubr.msk.f32.gmra.mrb[166].mxu0 %vm1385_vm8, %v9766_v8 }
 0x212   :  { %8113 = vmatprep.mubr.msk.f32.mxu0 %vm9097_vm1, %v9096_v0 }
 0x215   :  { %8114 = vmatmul.mubr.msk.f32.gmra.mrb[168].mxu0 %vm1385_vm8, %v9782_v58 }
 0x216   :  { %8116 = vmatprep.mubr.msk.f32.mxu0 %vm9097_vm1, %v9096_v0 }
 0x219   :  { %8117 = vmatmul.mubr.msk.f32.gmra.mrb[170].mxu0 %vm1385_vm8, %v9806_v24 }
 0x21a   :  { %8119 = vmatprep.mubr.msk.f32.mxu0 %vm9097_vm1, %v9096_v0 }
 0x21d   :  { %8120 = vmatmul.mubr.msk.f32.gmra.mrb[172].mxu0 %vm1385_vm8, %v9827_v23 }
 0x21e   :  { %8122 = vmatprep.mubr.msk.f32.mxu0 %vm9097_vm1, %v9096_v0 }
 0x221   :  { %8123 = vmatmul.mubr.msk.f32.gmra.mrb[174].mxu0 %vm1385_vm8, %v9848_v41 }
 0x222   :  { %8125 = vmatprep.mubr.msk.f32.mxu0 %vm9097_vm1, %v9096_v0 }
 0x225   :  { %8126 = vmatmul.mubr.msk.f32.gmra.mrb[176].mxu0 %vm1385_vm8, %v9869_v53 }
 0x226   :  { %8128 = vmatprep.mubr.msk.f32.mxu0 %vm9097_vm1, %v9096_v0 }
 0x229   :  { %8129 = vmatmul.mubr.msk.f32.gmra.mrb[178].mxu0 %vm1385_vm8, %v9888_v62 }
 0x22a   :  { %8139 = vmatprep.mubr.msk.f32.mxu0 %vm9097_vm1, %v9096_v0 }
 0x22d   :  { %8140 = vmatmul.mubr.msk.f32.vlgmr.msra.gmra.mrb[180].mxu0 %vm1385_vm8, %v9763_v55  ;;  %v6856_v55 = vld [vmem:[%s12366_s3 + $0x80] sm:$0xff] }
 0x22e   :  { %8514 = vmatpush3.bf16.msra.mxu0 %v8513_v10  ;;  %8142 = vmatprep.mubr.msk.f32.mxu0 %vm9097_vm1, %v9096_v0 }
 0x22f   :  { %8515 = vmatprep.subr.bf16.mxu0 %v9098_v42 }
 0x231   :  { %8143 = vmatmul.mubr.msk.f32.gmra.mrb[182].mxu0 %vm1385_vm8, %v9779_v3  ;;  %v6857_v3 = vld [vmem:[%s12366_s3 + $0x88] sm:$0xff] }
 0x232   :  { %8145 = vmatprep.mubr.msk.f32.mxu0 %vm9097_vm1, %v9096_v0  ;;  %8518 = vmatpush3.bf16.msk.msra.mxu0 %vm9690_vm7, %v8516_v19  ;;  %v8520_v25 = vpack.c.bf16 %v6857_v3, %v6856_v55 }
 0x233   :  { %8519 = vmatprep.subr.bf16.mxu0 %v9098_v42 }
 0x235   :  { %8146 = vmatmul.mubr.msk.f32.gmra.mrb[184].mxu0 %vm1385_vm8, %v9802_v17  ;;  %v1819_v17 = vrot.slane %v9748_v34, 6 }
 0x236   :  { %8148 = vmatprep.mubr.msk.f32.mxu0 %vm9097_vm1, %v9096_v0 }
 0x237   :  { %v1822_v35 = vsel %vm509_vm5, %v1819_v17, %v1821_v33 }
 0x239   :  { %8149 = vmatmul.mubr.msk.f32.gmra.mrb[186].mxu0 %vm1385_vm8, %v9824_v22  ;;  %v1818_v22 = vrot.slane %v9744_v28, 6  ;;  %v8523_v28 = vpack.c.bf16 %v6859_v30, %v6858_v27 }
 0x23a   :  { %8151 = vmatprep.mubr.msk.f32.mxu0 %vm9097_vm1, %v9096_v0 }
 0x23b   :  { %v1820_v31 = vsel %vm509_vm5, %v1818_v22, %v1819_v17 }
 0x23d   :  { %8152 = vmatmul.mubr.msk.f32.gmra.mrb[188].mxu0 %vm1385_vm8, %v9845_v39  ;;  %v1825_v39 = vrot.slane %v9806_v24, 6 }
 0x23e   :  { %8154 = vmatprep.mubr.msk.f32.mxu0 %vm9097_vm1, %v9096_v0 }
 0x23f   :  { %v1826_v44 = vsel %vm509_vm5, %v1823_v61, %v1825_v39  ;;  %v1828_v46 = vsel %vm509_vm5, %v1825_v39, %v1827_v45  ;;  %v6900_v61 = vld [vmem:[%s12368_s5 + $0x30] sm:$0xff] }
 0x241   :  { %8155 = vmatmul.mubr.msk.f32.gmra.mrb[190].mxu0 %vm1385_vm8, %v9866_v40  ;;  %v1833_v40 = vrot.slane %v9888_v62, 6 }
 0x242   :  { %8157 = vmatprep.mubr.msk.f32.mxu0 %vm9097_vm1, %v9096_v0 }
 0x243   :  { %v1834_v57 = vsel %vm509_vm5, %v1831_v50, %v1833_v40 }
 0x245   :  { %8158 = vmatmul.mubr.msk.f32.gmra.mrb[192].mxu0 %vm1385_vm8, %v9885_v48  ;;  %v1836_v48 = vsel %vm509_vm5, %v1833_v40, %v1835_v14  ;;  %v6902_v14 = vld [vmem:[%s12368_s5 + $0x40] sm:$0xff] }
 0x246   :  { %8160 = vmatprep.mubr.msk.f32.mxu0 %vm9097_vm1, %v9096_v0 }
 0x249   :  { %8161 = vmatmul.mubr.msk.f32.gmra.mrb[194].mxu0 %vm1385_vm8, %v9910_v6  ;;  %v6872_v6 = vld [vmem:[%s12366_s3 + $0xb0] sm:$0xff] }
 0x24a   :  { %8163 = vmatprep.mubr.msk.f32.mxu0 %vm9097_vm1, %v9096_v0  ;;  %v8530_v7 = vpack.c.bf16 %v6873_v37, %v6872_v6  ;;  %v2424_v6 = vld [vmem:[%s12368_s5] sm:$0xff]  ;;  %v2425_v37 = vld [vmem:[%s12368_s5 + $0x8] sm:$0xff] }
 0x24d   :  { %8164 = vmatmul.mubr.msk.f32.gmra.mrb[196].mxu0 %vm1385_vm8, %v9928_v11 }
 0x24e   :  { %8174 = vmatprep.mubr.msk.f32.mxu0 %vm9097_vm1, %v9096_v0 }
 0x251   :  { %8175 = vmatmul.mubr.msk.f32.vlgmr.msra.gmra.mrb[198].mxu0 %vm1385_vm8, %v1820_v31 }
 0x252   :  { %8521 = vmatpush3.bf16.msra.mxu0 %v8520_v25  ;;  %8177 = vmatprep.mubr.msk.f32.mxu0 %vm9097_vm1, %v9096_v0 }
 0x253   :  { %8522 = vmatprep.subr.bf16.mxu0 %v9098_v42 }
 0x255   :  { %8178 = vmatmul.mubr.msk.f32.gmra.mrb[200].mxu0 %vm1385_vm8, %v1822_v35  ;;  %v6899_v35 = vld [vmem:[%s12368_s5 + $0x28] sm:$0xff] }
 0x256   :  { %8180 = vmatprep.mubr.msk.f32.mxu0 %vm9097_vm1, %v9096_v0  ;;  %8525 = vmatpush3.bf16.msk.msra.mxu0 %vm9690_vm7, %v8523_v28 }
 0x257   :  { %8526 = vmatprep.subr.bf16.mxu0 %v9098_v42 }
 0x259   :  { %8181 = vmatmul.mubr.msk.f32.gmra.mrb[202].mxu0 %vm1385_vm8, %v1824_v36  ;;  %v8541_v36 = vpack.c.bf16 %v6900_v61, %v6899_v35 }
 0x25a   :  { %8183 = vmatprep.mubr.msk.f32.mxu0 %vm9097_vm1, %v9096_v0 }
 0x25d   :  { %8184 = vmatmul.mubr.msk.f32.gmra.mrb[204].mxu0 %vm1385_vm8, %v1826_v44 }
 0x25e   :  { %8186 = vmatprep.mubr.msk.f32.mxu0 %vm9097_vm1, %v9096_v0 }
 0x261   :  { %8187 = vmatmul.mubr.msk.f32.gmra.mrb[206].mxu0 %vm1385_vm8, %v1828_v46 }
 0x262   :  { %8189 = vmatprep.mubr.msk.f32.mxu0 %vm9097_vm1, %v9096_v0 }
 0x265   :  { %8190 = vmatmul.mubr.msk.f32.gmra.mrb[208].mxu0 %vm1385_vm8, %v1830_v49 }
 0x266   :  { %8192 = vmatprep.mubr.msk.f32.mxu0 %vm9097_vm1, %v9096_v0 }
 0x269   :  { %8193 = vmatmul.mubr.msk.f32.gmra.mrb[210].mxu0 %vm1385_vm8, %v1832_v21 }
 0x26a   :  { %8195 = vmatprep.mubr.msk.f32.mxu0 %vm9097_vm1, %v9096_v0 }
 0x26d   :  { %8196 = vmatmul.mubr.msk.f32.gmra.mrb[212].mxu0 %vm1385_vm8, %v1834_v57  ;;  %v6901_v57 = vld [vmem:[%s12368_s5 + $0x38] sm:$0xff] }
 0x26e   :  { %8198 = vmatprep.mubr.msk.f32.mxu0 %vm9097_vm1, %v9096_v0  ;;  %v8544_v12 = vpack.c.bf16 %v6902_v14, %v6901_v57 }
 0x271   :  { %8199 = vmatmul.mubr.msk.f32.gmra.mrb[214].mxu0 %vm1385_vm8, %v1836_v48 }
 0x272   :  { %8209 = vmatprep.mubr.msk.f32.mxu0 %vm9097_vm1, %v9096_v0 }
 0x275   :  { %8210 = vmatmul.mubr.msk.f32.vlgmr.msra.gmra.mrb[216].mxu0 %vm1385_vm8, %v9748_v34  ;;  %v2112_v34 = vsel %vm49_vm2, %v9902_v4, %v2111_v20 }
 0x276   :  { %8528 = vmatpush3.bf16.msra.mxu0 %v8527_v1  ;;  %8212 = vmatprep.mubr.msk.f32.mxu0 %vm9097_vm1, %v9096_v0 }
 0x277   :  { %8529 = vmatprep.subr.bf16.mxu0 %v9098_v42 }
 0x279   :  { %8213 = vmatmul.mubr.msk.f32.gmra.mrb[218].mxu0 %vm1385_vm8, %v9766_v8 }
 0x27a   :  { %8215 = vmatprep.mubr.msk.f32.mxu0 %vm9097_vm1, %v9096_v0  ;;  %8532 = vmatpush3.bf16.msk.msra.mxu0 %vm9690_vm7, %v8530_v7  ;;  %v8547_v7 = vpack.c.bf16 %v2425_v37, %v2424_v6 }
 0x27b   :  { %8540 = vmatprep.subr.bf16.mxu0 %v9098_v42 }
 0x27c   :  { %8548 = vmatpush3.bf16.msra.mxu1 %v8547_v7 }
 0x27d   :  { %8216 = vmatmul.mubr.msk.f32.gmra.mrb[220].mxu0 %vm1385_vm8, %v9782_v58  ;;  %8549 = vmatprep.subr.bf16.mxu1 %v9098_v42 }
 0x27e   :  { %8218 = vmatprep.mubr.msk.f32.mxu0 %vm9097_vm1, %v9096_v0 }
 0x281   :  { %8219 = vmatmul.mubr.msk.f32.gmra.mrb[222].mxu0 %vm1385_vm8, %v9806_v24 }
 0x282   :  { %8221 = vmatprep.mubr.msk.f32.mxu0 %vm9097_vm1, %v9096_v0 }
 0x285   :  { %8222 = vmatmul.mubr.msk.f32.gmra.mrb[224].mxu0 %vm1385_vm8, %v9827_v23 }
 0x286   :  { %8224 = vmatprep.mubr.msk.f32.mxu0 %vm9097_vm1, %v9096_v0 }
 0x289   :  { %8225 = vmatmul.mubr.msk.f32.gmra.mrb[226].mxu0 %vm1385_vm8, %v9848_v41 }
 0x28a   :  { %8227 = vmatprep.mubr.msk.f32.mxu0 %vm9097_vm1, %v9096_v0 }
 0x28d   :  { %8228 = vmatmul.mubr.msk.f32.gmra.mrb[228].mxu0 %vm1385_vm8, %v9869_v53 }
 0x28e   :  { %8230 = vmatprep.mubr.msk.f32.mxu0 %vm9097_vm1, %v9096_v0 }
 0x291   :  { %8231 = vmatmul.mubr.msk.f32.gmra.mrb[230].mxu0 %vm1385_vm8, %v9888_v62 }
 0x292   :  { %8233 = vmatprep.mubr.msk.f32.mxu0 %vm9097_vm1, %v9096_v0 }
 0x295   :  { %8234 = vmatmul.mubr.msk.f32.gmra.mrb[232].mxu0 %vm1385_vm8, %v9891_v63 }
 0x296   :  { %8244 = vmatprep.mubr.msk.f32.mxu0 %vm9097_vm1, %v9096_v0 }
 0x299   :  { %8245 = vmatmul.mubr.msk.f32.vlgmr.msra.gmra.mrb[234].mxu0 %vm1385_vm8, %v9776_v16 }
 0x29a   :  { %8247 = vmatprep.mubr.msk.f32.mxu0 %vm9097_vm1, %v9096_v0  ;;  %8542 = vmatpush3.bf16.msra.mxu0 %v8541_v36 }
 0x29b   :  { %8543 = vmatprep.subr.bf16.mxu0 %v9098_v42 }
 0x29d   :  { %8248 = vmatmul.mubr.msk.f32.gmra.mrb[236].mxu0 %vm1385_vm8, %v9799_v56 }
 0x29e   :  { %8250 = vmatprep.mubr.msk.f32.mxu0 %vm9097_vm1, %v9096_v0  ;;  %8545 = vmatpush3.bf16.msra.mxu0 %v8544_v12 }
 0x29f   :  { %8314 = vmatprep.subr.mxu0 %v9096_v0 }
 0x2a1   :  { %8251 = vmatmul.mubr.msk.f32.gmra.mrb[238].mxu0 %vm1385_vm8, %v9821_v18 }
 0x2a2   :  { %8253 = vmatprep.mubr.msk.f32.mxu0 %vm9097_vm1, %v9096_v0 }
 0x2a5   :  { %8254 = vmatmul.mubr.msk.f32.gmra.mrb[240].mxu0 %vm1385_vm8, %v9842_v38 }
 0x2a6   :  { %8256 = vmatprep.mubr.msk.f32.mxu0 %vm9097_vm1, %v9096_v0 }
 0x2a9   :  { %8257 = vmatmul.mubr.msk.f32.gmra.mrb[242].mxu0 %vm1385_vm8, %v9863_v52 }
 0x2aa   :  { %8259 = vmatprep.mubr.msk.f32.mxu0 %vm9097_vm1, %v9096_v0 }
 0x2ad   :  { %8260 = vmatmul.mubr.msk.f32.gmra.mrb[244].mxu0 %vm1385_vm8, %v9882_v15 }
 0x2ae   :  { %8262 = vmatprep.mubr.msk.f32.mxu0 %vm9097_vm1, %v9096_v0 }
 0x2b1   :  { %8263 = vmatmul.mubr.msk.f32.gmra.mrb[246].mxu0 %vm1385_vm8, %v9907_v5 }
 0x2b2   :  { %8265 = vmatprep.mubr.msk.f32.mxu0 %vm9097_vm1, %v9096_v0 }
 0x2b5   :  { %8266 = vmatmul.mubr.msk.f32.gmra.mrb[248].mxu0 %vm1385_vm8, %v2112_v34 }
 0x2b6   :  { %8268 = vmatprep.mubr.msk.f32.mxu0 %vm9097_vm1, %v9096_v0 }
 0x2b8   :  { %v1473_v8 = vpop.f32.mrb[144].mxu0 }
 0x2b9   :  { %v8071_v16 = vpop.f32.mrb[145].mxu0  ;;  %8269 = vmatmul.mubr.msk.f32.gmra.mrb[250].mxu0 %vm1385_vm8, %v2111_v20 }
 0x2ba   :  { %8316 = vmatprep.mubr.msk.f32.mxu0 %vm9097_vm1, %v9096_v0  ;;  %v2426_v16 = vld [vmem:[%s12368_s5 + $0x10] sm:$0xff] }
 0x2bc   :  { %v1478_v58 = vpop.f32.mrb[146].mxu0  ;;  %v10192_v56 = vpop.f32.mrb[18].mxu1 }
 0x2bd   :  { %v8074_v24 = vpop.f32.mrb[147].mxu0  ;;  %v8281_v18 = vpop.f32.mrb[19].mxu1 }
 0x2c0   :  { %v1483_v23 = vpop.f32.mrb[148].mxu0  ;;  %v10194_v38 = vpop.f32.mrb[20].mxu1 }
 0x2c1   :  { %v8077_v41 = vpop.f32.mrb[149].mxu0  ;;  %v8284_v52 = vpop.f32.mrb[21].mxu1 }
 0x2c2   :  { %v2428_v52 = vld [vmem:[%s12368_s5 + $0x20] sm:$0xff] }
 0x2c4   :  { %v1488_v53 = vpop.f32.mrb[150].mxu0  ;;  %v10196_v15 = vpop.f32.mrb[22].mxu1 }
 0x2c5   :  { %v8080_v62 = vpop.f32.mrb[151].mxu0  ;;  %v8287_v63 = vpop.f32.mrb[23].mxu1 }
 0x2c8   :  { %v1493_v4 = vpop.f32.mrb[152].mxu0  ;;  %v10198_v5 = vpop.f32.mrb[24].mxu1 }
 0x2c9   :  { %v8083_v43 = vpop.f32.mrb[153].mxu0  ;;  %v8290_v11 = vpop.f32.mrb[25].mxu1 }
 0x2cc   :  { %v1498_v26 = vpop.f32.mrb[154].mxu0  ;;  %v10200_v51 = vpop.f32.mrb[26].mxu1 }
 0x2cd   :  { %v8086_v54 = vpop.f32.mrb[155].mxu0  ;;  %v8293_v2 = vpop.f32.mrb[27].mxu1 }
 0x2d0   :  { %v1503_v59 = vpop.f32.mrb[156].mxu0  ;;  %v10202_v29 = vpop.f32.mrb[28].mxu1 }
 0x2d1   :  { %v8089_v9 = vpop.f32.mrb[157].mxu0  ;;  %v8296_v10 = vpop.f32.mrb[29].mxu1 }
 0x2d4   :  { %v1508_v13 = vpop.f32.mrb[158].mxu0  ;;  %v10204_v32 = vpop.f32.mrb[30].mxu1 }
 0x2d5   :  { %v8092_v19 = vpop.f32.mrb[159].mxu0  ;;  %v8299_v55 = vpop.f32.mrb[31].mxu1 }
 0x2d8   :  { %v1513_v3 = vpop.f32.mrb[160].mxu0  ;;  %v10206_v17 = vpop.f32.mrb[32].mxu1 }
 0x2d9   :  { %v8095_v22 = vpop.f32.mrb[161].mxu0  ;;  %v8302_v25 = vpop.f32.mrb[33].mxu1 }
 0x2dc   :  { %v1604_v27 = vpop.f32.mrb[162].mxu0  ;;  %v10208_v30 = vpop.f32.mrb[34].mxu1 }
 0x2dd   :  { %v1605_v31 = vadd.f32 %v1604_v27, %v1473_v8  ;;  %v8106_v33 = vpop.f32.mrb[163].mxu0  ;;  %v8305_v28 = vpop.f32.mrb[35].mxu1 }
 0x2e0   :  { %v1609_v39 = vpop.f32.mrb[164].mxu0 }
 0x2e1   :  { %v1610_v44 = vadd.f32 %v1609_v39, %v1478_v58  ;;  %v8109_v45 = vpop.f32.mrb[165].mxu0  ;;  %v2427_v58 = vld [vmem:[%s12368_s5 + $0x18] sm:$0xff] }
 0x2e2   :  { %v8550_v24 = vpack.c.bf16 %v2427_v58, %v2426_v16 }
 0x2e4   :  { %v1614_v46 = vpop.f32.mrb[166].mxu0  ;;  %8551 = vmatpush3.bf16.msra.mxu1 %v8550_v24 }
 0x2e5   :  { %v1615_v47 = vadd.f32 %v1614_v46, %v1483_v23  ;;  %v8112_v49 = vpop.f32.mrb[167].mxu0  ;;  %8351 = vmatprep.subr.mxu1 %v9096_v0 }
 0x2e8   :  { %v1619_v50 = vpop.f32.mrb[168].mxu0  ;;  %8352 = vmatpush3.msra.mxu1 %v2428_v52 }
 0x2e9   :  { %v1620_v21 = vadd.f32 %v1619_v50, %v1488_v53  ;;  %v8115_v40 = vpop.f32.mrb[169].mxu0  ;;  %8558 = vmatprep.subr.bf16.mxu1 %v9098_v42 }
 0x2ec   :  { %v1624_v60 = vpop.f32.mrb[170].mxu0 }
 0x2ed   :  { %v1625_v48 = vadd.f32 %v1624_v60, %v1493_v4  ;;  %v8118_v1 = vpop.f32.mrb[171].mxu0 }
 0x2f0   :  { %v1629_v20 = vpop.f32.mrb[172].mxu0 }
 0x2f1   :  { %v1630_v34 = vadd.f32 %v1629_v20, %v1498_v26  ;;  %v8121_v8 = vpop.f32.mrb[173].mxu0  ;;  %v6903_v26 = vld [vmem:[%s12368_s5 + $0x48] sm:$0xff] }
 0x2f2   :  { %8315 = vmatpush3.msra.mxu0 %v6903_v26 }
 0x2f3   :  { %8552 = vmatprep.subr.bf16.mxu0 %v9098_v42 }
 0x2f4   :  { %v1634_v18 = vpop.f32.mrb[174].mxu0 }
 0x2f5   :  { %v1635_v23 = vadd.f32 %v1634_v18, %v1503_v59  ;;  %v8124_v41 = vpop.f32.mrb[175].mxu0 }
 0x2f8   :  { %v1639_v53 = vpop.f32.mrb[176].mxu0 }
 0x2f9   :  { %v1640_v62 = vadd.f32 %v1639_v53, %v1508_v13  ;;  %v8127_v63 = vpop.f32.mrb[177].mxu0 }
 0x2fc   :  { %v1644_v4 = vpop.f32.mrb[178].mxu0 }
 0x2fd   :  { %v1645_v43 = vadd.f32 %v1644_v4, %v1513_v3  ;;  %v8130_v11 = vpop.f32.mrb[179].mxu0 }
 0x300   :  { %v1760_v54 = vpop.f32.mrb[180].mxu0 }
 0x301   :  { %v1804_v2 = vadd.f32 %v1760_v54, %v1605_v31  ;;  %v8141_v59 = vpop.f32.mrb[181].mxu0 }
 0x304   :  { %v1765_v9 = vpop.f32.mrb[182].mxu0 }
 0x305   :  { %v1805_v10 = vadd.f32 %v1765_v9, %v1610_v44  ;;  %v8144_v19 = vpop.f32.mrb[183].mxu0 }
 0x308   :  { %v1770_v13 = vpop.f32.mrb[184].mxu0 }
 0x309   :  { %v1806_v55 = vadd.f32 %v1770_v13, %v1615_v47  ;;  %v8147_v22 = vpop.f32.mrb[185].mxu0 }
 0x30c   :  { %v1775_v25 = vpop.f32.mrb[186].mxu0 }
 0x30d   :  { %v1807_v27 = vadd.f32 %v1775_v25, %v1620_v21  ;;  %v8150_v3 = vpop.f32.mrb[187].mxu0 }
 0x310   :  { %v1780_v33 = vpop.f32.mrb[188].mxu0 }
 0x311   :  { %v1808_v28 = vadd.f32 %v1780_v33, %v1625_v48  ;;  %v8153_v35 = vpop.f32.mrb[189].mxu0 }
 0x314   :  { %v1785_v61 = vpop.f32.mrb[190].mxu0 }
 0x315   :  { %v1809_v36 = vadd.f32 %v1785_v61, %v1630_v34  ;;  %v8156_v39 = vpop.f32.mrb[191].mxu0 }
 0x318   :  { %v1790_v45 = vpop.f32.mrb[192].mxu0 }
 0x319   :  { %v1810_v46 = vadd.f32 %v1790_v45, %v1635_v23  ;;  %v8159_v49 = vpop.f32.mrb[193].mxu0 }
 0x31c   :  { %v1795_v31 = vpop.f32.mrb[194].mxu0 }
 0x31d   :  { %v1811_v50 = vadd.f32 %v1795_v31, %v1640_v62  ;;  %v8162_v40 = vpop.f32.mrb[195].mxu0 }
 0x320   :  { %v1800_v44 = vpop.f32.mrb[196].mxu0 }
 0x321   :  { %v1812_v57 = vadd.f32 %v1800_v44, %v1645_v43  ;;  %v8165_v14 = vpop.f32.mrb[197].mxu0 }
 0x324   :  { %v1924_v47 = vpop.f32.mrb[198].mxu0 }
 0x325   :  { %v1968_v12 = vadd.f32 %v1924_v47, %v1804_v2  ;;  %v8176_v60 = vpop.f32.mrb[199].mxu0 }
 0x328   :  { %v1929_v21 = vpop.f32.mrb[200].mxu0 }
 0x329   :  { %v1969_v1 = vadd.f32 %v1929_v21, %v1805_v10  ;;  %v8179_v6 = vpop.f32.mrb[201].mxu0 }
 0x32c   :  { %v1934_v48 = vpop.f32.mrb[202].mxu0 }
 0x32d   :  { %v1970_v37 = vadd.f32 %v1934_v48, %v1806_v55  ;;  %v8182_v7 = vpop.f32.mrb[203].mxu0 }
 0x330   :  { %v1939_v20 = vpop.f32.mrb[204].mxu0 }
 0x331   :  { %v1971_v34 = vadd.f32 %v1939_v20, %v1807_v27  ;;  %v8185_v8 = vpop.f32.mrb[205].mxu0 }
 0x332   :  { %v6937_v8 = vld [vmem:[%s12368_s5 + $0x80] sm:$0xff] }
 0x334   :  { %v1944_v16 = vpop.f32.mrb[206].mxu0 }
 0x335   :  { %v1972_v58 = vadd.f32 %v1944_v16, %v1808_v28  ;;  %v8188_v24 = vpop.f32.mrb[207].mxu0 }
 0x338   :  { %v1949_v18 = vpop.f32.mrb[208].mxu0 }
 0x339   :  { %v1973_v23 = vadd.f32 %v1949_v18, %v1809_v36  ;;  %v8191_v41 = vpop.f32.mrb[209].mxu0 }
 0x33c   :  { %v1954_v52 = vpop.f32.mrb[210].mxu0 }
 0x33d   :  { %v1974_v53 = vadd.f32 %v1954_v52, %v1810_v46  ;;  %v8194_v62 = vpop.f32.mrb[211].mxu0 }
 0x33e   :  { %v6939_v62 = vld [vmem:[%s12368_s5 + $0x90] sm:$0xff] }
 0x340   :  { %v1959_v63 = vpop.f32.mrb[212].mxu0 }
 0x341   :  { %v1975_v4 = vadd.f32 %v1959_v63, %v1811_v50  ;;  %v8197_v43 = vpop.f32.mrb[213].mxu0 }
 0x344   :  { %v1964_v11 = vpop.f32.mrb[214].mxu0 }
 0x345   :  { %v1976_v26 = vadd.f32 %v1964_v11, %v1812_v57  ;;  %v8200_v54 = vpop.f32.mrb[215].mxu0 }
 0x348   :  { %v2053_v2 = vpop.f32.mrb[216].mxu0 }
 0x349   :  { %v2097_v59 = vadd.f32 %v2053_v2, %v1968_v12  ;;  %v8211_v9 = vpop.f32.mrb[217].mxu0 }
 0x34c   :  { %v2058_v10 = vpop.f32.mrb[218].mxu0 }
 0x34d   :  { %v2098_v19 = vadd.f32 %v2058_v10, %v1969_v1  ;;  %v8214_v13 = vpop.f32.mrb[219].mxu0  ;;  %v10257_v1 = vld [vmem:[%s12369_s4] ss:$0 sm:$0xff] }
 0x350   :  { %v2063_v55 = vpop.f32.mrb[220].mxu0 }
 0x351   :  { %v2099_v22 = vadd.f32 %v2063_v55, %v1970_v37  ;;  %v8217_v25 = vpop.f32.mrb[221].mxu0 }
 0x354   :  { %v2068_v27 = vpop.f32.mrb[222].mxu0 }
 0x355   :  { %v2100_v3 = vadd.f32 %v2068_v27, %v1971_v34  ;;  %v8220_v33 = vpop.f32.mrb[223].mxu0  ;;  %v6936_v34 = vld [vmem:[%s12368_s5 + $0x78] sm:$0xff] }
 0x356   :  { %v8559_v52 = vpack.c.bf16 %v6937_v8, %v6936_v34 }
 0x358   :  { %v2073_v28 = vpop.f32.mrb[224].mxu0 }
 0x359   :  { %v2101_v35 = vadd.f32 %v2073_v28, %v1972_v58  ;;  %v8223_v61 = vpop.f32.mrb[225].mxu0 }
 0x35c   :  { %v2078_v36 = vpop.f32.mrb[226].mxu0 }
 0x35d   :  { %v10246_v39 = vadd.f32 %v2078_v36, %v1973_v23  ;;  %v8226_v45 = vpop.f32.mrb[227].mxu0  ;;  %v6924_v36 = vld [vmem:[%s12368_s5 + $0x60] sm:$0xff] }
 0x35e   :  { %v6925_v45 = vld [vmem:[%s12368_s5 + $0x68] sm:$0xff] }
 0x360   :  { %v2083_v46 = vpop.f32.mrb[228].mxu0 }
 0x361   :  { %v10248_v49 = vadd.f32 %v2083_v46, %v1974_v53  ;;  %v8229_v31 = vpop.f32.mrb[229].mxu0  ;;  %v6938_v53 = vld [vmem:[%s12368_s5 + $0x88] sm:$0xff] }
 0x362   :  { %v8562_v9 = vpack.c.bf16 %v6939_v62, %v6938_v53 }
 0x364   :  { %v2088_v50 = vpop.f32.mrb[230].mxu0 }
 0x365   :  { %v10250_v40 = vadd.f32 %v2088_v50, %v1975_v4  ;;  %v8232_v44 = vpop.f32.mrb[231].mxu0  ;;  %v6940_v50 = vld [vmem:[%s12368_s5 + $0x98] sm:$0xff] }
 0x368   :  { %v2093_v57 = vpop.f32.mrb[232].mxu0 }
 0x369   :  { %v10252_v14 = vadd.f32 %v2093_v57, %v1976_v26  ;;  %v8235_v47 = vpop.f32.mrb[233].mxu0 }
 0x36c   :  { %v2186_v12 = vpop.f32.mrb[234].mxu0 }
 0x36d   :  { %v2230_v60 = vadd.f32 %v2186_v12, %v2097_v59  ;;  %v8246_v21 = vpop.f32.mrb[235].mxu0  ;;  %v6922_v59 = vld [vmem:[%s12368_s5 + $0x50] sm:$0xff] }
 0x36e   :  { %v8556_v21 = vpack.c.bf16 %v6925_v45, %v6924_v36 }
 0x36f   :  { %v2360_v6 = vadd.f32 %v10192_v56, %v2230_v60 }
 0x370   :  { %v2191_v48 = vpop.f32.mrb[236].mxu0 }
 0x371   :  { %v2376_v37 = vadd.f32 %v10257_v1, %v2360_v6  ;;  %v2231_v7 = vadd.f32 %v2191_v48, %v2098_v19  ;;  %v8249_v20 = vpop.f32.mrb[237].mxu0 }
 0x373   :  { %v2385_v16 = vmax.f32 %v2376_v37, 0.0  ;;  %v2361_v58 = vadd.f32 %v10194_v38, %v2231_v7 }
 0x374   :  { %v2196_v24 = vpop.f32.mrb[238].mxu0 }
 0x375   :  { %v2403_v18 = vrot.slane %v2385_v16, 4  ;;  %v2377_v56 = vadd.f32 %v10257_v1, %v2361_v58  ;;  %v2232_v23 = vadd.f32 %v2196_v24, %v2099_v22  ;;  %v8252_v41 = vpop.f32.mrb[239].mxu0  ;;  %v6926_v24 = vld [vmem:[%s12368_s5 + $0x70] sm:$0xff] }
 0x377   :  { %v10276_v63 = vsel %vm347_vm4, 0.0, %v2403_v18  ;;  %v2386_v38 = vmax.f32 %v2377_v56, 0.0  ;;  %v2362_v4 = vadd.f32 %v10196_v15, %v2232_v23  ;;  %v6923_v15 = vld [vmem:[%s12368_s5 + $0x58] sm:$0xff] }
 0x378   :  { %v2201_v43 = vpop.f32.mrb[240].mxu0  ;;  %8354 = vmatmul.mubr.msk.f32.vlgmr.msra.gmra.mrb[36].mxu1 %vm2453_vm9, %v10276_v63  ;;  %v2436_v55 = vrot.slane %v10276_v63, 2  ;;  %v8553_v27 = vpack.c.bf16 %v6923_v15, %v6922_v59  ;;  %v2879_v36 = vrot.slane %v10276_v63, 6 }
 0x379   :  { %v2404_v11 = vrot.slane %v2386_v38, 4  ;;  %v2378_v26 = vadd.f32 %v10257_v1, %v2362_v4  ;;  %v2233_v54 = vadd.f32 %v2201_v43, %v2100_v3  ;;  %v8255_v2 = vpop.f32.mrb[241].mxu0  ;;  %8356 = vmatprep.mubr.msk.f32.mxu1 %vm9097_vm1, %v9096_v0  ;;  %8560 = vmatpush3.bf16.msra.mxu1 %v8559_v52 }
 0x37a   :  { %8561 = vmatprep.subr.bf16.mxu1 %v9098_v42 }
 0x37b   :  { %v2387_v10 = vmax.f32 %v2378_v26, 0.0  ;;  %v2363_v19 = vadd.f32 %v10198_v5, %v2233_v54  ;;  %v10293_v13 = vsel %vm347_vm4, %v2403_v18, %v2404_v11 }
 0x37c   :  { %v2206_v22 = vpop.f32.mrb[242].mxu0  ;;  %v2437_v25 = vrot.slane %v10293_v13, 2  ;;  %8357 = vmatmul.mubr.msk.f32.gmra.mrb[38].mxu1 %vm2453_vm9, %v10293_v13 }
 0x37d   :  { %v2406_v3 = vrot.slane %v2387_v10, 4  ;;  %v2379_v33 = vadd.f32 %v10257_v1, %v2363_v19  ;;  %v2234_v28 = vadd.f32 %v2206_v22, %v2101_v35  ;;  %v8258_v61 = vpop.f32.mrb[243].mxu0  ;;  %8359 = vmatprep.mubr.msk.f32.mxu1 %vm9097_vm1, %v9096_v0  ;;  %8563 = vmatpush3.bf16.msra.mxu1 %v8562_v9 }
 0x37e   :  { %v2438_v5 = vsel %vm49_vm2, %v2436_v55, %v2437_v25  ;;  %8425 = vmatprep.subr.mxu1 %v9096_v0 }
 0x37f   :  { %v2388_v46 = vmax.f32 %v2379_v33, 0.0  ;;  %v2364_v35 = vadd.f32 %v10200_v51, %v2234_v28  ;;  %8317 = vmatmul.mubr.msk.f32.vlgmr.msra.gmra.mrb[252].mxu0 %vm2453_vm9, %v2438_v5  ;;  %v10313_v31 = vsel %vm347_vm4, %v2404_v11, %v2406_v3  ;;  %v2880_v28 = vrot.slane %v10293_v13, 6 }
 0x380   :  { %v2211_v44 = vpop.f32.mrb[244].mxu0  ;;  %8360 = vmatmul.mubr.msk.f32.gmra.mrb[40].mxu1 %vm2453_vm9, %v10313_v31  ;;  %8554 = vmatpush3.bf16.msra.mxu0 %v8553_v27  ;;  %v2439_v57 = vrot.slane %v10313_v31, 2 }
 0x381   :  { %v2408_v47 = vrot.slane %v2388_v46, 4  ;;  %v2380_v12 = vadd.f32 %v10257_v1, %v2364_v35  ;;  %v2235_v51 = vadd.f32 %v2211_v44, %v10246_v39  ;;  %v8261_v60 = vpop.f32.mrb[245].mxu0  ;;  %8319 = vmatprep.mubr.msk.f32.mxu0 %vm9097_vm1, %v9096_v0  ;;  %8362 = vmatprep.mubr.msk.f32.mxu1 %vm9097_vm1, %v9096_v0  ;;  %v2881_v46 = vsel %vm509_vm5, %v2879_v36, %v2880_v28  ;;  %v6951_v44 = vld [vmem:[%s12368_s5 + $0xa8] sm:$0xff]  ;;  %v6975_v36 = vld [vmem:[%s12370_s7 + $0xc0] sm:$0xff] }
 0x382   :  { %v2440_v6 = vsel %vm49_vm2, %v2437_v25, %v2439_v57  ;;  %8555 = vmatprep.subr.bf16.mxu0 %v9098_v42  ;;  %8426 = vmatpush3.msra.mxu1 %v6940_v50  ;;  %v2882_v35 = vrot.slane %v10313_v31, 6  ;;  %v6950_v50 = vld [vmem:[%s12368_s5 + $0xa0] sm:$0xff] }
 0x383   :  { %v2389_v48 = vmax.f32 %v2380_v12, 0.0  ;;  %v2365_v37 = vadd.f32 %v10202_v29, %v2235_v51  ;;  %8320 = vmatmul.mubr.msk.f32.gmra.mrb[254].mxu0 %vm2453_vm9, %v2440_v6  ;;  %v10332_v39 = vsel %vm347_vm4, %v2406_v3, %v2408_v47  ;;  %v2717_v51 = vrot.slane %v10276_v63, 4  ;;  %v6953_v63 = vld [vmem:[%s12368_s5 + $0xb8] sm:$0xff] }
 0x384   :  { %v2216_v7 = vpop.f32.mrb[246].mxu0  ;;  %v2441_v20 = vrot.slane %v10332_v39, 2  ;;  %8363 = vmatmul.mubr.msk.f32.gmra.mrb[42].mxu1 %vm2453_vm9, %v10332_v39  ;;  %8322 = vmatprep.mubr.msk.f32.mxu0 %vm9097_vm1, %v9096_v0  ;;  %v2884_v12 = vrot.slane %v10332_v39, 6  ;;  %v8565_v60 = vpack.c.bf16 %v6951_v44, %v6950_v50  ;;  %v3190_v50 = vld [vmem:[%s12370_s7 + $0x18] sm:$0xff]  ;;  %v6977_v44 = vld [vmem:[%s12370_s7 + $0xd0] sm:$0x3] }
 0x385   :  { %v2410_v34 = vrot.slane %v2389_v48, 4  ;;  %v2381_v8 = vadd.f32 %v10257_v1, %v2365_v37  ;;  %v2236_v16 = vadd.f32 %v2216_v7, %v10248_v49  ;;  %v8264_v29 = vpop.f32.mrb[247].mxu0  ;;  %8365 = vmatprep.mubr.msk.f32.mxu1 %vm9097_vm1, %v9096_v0  ;;  %8557 = vmatpush3.bf16.msra.mxu0 %v8556_v21  ;;  %v2720_v21 = vrot.slane %v10313_v31, 4  ;;  %v6952_v48 = vld [vmem:[%s12368_s5 + $0xb0] sm:$0xff] }
 0x386   :  { %v2442_v58 = vsel %vm49_vm2, %v2439_v57, %v2441_v20  ;;  %8388 = vmatprep.subr.mxu0 %v9096_v0  ;;  %v2718_v57 = vrot.slane %v10293_v13, 4  ;;  %v2885_v37 = vsel %vm509_vm5, %v2882_v35, %v2884_v12 }
 0x387   :  { %v2390_v18 = vmax.f32 %v2381_v8, 0.0  ;;  %v2366_v56 = vadd.f32 %v10204_v32, %v2236_v16  ;;  %8323 = vmatmul.mubr.msk.f32.gmra.mrb[0].mxu0 %vm2453_vm9, %v2442_v58  ;;  %v10351_v49 = vsel %vm347_vm4, %v2408_v47, %v2410_v34  ;;  %v2883_v47 = vsel %vm509_vm5, %v2880_v28, %v2882_v35  ;;  %v6976_v28 = vld [vmem:[%s12370_s7 + $0xc8] sm:$0xff] }
 0x388   :  { %v2221_v23 = vpop.f32.mrb[248].mxu0  ;;  %v2443_v41 = vrot.slane %v10351_v49, 2  ;;  %8366 = vmatmul.mubr.msk.f32.gmra.mrb[44].mxu1 %vm2453_vm9, %v10351_v49  ;;  %8325 = vmatprep.mubr.msk.f32.mxu0 %vm9097_vm1, %v9096_v0  ;;  %v2719_v6 = vsel %vm347_vm4, %v2717_v51, %v2718_v57  ;;  %v2886_v7 = vrot.slane %v10351_v49, 6  ;;  %v2721_v8 = vsel %vm347_vm4, %v2718_v57, %v2720_v21  ;;  %v3188_v35 = vld [vmem:[%s12370_s7 + $0x8] sm:$0xff] }
 0x389   :  { %v2412_v52 = vrot.slane %v2390_v18, 4  ;;  %v2382_v53 = vadd.f32 %v10257_v1, %v2366_v56  ;;  %v2237_v62 = vadd.f32 %v2221_v23, %v10250_v40  ;;  %v8267_v32 = vpop.f32.mrb[249].mxu0  ;;  %8368 = vmatprep.mubr.msk.f32.mxu1 %vm9097_vm1, %v9096_v0  ;;  %8389 = vmatpush3.msra.mxu0 %v6926_v24  ;;  %v2724_v58 = vrot.slane %v10351_v49, 4  ;;  %v6954_v18 = vld [vmem:[%s12368_s5 + $0xc0] sm:$0xff] }
 0x38a   :  { %v2444_v38 = vsel %vm49_vm2, %v2441_v20, %v2443_v41  ;;  %8564 = vmatprep.subr.bf16.mxu0 %v9098_v42  ;;  %v8568_v20 = vpack.c.bf16 %v6953_v63, %v6952_v48  ;;  %v2887_v16 = vsel %vm509_vm5, %v2884_v12, %v2886_v7  ;;  %v8582_v57 = vpack.c.bf16 %v3190_v50, %v3188_v35 }
 0x38b   :  { %v2391_v4 = vmax.f32 %v2382_v53, 0.0  ;;  %v2367_v43 = vadd.f32 %v10206_v17, %v2237_v62  ;;  %8326 = vmatmul.mubr.msk.f32.gmra.mrb[2].mxu0 %vm2453_vm9, %v2444_v38  ;;  %v10367_v11 = vsel %vm347_vm4, %v2410_v34, %v2412_v52  ;;  %v2722_v34 = vrot.slane %v10332_v39, 4 }
 0x38c   :  { %v2226_v26 = vpop.f32.mrb[250].mxu0  ;;  %v2445_v40 = vrot.slane %v10367_v11, 2  ;;  %8369 = vmatmul.mubr.msk.f32.gmra.mrb[46].mxu1 %vm2453_vm9, %v10367_v11  ;;  %8328 = vmatprep.mubr.msk.f32.mxu0 %vm9097_vm1, %v9096_v0  ;;  %v2888_v29 = vrot.slane %v10367_v11, 6 }
 0x38d   :  { %v2414_v54 = vrot.slane %v2391_v4, 4  ;;  %v2383_v2 = vadd.f32 %v10257_v1, %v2367_v43  ;;  %v2238_v59 = vadd.f32 %v2226_v26, %v10252_v14  ;;  %v8270_v17 = vpop.f32.mrb[251].mxu0  ;;  %8371 = vmatprep.mubr.msk.f32.mxu1 %vm9097_vm1, %v9096_v0  ;;  %v2723_v24 = vsel %vm347_vm4, %v2720_v21, %v2722_v34 }
 0x38e   :  { %v2446_v15 = vsel %vm49_vm2, %v2443_v41, %v2445_v40  ;;  %v2889_v56 = vsel %vm509_vm5, %v2886_v7, %v2888_v29  ;;  %v2726_v41 = vrot.slane %v10367_v11, 4 }
 0x38f   :  { %v2392_v9 = vmax.f32 %v2383_v2, 0.0  ;;  %v2368_v10 = vadd.f32 %v10208_v30, %v2238_v59  ;;  %8329 = vmatmul.mubr.msk.f32.gmra.mrb[4].mxu0 %vm2453_vm9, %v2446_v15  ;;  %v10382_v19 = vsel %vm347_vm4, %v2412_v52, %v2414_v54  ;;  %v2725_v52 = vsel %vm347_vm4, %v2722_v34, %v2724_v58 }
 0x390   :  { %v2447_v55 = vrot.slane %v10382_v19, 2  ;;  %8372 = vmatmul.mubr.msk.f32.gmra.mrb[48].mxu1 %vm2453_vm9, %v10382_v19  ;;  %8331 = vmatprep.mubr.msk.f32.mxu0 %vm9097_vm1, %v9096_v0  ;;  %v2890_v23 = vrot.slane %v10382_v19, 6  ;;  %v2728_v32 = vrot.slane %v10382_v19, 4  ;;  %v2727_v38 = vsel %vm347_vm4, %v2724_v58, %v2726_v41 }
 0x391   :  { %v2416_v14 = vrot.slane %v2392_v9, 4  ;;  %v2384_v22 = vadd.f32 %v10257_v1, %v2368_v10  ;;  %8374 = vmatprep.mubr.msk.f32.mxu1 %vm9097_vm1, %v9096_v0 }
 0x392   :  { %v2448_v30 = vsel %vm49_vm2, %v2445_v40, %v2447_v55  ;;  %v2891_v53 = vsel %vm509_vm5, %v2888_v29, %v2890_v23 }
 0x393   :  { %v2393_v25 = vmax.f32 %v2384_v22, 0.0  ;;  %8332 = vmatmul.mubr.msk.f32.gmra.mrb[6].mxu0 %vm2453_vm9, %v2448_v30  ;;  %v10395_v27 = vsel %vm347_vm4, %v2414_v54, %v2416_v14  ;;  %v2729_v54 = vsel %vm347_vm4, %v2726_v41, %v2728_v32  ;;  %v6970_v22 = vld [vmem:[%s12370_s7 + $0x98] sm:$0xff]  ;;  %v6972_v30 = vld [vmem:[%s12370_s7 + $0xa8] sm:$0xff] }
 0x394   :  { %v2449_v3 = vrot.slane %v10395_v27, 2  ;;  %8375 = vmatmul.mubr.msk.f32.gmra.mrb[50].mxu1 %vm2453_vm9, %v10395_v27  ;;  %8334 = vmatprep.mubr.msk.f32.mxu0 %vm9097_vm1, %v9096_v0  ;;  %v2892_v62 = vrot.slane %v10395_v27, 6  ;;  %v2730_v40 = vrot.slane %v10395_v27, 4 }
 0x395   :  { %v10402_v1 = vrot.slane %v2393_v25, 4  ;;  %8377 = vmatprep.mubr.msk.f32.mxu1 %vm9097_vm1, %v9096_v0  ;;  %v6969_v25 = vld [vmem:[%s12370_s7 + $0x90] sm:$0xff] }
 0x396   :  { %v2450_v33 = vsel %vm49_vm2, %v2447_v55, %v2449_v3  ;;  %v2893_v4 = vsel %vm509_vm5, %v2890_v23, %v2892_v62  ;;  %v2731_v15 = vsel %vm347_vm4, %v2728_v32, %v2730_v40 }
 0x397   :  { %8335 = vmatmul.mubr.msk.f32.gmra.mrb[8].mxu0 %vm2453_vm9, %v2450_v33  ;;  %v10411_v61 = vsel %vm347_vm4, %v2416_v14, %v10402_v1  ;;  %v2423_v26 = vsel %vm509_vm5, %v10402_v1, 0.0  ;;  %v6974_v33 = vld [vmem:[%s12370_s7 + $0xb8] sm:$0xff] }
 0x398   :  { %v2451_v5 = vrot.slane %v10411_v61, 2  ;;  %8378 = vmatmul.mubr.msk.f32.gmra.mrb[52].mxu1 %vm2453_vm9, %v10411_v61  ;;  %8337 = vmatprep.mubr.msk.f32.mxu0 %vm9097_vm1, %v9096_v0  ;;  %v2894_v43 = vrot.slane %v10411_v61, 6  ;;  %v2896_v59 = vrot.slane %v2423_v26, 6  ;;  %v2732_v17 = vrot.slane %v10411_v61, 4 }
 0x399   :  { %8427 = vmatprep.mubr.msk.f32.mxu1 %vm9097_vm1, %v9096_v0  ;;  %v2734_v10 = vrot.slane %v2423_v26, 4 }
 0x39a   :  { %v2452_v45 = vsel %vm49_vm2, %v2449_v3, %v2451_v5  ;;  %v2895_v2 = vsel %vm509_vm5, %v2892_v62, %v2894_v43  ;;  %v2897_v9 = vsel %vm509_vm5, %v2894_v43, %v2896_v59  ;;  %v2733_v55 = vsel %vm347_vm4, %v2730_v40, %v2732_v17  ;;  %v6971_v3 = vld [vmem:[%s12370_s7 + $0xa0] sm:$0xff] }
 0x39b   :  { %8338 = vmatmul.mubr.msk.f32.gmra.mrb[10].mxu0 %vm2453_vm9, %v2452_v45  ;;  %v2735_v14 = vsel %vm347_vm4, %v2732_v17, %v2734_v10  ;;  %v8576_v1 = vpack.c.bf16 %v6971_v3, %v6969_v25 }
 0x39c   :  { %8428 = vmatmul.mubr.msk.f32.vlgmr.msra.gmra.mrb[54].mxu1 %vm2453_vm9, %v2881_v46  ;;  %8340 = vmatprep.mubr.msk.f32.mxu0 %vm9097_vm1, %v9096_v0  ;;  %v6978_v46 = vld [vmem:[%s12370_s7 + $0xd8] sm:$0x3] }
 0x39d   :  { %8430 = vmatprep.mubr.msk.f32.mxu1 %vm9097_vm1, %v9096_v0 }
 0x39f   :  { %8341 = vmatmul.mubr.msk.f32.gmra.mrb[12].mxu0 %vm2453_vm9, %v2451_v5  ;;  %v6973_v5 = vld [vmem:[%s12370_s7 + $0xb0] sm:$0xff] }
 0x3a0   :  { %8431 = vmatmul.mubr.msk.f32.gmra.mrb[56].mxu1 %vm2453_vm9, %v2883_v47  ;;  %8390 = vmatprep.mubr.msk.f32.mxu0 %vm9097_vm1, %v9096_v0  ;;  %v8580_v45 = vpack.c.bf16 %v6975_v36, %v6973_v5 }
 0x3a1   :  { %8433 = vmatprep.mubr.msk.f32.mxu1 %vm9097_vm1, %v9096_v0 }
 0x3a3   :  { %8391 = vmatmul.mubr.msk.f32.vlgmr.msra.gmra.mrb[14].mxu0 %vm2453_vm9, %v2719_v6 }
 0x3a4   :  { %8434 = vmatmul.mubr.msk.f32.gmra.mrb[58].mxu1 %vm2453_vm9, %v2885_v37  ;;  %8566 = vmatpush3.bf16.msra.mxu0 %v8565_v60 }
 0x3a5   :  { %8393 = vmatprep.mubr.msk.f32.mxu0 %vm9097_vm1, %v9096_v0  ;;  %8436 = vmatprep.mubr.msk.f32.mxu1 %vm9097_vm1, %v9096_v0 }
 0x3a6   :  { %8567 = vmatprep.subr.bf16.mxu0 %v9098_v42 }
 0x3a7   :  { %8394 = vmatmul.mubr.msk.f32.gmra.mrb[16].mxu0 %vm2453_vm9, %v2721_v8 }
 0x3a8   :  { %8437 = vmatmul.mubr.msk.f32.gmra.mrb[60].mxu1 %vm2453_vm9, %v2887_v16  ;;  %8396 = vmatprep.mubr.msk.f32.mxu0 %vm9097_vm1, %v9096_v0 }
 0x3a9   :  { %8439 = vmatprep.mubr.msk.f32.mxu1 %vm9097_vm1, %v9096_v0  ;;  %8569 = vmatpush3.bf16.msra.mxu0 %v8568_v20 }
 0x3aa   :  { %8462 = vmatprep.subr.mxu0 %v9096_v0 }
 0x3ab   :  { %8397 = vmatmul.mubr.msk.f32.gmra.mrb[18].mxu0 %vm2453_vm9, %v2723_v24 }
 0x3ac   :  { %8440 = vmatmul.mubr.msk.f32.gmra.mrb[62].mxu1 %vm2453_vm9, %v2889_v56  ;;  %8399 = vmatprep.mubr.msk.f32.mxu0 %vm9097_vm1, %v9096_v0 }
 0x3ad   :  { %8442 = vmatprep.mubr.msk.f32.mxu1 %vm9097_vm1, %v9096_v0  ;;  %8463 = vmatpush3.msra.mxu0 %v6954_v18 }
 0x3ae   :  { %8990 = vmatprep.subr.bf16.mxu0 %v9098_v42 }
 0x3af   :  { %8400 = vmatmul.mubr.msk.f32.gmra.mrb[20].mxu0 %vm2453_vm9, %v2725_v52 }
 0x3b0   :  { %8443 = vmatmul.mubr.msk.f32.gmra.mrb[64].mxu1 %vm2453_vm9, %v2891_v53  ;;  %8402 = vmatprep.mubr.msk.f32.mxu0 %vm9097_vm1, %v9096_v0 }
 0x3b1   :  { %8445 = vmatprep.mubr.msk.f32.mxu1 %vm9097_vm1, %v9096_v0 }
 0x3b3   :  { %8403 = vmatmul.mubr.msk.f32.gmra.mrb[22].mxu0 %vm2453_vm9, %v2727_v38 }
 0x3b4   :  { %8446 = vmatmul.mubr.msk.f32.gmra.mrb[66].mxu1 %vm2453_vm9, %v2893_v4  ;;  %8405 = vmatprep.mubr.msk.f32.mxu0 %vm9097_vm1, %v9096_v0 }
 0x3b5   :  { %8448 = vmatprep.mubr.msk.f32.mxu1 %vm9097_vm1, %v9096_v0 }
 0x3b7   :  { %8406 = vmatmul.mubr.msk.f32.gmra.mrb[24].mxu0 %vm2453_vm9, %v2729_v54 }
 0x3b8   :  { %8449 = vmatmul.mubr.msk.f32.gmra.mrb[68].mxu1 %vm2453_vm9, %v2895_v2  ;;  %8408 = vmatprep.mubr.msk.f32.mxu0 %vm9097_vm1, %v9096_v0 }
 0x3b9   :  { %8451 = vmatprep.mubr.msk.f32.mxu1 %vm9097_vm1, %v9096_v0 }
 0x3bb   :  { %8409 = vmatmul.mubr.msk.f32.gmra.mrb[26].mxu0 %vm2453_vm9, %v2731_v15 }
 0x3bc   :  { %8452 = vmatmul.mubr.msk.f32.gmra.mrb[70].mxu1 %vm2453_vm9, %v2897_v9  ;;  %8411 = vmatprep.mubr.msk.f32.mxu0 %vm9097_vm1, %v9096_v0 }
 0x3bd   :  { %3291 = vmatprep.mubr.f32.mxu1 %v9096_v0 }
 0x3bf   :  { %8412 = vmatmul.mubr.msk.f32.gmra.mrb[28].mxu0 %vm2453_vm9, %v2733_v55 }
 0x3c0   :  { %8414 = vmatprep.mubr.msk.f32.mxu0 %vm9097_vm1, %v9096_v0 }
 0x3c3   :  { %8415 = vmatmul.mubr.msk.f32.gmra.mrb[30].mxu0 %vm2453_vm9, %v2735_v14 }
 0x3c4   :  { %8464 = vmatprep.mubr.msk.f32.mxu0 %vm9097_vm1, %v9096_v0 }
 0x3c7   :  { %8465 = vmatmul.mubr.msk.f32.vlgmr.msra.gmra.mrb[32].mxu0 %vm2453_vm9, %v10293_v13  ;;  %v6966_v13 = vld [vmem:[%s12370_s7 + $0x78] sm:$0xff] }
 0x3c8   :  { %8467 = vmatprep.mubr.msk.f32.mxu0 %vm9097_vm1, %v9096_v0 }
 0x3cb   :  { %8468 = vmatmul.mubr.msk.f32.gmra.mrb[34].mxu0 %vm2453_vm9, %v10313_v31  ;;  %v6968_v31 = vld [vmem:[%s12370_s7 + $0x88] sm:$0xff] }
 0x3cc   :  { %8470 = vmatprep.mubr.msk.f32.mxu0 %vm9097_vm1, %v9096_v0 }
 0x3cf   :  { %8471 = vmatmul.mubr.msk.f32.gmra.mrb[36].mxu0 %vm2453_vm9, %v10332_v39  ;;  %v6965_v39 = vld [vmem:[%s12370_s7 + $0x70] sm:$0xff] }
 0x3d0   :  { %8473 = vmatprep.mubr.msk.f32.mxu0 %vm9097_vm1, %v9096_v0 }
 0x3d3   :  { %8474 = vmatmul.mubr.msk.f32.gmra.mrb[38].mxu0 %vm2453_vm9, %v10351_v49  ;;  %v8570_v49 = vpack.c.bf16 %v6968_v31, %v6966_v13 }
 0x3d4   :  { %8476 = vmatprep.mubr.msk.f32.mxu0 %vm9097_vm1, %v9096_v0 }
 0x3d5   :  { %8571 = vmatprep.subr.bf16.mxu1 %v8570_v49 }
 0x3d7   :  { %8477 = vmatmul.mubr.msk.f32.gmra.mrb[40].mxu0 %vm2453_vm9, %v10367_v11  ;;  %v6967_v11 = vld [vmem:[%s12370_s7 + $0x80] sm:$0xff] }
 0x3d8   :  { %8479 = vmatprep.mubr.msk.f32.mxu0 %vm9097_vm1, %v9096_v0 }
 0x3db   :  { %8480 = vmatmul.mubr.msk.f32.gmra.mrb[42].mxu0 %vm2453_vm9, %v10382_v19  ;;  %v8572_v19 = vpack.c.bf16 %v6967_v11, %v6965_v39 }
 0x3dc   :  { %8482 = vmatprep.mubr.msk.f32.mxu0 %vm9097_vm1, %v9096_v0 }
 0x3dd   :  { %8573 = vmatpush1.bf16.msra.mxu1 %v8572_v19 }
 0x3df   :  { %8483 = vmatmul.mubr.msk.f32.gmra.mrb[44].mxu0 %vm2453_vm9, %v10395_v27  ;;  %v8574_v27 = vpack.c.bf16 %v6972_v30, %v6970_v22 }
 0x3e0   :  { %8485 = vmatprep.mubr.msk.f32.mxu0 %vm9097_vm1, %v9096_v0 }
 0x3e1   :  { %8575 = vmatprep.subr.bf16.mxu1 %v8574_v27 }
 0x3e2   :  { %8577 = vmatpush1.bf16.msra.mxu1 %v8576_v1 }
 0x3e3   :  { %8486 = vmatmul.mubr.msk.f32.gmra.mrb[46].mxu0 %vm2453_vm9, %v10411_v61  ;;  %v8578_v61 = vpack.c.bf16 %v6976_v28, %v6974_v33 }
 0x3e4   :  { %8488 = vmatprep.mubr.msk.f32.mxu0 %vm9097_vm1, %v9096_v0 }
 0x3e5   :  { %8579 = vmatprep.subr.bf16.mxu1 %v8578_v61 }
 0x3e6   :  { %8581 = vmatpush1.bf16.msra.mxu1 %v8580_v45 }
 0x3e7   :  { %8489 = vmatmul.mubr.msk.f32.gmra.mrb[48].mxu0 %vm2453_vm9, %v2423_v26  ;;  %6979 = vmatprep.subr.msk.mxu1 %vm509_vm5, %v6978_v46 }
 0x3ea   :  { %6980 = vmatpush1.msk.msra.mxu1 %vm509_vm5, %v6977_v44 }
 0x3eb   :  { %8583 = vmatprep.subr.bf16.mxu1 %v8582_v57 }
 0x44b   :  { %v2666_v47 = vpop.f32.mrb[36].mxu1 }
 0x44c   :  { %v8355_v12 = vpop.f32.mrb[37].mxu1 }
 0x44f   :  { %v2671_v51 = vpop.f32.mrb[38].mxu1 }
 0x450   :  { %v8358_v60 = vpop.f32.mrb[39].mxu1 }
 0x452   :  { %v2538_v21 = vpop.f32.mrb[252].mxu0 }
 0x453   :  { %v2667_v6 = vadd.f32 %v2666_v47, %v2538_v21  ;;  %v8318_v48 = vpop.f32.mrb[253].mxu0  ;;  %v2676_v63 = vpop.f32.mrb[40].mxu1 }
 0x454   :  { %v8361_v37 = vpop.f32.mrb[41].mxu1 }
 0x456   :  { %v2543_v7 = vpop.f32.mrb[254].mxu0 }
 0x457   :  { %v2672_v20 = vadd.f32 %v2671_v51, %v2543_v7  ;;  %v8321_v34 = vpop.f32.mrb[255].mxu0  ;;  %v2681_v8 = vpop.f32.mrb[42].mxu1 }
 0x458   :  { %v8364_v16 = vpop.f32.mrb[43].mxu1 }
 0x45a   :  { %v2548_v29 = vpop.f32.mrb[0].mxu0 }
 0x45b   :  { %v2677_v58 = vadd.f32 %v2676_v63, %v2548_v29  ;;  %v8324_v24 = vpop.f32.mrb[1].mxu0  ;;  %v2686_v18 = vpop.f32.mrb[44].mxu1 }
 0x45c   :  { %v8367_v56 = vpop.f32.mrb[45].mxu1 }
 0x45e   :  { %v2553_v23 = vpop.f32.mrb[2].mxu0 }
 0x45f   :  { %v2682_v41 = vadd.f32 %v2681_v8, %v2553_v23  ;;  %v8327_v52 = vpop.f32.mrb[3].mxu0  ;;  %v2691_v53 = vpop.f32.mrb[46].mxu1 }
 0x460   :  { %v8370_v62 = vpop.f32.mrb[47].mxu1 }
 0x462   :  { %v2558_v32 = vpop.f32.mrb[4].mxu0 }
 0x463   :  { %v2687_v38 = vadd.f32 %v2686_v18, %v2558_v32  ;;  %v8330_v4 = vpop.f32.mrb[5].mxu0  ;;  %v2696_v43 = vpop.f32.mrb[48].mxu1 }
 0x464   :  { %v8373_v26 = vpop.f32.mrb[49].mxu1 }
 0x466   :  { %v2563_v40 = vpop.f32.mrb[6].mxu0 }
 0x467   :  { %v2692_v54 = vadd.f32 %v2691_v53, %v2563_v40  ;;  %v8333_v2 = vpop.f32.mrb[7].mxu0  ;;  %v2701_v59 = vpop.f32.mrb[50].mxu1 }
 0x468   :  { %v8376_v17 = vpop.f32.mrb[51].mxu1 }
 0x46a   :  { %v2568_v15 = vpop.f32.mrb[8].mxu0 }
 0x46b   :  { %v2697_v9 = vadd.f32 %v2696_v43, %v2568_v15  ;;  %v8336_v10 = vpop.f32.mrb[9].mxu0  ;;  %v2706_v55 = vpop.f32.mrb[52].mxu1 }
 0x46c   :  { %v8379_v14 = vpop.f32.mrb[53].mxu1 }
 0x46e   :  { %v2573_v13 = vpop.f32.mrb[10].mxu0 }
 0x46f   :  { %v2702_v31 = vadd.f32 %v2701_v59, %v2573_v13  ;;  %v8339_v39 = vpop.f32.mrb[11].mxu0  ;;  %v2982_v49 = vpop.f32.mrb[54].mxu1 }
 0x470   :  { %v8429_v11 = vpop.f32.mrb[55].mxu1 }
 0x471   :  { %v3189_v11 = vld [vmem:[%s12370_s7 + $0x10] sm:$0xff] }
 0x472   :  { %v2578_v19 = vpop.f32.mrb[12].mxu0 }
 0x473   :  { %v2707_v22 = vadd.f32 %v2706_v55, %v2578_v19  ;;  %v8342_v30 = vpop.f32.mrb[13].mxu0  ;;  %v2987_v25 = vpop.f32.mrb[56].mxu1 }
 0x474   :  { %v8432_v27 = vpop.f32.mrb[57].mxu1  ;;  %v3194_v30 = vld [vmem:[%s12370_s7 + $0x38] sm:$0xff] }
 0x476   :  { %v2820_v3 = vpop.f32.mrb[14].mxu0 }
 0x477   :  { %v2864_v1 = vadd.f32 %v2820_v3, %v2667_v6  ;;  %v8392_v33 = vpop.f32.mrb[15].mxu0  ;;  %v2992_v28 = vpop.f32.mrb[58].mxu1 }
 0x478   :  { %v8435_v61 = vpop.f32.mrb[59].mxu1 }
 0x479   :  { %v3026_v5 = vadd.f32 %v2982_v49, %v2864_v1  ;;  %v3191_v61 = vld [vmem:[%s12370_s7 + $0x20] sm:$0xff] }
 0x47a   :  { %v2825_v36 = vpop.f32.mrb[16].mxu0 }
 0x47b   :  { %v2865_v45 = vadd.f32 %v2825_v36, %v2672_v20  ;;  %v8395_v46 = vpop.f32.mrb[17].mxu0  ;;  %v2997_v35 = vpop.f32.mrb[60].mxu1 }
 0x47c   :  { %v8438_v50 = vpop.f32.mrb[61].mxu1  ;;  %v3198_v46 = vld [vmem:[%s12370_s7 + $0x58] sm:$0xff] }
 0x47d   :  { %v3027_v44 = vadd.f32 %v2987_v25, %v2865_v45  ;;  %v3196_v45 = vld [vmem:[%s12370_s7 + $0x48] sm:$0xff] }
 0x47e   :  { %v2830_v57 = vpop.f32.mrb[18].mxu0 }
 0x47f   :  { %v2866_v47 = vadd.f32 %v2830_v57, %v2677_v58  ;;  %v8398_v12 = vpop.f32.mrb[19].mxu0  ;;  %v3002_v51 = vpop.f32.mrb[62].mxu1 }
 0x480   :  { %v8441_v60 = vpop.f32.mrb[63].mxu1  ;;  %v3195_v12 = vld [vmem:[%s12370_s7 + $0x40] sm:$0xff] }
 0x481   :  { %v3028_v21 = vadd.f32 %v2992_v28, %v2866_v47  ;;  %v8590_v47 = vpack.c.bf16 %v3198_v46, %v3196_v45 }
 0x482   :  { %v2835_v48 = vpop.f32.mrb[20].mxu0 }
 0x483   :  { %v2867_v63 = vadd.f32 %v2835_v48, %v2682_v41  ;;  %v8401_v37 = vpop.f32.mrb[21].mxu0  ;;  %v3007_v6 = vpop.f32.mrb[64].mxu1 }
 0x484   :  { %v8444_v7 = vpop.f32.mrb[65].mxu1 }
 0x485   :  { %v3029_v34 = vadd.f32 %v2997_v35, %v2867_v63  ;;  %v3200_v7 = vld [vmem:[%s12370_s7 + $0x68] sm:$0x3] }
 0x486   :  { %v2840_v8 = vpop.f32.mrb[22].mxu0 }
 0x487   :  { %v2868_v16 = vadd.f32 %v2840_v8, %v2687_v38  ;;  %v8404_v29 = vpop.f32.mrb[23].mxu0  ;;  %v3012_v20 = vpop.f32.mrb[66].mxu1  ;;  %v6986_v8 = vld [vmem:[%s12370_s7 + $0xe8] sm:$0xff] }
 0x488   :  { %v8447_v24 = vpop.f32.mrb[67].mxu1 }
 0x489   :  { %v10618_v18 = vadd.f32 %v3002_v51, %v2868_v16  ;;  %v3197_v51 = vld [vmem:[%s12370_s7 + $0x50] sm:$0xff] }
 0x48a   :  { %v2845_v56 = vpop.f32.mrb[24].mxu0  ;;  %v8592_v63 = vpack.c.bf16 %v3197_v51, %v3195_v12  ;;  %v6987_v24 = vld [vmem:[%s12370_s7 + $0xf0] sm:$0xff] }
 0x48b   :  { %v2869_v23 = vadd.f32 %v2845_v56, %v2692_v54  ;;  %v8407_v58 = vpop.f32.mrb[25].mxu0  ;;  %v3017_v52 = vpop.f32.mrb[68].mxu1  ;;  %v6990_v56 = vld [vmem:[%s12370_s7 + $0x108] sm:$0xff] }
 0x48c   :  { %v8450_v53 = vpop.f32.mrb[69].mxu1  ;;  %v3199_v58 = vld [vmem:[%s12370_s7 + $0x60] sm:$0x3] }
 0x48d   :  { %v10620_v62 = vadd.f32 %v3007_v6, %v2869_v23  ;;  %v6992_v23 = vld [vmem:[%s12370_s7 + $0x118] sm:$0xff] }
 0x48e   :  { %v2850_v32 = vpop.f32.mrb[26].mxu0 }
 0x48f   :  { %v2870_v41 = vadd.f32 %v2850_v32, %v2697_v9  ;;  %v8410_v4 = vpop.f32.mrb[27].mxu0  ;;  %v3022_v43 = vpop.f32.mrb[70].mxu1  ;;  %v10631_v9 = vld [vmem:[%s12371_s6] ss:$0 sm:$0xff] }
 0x490   :  { %v8453_v26 = vpop.f32.mrb[71].mxu1 }
 0x491   :  { %v10622_v40 = vadd.f32 %v3012_v20, %v2870_v41  ;;  %v6985_v20 = vld [vmem:[%s12370_s7 + $0xe0] sm:$0xff] }
 0x492   :  { %v2855_v38 = vpop.f32.mrb[28].mxu0  ;;  %v8596_v32 = vpack.c.bf16 %v6987_v24, %v6985_v20  ;;  %v6989_v26 = vld [vmem:[%s12370_s7 + $0x100] sm:$0xff]  ;;  %v7022_v20 = vld [vmem:[%s12370_s7 + $0x1d8] sm:$0xff] }
 0x493   :  { %v2871_v2 = vadd.f32 %v2855_v38, %v2702_v31  ;;  %v8413_v59 = vpop.f32.mrb[29].mxu0  ;;  %v3187_v31 = vld [vmem:[%s12370_s7] sm:$0xff]  ;;  %v6991_v38 = vld [vmem:[%s12370_s7 + $0x110] sm:$0xff] }
 0x494   :  { %v8584_v1 = vpack.c.bf16 %v3189_v11, %v3187_v31  ;;  %v7019_v24 = vld [vmem:[%s12370_s7 + $0x1c0] sm:$0xff] }
 0x495   :  { %v10624_v17 = vadd.f32 %v3017_v52, %v2871_v2  ;;  %v6994_v2 = vld [vmem:[%s12370_s7 + $0x128] sm:$0xff] }
 0x496   :  { %v2860_v15 = vpop.f32.mrb[30].mxu0 }
 0x497   :  { %v2872_v10 = vadd.f32 %v2860_v15, %v2707_v22  ;;  %v8416_v54 = vpop.f32.mrb[31].mxu0  ;;  %v3192_v22 = vld [vmem:[%s12370_s7 + $0x28] sm:$0xff] }
 0x498   :  { %v8586_v28 = vpack.c.bf16 %v3194_v30, %v3192_v22  ;;  %v6998_v30 = vld [vmem:[%s12370_s7 + $0x148] sm:$0x3] }
 0x499   :  { %v10626_v55 = vadd.f32 %v3022_v43, %v2872_v10  ;;  %v8598_v43 = vpack.c.bf16 %v6992_v23, %v6990_v56  ;;  %v8600_v10 = vpack.c.bf16 %v6991_v38, %v6989_v26  ;;  %v7021_v56 = vld [vmem:[%s12370_s7 + $0x1d0] sm:$0xff]  ;;  %v7024_v23 = vld [vmem:[%s12370_s7 + $0x1e8] sm:$0xff] }
 0x49a   :  { %v3109_v14 = vpop.f32.mrb[32].mxu0  ;;  %v7025_v26 = vld [vmem:[%s12370_s7 + $0x1f0] sm:$0xff]  ;;  %v7028_v38 = vld [vmem:[%s12370_s7 + $0x208] sm:$0xff] }
 0x49b   :  { %v3153_v13 = vadd.f32 %v3109_v14, %v3026_v5  ;;  %v8466_v39 = vpop.f32.mrb[33].mxu0  ;;  %v3193_v5 = vld [vmem:[%s12370_s7 + $0x30] sm:$0xff] }
 0x49c   :  { %v6993_v39 = vld [vmem:[%s12370_s7 + $0x120] sm:$0xff] }
 0x49d   :  { %v3169_v49 = vadd.f32 %v10631_v9, %v3153_v13 }
 0x49e   :  { %v3114_v19 = vpop.f32.mrb[34].mxu0 }
 0x49f   :  { %v10646_v25 = vmax.f32 %v3169_v49, 0.0  ;;  %v10648_v27 = vadd.f32 %v3114_v19, %v3027_v44  ;;  %v8469_v3 = vpop.f32.mrb[35].mxu0  ;;  %v8588_v44 = vpack.c.bf16 %v3193_v5, %v3191_v61  ;;  %v6995_v49 = vld [vmem:[%s12370_s7 + $0x130] sm:$0xff]  ;;  %v7007_v5 = vld [vmem:[%s12370_s7 + $0x178] sm:$0xff] }
 0x4a0   :  { %v8604_v19 = vpack.c.bf16 %v6995_v49, %v6993_v39  ;;  %v7003_v3 = vld [vmem:[%s12370_s7 + $0x158] sm:$0xff]  ;;  %v7039_v39 = vld [vmem:[%s12370_s7 + $0x248] sm:$0xff] }
 0x4a1   :  { %v3217_v33 = vrot.slane %v10646_v25, 2  ;;  %v3170_v49 = vadd.f32 %v10631_v9, %v10648_v27 }
 0x4a2   :  { %v3119_v36 = vpop.f32.mrb[36].mxu0 }
 0x4a3   :  { %v3155_v35 = vadd.f32 %v3119_v36, %v3028_v21  ;;  %v8472_v50 = vpop.f32.mrb[37].mxu0  ;;  %6981 = vmatmul.mubr.msk.f32.vlgmr.msra.gmra.mrb[72].mxu1 %vm3218_vm10, %v3217_v33  ;;  %v7009_v36 = vld [vmem:[%s12370_s7 + $0x188] sm:$0xff] }
 0x4a4   :  { %8585 = vmatpush1.bf16.msra.mxu1 %v8584_v1  ;;  %3370 = vmatprep.mubr.f32.mxu1 %v9096_v0  ;;  %v7005_v1 = vld [vmem:[%s12370_s7 + $0x168] sm:$0xff]  ;;  %v8610_v51 = vpack.c.bf16 %v7009_v36, %v7007_v5 }
 0x4a5   :  { %v10666_v57 = vadd.f32 %v10631_v9, %v3155_v35  ;;  %8587 = vmatprep.subr.bf16.mxu1 %v8586_v28  ;;  %v7004_v28 = vld [vmem:[%s12370_s7 + $0x160] sm:$0xff]  ;;  %v8606_v50 = vpack.c.bf16 %v7005_v1, %v7003_v3  ;;  %v10865_v3 = vmax.f32 %v3170_v49, 0.0  ;;  %v7047_v5 = vld [vmem:[%s12370_s7 + $0x288] sm:$0xff] }
 0x4a6   :  { %v3124_v60 = vpop.f32.mrb[38].mxu0  ;;  %v6997_v35 = vld [vmem:[%s12370_s7 + $0x140] sm:$0x3]  ;;  %v7081_v49 = vld [vmem:[%s12370_s7 + $0x368] sm:$0xff] }
 0x4a7   :  { %v3156_v21 = vadd.f32 %v3124_v60, %v3029_v34  ;;  %v8475_v48 = vpop.f32.mrb[39].mxu0  ;;  %v6988_v34 = vld [vmem:[%s12370_s7 + $0xf8] sm:$0xff]  ;;  %v7006_v60 = vld [vmem:[%s12370_s7 + $0x170] sm:$0xff] }
 0x4a8   :  { %8589 = vmatpush1.bf16.msra.mxu1 %v8588_v44  ;;  %v8594_v52 = vpack.c.bf16 %v6988_v34, %v6986_v8  ;;  %v7013_v48 = vld [vmem:[%s12370_s7 + $0x1a8] sm:$0xff]  ;;  %v7012_v8 = vld [vmem:[%s12370_s7 + $0x1a0] sm:$0xff] }
 0x4a9   :  { %v10675_v37 = vadd.f32 %v10631_v9, %v3156_v21  ;;  %8591 = vmatprep.subr.bf16.mxu1 %v8590_v47  ;;  %v3392_v47 = vrot.slane %v10646_v25, 4  ;;  %v7011_v21 = vld [vmem:[%s12370_s7 + $0x198] sm:$0xff] }
 0x4aa   :  { %v3129_v6 = vpop.f32.mrb[40].mxu0 }
 0x4ab   :  { %v3157_v16 = vadd.f32 %v3129_v6, %v10618_v18  ;;  %v8478_v29 = vpop.f32.mrb[41].mxu0  ;;  %v8614_v6 = vpack.c.bf16 %v7013_v48, %v7011_v21  ;;  %v7058_v21 = vld [vmem:[%s12370_s7 + $0x2c8] sm:$0xff]  ;;  %v7060_v48 = vld [vmem:[%s12370_s7 + $0x2d8] sm:$0xff] }
 0x4ac   :  { %8593 = vmatpush1.bf16.msra.mxu1 %v8592_v63  ;;  %v7020_v29 = vld [vmem:[%s12370_s7 + $0x1c8] sm:$0xff] }
 0x4ad   :  { %v10700_v18 = vadd.f32 %v10631_v9, %v3157_v16  ;;  %6982 = vmatprep.subr.msk.mxu1 %vm509_vm5, %v3200_v7  ;;  %v7010_v7 = vld [vmem:[%s12370_s7 + $0x190] sm:$0xff]  ;;  %v7015_v16 = vld [vmem:[%s12370_s7 + $0x1b8] sm:$0x3] }
 0x4ae   :  { %v3134_v53 = vpop.f32.mrb[42].mxu0  ;;  %v8616_v34 = vpack.c.bf16 %v7012_v8, %v7010_v7  ;;  %v3683_v8 = vrot.slane %v10865_v3, 2 }
 0x4af   :  { %v3158_v41 = vadd.f32 %v3134_v53, %v10620_v62  ;;  %v8481_v4 = vpop.f32.mrb[43].mxu0  ;;  %v6996_v62 = vld [vmem:[%s12370_s7 + $0x138] sm:$0xff]  ;;  %v8618_v53 = vpack.c.bf16 %v7022_v20, %v7020_v29  ;;  %v7059_v29 = vld [vmem:[%s12370_s7 + $0x2d0] sm:$0xff]  ;;  %v7062_v20 = vld [vmem:[%s12370_s7 + $0x2e8] sm:$0xff] }
 0x4b0   :  { %6983 = vmatpush1.msk.msra.mxu1 %vm509_vm5, %v3199_v58  ;;  %v8602_v13 = vpack.c.bf16 %v6996_v62, %v6994_v2  ;;  %v7026_v58 = vld [vmem:[%s12370_s7 + $0x1f8] sm:$0xff] }
 0x4b1   :  { %v10721_v59 = vadd.f32 %v10631_v9, %v3158_v41  ;;  %6984 = vmatmul.mubr.msk.f32.vlgmr.msra.gmra.mrb[72].mxu1 %vm3218_vm10, %v10646_v25  ;;  %8595 = vmatprep.subr.bf16.mxu1 %v8594_v52  ;;  %v7014_v52 = vld [vmem:[%s12370_s7 + $0x1b0] sm:$0x3]  ;;  %v3489_v41 = vrot.slane %v10646_v25, 6  ;;  %v8622_v4 = vpack.c.bf16 %v7026_v58, %v7024_v23  ;;  %v7030_v2 = vld [vmem:[%s12370_s7 + $0x218] sm:$0xff]  ;;  %v7061_v58 = vld [vmem:[%s12370_s7 + $0x2e0] sm:$0xff] }
 0x4b2   :  { %8597 = vmatpush1.bf16.msra.mxu1 %v8596_v32  ;;  %v3139_v15 = vpop.f32.mrb[44].mxu0  ;;  %3465 = vmatprep.mubr.f32.mxu1 %v9096_v0  ;;  %v8620_v32 = vpack.c.bf16 %v7021_v56, %v7019_v24  ;;  %v8626_v62 = vpack.c.bf16 %v7030_v2, %v7028_v38  ;;  %v7064_v24 = vld [vmem:[%s12370_s7 + $0x2f8] sm:$0xff]  ;;  %v7077_v2 = vld [vmem:[%s12370_s7 + $0x348] sm:$0xff] }
 0x4b3   :  { %v3159_v54 = vadd.f32 %v3139_v15, %v10622_v40  ;;  %v8484_v14 = vpop.f32.mrb[45].mxu0  ;;  %8599 = vmatprep.subr.bf16.mxu1 %v8598_v43  ;;  %v7023_v43 = vld [vmem:[%s12370_s7 + $0x1e0] sm:$0xff]  ;;  %v8650_v23 = vpack.c.bf16 %v7064_v24, %v7062_v20  ;;  %v7075_v38 = vld [vmem:[%s12370_s7 + $0x338] sm:$0xff]  ;;  %v7111_v20 = vld [vmem:[%s12370_s7 + $0x428] sm:$0xff] }
 0x4b4   :  { %v8624_v25 = vpack.c.bf16 %v7025_v26, %v7023_v43  ;;  %v7027_v15 = vld [vmem:[%s12370_s7 + $0x200] sm:$0xff]  ;;  %v7032_v14 = vld [vmem:[%s12370_s7 + $0x228] sm:$0x3]  ;;  %v7070_v43 = vld [vmem:[%s12370_s7 + $0x310] sm:$0xff] }
 0x4b5   :  { %v10734_v31 = vadd.f32 %v10631_v9, %v3159_v54  ;;  %v7072_v26 = vld [vmem:[%s12370_s7 + $0x320] sm:$0xff] }
 0x4b6   :  { %8601 = vmatpush1.bf16.msra.mxu1 %v8600_v10  ;;  %v3144_v11 = vpop.f32.mrb[46].mxu0  ;;  %v7029_v10 = vld [vmem:[%s12370_s7 + $0x210] sm:$0xff]  ;;  %v7099_v24 = vld [vmem:[%s12370_s7 + $0x3e0] sm:$0x3] }
 0x4b7   :  { %v3160_v22 = vadd.f32 %v3144_v11, %v10624_v17  ;;  %v8487_v40 = vpop.f32.mrb[47].mxu0  ;;  %8603 = vmatprep.subr.bf16.mxu1 %v8602_v13  ;;  %v7002_v17 = vld [vmem:[%s12370_s7 + $0x150] sm:$0xff]  ;;  %v8628_v54 = vpack.c.bf16 %v7029_v10, %v7027_v15  ;;  %v7037_v13 = vld [vmem:[%s12370_s7 + $0x238] sm:$0xff]  ;;  %v8656_v15 = vpack.c.bf16 %v7072_v26, %v7070_v43  ;;  %v3780_v10 = vrot.slane %v10865_v3, 4 }
 0x4b8   :  { %v8608_v44 = vpack.c.bf16 %v7004_v28, %v7002_v17  ;;  %v7036_v11 = vld [vmem:[%s12370_s7 + $0x230] sm:$0xff]  ;;  %v7043_v40 = vld [vmem:[%s12370_s7 + $0x268] sm:$0xff]  ;;  %v8630_v27 = vpack.c.bf16 %v7039_v39, %v7037_v13  ;;  %v7042_v28 = vld [vmem:[%s12370_s7 + $0x260] sm:$0xff] }
 0x4b9   :  { %v10747_v33 = vadd.f32 %v10631_v9, %v3160_v22  ;;  %v7041_v22 = vld [vmem:[%s12370_s7 + $0x258] sm:$0xff]  ;;  %v7040_v17 = vld [vmem:[%s12370_s7 + $0x250] sm:$0xff]  ;;  %v7076_v13 = vld [vmem:[%s12370_s7 + $0x340] sm:$0xff] }
 0x4ba   :  { %8605 = vmatpush1.bf16.msra.mxu1 %v8604_v19  ;;  %v3149_v61 = vpop.f32.mrb[48].mxu0  ;;  %v7038_v19 = vld [vmem:[%s12370_s7 + $0x240] sm:$0xff]  ;;  %v8634_v1 = vpack.c.bf16 %v7043_v40, %v7041_v22  ;;  %v8636_v36 = vpack.c.bf16 %v7042_v28, %v7040_v17  ;;  %v7079_v39 = vld [vmem:[%s12370_s7 + $0x358] sm:$0xff]  ;;  %v7078_v22 = vld [vmem:[%s12370_s7 + $0x350] sm:$0xff] }
 0x4bb   :  { %v3161_v45 = vadd.f32 %v3149_v61, %v10626_v55  ;;  %v8490_v46 = vpop.f32.mrb[49].mxu0  ;;  %6999 = vmatprep.subr.msk.mxu1 %vm509_vm5, %v6998_v30  ;;  %v7008_v55 = vld [vmem:[%s12370_s7 + $0x180] sm:$0xff]  ;;  %v8632_v30 = vpack.c.bf16 %v7038_v19, %v7036_v11  ;;  %v7045_v61 = vld [vmem:[%s12370_s7 + $0x278] sm:$0xff]  ;;  %v8662_v19 = vpack.c.bf16 %v7081_v49, %v7079_v39  ;;  %v7089_v28 = vld [vmem:[%s12370_s7 + $0x390] sm:$0xff] }
 0x4bc   :  { %v8612_v63 = vpack.c.bf16 %v7008_v55, %v7006_v60  ;;  %v7044_v46 = vld [vmem:[%s12370_s7 + $0x270] sm:$0xff]  ;;  %v7053_v60 = vld [vmem:[%s12370_s7 + $0x2a0] sm:$0xff] }
 0x4bd   :  { %v10768_v12 = vadd.f32 %v10631_v9, %v3161_v45  ;;  %v7031_v9 = vld [vmem:[%s12370_s7 + $0x220] sm:$0x3]  ;;  %v8638_v45 = vpack.c.bf16 %v7047_v5, %v7045_v61  ;;  %v7055_v55 = vld [vmem:[%s12370_s7 + $0x2b0] sm:$0xff]  ;;  %v7092_v61 = vld [vmem:[%s12370_s7 + $0x3a8] sm:$0xff] }
 0x4be   :  { %7000 = vmatpush1.msk.msra.mxu1 %vm509_vm5, %v6997_v35  ;;  %v7046_v35 = vld [vmem:[%s12370_s7 + $0x280] sm:$0xff]  ;;  %v8644_v7 = vpack.c.bf16 %v7055_v55, %v7053_v60  ;;  %v7094_v5 = vld [vmem:[%s12370_s7 + $0x3b8] sm:$0xff]  ;;  %v7112_v26 = vld [vmem:[%s12370_s7 + $0x430] sm:$0xff] }
 0x4bf   :  { %7001 = vmatmul.mubr.msk.f32.vlgmr.msra.gmra.mrb[72].mxu1 %vm3218_vm10, %v3392_v47  ;;  %8607 = vmatprep.subr.bf16.mxu1 %v8606_v50  ;;  %v8640_v50 = vpack.c.bf16 %v7046_v35, %v7044_v46  ;;  %v7054_v47 = vld [vmem:[%s12370_s7 + $0x2a8] sm:$0xff]  ;;  %v7080_v40 = vld [vmem:[%s12370_s7 + $0x360] sm:$0xff]  ;;  %v3877_v35 = vrot.slane %v10865_v3, 6  ;;  %v7098_v60 = vld [vmem:[%s12370_s7 + $0x3d8] sm:$0xff] }
 0x4c0   :  { %8609 = vmatpush1.bf16.msra.mxu1 %v8608_v44  ;;  %3562 = vmatprep.mubr.f32.mxu1 %v9096_v0  ;;  %v7049_v44 = vld [vmem:[%s12370_s7 + $0x298] sm:$0x3]  ;;  %v7087_v17 = vld [vmem:[%s12370_s7 + $0x380] sm:$0xff]  ;;  %v7116_v39 = vld [vmem:[%s12370_s7 + $0x450] sm:$0x3] }
 0x4c1   :  { %8611 = vmatprep.subr.bf16.mxu1 %v8610_v51  ;;  %v7056_v51 = vld [vmem:[%s12370_s7 + $0x2b8] sm:$0xff]  ;;  %v8668_v46 = vpack.c.bf16 %v7089_v28, %v7087_v17  ;;  %v7129_v28 = vld [vmem:[%s12370_s7 + $0x4a0] sm:$0xff] }
 0x4c4   :  { %8613 = vmatpush1.bf16.msra.mxu1 %v8612_v63  ;;  %v7048_v63 = vld [vmem:[%s12370_s7 + $0x290] sm:$0x3] }
 0x4c5   :  { %8615 = vmatprep.subr.bf16.mxu1 %v8614_v6  ;;  %v8642_v6 = vpack.c.bf16 %v7056_v51, %v7054_v47  ;;  %v7093_v47 = vld [vmem:[%s12370_s7 + $0x3b0] sm:$0xff]  ;;  %v7096_v51 = vld [vmem:[%s12370_s7 + $0x3c8] sm:$0xff] }
 0x4c6   :  { %v8674_v55 = vpack.c.bf16 %v7098_v60, %v7096_v51  ;;  %v7133_v51 = vld [vmem:[%s12370_s7 + $0x4c0] sm:$0x3] }
 0x4c8   :  { %8617 = vmatpush1.bf16.msra.mxu1 %v8616_v34  ;;  %v8646_v34 = vpack.c.bf16 %v7060_v48, %v7058_v21  ;;  %v7095_v21 = vld [vmem:[%s12370_s7 + $0x3c0] sm:$0xff]  ;;  %v7097_v48 = vld [vmem:[%s12370_s7 + $0x3d0] sm:$0xff] }
 0x4c9   :  { %7016 = vmatprep.subr.msk.mxu1 %vm509_vm5, %v7015_v16  ;;  %v7057_v16 = vld [vmem:[%s12370_s7 + $0x2c0] sm:$0xff] }
 0x4ca   :  { %v8648_v56 = vpack.c.bf16 %v7059_v29, %v7057_v16  ;;  %v7106_v16 = vld [vmem:[%s12370_s7 + $0x400] sm:$0xff]  ;;  %v7109_v29 = vld [vmem:[%s12370_s7 + $0x418] sm:$0xff] }
 0x4cc   :  { %7017 = vmatpush1.msk.msra.mxu1 %vm509_vm5, %v7014_v52  ;;  %v7063_v52 = vld [vmem:[%s12370_s7 + $0x2f0] sm:$0xff] }
 0x4cd   :  { %7018 = vmatmul.mubr.msk.f32.vlgmr.msra.gmra.mrb[72].mxu1 %vm3218_vm10, %v3489_v41  ;;  %8619 = vmatprep.subr.bf16.mxu1 %v8618_v53  ;;  %v8652_v53 = vpack.c.bf16 %v7063_v52, %v7061_v58  ;;  %v7071_v41 = vld [vmem:[%s12370_s7 + $0x318] sm:$0xff]  ;;  %v11056_v58 = vmax.f32 %v10666_v57, 0.0  ;;  %v8682_v52 = vpack.c.bf16 %v7111_v20, %v7109_v29  ;;  %v7115_v57 = vld [vmem:[%s12370_s7 + $0x448] sm:$0xff]  ;;  %v7148_v29 = vld [vmem:[%s12370_s7 + $0x520] sm:$0xff] }
 0x4ce   :  { %8621 = vmatpush1.bf16.msra.mxu1 %v8620_v32  ;;  %3659 = vmatprep.mubr.f32.mxu1 %v9096_v0  ;;  %v7066_v32 = vld [vmem:[%s12370_s7 + $0x308] sm:$0x3] }
 0x4cf   :  { %8623 = vmatprep.subr.bf16.mxu1 %v8622_v4  ;;  %v7073_v4 = vld [vmem:[%s12370_s7 + $0x328] sm:$0xff] }
 0x4d2   :  { %8625 = vmatpush1.bf16.msra.mxu1 %v8624_v25  ;;  %v7065_v25 = vld [vmem:[%s12370_s7 + $0x300] sm:$0x3] }
 0x4d3   :  { %8627 = vmatprep.subr.bf16.mxu1 %v8626_v62  ;;  %v8654_v62 = vpack.c.bf16 %v7073_v4, %v7071_v41  ;;  %v7113_v41 = vld [vmem:[%s12370_s7 + $0x438] sm:$0xff] }
 0x4d4   :  { %v8686_v43 = vpack.c.bf16 %v7115_v57, %v7113_v41  ;;  %v7162_v41 = vld [vmem:[%s12370_s7 + $0x578] sm:$0xff]  ;;  %v7150_v57 = vld [vmem:[%s12370_s7 + $0x530] sm:$0x3] }
 0x4d6   :  { %8629 = vmatpush1.bf16.msra.mxu1 %v8628_v54  ;;  %v8658_v54 = vpack.c.bf16 %v7077_v2, %v7075_v38  ;;  %v7114_v38 = vld [vmem:[%s12370_s7 + $0x440] sm:$0xff] }
 0x4d7   :  { %7033 = vmatprep.subr.msk.mxu1 %vm509_vm5, %v7032_v14  ;;  %v7074_v14 = vld [vmem:[%s12370_s7 + $0x330] sm:$0xff]  ;;  %v8688_v2 = vpack.c.bf16 %v7114_v38, %v7112_v26  ;;  %v4265_v26 = vrot.slane %v11056_v58, 6 }
 0x4d8   :  { %v8660_v11 = vpack.c.bf16 %v7076_v13, %v7074_v14  ;;  %v7126_v14 = vld [vmem:[%s12370_s7 + $0x488] sm:$0xff]  ;;  %v7128_v13 = vld [vmem:[%s12370_s7 + $0x498] sm:$0xff] }
 0x4da   :  { %7034 = vmatpush1.msk.msra.mxu1 %vm509_vm5, %v7031_v9  ;;  %v8664_v9 = vpack.c.bf16 %v7080_v40, %v7078_v22  ;;  %v8694_v22 = vpack.c.bf16 %v7128_v13, %v7126_v14  ;;  %v7125_v40 = vld [vmem:[%s12370_s7 + $0x480] sm:$0xff]  ;;  %v7165_v14 = vld [vmem:[%s12370_s7 + $0x590] sm:$0xff] }
 0x4db   :  { %7035 = vmatmul.mubr.msk.f32.vlgmr.msra.gmra.mrb[72].mxu1 %vm3218_vm10, %v10865_v3  ;;  %8631 = vmatprep.subr.bf16.mxu1 %v8630_v27  ;;  %v7083_v27 = vld [vmem:[%s12370_s7 + $0x378] sm:$0x3] }
 0x4dc   :  { %8633 = vmatpush1.bf16.msra.mxu1 %v8632_v30  ;;  %3756 = vmatprep.mubr.f32.mxu1 %v9096_v0  ;;  %v7088_v30 = vld [vmem:[%s12370_s7 + $0x388] sm:$0xff] }
 0x4dd   :  { %8635 = vmatprep.subr.bf16.mxu1 %v8634_v1  ;;  %v7090_v1 = vld [vmem:[%s12370_s7 + $0x398] sm:$0xff] }
 0x4e0   :  { %8637 = vmatpush1.bf16.msra.mxu1 %v8636_v36  ;;  %v7082_v36 = vld [vmem:[%s12370_s7 + $0x370] sm:$0x3] }
 0x4e1   :  { %8639 = vmatprep.subr.bf16.mxu1 %v8638_v45  ;;  %v8666_v45 = vpack.c.bf16 %v7090_v1, %v7088_v30  ;;  %v7132_v30 = vld [vmem:[%s12370_s7 + $0x4b8] sm:$0xff] }
 0x4e4   :  { %8641 = vmatpush1.bf16.msra.mxu1 %v8640_v50  ;;  %v8670_v50 = vpack.c.bf16 %v7094_v5, %v7092_v61  ;;  %v7131_v61 = vld [vmem:[%s12370_s7 + $0x4b0] sm:$0xff] }
 0x4e5   :  { %7050 = vmatprep.subr.msk.mxu1 %vm509_vm5, %v7049_v44  ;;  %v7091_v44 = vld [vmem:[%s12370_s7 + $0x3a0] sm:$0xff]  ;;  %v8700_v5 = vpack.c.bf16 %v7131_v61, %v7129_v28  ;;  %v7176_v61 = vld [vmem:[%s12370_s7 + $0x5d0] sm:$0xff] }
 0x4e6   :  { %v8672_v3 = vpack.c.bf16 %v7093_v47, %v7091_v44  ;;  %v7143_v44 = vld [vmem:[%s12370_s7 + $0x4f8] sm:$0xff]  ;;  %v7145_v47 = vld [vmem:[%s12370_s7 + $0x508] sm:$0xff] }
 0x4e8   :  { %7051 = vmatpush1.msk.msra.mxu1 %vm509_vm5, %v7048_v63  ;;  %v8676_v63 = vpack.c.bf16 %v7097_v48, %v7095_v21  ;;  %v8706_v21 = vpack.c.bf16 %v7145_v47, %v7143_v44  ;;  %v7142_v48 = vld [vmem:[%s12370_s7 + $0x4f0] sm:$0xff]  ;;  %v7185_v47 = vld [vmem:[%s12370_s7 + $0x618] sm:$0x3] }
 0x4e9   :  { %7052 = vmatmul.mubr.msk.f32.vlgmr.msra.gmra.mrb[72].mxu1 %vm3218_vm10, %v3683_v8  ;;  %8643 = vmatprep.subr.bf16.mxu1 %v8642_v6  ;;  %v7100_v6 = vld [vmem:[%s12370_s7 + $0x3e8] sm:$0x3] }
 0x4ea   :  { %8645 = vmatpush1.bf16.msra.mxu1 %v8644_v7  ;;  %3853 = vmatprep.mubr.f32.mxu1 %v9096_v0  ;;  %v7105_v7 = vld [vmem:[%s12370_s7 + $0x3f8] sm:$0xff]  ;;  %v7107_v8 = vld [vmem:[%s12370_s7 + $0x408] sm:$0xff] }
 0x4eb   :  { %8647 = vmatprep.subr.bf16.mxu1 %v8646_v34  ;;  %v7104_v34 = vld [vmem:[%s12370_s7 + $0x3f0] sm:$0xff] }
 0x4ee   :  { %8649 = vmatpush1.bf16.msra.mxu1 %v8648_v56  ;;  %v8678_v56 = vpack.c.bf16 %v7107_v8, %v7105_v7  ;;  %v7149_v7 = vld [vmem:[%s12370_s7 + $0x528] sm:$0xff] }
 0x4ef   :  { %8651 = vmatprep.subr.bf16.mxu1 %v8650_v23  ;;  %v8680_v23 = vpack.c.bf16 %v7106_v16, %v7104_v34  ;;  %v7146_v16 = vld [vmem:[%s12370_s7 + $0x510] sm:$0xff] }
 0x4f0   :  { %v8712_v20 = vpack.c.bf16 %v7148_v29, %v7146_v16  ;;  %v7193_v16 = vld [vmem:[%s12370_s7 + $0x640] sm:$0xff]  ;;  %v7195_v29 = vld [vmem:[%s12370_s7 + $0x650] sm:$0xff] }
 0x4f2   :  { %8653 = vmatpush1.bf16.msra.mxu1 %v8652_v53  ;;  %v7108_v53 = vld [vmem:[%s12370_s7 + $0x410] sm:$0xff] }
 0x4f3   :  { %7067 = vmatprep.subr.msk.mxu1 %vm509_vm5, %v7066_v32  ;;  %v7110_v32 = vld [vmem:[%s12370_s7 + $0x420] sm:$0xff] }
 0x4f4   :  { %v8684_v4 = vpack.c.bf16 %v7110_v32, %v7108_v53  ;;  %v7157_v53 = vld [vmem:[%s12370_s7 + $0x550] sm:$0xff]  ;;  %v7160_v32 = vld [vmem:[%s12370_s7 + $0x568] sm:$0xff] }
 0x4f5   :  { %v8718_v38 = vpack.c.bf16 %v7162_v41, %v7160_v32  ;;  %v7202_v41 = vld [vmem:[%s12370_s7 + $0x688] sm:$0x3] }
 0x4f6   :  { %7068 = vmatpush1.msk.msra.mxu1 %vm509_vm5, %v7065_v25  ;;  %v7117_v25 = vld [vmem:[%s12370_s7 + $0x458] sm:$0x3] }
 0x4f7   :  { %7069 = vmatmul.mubr.msk.f32.vlgmr.msra.gmra.mrb[72].mxu1 %vm3218_vm10, %v3780_v10  ;;  %8655 = vmatprep.subr.bf16.mxu1 %v8654_v62  ;;  %v7122_v62 = vld [vmem:[%s12370_s7 + $0x468] sm:$0xff]  ;;  %v7121_v10 = vld [vmem:[%s12370_s7 + $0x460] sm:$0xff] }
 0x4f8   :  { %8657 = vmatpush1.bf16.msra.mxu1 %v8656_v15  ;;  %3950 = vmatprep.mubr.f32.mxu1 %v9096_v0  ;;  %v7124_v15 = vld [vmem:[%s12370_s7 + $0x478] sm:$0xff] }
 0x4f9   :  { %8659 = vmatprep.subr.bf16.mxu1 %v8658_v54  ;;  %v7123_v54 = vld [vmem:[%s12370_s7 + $0x470] sm:$0xff]  ;;  %v8690_v49 = vpack.c.bf16 %v7124_v15, %v7122_v62  ;;  %v7164_v62 = vld [vmem:[%s12370_s7 + $0x588] sm:$0xff]  ;;  %v7166_v15 = vld [vmem:[%s12370_s7 + $0x598] sm:$0xff] }
 0x4fc   :  { %8661 = vmatpush1.bf16.msra.mxu1 %v8660_v11  ;;  %v8692_v11 = vpack.c.bf16 %v7123_v54, %v7121_v10  ;;  %v8722_v10 = vpack.c.bf16 %v7166_v15, %v7164_v62  ;;  %v7163_v54 = vld [vmem:[%s12370_s7 + $0x580] sm:$0xff] }
 0x4fd   :  { %8663 = vmatprep.subr.bf16.mxu1 %v8662_v19  ;;  %v4071_v19 = vrot.slane %v11056_v58, 2  ;;  %v8724_v13 = vpack.c.bf16 %v7165_v14, %v7163_v54  ;;  %v7210_v54 = vld [vmem:[%s12370_s7 + $0x6b0] sm:$0xff]  ;;  %v7212_v14 = vld [vmem:[%s12370_s7 + $0x6c0] sm:$0xff] }
 0x500   :  { %8665 = vmatpush1.bf16.msra.mxu1 %v8664_v9  ;;  %v7127_v9 = vld [vmem:[%s12370_s7 + $0x490] sm:$0xff] }
 0x501   :  { %7084 = vmatprep.subr.msk.mxu1 %vm509_vm5, %v7083_v27  ;;  %v7130_v27 = vld [vmem:[%s12370_s7 + $0x4a8] sm:$0xff]  ;;  %v8696_v1 = vpack.c.bf16 %v7127_v9, %v7125_v40  ;;  %v7177_v40 = vld [vmem:[%s12370_s7 + $0x5d8] sm:$0xff] }
 0x502   :  { %v8698_v17 = vpack.c.bf16 %v7132_v30, %v7130_v27  ;;  %v7179_v9 = vld [vmem:[%s12370_s7 + $0x5e8] sm:$0xff]  ;;  %v7167_v27 = vld [vmem:[%s12370_s7 + $0x5a0] sm:$0x3] }
 0x503   :  { %v8730_v28 = vpack.c.bf16 %v7179_v9, %v7177_v40  ;;  %v7219_v9 = vld [vmem:[%s12370_s7 + $0x6f8] sm:$0x3] }
 0x504   :  { %7085 = vmatpush1.msk.msra.mxu1 %vm509_vm5, %v7082_v36  ;;  %v7134_v36 = vld [vmem:[%s12370_s7 + $0x4c8] sm:$0x3] }
 0x505   :  { %7086 = vmatmul.mubr.msk.f32.vlgmr.msra.gmra.mrb[72].mxu1 %vm3218_vm10, %v3877_v35  ;;  %8667 = vmatprep.subr.bf16.mxu1 %v8666_v45  ;;  %v7139_v45 = vld [vmem:[%s12370_s7 + $0x4d8] sm:$0xff]  ;;  %v7138_v35 = vld [vmem:[%s12370_s7 + $0x4d0] sm:$0xff] }
 0x506   :  { %8669 = vmatpush1.bf16.msra.mxu1 %v8668_v46  ;;  %4047 = vmatprep.mubr.f32.mxu1 %v9096_v0  ;;  %v7141_v46 = vld [vmem:[%s12370_s7 + $0x4e8] sm:$0xff] }
 0x507   :  { %8671 = vmatprep.subr.bf16.mxu1 %v8670_v50  ;;  %v7140_v50 = vld [vmem:[%s12370_s7 + $0x4e0] sm:$0xff]  ;;  %v8702_v60 = vpack.c.bf16 %v7141_v46, %v7139_v45 }
 0x50a   :  { %8673 = vmatpush1.bf16.msra.mxu1 %v8672_v3  ;;  %v8704_v3 = vpack.c.bf16 %v7140_v50, %v7138_v35  ;;  %v7180_v35 = vld [vmem:[%s12370_s7 + $0x5f0] sm:$0xff]  ;;  %v7182_v50 = vld [vmem:[%s12370_s7 + $0x600] sm:$0xff] }
 0x50b   :  { %8675 = vmatprep.subr.bf16.mxu1 %v8674_v55  ;;  %v4168_v55 = vrot.slane %v11056_v58, 4  ;;  %v8736_v44 = vpack.c.bf16 %v7182_v50, %v7180_v35  ;;  %v7227_v50 = vld [vmem:[%s12370_s7 + $0x720] sm:$0xff] }
 0x50e   :  { %8677 = vmatpush1.bf16.msra.mxu1 %v8676_v63  ;;  %v7144_v63 = vld [vmem:[%s12370_s7 + $0x500] sm:$0xff] }
 0x50f   :  { %7101 = vmatprep.subr.msk.mxu1 %vm509_vm5, %v7100_v6  ;;  %v7147_v6 = vld [vmem:[%s12370_s7 + $0x518] sm:$0xff]  ;;  %v8708_v8 = vpack.c.bf16 %v7144_v63, %v7142_v48  ;;  %v7184_v63 = vld [vmem:[%s12370_s7 + $0x610] sm:$0x3] }
 0x510   :  { %v8710_v34 = vpack.c.bf16 %v7149_v7, %v7147_v6  ;;  %v7196_v48 = vld [vmem:[%s12370_s7 + $0x658] sm:$0xff] }
 0x512   :  { %7102 = vmatpush1.msk.msra.mxu1 %vm509_vm5, %v7099_v24  ;;  %v7151_v24 = vld [vmem:[%s12370_s7 + $0x538] sm:$0x3] }
 0x513   :  { %7103 = vmatmul.mubr.msk.f32.vlgmr.msra.gmra.mrb[72].mxu1 %vm3218_vm10, %v11056_v58  ;;  %8679 = vmatprep.subr.bf16.mxu1 %v8678_v56  ;;  %v7156_v56 = vld [vmem:[%s12370_s7 + $0x548] sm:$0xff] }
 0x514   :  { %8681 = vmatpush1.bf16.msra.mxu1 %v8680_v23  ;;  %4144 = vmatprep.mubr.f32.mxu1 %v9096_v0  ;;  %v7158_v23 = vld [vmem:[%s12370_s7 + $0x558] sm:$0xff] }
 0x515   :  { %8683 = vmatprep.subr.bf16.mxu1 %v8682_v52  ;;  %v7155_v52 = vld [vmem:[%s12370_s7 + $0x540] sm:$0xff] }
 0x518   :  { %8685 = vmatpush1.bf16.msra.mxu1 %v8684_v4  ;;  %v8714_v4 = vpack.c.bf16 %v7158_v23, %v7156_v56  ;;  %v8744_v56 = vpack.c.bf16 %v7195_v29, %v7193_v16  ;;  %v7247_v16 = vld [vmem:[%s12370_s7 + $0x7a8] sm:$0xff]  ;;  %v7235_v29 = vld [vmem:[%s12370_s7 + $0x760] sm:$0x3] }
 0x519   :  { %8687 = vmatprep.subr.bf16.mxu1 %v8686_v43  ;;  %v8716_v43 = vpack.c.bf16 %v7157_v53, %v7155_v52  ;;  %v7197_v52 = vld [vmem:[%s12370_s7 + $0x660] sm:$0xff]  ;;  %v7199_v53 = vld [vmem:[%s12370_s7 + $0x670] sm:$0xff] }
 0x51a   :  { %v8748_v32 = vpack.c.bf16 %v7199_v53, %v7197_v52  ;;  %v7244_v52 = vld [vmem:[%s12370_s7 + $0x790] sm:$0xff]  ;;  %v7246_v53 = vld [vmem:[%s12370_s7 + $0x7a0] sm:$0xff] }
 0x51c   :  { %8689 = vmatpush1.bf16.msra.mxu1 %v8688_v2  ;;  %v7159_v2 = vld [vmem:[%s12370_s7 + $0x560] sm:$0xff] }
 0x51d   :  { %7118 = vmatprep.subr.msk.mxu1 %vm509_vm5, %v7117_v25  ;;  %v7161_v25 = vld [vmem:[%s12370_s7 + $0x570] sm:$0xff] }
 0x51e   :  { %v8720_v58 = vpack.c.bf16 %v7161_v25, %v7159_v2  ;;  %v7213_v2 = vld [vmem:[%s12370_s7 + $0x6c8] sm:$0xff]  ;;  %v7201_v25 = vld [vmem:[%s12370_s7 + $0x680] sm:$0x3] }
 0x520   :  { %7119 = vmatpush1.msk.msra.mxu1 %vm509_vm5, %v7116_v39  ;;  %v7168_v39 = vld [vmem:[%s12370_s7 + $0x5a8] sm:$0x3] }
 0x521   :  { %7120 = vmatmul.mubr.msk.f32.vlgmr.msra.gmra.mrb[72].mxu1 %vm3218_vm10, %v4071_v19  ;;  %8691 = vmatprep.subr.bf16.mxu1 %v8690_v49  ;;  %v7173_v49 = vld [vmem:[%s12370_s7 + $0x5b8] sm:$0xff]  ;;  %v7172_v19 = vld [vmem:[%s12370_s7 + $0x5b0] sm:$0xff] }
 0x522   :  { %8693 = vmatpush1.bf16.msra.mxu1 %v8692_v11  ;;  %4241 = vmatprep.mubr.f32.mxu1 %v9096_v0  ;;  %v7175_v11 = vld [vmem:[%s12370_s7 + $0x5c8] sm:$0xff] }
 0x523   :  { %8695 = vmatprep.subr.bf16.mxu1 %v8694_v22  ;;  %v7174_v22 = vld [vmem:[%s12370_s7 + $0x5c0] sm:$0xff]  ;;  %v8726_v30 = vpack.c.bf16 %v7175_v11, %v7173_v49  ;;  %v8756_v49 = vpack.c.bf16 %v7212_v14, %v7210_v54  ;;  %v7252_v54 = vld [vmem:[%s12370_s7 + $0x7d0] sm:$0x3] }
 0x526   :  { %8697 = vmatpush1.bf16.msra.mxu1 %v8696_v1  ;;  %v8728_v1 = vpack.c.bf16 %v7174_v22, %v7172_v19  ;;  %v7214_v19 = vld [vmem:[%s12370_s7 + $0x6d0] sm:$0xff]  ;;  %v7216_v22 = vld [vmem:[%s12370_s7 + $0x6e0] sm:$0xff] }
 0x527   :  { %8699 = vmatprep.subr.bf16.mxu1 %v8698_v17  ;;  %v11247_v17 = vmax.f32 %v10675_v37, 0.0  ;;  %v7183_v37 = vld [vmem:[%s12370_s7 + $0x608] sm:$0xff]  ;;  %v8760_v40 = vpack.c.bf16 %v7216_v22, %v7214_v19  ;;  %v7263_v19 = vld [vmem:[%s12370_s7 + $0x810] sm:$0xff] }
 0x528   :  { %v7266_v22 = vld [vmem:[%s12370_s7 + $0x828] sm:$0xff] }
 0x52a   :  { %8701 = vmatpush1.bf16.msra.mxu1 %v8700_v5  ;;  %v7178_v5 = vld [vmem:[%s12370_s7 + $0x5e0] sm:$0xff] }
 0x52b   :  { %7135 = vmatprep.subr.msk.mxu1 %vm509_vm5, %v7134_v36  ;;  %v7181_v36 = vld [vmem:[%s12370_s7 + $0x5f8] sm:$0xff]  ;;  %v8732_v45 = vpack.c.bf16 %v7178_v5, %v7176_v61  ;;  %v7228_v61 = vld [vmem:[%s12370_s7 + $0x728] sm:$0xff] }
 0x52c   :  { %v8734_v46 = vpack.c.bf16 %v7183_v37, %v7181_v36  ;;  %v7230_v5 = vld [vmem:[%s12370_s7 + $0x738] sm:$0xff]  ;;  %v7218_v36 = vld [vmem:[%s12370_s7 + $0x6f0] sm:$0x3] }
 0x52d   :  { %v8766_v35 = vpack.c.bf16 %v7230_v5, %v7228_v61  ;;  %v7270_v61 = vld [vmem:[%s12370_s7 + $0x848] sm:$0x3]  ;;  %v7275_v5 = vld [vmem:[%s12370_s7 + $0x858] sm:$0xff] }
 0x52e   :  { %7136 = vmatpush1.msk.msra.mxu1 %vm509_vm5, %v7133_v51  ;;  %v7190_v51 = vld [vmem:[%s12370_s7 + $0x628] sm:$0xff] }
 0x52f   :  { %7137 = vmatmul.mubr.msk.f32.vlgmr.msra.gmra.mrb[72].mxu1 %vm3218_vm10, %v4168_v55  ;;  %8703 = vmatprep.subr.bf16.mxu1 %v8702_v60  ;;  %v7192_v60 = vld [vmem:[%s12370_s7 + $0x638] sm:$0xff]  ;;  %v7191_v55 = vld [vmem:[%s12370_s7 + $0x630] sm:$0xff] }
 0x530   :  { %8705 = vmatpush1.bf16.msra.mxu1 %v8704_v3  ;;  %4338 = vmatprep.mubr.f32.mxu1 %v9096_v0  ;;  %v7189_v3 = vld [vmem:[%s12370_s7 + $0x620] sm:$0xff]  ;;  %v8738_v6 = vpack.c.bf16 %v7192_v60, %v7190_v51  ;;  %v7234_v51 = vld [vmem:[%s12370_s7 + $0x758] sm:$0xff] }
 0x531   :  { %8707 = vmatprep.subr.bf16.mxu1 %v8706_v21  ;;  %v7194_v21 = vld [vmem:[%s12370_s7 + $0x648] sm:$0xff]  ;;  %v8740_v7 = vpack.c.bf16 %v7191_v55, %v7189_v3  ;;  %v7231_v3 = vld [vmem:[%s12370_s7 + $0x740] sm:$0xff]  ;;  %v7233_v55 = vld [vmem:[%s12370_s7 + $0x750] sm:$0xff] }
 0x534   :  { %8709 = vmatpush1.bf16.msra.mxu1 %v8708_v8  ;;  %v4459_v8 = vrot.slane %v11247_v17, 2 }
 0x535   :  { %8711 = vmatprep.subr.bf16.mxu1 %v8710_v34  ;;  %v8742_v34 = vpack.c.bf16 %v7196_v48, %v7194_v21  ;;  %v8772_v21 = vpack.c.bf16 %v7233_v55, %v7231_v3  ;;  %v7236_v48 = vld [vmem:[%s12370_s7 + $0x768] sm:$0x3]  ;;  %v7280_v3 = vld [vmem:[%s12370_s7 + $0x880] sm:$0xff]  ;;  %v7283_v55 = vld [vmem:[%s12370_s7 + $0x898] sm:$0xff] }
 0x538   :  { %8713 = vmatpush1.bf16.msra.mxu1 %v8712_v20  ;;  %v7198_v20 = vld [vmem:[%s12370_s7 + $0x668] sm:$0xff] }
 0x539   :  { %7152 = vmatprep.subr.msk.mxu1 %vm509_vm5, %v7151_v24  ;;  %v7200_v24 = vld [vmem:[%s12370_s7 + $0x678] sm:$0xff] }
 0x53a   :  { %v8746_v23 = vpack.c.bf16 %v7200_v24, %v7198_v20 }
 0x53c   :  { %7153 = vmatpush1.msk.msra.mxu1 %vm509_vm5, %v7150_v57  ;;  %v7207_v57 = vld [vmem:[%s12370_s7 + $0x698] sm:$0xff] }
 0x53d   :  { %7154 = vmatmul.mubr.msk.f32.vlgmr.msra.gmra.mrb[72].mxu1 %vm3218_vm10, %v4265_v26  ;;  %8715 = vmatprep.subr.bf16.mxu1 %v8714_v4  ;;  %v7209_v4 = vld [vmem:[%s12370_s7 + $0x6a8] sm:$0xff]  ;;  %v7208_v26 = vld [vmem:[%s12370_s7 + $0x6a0] sm:$0xff] }
 0x53e   :  { %8717 = vmatpush1.bf16.msra.mxu1 %v8716_v43  ;;  %4435 = vmatprep.mubr.f32.mxu1 %v9096_v0  ;;  %v7206_v43 = vld [vmem:[%s12370_s7 + $0x690] sm:$0xff]  ;;  %v8750_v62 = vpack.c.bf16 %v7209_v4, %v7207_v57 }
 0x53f   :  { %8719 = vmatprep.subr.bf16.mxu1 %v8718_v38  ;;  %v7211_v38 = vld [vmem:[%s12370_s7 + $0x6b8] sm:$0xff]  ;;  %v8752_v15 = vpack.c.bf16 %v7208_v26, %v7206_v43  ;;  %v7248_v4 = vld [vmem:[%s12370_s7 + $0x7b0] sm:$0xff]  ;;  %v7250_v43 = vld [vmem:[%s12370_s7 + $0x7c0] sm:$0xff] }
 0x540   :  { %v8784_v26 = vpack.c.bf16 %v7250_v43, %v7248_v4  ;;  %v7295_v4 = vld [vmem:[%s12370_s7 + $0x8e0] sm:$0xff]  ;;  %v7297_v43 = vld [vmem:[%s12370_s7 + $0x8f0] sm:$0xff] }
 0x542   :  { %8721 = vmatpush1.bf16.msra.mxu1 %v8720_v58  ;;  %v4556_v58 = vrot.slane %v11247_v17, 4 }
 0x543   :  { %8723 = vmatprep.subr.bf16.mxu1 %v8722_v10  ;;  %v8754_v10 = vpack.c.bf16 %v7213_v2, %v7211_v38  ;;  %v7253_v38 = vld [vmem:[%s12370_s7 + $0x7d8] sm:$0x3]  ;;  %v7258_v2 = vld [vmem:[%s12370_s7 + $0x7e8] sm:$0xff] }
 0x546   :  { %8725 = vmatpush1.bf16.msra.mxu1 %v8724_v13  ;;  %v7215_v13 = vld [vmem:[%s12370_s7 + $0x6d8] sm:$0xff] }
 0x547   :  { %7169 = vmatprep.subr.msk.mxu1 %vm509_vm5, %v7168_v39  ;;  %v7217_v39 = vld [vmem:[%s12370_s7 + $0x6e8] sm:$0xff] }
 0x548   :  { %v8758_v11 = vpack.c.bf16 %v7217_v39, %v7215_v13 }
 0x54a   :  { %7170 = vmatpush1.msk.msra.mxu1 %vm509_vm5, %v7167_v27  ;;  %v7224_v27 = vld [vmem:[%s12370_s7 + $0x708] sm:$0xff] }
 0x54b   :  { %7171 = vmatmul.mubr.msk.f32.vlgmr.msra.gmra.mrb[72].mxu1 %vm3218_vm10, %v11247_v17  ;;  %8727 = vmatprep.subr.bf16.mxu1 %v8726_v30  ;;  %v7226_v30 = vld [vmem:[%s12370_s7 + $0x718] sm:$0xff] }
 0x54c   :  { %8729 = vmatpush1.bf16.msra.mxu1 %v8728_v1  ;;  %4532 = vmatprep.mubr.f32.mxu1 %v9096_v0  ;;  %v7223_v1 = vld [vmem:[%s12370_s7 + $0x700] sm:$0xff]  ;;  %v8762_v37 = vpack.c.bf16 %v7226_v30, %v7224_v27 }
 0x54d   :  { %8731 = vmatprep.subr.bf16.mxu1 %v8730_v28  ;;  %v7225_v28 = vld [vmem:[%s12370_s7 + $0x710] sm:$0xff]  ;;  %v7265_v30 = vld [vmem:[%s12370_s7 + $0x820] sm:$0xff] }
 0x550   :  { %8733 = vmatpush1.bf16.msra.mxu1 %v8732_v45  ;;  %v8764_v45 = vpack.c.bf16 %v7225_v28, %v7223_v1  ;;  %v7267_v1 = vld [vmem:[%s12370_s7 + $0x830] sm:$0xff] }
 0x551   :  { %8735 = vmatprep.subr.bf16.mxu1 %v8734_v46  ;;  %v4653_v46 = vrot.slane %v11247_v17, 6  ;;  %v8796_v28 = vpack.c.bf16 %v7267_v1, %v7265_v30  ;;  %v7314_v30 = vld [vmem:[%s12370_s7 + $0x960] sm:$0xff]  ;;  %v7317_v1 = vld [vmem:[%s12370_s7 + $0x978] sm:$0xff] }
 0x554   :  { %8737 = vmatpush1.bf16.msra.mxu1 %v8736_v44  ;;  %v7229_v44 = vld [vmem:[%s12370_s7 + $0x730] sm:$0xff] }
 0x555   :  { %7186 = vmatprep.subr.msk.mxu1 %vm509_vm5, %v7185_v47  ;;  %v7232_v47 = vld [vmem:[%s12370_s7 + $0x748] sm:$0xff]  ;;  %v8768_v17 = vpack.c.bf16 %v7229_v44, %v7227_v50  ;;  %v7269_v50 = vld [vmem:[%s12370_s7 + $0x840] sm:$0x3] }
 0x556   :  { %v8770_v60 = vpack.c.bf16 %v7234_v51, %v7232_v47 }
 0x558   :  { %7187 = vmatpush1.msk.msra.mxu1 %vm509_vm5, %v7184_v63  ;;  %v7241_v63 = vld [vmem:[%s12370_s7 + $0x778] sm:$0xff] }
 0x559   :  { %7188 = vmatmul.mubr.msk.f32.vlgmr.msra.gmra.mrb[72].mxu1 %vm3218_vm10, %v4459_v8  ;;  %8739 = vmatprep.subr.bf16.mxu1 %v8738_v6  ;;  %v7243_v6 = vld [vmem:[%s12370_s7 + $0x788] sm:$0xff]  ;;  %v7242_v8 = vld [vmem:[%s12370_s7 + $0x780] sm:$0xff] }
 0x55a   :  { %8741 = vmatpush1.bf16.msra.mxu1 %v8740_v7  ;;  %4629 = vmatprep.mubr.f32.mxu1 %v9096_v0  ;;  %v7240_v7 = vld [vmem:[%s12370_s7 + $0x770] sm:$0xff]  ;;  %v8774_v20 = vpack.c.bf16 %v7243_v6, %v7241_v63 }
 0x55b   :  { %8743 = vmatprep.subr.bf16.mxu1 %v8742_v34  ;;  %v7245_v34 = vld [vmem:[%s12370_s7 + $0x798] sm:$0xff]  ;;  %v8776_v24 = vpack.c.bf16 %v7242_v8, %v7240_v7  ;;  %v7282_v6 = vld [vmem:[%s12370_s7 + $0x890] sm:$0xff]  ;;  %v7284_v7 = vld [vmem:[%s12370_s7 + $0x8a0] sm:$0xff] }
 0x55c   :  { %v8808_v8 = vpack.c.bf16 %v7284_v7, %v7282_v6  ;;  %v7334_v6 = vld [vmem:[%s12370_s7 + $0x9e8] sm:$0xff]  ;;  %v7336_v7 = vld [vmem:[%s12370_s7 + $0x9f8] sm:$0xff] }
 0x55e   :  { %8745 = vmatpush1.bf16.msra.mxu1 %v8744_v56  ;;  %v11438_v56 = vmax.f32 %v10700_v18, 0.0  ;;  %v7251_v18 = vld [vmem:[%s12370_s7 + $0x7c8] sm:$0xff] }
 0x55f   :  { %8747 = vmatprep.subr.bf16.mxu1 %v8746_v23  ;;  %v8778_v23 = vpack.c.bf16 %v7247_v16, %v7245_v34  ;;  %v7287_v34 = vld [vmem:[%s12370_s7 + $0x8b8] sm:$0x3]  ;;  %v7292_v16 = vld [vmem:[%s12370_s7 + $0x8c8] sm:$0xff] }
 0x560   :  { %v4847_v39 = vrot.slane %v11438_v56, 2  ;;  %v4944_v51 = vrot.slane %v11438_v56, 4 }
 0x562   :  { %8749 = vmatpush1.bf16.msra.mxu1 %v8748_v32  ;;  %v7249_v32 = vld [vmem:[%s12370_s7 + $0x7b8] sm:$0xff] }
 0x563   :  { %7203 = vmatprep.subr.msk.mxu1 %vm509_vm5, %v7202_v41  ;;  %v8780_v41 = vpack.c.bf16 %v7246_v53, %v7244_v52  ;;  %v8782_v57 = vpack.c.bf16 %v7251_v18, %v7249_v32  ;;  %v7298_v52 = vld [vmem:[%s12370_s7 + $0x8f8] sm:$0xff]  ;;  %v7286_v53 = vld [vmem:[%s12370_s7 + $0x8b0] sm:$0x3] }
 0x566   :  { %7204 = vmatpush1.msk.msra.mxu1 %vm509_vm5, %v7201_v25  ;;  %v7260_v25 = vld [vmem:[%s12370_s7 + $0x7f8] sm:$0xff] }
 0x567   :  { %7205 = vmatmul.mubr.msk.f32.vlgmr.msra.gmra.mrb[72].mxu1 %vm3218_vm10, %v4556_v58  ;;  %8751 = vmatprep.subr.bf16.mxu1 %v8750_v62  ;;  %v7257_v62 = vld [vmem:[%s12370_s7 + $0x7e0] sm:$0xff]  ;;  %v7262_v58 = vld [vmem:[%s12370_s7 + $0x808] sm:$0xff]  ;;  %v8786_v14 = vpack.c.bf16 %v7260_v25, %v7258_v2 }
 0x568   :  { %8753 = vmatpush1.bf16.msra.mxu1 %v8752_v15  ;;  %4726 = vmatprep.mubr.f32.mxu1 %v9096_v0  ;;  %v7259_v15 = vld [vmem:[%s12370_s7 + $0x7f0] sm:$0xff]  ;;  %v7299_v25 = vld [vmem:[%s12370_s7 + $0x900] sm:$0xff] }
 0x569   :  { %8755 = vmatprep.subr.bf16.mxu1 %v8754_v10  ;;  %v7264_v10 = vld [vmem:[%s12370_s7 + $0x818] sm:$0xff]  ;;  %v8788_v13 = vpack.c.bf16 %v7259_v15, %v7257_v62  ;;  %v7301_v62 = vld [vmem:[%s12370_s7 + $0x910] sm:$0xff] }
 0x56a   :  { %v8820_v15 = vpack.c.bf16 %v7301_v62, %v7299_v25  ;;  %v7351_v25 = vld [vmem:[%s12370_s7 + $0xa58] sm:$0xff]  ;;  %v7353_v62 = vld [vmem:[%s12370_s7 + $0xa68] sm:$0xff] }
 0x56c   :  { %8757 = vmatpush1.bf16.msra.mxu1 %v8756_v49  ;;  %v8790_v49 = vpack.c.bf16 %v7264_v10, %v7262_v58  ;;  %v7304_v58 = vld [vmem:[%s12370_s7 + $0x928] sm:$0x3]  ;;  %v7309_v10 = vld [vmem:[%s12370_s7 + $0x938] sm:$0xff] }
 0x56d   :  { %8759 = vmatprep.subr.bf16.mxu1 %v8758_v11  ;;  %v7261_v11 = vld [vmem:[%s12370_s7 + $0x800] sm:$0xff] }
 0x570   :  { %8761 = vmatpush1.bf16.msra.mxu1 %v8760_v40  ;;  %v7268_v40 = vld [vmem:[%s12370_s7 + $0x838] sm:$0xff] }
 0x571   :  { %7220 = vmatprep.subr.msk.mxu1 %vm509_vm5, %v7219_v9  ;;  %v8792_v9 = vpack.c.bf16 %v7263_v19, %v7261_v11  ;;  %v8794_v27 = vpack.c.bf16 %v7268_v40, %v7266_v22  ;;  %v7303_v11 = vld [vmem:[%s12370_s7 + $0x920] sm:$0x3]  ;;  %v11629_v40 = vmax.f32 %v10721_v59, 0.0  ;;  %v7319_v59 = vld [vmem:[%s12370_s7 + $0x988] sm:$0xff] }
 0x574   :  { %7221 = vmatpush1.msk.msra.mxu1 %vm509_vm5, %v7218_v36  ;;  %v7277_v36 = vld [vmem:[%s12370_s7 + $0x868] sm:$0xff] }
 0x575   :  { %7222 = vmatmul.mubr.msk.f32.vlgmr.msra.gmra.mrb[72].mxu1 %vm3218_vm10, %v4653_v46  ;;  %8763 = vmatprep.subr.bf16.mxu1 %v8762_v37  ;;  %v7274_v37 = vld [vmem:[%s12370_s7 + $0x850] sm:$0xff]  ;;  %v7279_v46 = vld [vmem:[%s12370_s7 + $0x878] sm:$0xff]  ;;  %v8798_v44 = vpack.c.bf16 %v7277_v36, %v7275_v5  ;;  %v7318_v36 = vld [vmem:[%s12370_s7 + $0x980] sm:$0xff] }
 0x576   :  { %8765 = vmatpush1.bf16.msra.mxu1 %v8764_v45  ;;  %4823 = vmatprep.mubr.f32.mxu1 %v9096_v0  ;;  %v7276_v45 = vld [vmem:[%s12370_s7 + $0x860] sm:$0xff]  ;;  %v7316_v5 = vld [vmem:[%s12370_s7 + $0x970] sm:$0xff] }
 0x577   :  { %8767 = vmatprep.subr.bf16.mxu1 %v8766_v35  ;;  %v7281_v35 = vld [vmem:[%s12370_s7 + $0x888] sm:$0xff]  ;;  %v8800_v47 = vpack.c.bf16 %v7276_v45, %v7274_v37  ;;  %v8832_v37 = vpack.c.bf16 %v7318_v36, %v7316_v5  ;;  %v7321_v45 = vld [vmem:[%s12370_s7 + $0x998] sm:$0x3]  ;;  %v7365_v5 = vld [vmem:[%s12370_s7 + $0xab0] sm:$0xff] }
 0x578   :  { %v7368_v36 = vld [vmem:[%s12370_s7 + $0xac8] sm:$0xff] }
 0x57a   :  { %8769 = vmatpush1.bf16.msra.mxu1 %v8768_v17  ;;  %v8802_v17 = vpack.c.bf16 %v7281_v35, %v7279_v46  ;;  %v7326_v46 = vld [vmem:[%s12370_s7 + $0x9a8] sm:$0xff]  ;;  %v7328_v35 = vld [vmem:[%s12370_s7 + $0x9b8] sm:$0xff] }
 0x57b   :  { %8771 = vmatprep.subr.bf16.mxu1 %v8770_v60  ;;  %v7278_v60 = vld [vmem:[%s12370_s7 + $0x870] sm:$0xff] }
 0x57e   :  { %8773 = vmatpush1.bf16.msra.mxu1 %v8772_v21  ;;  %v7285_v21 = vld [vmem:[%s12370_s7 + $0x8a8] sm:$0xff] }
 0x57f   :  { %7237 = vmatprep.subr.msk.mxu1 %vm509_vm5, %v7236_v48  ;;  %v8804_v48 = vpack.c.bf16 %v7280_v3, %v7278_v60  ;;  %v8806_v63 = vpack.c.bf16 %v7285_v21, %v7283_v55  ;;  %v8834_v60 = vpack.c.bf16 %v7328_v35, %v7326_v46  ;;  %v5235_v55 = vrot.slane %v11629_v40, 2  ;;  %v7367_v46 = vld [vmem:[%s12370_s7 + $0xac0] sm:$0xff]  ;;  %v7369_v35 = vld [vmem:[%s12370_s7 + $0xad0] sm:$0xff] }
 0x582   :  { %7238 = vmatpush1.msk.msra.mxu1 %vm509_vm5, %v7235_v29  ;;  %v7294_v29 = vld [vmem:[%s12370_s7 + $0x8d8] sm:$0xff] }
 0x583   :  { %7239 = vmatmul.mubr.msk.f32.vlgmr.msra.gmra.mrb[72].mxu1 %vm3218_vm10, %v11438_v56  ;;  %8775 = vmatprep.subr.bf16.mxu1 %v8774_v20  ;;  %v7291_v20 = vld [vmem:[%s12370_s7 + $0x8c0] sm:$0xff]  ;;  %v8810_v32 = vpack.c.bf16 %v7294_v29, %v7292_v16  ;;  %v7335_v29 = vld [vmem:[%s12370_s7 + $0x9f0] sm:$0xff] }
 0x584   :  { %8777 = vmatpush1.bf16.msra.mxu1 %v8776_v24  ;;  %4920 = vmatprep.mubr.f32.mxu1 %v9096_v0  ;;  %v7293_v24 = vld [vmem:[%s12370_s7 + $0x8d0] sm:$0xff]  ;;  %v7333_v16 = vld [vmem:[%s12370_s7 + $0x9e0] sm:$0xff] }
 0x585   :  { %8779 = vmatprep.subr.bf16.mxu1 %v8778_v23  ;;  %v7296_v23 = vld [vmem:[%s12370_s7 + $0x8e8] sm:$0xff]  ;;  %v8812_v18 = vpack.c.bf16 %v7293_v24, %v7291_v20  ;;  %v8844_v20 = vpack.c.bf16 %v7335_v29, %v7333_v16  ;;  %v7385_v16 = vld [vmem:[%s12370_s7 + $0xb38] sm:$0xff] }
 0x586   :  { %v7338_v24 = vld [vmem:[%s12370_s7 + $0xa08] sm:$0x3] }
 0x588   :  { %8781 = vmatpush1.bf16.msra.mxu1 %v8780_v41  ;;  %v5041_v41 = vrot.slane %v11438_v56, 6  ;;  %v8816_v56 = vpack.c.bf16 %v7297_v43, %v7295_v4 }
 0x589   :  { %8783 = vmatprep.subr.bf16.mxu1 %v8782_v57  ;;  %v8814_v57 = vpack.c.bf16 %v7298_v52, %v7296_v23  ;;  %v7343_v23 = vld [vmem:[%s12370_s7 + $0xa18] sm:$0xff]  ;;  %v7345_v52 = vld [vmem:[%s12370_s7 + $0xa28] sm:$0xff] }
 0x58a   :  { %v8846_v4 = vpack.c.bf16 %v7345_v52, %v7343_v23  ;;  %v7386_v23 = vld [vmem:[%s12370_s7 + $0xb40] sm:$0xff] }
 0x58c   :  { %8785 = vmatpush1.bf16.msra.mxu1 %v8784_v26  ;;  %v7300_v26 = vld [vmem:[%s12370_s7 + $0x908] sm:$0xff] }
 0x58d   :  { %7254 = vmatprep.subr.msk.mxu1 %vm509_vm5, %v7253_v38  ;;  %v7302_v38 = vld [vmem:[%s12370_s7 + $0x918] sm:$0xff] }
 0x58e   :  { %v8818_v2 = vpack.c.bf16 %v7302_v38, %v7300_v26  ;;  %v5332_v26 = vrot.slane %v11629_v40, 4 }
 0x590   :  { %7255 = vmatpush1.msk.msra.mxu1 %vm509_vm5, %v7252_v54  ;;  %v7311_v54 = vld [vmem:[%s12370_s7 + $0x948] sm:$0xff] }
 0x591   :  { %7256 = vmatmul.mubr.msk.f32.vlgmr.msra.gmra.mrb[72].mxu1 %vm3218_vm10, %v4847_v39  ;;  %8787 = vmatprep.subr.bf16.mxu1 %v8786_v14  ;;  %v7308_v14 = vld [vmem:[%s12370_s7 + $0x930] sm:$0xff]  ;;  %v7313_v39 = vld [vmem:[%s12370_s7 + $0x958] sm:$0xff]  ;;  %v8822_v19 = vpack.c.bf16 %v7311_v54, %v7309_v10  ;;  %v7352_v54 = vld [vmem:[%s12370_s7 + $0xa60] sm:$0xff] }
 0x592   :  { %8789 = vmatpush1.bf16.msra.mxu1 %v8788_v13  ;;  %5017 = vmatprep.mubr.f32.mxu1 %v9096_v0  ;;  %v7310_v13 = vld [vmem:[%s12370_s7 + $0x940] sm:$0xff]  ;;  %v7350_v10 = vld [vmem:[%s12370_s7 + $0xa50] sm:$0xff] }
 0x593   :  { %8791 = vmatprep.subr.bf16.mxu1 %v8790_v49  ;;  %v7315_v49 = vld [vmem:[%s12370_s7 + $0x968] sm:$0xff]  ;;  %v8824_v22 = vpack.c.bf16 %v7310_v13, %v7308_v14  ;;  %v8856_v14 = vpack.c.bf16 %v7352_v54, %v7350_v10  ;;  %v7355_v13 = vld [vmem:[%s12370_s7 + $0xa78] sm:$0x3]  ;;  %v6594_v54 = vld [vmem:[%s12372_s9] sm:$0xff] }
 0x594   :  { %v7404_v10 = vld [vmem:[%s12370_s7 + $0xbb8] sm:$0xff] }
 0x596   :  { %8793 = vmatpush1.bf16.msra.mxu1 %v8792_v9  ;;  %v8826_v9 = vpack.c.bf16 %v7315_v49, %v7313_v39  ;;  %v7360_v39 = vld [vmem:[%s12370_s7 + $0xa88] sm:$0xff]  ;;  %v7362_v49 = vld [vmem:[%s12370_s7 + $0xa98] sm:$0xff] }
 0x597   :  { %8795 = vmatprep.subr.bf16.mxu1 %v8794_v27  ;;  %v7312_v27 = vld [vmem:[%s12370_s7 + $0x950] sm:$0xff] }
 0x59a   :  { %8797 = vmatpush1.bf16.msra.mxu1 %v8796_v28  ;;  %v8828_v28 = vpack.c.bf16 %v7314_v30, %v7312_v27  ;;  %v7354_v27 = vld [vmem:[%s12370_s7 + $0xa70] sm:$0x3]  ;;  %v8858_v30 = vpack.c.bf16 %v7362_v49, %v7360_v39  ;;  %v6597_v49 = vld [vmem:[%s12372_s9 + $0x18] sm:$0xff] }
 0x59b   :  { %7271 = vmatprep.subr.msk.mxu1 %vm509_vm5, %v7270_v61  ;;  %v8830_v61 = vpack.c.bf16 %v7319_v59, %v7317_v1  ;;  %v5429_v59 = vrot.slane %v11629_v40, 6 }
 0x59e   :  { %7272 = vmatpush1.msk.msra.mxu1 %vm509_vm5, %v7269_v50  ;;  %v7325_v50 = vld [vmem:[%s12370_s7 + $0x9a0] sm:$0xff] }
 0x59f   :  { %7273 = vmatmul.mubr.msk.f32.vlgmr.msra.gmra.mrb[72].mxu1 %vm3218_vm10, %v4944_v51  ;;  %8799 = vmatprep.subr.bf16.mxu1 %v8798_v44  ;;  %v7327_v44 = vld [vmem:[%s12370_s7 + $0x9b0] sm:$0xff]  ;;  %v7332_v51 = vld [vmem:[%s12370_s7 + $0x9d8] sm:$0xff] }
 0x5a0   :  { %8801 = vmatpush1.bf16.msra.mxu1 %v8800_v47  ;;  %5114 = vmatprep.mubr.f32.mxu1 %v9096_v0  ;;  %v7330_v47 = vld [vmem:[%s12370_s7 + $0x9c8] sm:$0xff]  ;;  %v8836_v3 = vpack.c.bf16 %v7327_v44, %v7325_v50  ;;  %v8868_v50 = vpack.c.bf16 %v7369_v35, %v7367_v46  ;;  %v6600_v35 = vld [vmem:[%s12372_s9 + $0x30] sm:$0xff] }
 0x5a1   :  { %8803 = vmatprep.subr.bf16.mxu1 %v8802_v17  ;;  %v7320_v17 = vld [vmem:[%s12370_s7 + $0x990] sm:$0x3]  ;;  %v8838_v21 = vpack.c.bf16 %v7332_v51, %v7330_v47  ;;  %v7372_v44 = vld [vmem:[%s12370_s7 + $0xae8] sm:$0x3]  ;;  %v7377_v47 = vld [vmem:[%s12370_s7 + $0xaf8] sm:$0xff] }
 0x5a2   :  { %v7379_v51 = vld [vmem:[%s12370_s7 + $0xb08] sm:$0xff] }
 0x5a3   :  { %v7417_v46 = vld [vmem:[%s12370_s7 + $0xc08] sm:$0xff] }
 0x5a4   :  { %8805 = vmatpush1.bf16.msra.mxu1 %v8804_v48  ;;  %v7329_v48 = vld [vmem:[%s12370_s7 + $0x9c0] sm:$0xff] }
 0x5a5   :  { %8807 = vmatprep.subr.bf16.mxu1 %v8806_v63  ;;  %v7331_v63 = vld [vmem:[%s12370_s7 + $0x9d0] sm:$0xff] }
 0x5a8   :  { %8809 = vmatpush1.bf16.msra.mxu1 %v8808_v8  ;;  %v8840_v8 = vpack.c.bf16 %v7331_v63, %v7329_v48  ;;  %v8870_v48 = vpack.c.bf16 %v7379_v51, %v7377_v47 }
 0x5a9   :  { %7288 = vmatprep.subr.msk.mxu1 %vm509_vm5, %v7287_v34  ;;  %v8842_v34 = vpack.c.bf16 %v7336_v7, %v7334_v6  ;;  %v11820_v6 = vmax.f32 %v10734_v31, 0.0  ;;  %v7387_v31 = vld [vmem:[%s12370_s7 + $0xb48] sm:$0xff] }
 0x5ac   :  { %7289 = vmatpush1.msk.msra.mxu1 %vm509_vm5, %v7286_v53  ;;  %v7342_v53 = vld [vmem:[%s12370_s7 + $0xa10] sm:$0xff] }
 0x5ad   :  { %7290 = vmatmul.mubr.msk.f32.vlgmr.msra.gmra.mrb[72].mxu1 %vm3218_vm10, %v5041_v41  ;;  %8811 = vmatprep.subr.bf16.mxu1 %v8810_v32  ;;  %v7344_v32 = vld [vmem:[%s12370_s7 + $0xa20] sm:$0xff]  ;;  %v7349_v41 = vld [vmem:[%s12370_s7 + $0xa48] sm:$0xff] }
 0x5ae   :  { %8813 = vmatpush1.bf16.msra.mxu1 %v8812_v18  ;;  %5211 = vmatprep.mubr.f32.mxu1 %v9096_v0  ;;  %v7347_v18 = vld [vmem:[%s12370_s7 + $0xa38] sm:$0xff]  ;;  %v8848_v43 = vpack.c.bf16 %v7344_v32, %v7342_v53  ;;  %v7394_v32 = vld [vmem:[%s12370_s7 + $0xb68] sm:$0xff] }
 0x5af   :  { %8815 = vmatprep.subr.bf16.mxu1 %v8814_v57  ;;  %v7337_v57 = vld [vmem:[%s12370_s7 + $0xa00] sm:$0x3]  ;;  %v8850_v38 = vpack.c.bf16 %v7349_v41, %v7347_v18  ;;  %v7389_v53 = vld [vmem:[%s12370_s7 + $0xb58] sm:$0x3] }
 0x5b0   :  { %v7396_v18 = vld [vmem:[%s12370_s7 + $0xb78] sm:$0xff]  ;;  %v7393_v41 = vld [vmem:[%s12370_s7 + $0xb60] sm:$0xff] }
 0x5b2   :  { %8817 = vmatpush1.bf16.msra.mxu1 %v8816_v56  ;;  %v7346_v56 = vld [vmem:[%s12370_s7 + $0xa30] sm:$0xff] }
 0x5b3   :  { %8819 = vmatprep.subr.bf16.mxu1 %v8818_v2  ;;  %v7348_v2 = vld [vmem:[%s12370_s7 + $0xa40] sm:$0xff] }
 0x5b6   :  { %8821 = vmatpush1.bf16.msra.mxu1 %v8820_v15  ;;  %v8852_v15 = vpack.c.bf16 %v7348_v2, %v7346_v56  ;;  %v7397_v2 = vld [vmem:[%s12370_s7 + $0xb80] sm:$0xff] }
 0x5b7   :  { %7305 = vmatprep.subr.msk.mxu1 %vm509_vm5, %v7304_v58  ;;  %v8854_v58 = vpack.c.bf16 %v7353_v62, %v7351_v25  ;;  %v5623_v25 = vrot.slane %v11820_v6, 2 }
 0x5ba   :  { %7306 = vmatpush1.msk.msra.mxu1 %vm509_vm5, %v7303_v11  ;;  %v7359_v11 = vld [vmem:[%s12370_s7 + $0xa80] sm:$0xff] }
 0x5bb   :  { %7307 = vmatmul.mubr.msk.f32.vlgmr.msra.gmra.mrb[72].mxu1 %vm3218_vm10, %v11629_v40  ;;  %8823 = vmatprep.subr.bf16.mxu1 %v8822_v19  ;;  %v7361_v19 = vld [vmem:[%s12370_s7 + $0xa90] sm:$0xff] }
 0x5bc   :  { %8825 = vmatpush1.bf16.msra.mxu1 %v8824_v22  ;;  %5308 = vmatprep.mubr.f32.mxu1 %v9096_v0  ;;  %v7364_v22 = vld [vmem:[%s12370_s7 + $0xaa8] sm:$0xff]  ;;  %v8860_v1 = vpack.c.bf16 %v7361_v19, %v7359_v11 }
 0x5bd   :  { %8827 = vmatprep.subr.bf16.mxu1 %v8826_v9  ;;  %v7366_v9 = vld [vmem:[%s12370_s7 + $0xab8] sm:$0xff] }
 0x5c0   :  { %8829 = vmatpush1.bf16.msra.mxu1 %v8828_v28  ;;  %v8862_v28 = vpack.c.bf16 %v7366_v9, %v7364_v22  ;;  %v7401_v22 = vld [vmem:[%s12370_s7 + $0xba0] sm:$0xff]  ;;  %v7403_v9 = vld [vmem:[%s12370_s7 + $0xbb0] sm:$0xff] }
 0x5c1   :  { %8831 = vmatprep.subr.bf16.mxu1 %v8830_v61  ;;  %v7363_v61 = vld [vmem:[%s12370_s7 + $0xaa0] sm:$0xff] }
 0x5c2   :  { %v8864_v40 = vpack.c.bf16 %v7365_v5, %v7363_v61  ;;  %v7406_v61 = vld [vmem:[%s12370_s7 + $0xbc8] sm:$0x3]  ;;  %v7411_v5 = vld [vmem:[%s12370_s7 + $0xbd8] sm:$0xff] }
 0x5c4   :  { %8833 = vmatpush1.bf16.msra.mxu1 %v8832_v37  ;;  %v7370_v37 = vld [vmem:[%s12370_s7 + $0xad8] sm:$0xff] }
 0x5c5   :  { %7322 = vmatprep.subr.msk.mxu1 %vm509_vm5, %v7321_v45  ;;  %v8866_v45 = vpack.c.bf16 %v7370_v37, %v7368_v36  ;;  %v7413_v36 = vld [vmem:[%s12370_s7 + $0xbe8] sm:$0xff]  ;;  %v7410_v37 = vld [vmem:[%s12370_s7 + $0xbd0] sm:$0xff] }
 0x5c6   :  { %v8894_v47 = vpack.c.bf16 %v7413_v36, %v7411_v5  ;;  %v7445_v5 = vld [vmem:[%s12370_s7 + $0xcb8] sm:$0xff]  ;;  %v7447_v36 = vld [vmem:[%s12370_s7 + $0xcc8] sm:$0xff] }
 0x5c8   :  { %7323 = vmatpush1.msk.msra.mxu1 %vm509_vm5, %v7320_v17  ;;  %v7376_v17 = vld [vmem:[%s12370_s7 + $0xaf0] sm:$0xff] }
 0x5c9   :  { %7324 = vmatmul.mubr.msk.f32.vlgmr.msra.gmra.mrb[72].mxu1 %vm3218_vm10, %v5235_v55  ;;  %8835 = vmatprep.subr.bf16.mxu1 %v8834_v60  ;;  %v7378_v60 = vld [vmem:[%s12370_s7 + $0xb00] sm:$0xff]  ;;  %v7383_v55 = vld [vmem:[%s12370_s7 + $0xb28] sm:$0xff] }
 0x5ca   :  { %8837 = vmatpush1.bf16.msra.mxu1 %v8836_v3  ;;  %5405 = vmatprep.mubr.f32.mxu1 %v9096_v0  ;;  %v7381_v3 = vld [vmem:[%s12370_s7 + $0xb18] sm:$0xff]  ;;  %v8872_v63 = vpack.c.bf16 %v7378_v60, %v7376_v17  ;;  %v5720_v17 = vrot.slane %v11820_v6, 4 }
 0x5cb   :  { %8839 = vmatprep.subr.bf16.mxu1 %v8838_v21  ;;  %v7371_v21 = vld [vmem:[%s12370_s7 + $0xae0] sm:$0x3]  ;;  %v8874_v7 = vpack.c.bf16 %v7383_v55, %v7381_v3  ;;  %v7414_v3 = vld [vmem:[%s12370_s7 + $0xbf0] sm:$0xff] }
 0x5cc   :  { %v7416_v55 = vld [vmem:[%s12370_s7 + $0xc00] sm:$0xff] }
 0x5ce   :  { %8841 = vmatpush1.bf16.msra.mxu1 %v8840_v8  ;;  %v7380_v8 = vld [vmem:[%s12370_s7 + $0xb10] sm:$0xff] }
 0x5cf   :  { %8843 = vmatprep.subr.bf16.mxu1 %v8842_v34  ;;  %v7382_v34 = vld [vmem:[%s12370_s7 + $0xb20] sm:$0xff] }
 0x5d0   :  { %v8876_v29 = vpack.c.bf16 %v7382_v34, %v7380_v8  ;;  %v6603_v8 = vld [vmem:[%s12372_s9 + $0x48] sm:$0xff]  ;;  %v8900_v34 = vpack.c.bf16 %v7416_v55, %v7414_v3  ;;  %v7453_v3 = vld [vmem:[%s12370_s7 + $0xcf8] sm:$0xff] }
 0x5d2   :  { %8845 = vmatpush1.bf16.msra.mxu1 %v8844_v20  ;;  %v8878_v20 = vpack.c.bf16 %v7387_v31, %v7385_v16  ;;  %v7418_v31 = vld [vmem:[%s12370_s7 + $0xc10] sm:$0xff] }
 0x5d3   :  { %7339 = vmatprep.subr.msk.mxu1 %vm509_vm5, %v7338_v24  ;;  %v7384_v24 = vld [vmem:[%s12370_s7 + $0xb30] sm:$0xff] }
 0x5d4   :  { %v8880_v52 = vpack.c.bf16 %v7386_v23, %v7384_v24  ;;  %v6604_v24 = vld [vmem:[%s12372_s9 + $0x50] sm:$0xff]  ;;  %v6605_v23 = vld [vmem:[%s12372_s9 + $0x58] sm:$0xff] }
 0x5d6   :  { %7340 = vmatpush1.msk.msra.mxu1 %vm509_vm5, %v7337_v57  ;;  %v7395_v57 = vld [vmem:[%s12370_s7 + $0xb70] sm:$0xff] }
 0x5d7   :  { %7341 = vmatmul.mubr.msk.f32.vlgmr.msra.gmra.mrb[72].mxu1 %vm3218_vm10, %v5332_v26  ;;  %8847 = vmatprep.subr.bf16.mxu1 %v8846_v4  ;;  %v7398_v4 = vld [vmem:[%s12370_s7 + $0xb88] sm:$0xff]  ;;  %v7388_v26 = vld [vmem:[%s12370_s7 + $0xb50] sm:$0x3]  ;;  %v8884_v56 = vpack.c.bf16 %v7395_v57, %v7393_v41  ;;  %v7430_v41 = vld [vmem:[%s12370_s7 + $0xc58] sm:$0xff] }
 0x5d8   :  { %8849 = vmatpush1.bf16.msra.mxu1 %v8848_v43  ;;  %5502 = vmatprep.mubr.f32.mxu1 %v9096_v0  ;;  %v7400_v43 = vld [vmem:[%s12370_s7 + $0xb98] sm:$0xff]  ;;  %v7427_v57 = vld [vmem:[%s12370_s7 + $0xc40] sm:$0xff] }
 0x5d9   :  { %8851 = vmatprep.subr.bf16.mxu1 %v8850_v38  ;;  %v8882_v38 = vpack.c.bf16 %v7396_v18, %v7394_v32  ;;  %v8886_v62 = vpack.c.bf16 %v7400_v43, %v7398_v4  ;;  %v7423_v32 = vld [vmem:[%s12370_s7 + $0xc38] sm:$0x3]  ;;  %v7428_v18 = vld [vmem:[%s12370_s7 + $0xc48] sm:$0xff]  ;;  %v7429_v4 = vld [vmem:[%s12370_s7 + $0xc50] sm:$0xff] }
 0x5da   :  { %v7432_v43 = vld [vmem:[%s12370_s7 + $0xc68] sm:$0xff] }
 0x5dc   :  { %8853 = vmatpush1.bf16.msra.mxu1 %v8852_v15  ;;  %v7399_v15 = vld [vmem:[%s12370_s7 + $0xb90] sm:$0xff] }
 0x5dd   :  { %8855 = vmatprep.subr.bf16.mxu1 %v8854_v58  ;;  %v7402_v58 = vld [vmem:[%s12370_s7 + $0xba8] sm:$0xff]  ;;  %v8888_v11 = vpack.c.bf16 %v7399_v15, %v7397_v2  ;;  %v7422_v2 = vld [vmem:[%s12370_s7 + $0xc30] sm:$0x3]  ;;  %v5817_v15 = vrot.slane %v11820_v6, 6 }
 0x5de   :  { %v8890_v19 = vpack.c.bf16 %v7404_v10, %v7402_v58  ;;  %v7431_v10 = vld [vmem:[%s12370_s7 + $0xc60] sm:$0xff] }
 0x5e0   :  { %8857 = vmatpush1.bf16.msra.mxu1 %v8856_v14  ;;  %v6595_v14 = vld [vmem:[%s12372_s9 + $0x8] sm:$0xff] }
 0x5e1   :  { %7356 = vmatprep.subr.msk.mxu1 %vm509_vm5, %v7355_v13  ;;  %v6596_v13 = vld [vmem:[%s12372_s9 + $0x10] sm:$0xff]  ;;  %v8991_v39 = vpack.c.bf16 %v6595_v14, %v6594_v54  ;;  %v7436_v14 = vld [vmem:[%s12370_s7 + $0xc88] sm:$0xff] }
 0x5e2   :  { %v7433_v54 = vld [vmem:[%s12370_s7 + $0xc70] sm:$0xff] }
 0x5e3   :  { %8992 = vmatpush1.bf16.msra.mxu0 %v8991_v39  ;;  %v6608_v39 = vld [vmem:[%s12372_s9 + $0x70] sm:$0xff] }
 0x5e4   :  { %7357 = vmatpush1.msk.msra.mxu1 %vm509_vm5, %v7354_v27  ;;  %v8994_v27 = vpack.c.bf16 %v6597_v49, %v6596_v13  ;;  %8993 = vmatprep.subr.bf16.mxu0 %v9098_v42  ;;  %v6609_v49 = vld [vmem:[%s12372_s9 + $0x78] sm:$0xff] }
 0x5e5   :  { %7358 = vmatmul.mubr.msk.f32.vlgmr.msra.gmra.mrb[72].mxu1 %vm3218_vm10, %v5429_v59  ;;  %8859 = vmatprep.subr.bf16.mxu1 %v8858_v30  ;;  %v6598_v30 = vld [vmem:[%s12372_s9 + $0x20] sm:$0xff]  ;;  %v8892_v59 = vpack.c.bf16 %v7403_v9, %v7401_v22  ;;  %v7437_v9 = vld [vmem:[%s12370_s7 + $0xc90] sm:$0xff] }
 0x5e6   :  { %8861 = vmatpush1.bf16.msra.mxu1 %v8860_v1  ;;  %5599 = vmatprep.mubr.f32.mxu1 %v9096_v0  ;;  %v6599_v1 = vld [vmem:[%s12372_s9 + $0x28] sm:$0xff]  ;;  %v7435_v22 = vld [vmem:[%s12370_s7 + $0xc80] sm:$0xff] }
 0x5e7   :  { %8863 = vmatprep.subr.bf16.mxu1 %v8862_v28  ;;  %8995 = vmatpush1.bf16.msra.mxu0 %v8994_v27  ;;  %v8997_v28 = vpack.c.bf16 %v6599_v1, %v6598_v30  ;;  %v9012_v27 = vpack.c.bf16 %v6609_v49, %v6608_v39  ;;  %v6610_v30 = vld [vmem:[%s12372_s9 + $0x80] sm:$0xff]  ;;  %v6611_v1 = vld [vmem:[%s12372_s9 + $0x88] sm:$0xff] }
 0x5e8   :  { %8996 = vmatprep.subr.bf16.mxu0 %v9098_v42 }
 0x5ea   :  { %8865 = vmatpush1.bf16.msra.mxu1 %v8864_v40  ;;  %v7412_v40 = vld [vmem:[%s12370_s7 + $0xbe0] sm:$0xff] }
 0x5eb   :  { %8867 = vmatprep.subr.bf16.mxu1 %v8866_v45  ;;  %v7415_v45 = vld [vmem:[%s12370_s7 + $0xbf8] sm:$0xff]  ;;  %8998 = vmatpush1.bf16.msra.mxu0 %v8997_v28  ;;  %v8896_v51 = vpack.c.bf16 %v7412_v40, %v7410_v37  ;;  %v9015_v28 = vpack.c.bf16 %v6611_v1, %v6610_v30  ;;  %v7444_v37 = vld [vmem:[%s12370_s7 + $0xcb0] sm:$0xff]  ;;  %v7446_v40 = vld [vmem:[%s12370_s7 + $0xcc0] sm:$0xff] }
 0x5ec   :  { %8999 = vmatprep.subr.bf16.mxu0 %v9098_v42  ;;  %v8898_v60 = vpack.c.bf16 %v7417_v46, %v7415_v45  ;;  %v7449_v45 = vld [vmem:[%s12370_s7 + $0xcd8] sm:$0xff]  ;;  %v7451_v46 = vld [vmem:[%s12370_s7 + $0xce8] sm:$0xff] }
 0x5ed   :  { %v7489_v30 = vld [vmem:[%s12370_s7 + $0xde8] sm:$0xff] }
 0x5ee   :  { %8869 = vmatpush1.bf16.msra.mxu1 %v8868_v50  ;;  %v6601_v50 = vld [vmem:[%s12372_s9 + $0x38] sm:$0xff] }
 0x5ef   :  { %7373 = vmatprep.subr.msk.mxu1 %vm509_vm5, %v7372_v44  ;;  %v7405_v44 = vld [vmem:[%s12370_s7 + $0xbc0] sm:$0x3] }
 0x5f2   :  { %7374 = vmatpush1.msk.msra.mxu1 %vm509_vm5, %v7371_v21  ;;  %v7419_v21 = vld [vmem:[%s12370_s7 + $0xc18] sm:$0xff] }
 0x5f3   :  { %7375 = vmatmul.mubr.msk.f32.vlgmr.msra.gmra.mrb[72].mxu1 %vm3218_vm10, %v11820_v6  ;;  %8871 = vmatprep.subr.bf16.mxu1 %v8870_v48  ;;  %v9000_v48 = vpack.c.bf16 %v6601_v50, %v6600_v35  ;;  %v7438_v6 = vld [vmem:[%s12370_s7 + $0xc98] sm:$0xff]  ;;  %v7439_v35 = vld [vmem:[%s12370_s7 + $0xca0] sm:$0x3]  ;;  %v8918_v50 = vpack.c.bf16 %v7447_v36, %v7445_v5 }
 0x5f4   :  { %8873 = vmatpush1.bf16.msra.mxu1 %v8872_v63  ;;  %5696 = vmatprep.mubr.f32.mxu1 %v9096_v0  ;;  %v7421_v63 = vld [vmem:[%s12370_s7 + $0xc28] sm:$0xff]  ;;  %v7491_v36 = vld [vmem:[%s12370_s7 + $0xdf8] sm:$0x3] }
 0x5f5   :  { %8875 = vmatprep.subr.bf16.mxu1 %v8874_v7  ;;  %v6602_v7 = vld [vmem:[%s12372_s9 + $0x40] sm:$0xff]  ;;  %v8902_v16 = vpack.c.bf16 %v7421_v63, %v7419_v21  ;;  %9001 = vmatpush1.bf16.msra.mxu0 %v9000_v48  ;;  %v7452_v48 = vld [vmem:[%s12370_s7 + $0xcf0] sm:$0xff] }
 0x5f6   :  { %9002 = vmatprep.subr.bf16.mxu0 %v9098_v42  ;;  %v7454_v63 = vld [vmem:[%s12370_s7 + $0xd00] sm:$0xff] }
 0x5f8   :  { %8877 = vmatpush1.bf16.msra.mxu1 %v8876_v29  ;;  %v7420_v29 = vld [vmem:[%s12370_s7 + $0xc20] sm:$0xff] }
 0x5f9   :  { %8879 = vmatprep.subr.bf16.mxu1 %v8878_v20  ;;  %v9003_v20 = vpack.c.bf16 %v6603_v8, %v6602_v7  ;;  %v8928_v7 = vpack.c.bf16 %v7454_v63, %v7452_v48  ;;  %v7457_v8 = vld [vmem:[%s12370_s7 + $0xd18] sm:$0x3] }
 0x5fa   :  { %v7506_v48 = vld [vmem:[%s12370_s7 + $0xe58] sm:$0xff] }
 0x5fb   :  { %9004 = vmatpush1.bf16.msra.mxu0 %v9003_v20  ;;  %v7466_v20 = vld [vmem:[%s12370_s7 + $0xd48] sm:$0xff] }
 0x5fc   :  { %8881 = vmatpush1.bf16.msra.mxu1 %v8880_v52  ;;  %v8904_v52 = vpack.c.bf16 %v7420_v29, %v7418_v31  ;;  %9005 = vmatprep.subr.bf16.mxu0 %v9098_v42  ;;  %v7461_v31 = vld [vmem:[%s12370_s7 + $0xd20] sm:$0xff]  ;;  %v7463_v29 = vld [vmem:[%s12370_s7 + $0xd30] sm:$0xff] }
 0x5fd   :  { %7390 = vmatprep.subr.msk.mxu1 %vm509_vm5, %v7389_v53  ;;  %v9006_v53 = vpack.c.bf16 %v6605_v23, %v6604_v24  ;;  %v7468_v24 = vld [vmem:[%s12370_s7 + $0xd58] sm:$0xff]  ;;  %v7456_v23 = vld [vmem:[%s12370_s7 + $0xd10] sm:$0x3] }
 0x5ff   :  { %9007 = vmatpush1.bf16.msra.mxu0 %v9006_v53  ;;  %v8932_v53 = vpack.c.bf16 %v7463_v29, %v7461_v31  ;;  %v7513_v31 = vld [vmem:[%s12370_s7 + $0xe78] sm:$0xff]  ;;  %v7515_v29 = vld [vmem:[%s12370_s7 + $0xe88] sm:$0xff] }
 0x600   :  { %7391 = vmatpush1.msk.msra.mxu1 %vm509_vm5, %v7388_v26  ;;  %v7434_v26 = vld [vmem:[%s12370_s7 + $0xc78] sm:$0xff]  ;;  %9008 = vmatprep.subr.bf16.mxu0 %v9098_v42 }
 0x601   :  { %7392 = vmatmul.mubr.msk.f32.vlgmr.msra.gmra.mrb[72].mxu1 %vm3218_vm10, %v5623_v25  ;;  %8883 = vmatprep.subr.bf16.mxu1 %v8882_v38  ;;  %v6606_v38 = vld [vmem:[%s12372_s9 + $0x60] sm:$0xff]  ;;  %v8906_v25 = vpack.c.bf16 %v7430_v41, %v7428_v18  ;;  %v8910_v58 = vpack.c.bf16 %v7434_v26, %v7432_v43  ;;  %v8934_v18 = vpack.c.bf16 %v7468_v24, %v7466_v20  ;;  %v7472_v43 = vld [vmem:[%s12370_s7 + $0xd78] sm:$0xff]  ;;  %v7512_v20 = vld [vmem:[%s12370_s7 + $0xe70] sm:$0xff] }
 0x602   :  { %8885 = vmatpush1.bf16.msra.mxu1 %v8884_v56  ;;  %5793 = vmatprep.mubr.f32.mxu1 %v9096_v0  ;;  %v6607_v56 = vld [vmem:[%s12372_s9 + $0x68] sm:$0xff]  ;;  %v7465_v41 = vld [vmem:[%s12370_s7 + $0xd40] sm:$0xff] }
 0x603   :  { %8887 = vmatprep.subr.bf16.mxu1 %v8886_v62  ;;  %v8908_v62 = vpack.c.bf16 %v7429_v4, %v7427_v57  ;;  %v9009_v13 = vpack.c.bf16 %v6607_v56, %v6606_v38  ;;  %v7467_v57 = vld [vmem:[%s12370_s7 + $0xd50] sm:$0xff]  ;;  %v7470_v4 = vld [vmem:[%s12370_s7 + $0xd68] sm:$0xff]  ;;  %v7469_v56 = vld [vmem:[%s12370_s7 + $0xd60] sm:$0xff] }
 0x604   :  { %v8936_v26 = vpack.c.bf16 %v7467_v57, %v7465_v41  ;;  %v8938_v38 = vpack.c.bf16 %v7472_v43, %v7470_v4  ;;  %v7514_v24 = vld [vmem:[%s12370_s7 + $0xe80] sm:$0xff]  ;;  %v3186_v41 = vmax.f32 %v10768_v12, 0.0  ;;  %v7516_v4 = vld [vmem:[%s12370_s7 + $0xe90] sm:$0xff] }
 0x605   :  { %9010 = vmatpush1.bf16.msra.mxu0 %v9009_v13  ;;  %v7485_v13 = vld [vmem:[%s12370_s7 + $0xdc8] sm:$0xff]  ;;  %v7518_v43 = vld [vmem:[%s12370_s7 + $0xea0] sm:$0xff] }
 0x606   :  { %8889 = vmatpush1.bf16.msra.mxu1 %v8888_v11  ;;  %v8912_v11 = vpack.c.bf16 %v7433_v54, %v7431_v10  ;;  %9011 = vmatprep.subr.bf16.mxu0 %v9098_v42  ;;  %v7478_v10 = vld [vmem:[%s12370_s7 + $0xd90] sm:$0xff]  ;;  %v7480_v54 = vld [vmem:[%s12370_s7 + $0xda0] sm:$0xff]  ;;  %v8972_v12 = vpack.c.bf16 %v7518_v43, %v7516_v4 }
 0x607   :  { %8891 = vmatprep.subr.bf16.mxu1 %v8890_v19  ;;  %v8914_v19 = vpack.c.bf16 %v7438_v6, %v7436_v14  ;;  %v7483_v14 = vld [vmem:[%s12370_s7 + $0xdb8] sm:$0xff]  ;;  %v7473_v6 = vld [vmem:[%s12370_s7 + $0xd80] sm:$0x3]  ;;  %v8944_v49 = vpack.c.bf16 %v7480_v54, %v7478_v10 }
 0x608   :  { %v7532_v10 = vld [vmem:[%s12370_s7 + $0xef8] sm:$0xff]  ;;  %v7529_v54 = vld [vmem:[%s12370_s7 + $0xee0] sm:$0xff] }
 0x609   :  { %9013 = vmatpush1.bf16.msra.mxu0 %v9012_v27  ;;  %v7487_v27 = vld [vmem:[%s12370_s7 + $0xdd8] sm:$0xff] }
 0x60a   :  { %8893 = vmatpush1.bf16.msra.mxu1 %v8892_v59  ;;  %v8916_v59 = vpack.c.bf16 %v7437_v9, %v7435_v22  ;;  %9014 = vmatprep.subr.bf16.mxu0 %v9098_v42  ;;  %v7482_v22 = vld [vmem:[%s12370_s7 + $0xdb0] sm:$0xff]  ;;  %v7484_v9 = vld [vmem:[%s12370_s7 + $0xdc0] sm:$0xff] }
 0x60b   :  { %7407 = vmatprep.subr.msk.mxu1 %vm509_vm5, %v7406_v61  ;;  %v7440_v61 = vld [vmem:[%s12370_s7 + $0xca8] sm:$0x3]  ;;  %v8948_v1 = vpack.c.bf16 %v7484_v9, %v7482_v22  ;;  %v7533_v9 = vld [vmem:[%s12370_s7 + $0xf00] sm:$0xff] }
 0x60d   :  { %9016 = vmatpush1.bf16.msra.mxu0 %v9015_v28  ;;  %v7486_v28 = vld [vmem:[%s12370_s7 + $0xdd0] sm:$0xff] }
 0x60e   :  { %7408 = vmatpush1.msk.msra.mxu1 %vm509_vm5, %v7405_v44  ;;  %v8920_v44 = vpack.c.bf16 %v7446_v40, %v7444_v37  ;;  %9017 = vmatprep.subr.bf16.mxu0 %v9098_v42  ;;  %v7496_v37 = vld [vmem:[%s12370_s7 + $0xe08] sm:$0xff]  ;;  %v7498_v40 = vld [vmem:[%s12370_s7 + $0xe18] sm:$0xff] }
 0x60f   :  { %7409 = vmatmul.mubr.msk.f32.vlgmr.msra.gmra.mrb[72].mxu1 %vm3218_vm10, %v5720_v17  ;;  %8895 = vmatprep.subr.bf16.mxu1 %v8894_v47  ;;  %v12074_v47 = vmax.f32 %v10747_v33, 0.0  ;;  %v7448_v17 = vld [vmem:[%s12370_s7 + $0xcd0] sm:$0xff]  ;;  %v7455_v33 = vld [vmem:[%s12370_s7 + $0xd08] sm:$0xff] }
 0x610   :  { %8897 = vmatpush1.bf16.msra.mxu1 %v8896_v51  ;;  %5890 = vmatprep.mubr.f32.mxu1 %v9096_v0  ;;  %v8922_v51 = vpack.c.bf16 %v7451_v46, %v7449_v45  ;;  %v8926_v21 = vpack.c.bf16 %v7455_v33, %v7453_v3  ;;  %v7495_v45 = vld [vmem:[%s12370_s7 + $0xe00] sm:$0xff]  ;;  %v7497_v46 = vld [vmem:[%s12370_s7 + $0xe10] sm:$0xff] }
 0x611   :  { %8899 = vmatprep.subr.bf16.mxu1 %v8898_v60  ;;  %v7450_v60 = vld [vmem:[%s12370_s7 + $0xce0] sm:$0xff] }
 0x612   :  { %v8924_v55 = vpack.c.bf16 %v7450_v60, %v7448_v17  ;;  %v8956_v17 = vpack.c.bf16 %v7497_v46, %v7495_v45  ;;  %v6205_v60 = vrot.slane %v12074_v47, 6  ;;  %v7499_v33 = vld [vmem:[%s12370_s7 + $0xe20] sm:$0xff]  ;;  %v6612_v45 = vld [vmem:[%s12372_s9 + $0x90] sm:$0xff]  ;;  %v6613_v46 = vld [vmem:[%s12372_s9 + $0x98] sm:$0xff] }
 0x614   :  { %8901 = vmatpush1.bf16.msra.mxu1 %v8900_v34  ;;  %v7462_v34 = vld [vmem:[%s12370_s7 + $0xd28] sm:$0xff] }
 0x615   :  { %8903 = vmatprep.subr.bf16.mxu1 %v8902_v16  ;;  %v7464_v16 = vld [vmem:[%s12370_s7 + $0xd38] sm:$0xff] }
 0x618   :  { %8905 = vmatpush1.bf16.msra.mxu1 %v8904_v52  ;;  %v8930_v52 = vpack.c.bf16 %v7464_v16, %v7462_v34  ;;  %v7508_v16 = vld [vmem:[%s12370_s7 + $0xe68] sm:$0x3] }
 0x619   :  { %7424 = vmatprep.subr.msk.mxu1 %vm509_vm5, %v7423_v32  ;;  %v6011_v32 = vrot.slane %v12074_v47, 2 }
 0x61c   :  { %7425 = vmatpush1.msk.msra.mxu1 %vm509_vm5, %v7422_v2  ;;  %v7471_v2 = vld [vmem:[%s12370_s7 + $0xd70] sm:$0xff] }
 0x61d   :  { %7426 = vmatmul.mubr.msk.f32.vlgmr.msra.gmra.mrb[72].mxu1 %vm3218_vm10, %v5817_v15  ;;  %8907 = vmatprep.subr.bf16.mxu1 %v8906_v25  ;;  %v8940_v25 = vpack.c.bf16 %v7471_v2, %v7469_v56  ;;  %v7479_v15 = vld [vmem:[%s12370_s7 + $0xd98] sm:$0xff]  ;;  %v7520_v2 = vld [vmem:[%s12370_s7 + $0xeb0] sm:$0xff] }
 0x61e   :  { %8909 = vmatpush1.bf16.msra.mxu1 %v8908_v62  ;;  %5987 = vmatprep.mubr.f32.mxu1 %v9096_v0  ;;  %v7474_v62 = vld [vmem:[%s12370_s7 + $0xd88] sm:$0x3] }
 0x61f   :  { %8911 = vmatprep.subr.bf16.mxu1 %v8910_v58  ;;  %v7481_v58 = vld [vmem:[%s12370_s7 + $0xda8] sm:$0xff] }
 0x620   :  { %v8942_v39 = vpack.c.bf16 %v7481_v58, %v7479_v15  ;;  %v7525_v15 = vld [vmem:[%s12370_s7 + $0xed8] sm:$0x3]  ;;  %v7530_v58 = vld [vmem:[%s12370_s7 + $0xee8] sm:$0xff] }
 0x622   :  { %8913 = vmatpush1.bf16.msra.mxu1 %v8912_v11  ;;  %v6108_v11 = vrot.slane %v12074_v47, 4 }
 0x623   :  { %8915 = vmatprep.subr.bf16.mxu1 %v8914_v19  ;;  %v8946_v19 = vpack.c.bf16 %v7485_v13, %v7483_v14  ;;  %v7531_v14 = vld [vmem:[%s12370_s7 + $0xef0] sm:$0xff]  ;;  %v7534_v13 = vld [vmem:[%s12370_s7 + $0xf08] sm:$0xff] }
 0x626   :  { %8917 = vmatpush1.bf16.msra.mxu1 %v8916_v59  ;;  %v8950_v59 = vpack.c.bf16 %v7489_v30, %v7487_v27  ;;  %v7535_v27 = vld [vmem:[%s12370_s7 + $0xf10] sm:$0xff]  ;;  %v7538_v30 = vld [vmem:[%s12370_s7 + $0xf28] sm:$0xff] }
 0x627   :  { %7441 = vmatprep.subr.msk.mxu1 %vm509_vm5, %v7440_v61  ;;  %v7488_v61 = vld [vmem:[%s12370_s7 + $0xde0] sm:$0xff] }
 0x628   :  { %v8952_v5 = vpack.c.bf16 %v7488_v61, %v7486_v28  ;;  %v7537_v61 = vld [vmem:[%s12370_s7 + $0xf20] sm:$0xff] }
 0x62a   :  { %7442 = vmatpush1.msk.msra.mxu1 %vm509_vm5, %v7439_v35  ;;  %v7500_v35 = vld [vmem:[%s12370_s7 + $0xe28] sm:$0xff] }
 0x62b   :  { %7443 = vmatmul.mubr.msk.f32.vlgmr.msra.gmra.mrb[72].mxu1 %vm3218_vm10, %v12074_v47  ;;  %8919 = vmatprep.subr.bf16.mxu1 %v8918_v50  ;;  %v7502_v50 = vld [vmem:[%s12370_s7 + $0xe38] sm:$0xff] }
 0x62c   :  { %8921 = vmatpush1.bf16.msra.mxu1 %v8920_v44  ;;  %6084 = vmatprep.mubr.f32.mxu1 %v9096_v0  ;;  %v7490_v44 = vld [vmem:[%s12370_s7 + $0xdf0] sm:$0x3]  ;;  %v8958_v3 = vpack.c.bf16 %v7502_v50, %v7500_v35  ;;  %v9018_v35 = vpack.c.bf16 %v6613_v46, %v6612_v45  ;;  %v6614_v50 = vld [vmem:[%s12372_s9 + $0xa0] sm:$0xff] }
 0x62d   :  { %8923 = vmatprep.subr.bf16.mxu1 %v8922_v51  ;;  %v8954_v51 = vpack.c.bf16 %v7498_v40, %v7496_v37  ;;  %v7542_v37 = vld [vmem:[%s12370_s7 + $0xf48] sm:$0x3]  ;;  %v6496_v40 = vrot.slane %v3186_v41, 4 }
 0x62e   :  { %9019 = vmatpush1.bf16.msra.mxu0 %v9018_v35 }
 0x62f   :  { %9020 = vmatprep.subr.bf16.mxu0 %v9098_v42 }
 0x630   :  { %8925 = vmatpush1.bf16.msra.mxu1 %v8924_v55  ;;  %v7501_v55 = vld [vmem:[%s12370_s7 + $0xe30] sm:$0xff] }
 0x631   :  { %8927 = vmatprep.subr.bf16.mxu1 %v8926_v21  ;;  %v7504_v21 = vld [vmem:[%s12370_s7 + $0xe48] sm:$0xff]  ;;  %v8960_v47 = vpack.c.bf16 %v7501_v55, %v7499_v33  ;;  %v6578_v33 = vld [vmem:[%s12374_s8] sm:$0x3] }
 0x632   :  { %v8962_v63 = vpack.c.bf16 %v7506_v48, %v7504_v21 }
 0x634   :  { %8929 = vmatpush1.bf16.msra.mxu1 %v8928_v7  ;;  %v7503_v7 = vld [vmem:[%s12370_s7 + $0xe40] sm:$0xff] }
 0x635   :  { %7458 = vmatprep.subr.msk.mxu1 %vm509_vm5, %v7457_v8  ;;  %v7505_v8 = vld [vmem:[%s12370_s7 + $0xe50] sm:$0xff] }
 0x636   :  { %v8964_v34 = vpack.c.bf16 %v7505_v8, %v7503_v7 }
 0x638   :  { %7459 = vmatpush1.msk.msra.mxu1 %vm509_vm5, %v7456_v23  ;;  %v7517_v23 = vld [vmem:[%s12370_s7 + $0xe98] sm:$0xff] }
 0x639   :  { %7460 = vmatmul.mubr.msk.f32.vlgmr.msra.gmra.mrb[72].mxu1 %vm3218_vm10, %v6011_v32  ;;  %8931 = vmatprep.subr.bf16.mxu1 %v8930_v52  ;;  %v7519_v52 = vld [vmem:[%s12370_s7 + $0xea8] sm:$0xff]  ;;  %v8966_v32 = vpack.c.bf16 %v7515_v29, %v7513_v31 }
 0x63a   :  { %8933 = vmatpush1.bf16.msra.mxu1 %v8932_v53  ;;  %6181 = vmatprep.mubr.f32.mxu1 %v9096_v0  ;;  %v7507_v53 = vld [vmem:[%s12370_s7 + $0xe60] sm:$0x3]  ;;  %v8970_v57 = vpack.c.bf16 %v7519_v52, %v7517_v23 }
 0x63b   :  { %8935 = vmatprep.subr.bf16.mxu1 %v8934_v18  ;;  %v8968_v18 = vpack.c.bf16 %v7514_v24, %v7512_v20 }
 0x63e   :  { %8937 = vmatpush1.bf16.msra.mxu1 %v8936_v26  ;;  %v7521_v26 = vld [vmem:[%s12370_s7 + $0xeb8] sm:$0xff] }
 0x63f   :  { %8939 = vmatprep.subr.bf16.mxu1 %v8938_v38  ;;  %v7523_v38 = vld [vmem:[%s12370_s7 + $0xec8] sm:$0xff] }
 0x640   :  { %v8974_v56 = vpack.c.bf16 %v7523_v38, %v7521_v26 }
 0x642   :  { %8941 = vmatpush1.bf16.msra.mxu1 %v8940_v25  ;;  %v7522_v25 = vld [vmem:[%s12370_s7 + $0xec0] sm:$0xff] }
 0x643   :  { %7475 = vmatprep.subr.msk.mxu1 %vm509_vm5, %v7474_v62  ;;  %v8976_v62 = vpack.c.bf16 %v7522_v25, %v7520_v2 }
 0x646   :  { %7476 = vmatpush1.msk.msra.mxu1 %vm509_vm5, %v7473_v6  ;;  %v7536_v6 = vld [vmem:[%s12370_s7 + $0xf18] sm:$0xff] }
 0x647   :  { %7477 = vmatmul.mubr.msk.f32.vlgmr.msra.gmra.mrb[72].mxu1 %vm3218_vm10, %v6108_v11  ;;  %8943 = vmatprep.subr.bf16.mxu1 %v8942_v39  ;;  %v7524_v39 = vld [vmem:[%s12370_s7 + $0xed0] sm:$0x3]  ;;  %v8980_v11 = vpack.c.bf16 %v7531_v14, %v7529_v54  ;;  %v8982_v22 = vpack.c.bf16 %v7536_v6, %v7534_v13 }
 0x648   :  { %8945 = vmatpush1.bf16.msra.mxu1 %v8944_v49  ;;  %6278 = vmatprep.mubr.f32.mxu1 %v9096_v0  ;;  %v8978_v49 = vpack.c.bf16 %v7532_v10, %v7530_v58 }
 0x649   :  { %8947 = vmatprep.subr.bf16.mxu1 %v8946_v19  ;;  %v6399_v19 = vrot.slane %v3186_v41, 2 }
 0x64c   :  { %8949 = vmatpush1.bf16.msra.mxu1 %v8948_v1  ;;  %v7540_v1 = vld [vmem:[%s12370_s7 + $0xf38] sm:$0xff] }
 0x64d   :  { %8951 = vmatprep.subr.bf16.mxu1 %v8950_v59  ;;  %v8984_v59 = vpack.c.bf16 %v7535_v27, %v7533_v9  ;;  %v8986_v28 = vpack.c.bf16 %v7540_v1, %v7538_v30 }
 0x650   :  { %8953 = vmatpush1.bf16.msra.mxu1 %v8952_v5  ;;  %v7539_v5 = vld [vmem:[%s12370_s7 + $0xf30] sm:$0xff] }
 0x651   :  { %7492 = vmatprep.subr.msk.mxu1 %vm509_vm5, %v7491_v36  ;;  %v8988_v36 = vpack.c.bf16 %v7539_v5, %v7537_v61 }
 0x654   :  { %7493 = vmatpush1.msk.msra.mxu1 %vm509_vm5, %v7490_v44  ;;  %v6615_v44 = vld [vmem:[%s12372_s9 + $0xa8] sm:$0x7f] }
 0x655   :  { %7494 = vmatmul.mubr.msk.f32.vlgmr.msra.gmra.mrb[72].mxu1 %vm3218_vm10, %v6205_v60  ;;  %8955 = vmatprep.subr.bf16.mxu1 %v8954_v51  ;;  %v9021_v51 = vpack.c.bf16 %v6615_v44, %v6614_v50  ;;  %v6580_v60 = vlaneseq }
 0x656   :  { %8957 = vmatpush1.bf16.msra.mxu1 %v8956_v17  ;;  %6375 = vmatprep.mubr.f32.mxu1 %v9096_v0  ;;  %v16_v17 = vstv %s12373_s10 }
 0x657   :  { %8959 = vmatprep.subr.bf16.mxu1 %v8958_v3  ;;  %9023 = vmatpush1.bf16.msk.msra.mxu0 %vm9022_vm12, %v9021_v51  ;;  %17 = vst [vmem:[#allocation2] sm:$0x1] %v16_v17  ;;  %v6581_v42 = vshrl.u32 %v6580_v60, 7 }
 0x659   :  { %v6582_v3 = vsub.s32 0, %v6581_v42  ;;  %v6586_v55 = vsub.s32 1, %v6581_v42 }
 0x65a   :  { %8961 = vmatpush1.bf16.msra.mxu1 %v8960_v47 }
 0x65b   :  { %8963 = vmatprep.subr.bf16.mxu1 %v8962_v63  ;;  %v6583_v21 = vrot.slane %v6578_v33, %v6582_v3  ;;  %v6587_v48 = vrot.slane %v6578_v33, %v6586_v55 }
 0x65e   :  { %8965 = vmatpush1.bf16.msra.mxu1 %v8964_v34  ;;  %v7546_v31 = vld [vmem:[#allocation2] ss:$0 sm:$0xff] }
 0x65f   :  { %7509 = vmatprep.subr.msk.mxu1 %vm509_vm5, %v7508_v16 }
 0x662   :  { %7510 = vmatpush1.msk.msra.mxu1 %vm509_vm5, %v7507_v53 }
 0x663   :  { %7511 = vmatmul.mubr.msk.f32.vlgmr.msra.gmra.mrb[72].mxu1 %vm3218_vm10, %v3186_v41  ;;  %8967 = vmatprep.subr.bf16.mxu1 %v8966_v32 }
 0x664   :  { %8969 = vmatpush1.bf16.msra.mxu1 %v8968_v18  ;;  %6472 = vmatprep.mubr.f32.mxu1 %v9096_v0 }
 0x665   :  { %8971 = vmatprep.subr.bf16.mxu1 %v8970_v57 }
 0x668   :  { %8973 = vmatpush1.bf16.msra.mxu1 %v8972_v12 }
 0x669   :  { %8975 = vmatprep.subr.bf16.mxu1 %v8974_v56 }
 0x66c   :  { %8977 = vmatpush1.bf16.msra.mxu1 %v8976_v62 }
 0x66d   :  { %7526 = vmatprep.subr.msk.mxu1 %vm509_vm5, %v7525_v15 }
 0x670   :  { %7527 = vmatpush1.msk.msra.mxu1 %vm509_vm5, %v7524_v39 }
 0x671   :  { %7528 = vmatmul.mubr.msk.f32.vlgmr.msra.gmra.mrb[72].mxu1 %vm3218_vm10, %v6399_v19  ;;  %8979 = vmatprep.subr.bf16.mxu1 %v8978_v49 }
 0x672   :  { %8981 = vmatpush1.bf16.msra.mxu1 %v8980_v11  ;;  %6569 = vmatprep.mubr.f32.mxu1 %v9096_v0  ;;  %v7541_v0 = vld [vmem:[%s12370_s7 + $0xf40] sm:$0x3] }
 0x673   :  { %8983 = vmatprep.subr.bf16.mxu1 %v8982_v22 }
 0x676   :  { %8985 = vmatpush1.bf16.msra.mxu1 %v8984_v59 }
 0x677   :  { %8987 = vmatprep.subr.bf16.mxu1 %v8986_v28 }
 0x67a   :  { %8989 = vmatpush1.bf16.msra.mxu1 %v8988_v36 }
 0x67b   :  { %7543 = vmatprep.subr.msk.mxu1 %vm509_vm5, %v7542_v37 }
 0x67e   :  { %7544 = vmatpush1.msk.msra.mxu1 %vm509_vm5, %v7541_v0 }
 0x67f   :  { %7545 = vmatmul.mubr.msk.f32.vlgmr.msra.gmra.mrb[72].mxu1 %vm3218_vm10, %v6496_v40 }
 0x752   :  { %v6571_v47 = vpop.f32.mrb[72].mxu1 }
 0x753   :  { %v6590_v63 = vadd.f32 %v6583_v21, %v6571_v47  ;;  %v6573_v7 = vpop.f32.mrb[73].mxu1 }
 0x754   :  { %v6591_v8 = vadd.f32 %v6587_v48, %v6573_v7 }
 0x755   :  { %v6592_v16 = vmax.f32 %v6590_v63, 0.0 }
 0x756   :  { %v6593_v34 = vmax.f32 %v6591_v8, 0.0 }
 0x758   :  { %7548 = vmatprep.mubr.msk.f32.mxu0 %vm6623_vm13, %v6593_v34 }
 0x759   :  { %6696 = vmatmul.mubr.f32.vlgmr.msra.gmra.mrb[50].mxu0 %v6592_v16 }
 0x82c   :  { %v6697_v29 = vpop.f32.mrb[50].mxu0 }
 0x82d   :  { %v6698_v20 = vadd.f32 %v7546_v31, %v6697_v29  ;;  %v6699_v24 = vpop.f32.mrb[51].mxu0 }
 0x82f   :  { %6702 = vst.msk [vmem:[%s12375_s11] sm:$0x3] %vm6701_vm14, %v6698_v20 }

</bundles_post_ra>
